<compile_context>
chip_gen: v6e
topology: v6e:2x2x1
jax: 0.10.0
libtpu: 0.0.40
codegen_flags: <defaults>
</compile_context>

<pallas_src>
import functools

import jax
import jax.numpy as jnp
from jax.experimental import pallas as pl
from jax.experimental.pallas import tpu as pltpu


# ----------------------------------------------------------------------------
# Generation-aware VMEM budget (review item 1).
# ----------------------------------------------------------------------------
def _vmem_limit_bytes():
    try:
        cap = int(pltpu.get_tpu_info().vmem_capacity_bytes)
    except Exception:
        return 64 * 1024 * 1024                      # conservative fallback
    # ~96 MiB on v5e/v6e (128 MiB physical), ~48 MiB on v7x (64 MiB physical).
    return max(32 * 1024 * 1024, min(int(cap * 0.75), 100 * 1024 * 1024))


def _cparams(*sem, vmem_limit):
    return pltpu.CompilerParams(dimension_semantics=sem,
                                vmem_limit_bytes=vmem_limit)


# ----------------------------------------------------------------------------
# Static lane-roll shifts + boundary/pad masks for the in-kernel KxK unfold.
# ----------------------------------------------------------------------------
def _tap_shifts_and_masks(H, W, HW, HWp, k):
    pad = (k - 1) // 2
    p = jnp.arange(HWp, dtype=jnp.int32)
    h_idx, w_idx = p // W, p % W
    valid = p < HW
    shifts, rows = [], []
    for i in range(k):
        for j in range(k):
            di, dj = i - pad, j - pad
            off = di * W + dj
            shifts.append(int((-off) % HWp))          # static lane-roll amount
            m = (valid & (h_idx + di >= 0) & (h_idx + di < H)
                 & (w_idx + dj >= 0) & (w_idx + dj < W))
            rows.append(m)
    masks = jnp.stack(rows).astype(jnp.float32)                     # (k2, HWp)
    validk = jnp.tile(valid.astype(jnp.float32), (k * k,)).reshape(1, k * k * HWp)
    return tuple(shifts), masks, validk


# ----------------------------------------------------------------------------
# Kernel 1: emb_K / emb_V / Q-half-of-MLP1 projections + in-register unfold of
# yk + MLP layer 1 (K half) + ReLU.  The k2 taps are folded into the matmul N
# dimension.  Only yv and the mid-channel h are written back to HBM.
# ----------------------------------------------------------------------------
def _proj_unfold_mlp1_kernel(x_ref, wk_ref, bk_ref, wv_ref, bv_ref, wq_ref,
                             bq_ref, w1k_ref, mask_ref, yv_ref, h_ref,
                             *, k2, hwp, shifts):
    f32 = jnp.float32
    C = x_ref.shape[-2]
    x = x_ref[...].reshape(C, hwp)                       # bf16 or f32 operand

    # emb_K -> folded BN -> ReLU  (stays on-chip, never written to HBM)
    yk = jnp.maximum(
        jnp.dot(wk_ref[...], x, preferred_element_type=f32) + bk_ref[...], 0.0)
    # emb_V -> folded BN  (stored for kernel 2)
    yv = jnp.dot(wv_ref[...], x, preferred_element_type=f32) + bv_ref[...]
    yv_ref[...] = yv.reshape(yv_ref.shape).astype(yv_ref.dtype)
    # Q half of MLP layer 1 (folded BN bias included); ReLU comes after the sum
    xq = jnp.dot(wq_ref[...], x, preferred_element_type=f32) + bq_ref[...]

    # In-register unfold of yk: XLU lane rolls + boundary masks, concatenated
    # along lanes so layer-1 runs as ONE (mid,C)@(C,k2*HWp) MXU matmul.
    taps = []
    for r in range(k2):
        s = shifts[r]
        t = yk if s == 0 else pltpu.roll(yk, shift=s, axis=1)
        taps.append(t * mask_ref[r:r + 1, :])
    kall = jnp.concatenate(taps, axis=-1).astype(x.dtype)           # (C, k2*HWp)

    h = jnp.dot(w1k_ref[...], kall, preferred_element_type=f32)
    h = jnp.maximum(h + jnp.concatenate([xq] * k2, axis=-1), 0.0)   # (mid, k2*HWp)
    h_ref[...] = h.reshape(h_ref.shape).astype(h_ref.dtype)


def _proj_unfold_mlp1(x_cm, wk_t, bk, wv_t, bv, wq_t, bq, w1k_t, masks,
                      *, shifts, k2, hwp, out_dtype, vmem_limit):
    B, C, _ = x_cm.shape
    OG = wv_t.shape[0]
    mid = wq_t.shape[0]
    kern = functools.partial(_proj_unfold_mlp1_kernel,
                             k2=k2, hwp=hwp, shifts=tuple(shifts))
    return pl.pallas_call(
        kern,
        out_shape=(jax.ShapeDtypeStruct((B, OG, hwp), out_dtype),
                   jax.ShapeDtypeStruct((B, mid, k2 * hwp), out_dtype)),
        grid=(B,),
        in_specs=[
            pl.BlockSpec((1, C, hwp), lambda b: (b, 0, 0)),
            pl.BlockSpec((C, C), lambda b: (0, 0)),
            pl.BlockSpec((C, 1), lambda b: (0, 0)),
            pl.BlockSpec((OG, C), lambda b: (0, 0)),
            pl.BlockSpec((OG, 1), lambda b: (0, 0)),
            pl.BlockSpec((mid, C), lambda b: (0, 0)),
            pl.BlockSpec((mid, 1), lambda b: (0, 0)),
            pl.BlockSpec((mid, C), lambda b: (0, 0)),
            pl.BlockSpec((k2, hwp), lambda b: (0, 0)),
        ],
        out_specs=[
            pl.BlockSpec((1, OG, hwp), lambda b: (b, 0, 0)),
            pl.BlockSpec((1, mid, k2 * hwp), lambda b: (b, 0, 0)),
        ],
        compiler_params=_cparams("parallel", vmem_limit=vmem_limit),
    )(x_cm, wk_t, bk, wv_t, bv, wq_t, bq, w1k_t, masks)


# ----------------------------------------------------------------------------
# Kernel 2: MLP layer 2 + GroupNorm(num_groups=O) + in-register unfold of yv +
# attn*V + sum over (k2, G).  Tiled over (batch, O-tiles); z never hits HBM.
# ----------------------------------------------------------------------------
def _mlp2_gn_attnv_kernel(h_ref, yv_ref, w2_ref, b2_ref, gam_ref, bet_ref,
                          pavg_ref, mred_ref, mask_ref, validk_ref, o_ref,
                          *, k2, hwp, eps, shifts):
    f32 = jnp.float32
    mid = h_ref.shape[-2]
    tog = w2_ref.shape[0]

    h = h_ref[...].reshape(mid, k2 * hwp)                 # bf16 or f32 operand
    # MLP layer 2: big lane-dense MXU matmul, f32 accumulation.
    z = jnp.dot(w2_ref[...], h, preferred_element_type=f32) + b2_ref[...]
    z = z * validk_ref[...]          # zero HW-pad columns (no-op when unpadded)

    # GroupNorm statistics: lane sums on the XLU (not N=1 MXU matmuls).
    s1 = jnp.sum(z, axis=-1, keepdims=True)               # (tOG, 1)
    s2 = jnp.sum(z * z, axis=-1, keepdims=True)           # (tOG, 1)
    # Per-group average + broadcast back to channels in ONE tiny indicator
    # matmul (avoids sublane reshapes; 1/n is folded into pavg).
    st = jnp.dot(pavg_ref[...], jnp.concatenate([s1, s2], axis=1),
                 preferred_element_type=f32)              # (tOG, 2)
    mean_c = st[:, 0:1]
    var_c = jnp.maximum(st[:, 1:2] - mean_c * mean_c, 0.0)   # clamp (review)
    inv_c = jax.lax.rsqrt(var_c + eps)
    a = gam_ref[...] * inv_c
    c = bet_ref[...] - mean_c * a
    attn = z * a + c                                      # (tOG, k2*HWp), f32

    # attn * unfolded V, accumulated per tap (V taps built on-chip).
    yv = yv_ref[...].reshape(tog, hwp).astype(f32)
    acc = jnp.zeros((tog, hwp), f32)
    for r in range(k2):
        s = shifts[r]
        v = yv if s == 0 else pltpu.roll(yv, shift=s, axis=1)
        v = v * mask_ref[r:r + 1, :]
        acc = acc + attn[:, r * hwp:(r + 1) * hwp] * v

    # Reduce the G channels of each group: (o_tile, tOG)@(tOG, HWp) on the MXU.
    out = jnp.dot(mred_ref[...], acc, preferred_element_type=f32)
    o_ref[...] = out.reshape(o_ref.shape).astype(o_ref.dtype)


def _pick_o_tile(O, G, mid, k2, hwp, itemsize, vmem_budget):
    """Largest aligned divisor of O whose per-step working set fits VMEM."""
    def ok_align(t):
        return t == O or t % 8 == 0

    def est(t):
        tog = t * G
        vals = 4 * (2 * tog * k2 * hwp + 2 * tog * hwp + t * hwp + k2 * hwp)
        bufs = (2 * itemsize * (mid * k2 * hwp + tog * hwp) + 2 * 4 * t * hwp
                + itemsize * tog * mid
                + 4 * (3 * tog + tog * tog + t * tog + 2 * k2 * hwp))
        return vals + bufs

    divs = [t for t in range(1, O + 1) if O % t == 0 and ok_align(t)]
    fitting = [t for t in divs if est(t) <= int(vmem_budget * 0.6)]
    return max(fitting) if fitting else min(divs)


def _mlp2_gn_attnv(h_all, yv, w2_t, b2, gamma, beta, masks, validk,
                   *, shifts, O, G, o_tile, k2, hwp, hw, vmem_limit, eps=1e-5):
    B, mid, _ = h_all.shape
    tog = o_tile * G
    n = float(G * k2 * hw)                  # true (unpadded) element count/group
    grp = jnp.arange(tog, dtype=jnp.int32) // G
    pavg = (grp[:, None] == grp[None, :]).astype(jnp.float32) / n   # (tOG, tOG)
    mred = (jnp.arange(o_tile, dtype=jnp.int32)[:, None]
            == grp[None, :]).astype(jnp.float32)                    # (o_tile, tOG)
    kern = functools.partial(_mlp2_gn_attnv_kernel,
                             k2=k2, hwp=hwp, eps=eps, shifts=tuple(shifts))
    return pl.pallas_call(
        kern,
        out_shape=jax.ShapeDtypeStruct((B, O, hwp), jnp.float32),
        grid=(B, O // o_tile),
        in_specs=[
            pl.BlockSpec((1, mid, k2 * hwp), lambda b, t: (b, 0, 0)),
            pl.BlockSpec((1, tog, hwp), lambda b, t: (b, t, 0)),
            pl.BlockSpec((tog, mid), lambda b, t: (t, 0)),
            pl.BlockSpec((tog, 1), lambda b, t: (t, 0)),
            pl.BlockSpec((tog, 1), lambda b, t: (t, 0)),
            pl.BlockSpec((tog, 1), lambda b, t: (t, 0)),
            pl.BlockSpec((tog, tog), lambda b, t: (0, 0)),
            pl.BlockSpec((o_tile, tog), lambda b, t: (0, 0)),
            pl.BlockSpec((k2, hwp), lambda b, t: (0, 0)),
            pl.BlockSpec((1, k2 * hwp), lambda b, t: (0, 0)),
        ],
        out_specs=pl.BlockSpec((1, o_tile, hwp), lambda b, t: (b, t, 0)),
        compiler_params=_cparams("parallel", "parallel", vmem_limit=vmem_limit),
    )(h_all, yv, w2_t, b2, gamma, beta, pavg, mred, masks, validk)


# ----------------------------------------------------------------------------
# Glue: BN folding, params
# ----------------------------------------------------------------------------
def fold_bn(w, conv_b, gamma, beta, mean, var, eps=1e-5):
    """Fold eval-mode BatchNorm into the preceding 1x1 conv ([Cin, Cout])."""
    scale = gamma / jnp.sqrt(var + eps)
    return w * scale[None, :], (conv_b - mean) * scale + beta


def init_params(key, C, O, k, G, reduction_ratio):
    mid = C // reduction_ratio
    ks = jax.random.split(key, 24)

    def rnd(kk, shape, s=0.1):
        return s * jax.random.normal(kk, shape, dtype=jnp.float32)

    def bn_stats(k1, k2_, k3, k4, n):
        gamma = 1.0 + rnd(k1, (n,))
        beta = rnd(k2_, (n,))
        mean = rnd(k3, (n,))
        var = 1.0 + 0.1 * jnp.abs(jax.random.normal(k4, (n,), dtype=jnp.float32))
        return gamma, beta, mean, var

    params = {}
    wk = rnd(ks[0], (C, C))
    params['embK_w'], params['embK_b'] = fold_bn(
        wk, jnp.zeros((C,), jnp.float32), *bn_stats(ks[1], ks[2], ks[3], ks[4], C))
    wv = rnd(ks[5], (C, O * G))
    params['embV_w'], params['embV_b'] = fold_bn(
        wv, jnp.zeros((O * G,), jnp.float32), *bn_stats(ks[6], ks[7], ks[8], ks[9], O * G))
    w1 = rnd(ks[10], (2 * C, mid))
    b1 = rnd(ks[11], (mid,))
    params['mlp1_w'], params['mlp1_b'] = fold_bn(
        w1, b1, *bn_stats(ks[12], ks[13], ks[14], ks[15], mid))
    params['mlp2_w'] = rnd(ks[16], (mid, O * G))
    params['mlp2_b'] = rnd(ks[17], (O * G,))
    params['gn_gamma'] = 1.0 + rnd(ks[18], (O * G,))
    params['gn_beta'] = rnd(ks[19], (O * G,))
    return params


# ----------------------------------------------------------------------------
# Forward pass (Pallas)
# ----------------------------------------------------------------------------
def at_kernel_forward(x_nchw, params, *, kernel_size, out_channels,
                      group_channels, stride=1, matmul_dtype=jnp.float32):
    if stride > 1:  # nn.AvgPool2d(stride, stride), non-overlapping
        B0, C0, H0, W0 = x_nchw.shape
        x_nchw = x_nchw.reshape(B0, C0, H0 // stride, stride,
                                W0 // stride, stride).mean(axis=(3, 5))
    B, C, H, W = x_nchw.shape
    k = kernel_size
    k2 = k * k
    O, G = out_channels, group_channels
    OG = O * G
    HW = H * W
    HWp = ((HW + 127) // 128) * 128          # lane-align HW (review item)
    mid = params['mlp2_w'].shape[0]
    mm = matmul_dtype
    f32 = jnp.float32

    # ---- channel-major weights (BN folded at init); bf16 MXU operands opt-in
    wk_t = params['embK_w'].T.astype(mm)                    # (C, C)
    bk = params['embK_b'].reshape(C, 1).astype(f32)
    wv_t = params['embV_w'].T.astype(mm)                     # (OG, C)
    bv = params['embV_b'].reshape(OG, 1).astype(f32)
    wq_t = params['mlp1_w'][:C].T.astype(mm)                 # (mid, C)  Q half
    w1k_t = params['mlp1_w'][C:].T.astype(mm)                # (mid, C)  K half
    bq = params['mlp1_b'].reshape(mid, 1).astype(f32)
    w2_t = params['mlp2_w'].T.astype(mm)                     # (OG, mid)
    b2 = params['mlp2_b'].reshape(OG, 1).astype(f32)
    gamma = params['gn_gamma'].reshape(OG, 1).astype(f32)
    beta = params['gn_beta'].reshape(OG, 1).astype(f32)

    # ---- in-kernel unfold constants (static shifts + boundary/pad masks) ----
    shifts, masks, validk = _tap_shifts_and_masks(H, W, HW, HWp, k)

    # ---- lane-padded, channel-major x ---------------------------------------
    x_cm = x_nchw.reshape(B, C, HW)
    if HWp != HW:
        x_cm = jnp.pad(x_cm, ((0, 0), (0, 0), (0, HWp - HW)))
    x_cm = x_cm.astype(mm)

    vmem_limit = _vmem_limit_bytes()

    # ---- Kernel 1: projections + in-register unfold(K) + MLP layer 1 --------
    yv, h_all = _proj_unfold_mlp1(
        x_cm, wk_t, bk, wv_t, bv, wq_t, bq, w1k_t, masks,
        shifts=shifts, k2=k2, hwp=HWp, out_dtype=mm, vmem_limit=vmem_limit)

    # ---- Kernel 2: MLP layer 2 + GroupNorm + unfold(V) + attn*V + reduce ----
    o_tile = _pick_o_tile(O, G, mid, k2, HWp, jnp.dtype(mm).itemsize, vmem_limit)
    out = _mlp2_gn_attnv(
        h_all, yv, w2_t, b2, gamma, beta, masks, validk,
        shifts=shifts, O=O, G=G, o_tile=o_tile, k2=k2, hwp=HWp, hw=HW,
        vmem_limit=vmem_limit)                               # [B, O, HWp]

    return out[:, :, :HW].reshape(B, O, H, W)


# ----------------------------------------------------------------------------
# Pure-JAX reference (mirrors the PyTorch forward, NCHW), for validation
# ----------------------------------------------------------------------------
def reference_forward(x, params, *, kernel_size, out_channels, group_channels):
    B, C, H, W = x.shape
    k = kernel_size
    k2 = k * k
    O, G = out_channels, group_channels
    pad = (k - 1) // 2

    def conv1x1(inp, w, b):
        return jnp.einsum('bchw,cd->bdhw', inp, w) + b[None, :, None, None]

    def unfold(y):
        yp = jnp.pad(y, ((0, 0), (0, 0), (pad, pad), (pad, pad)))
        cols = []
        for i in range(k):
            for j in range(k):
                cols.append(yp[:, :, i:i + H, j:j + W])
        return jnp.stack(cols, axis=2)               # [B, Cy, k2, H, W]

    yk = jax.nn.relu(conv1x1(x, params['embK_w'], params['embK_b']))
    yv = conv1x1(x, params['embV_w'], params['embV_b'])
    Kt = unfold(yk)                                   # [B, C, k2, H, W]
    Q = jnp.broadcast_to(x[:, :, None], (B, C, k2, H, W))
    qk = jnp.concatenate([Q, Kt], axis=1)             # [B, 2C, k2, H, W]
    h1 = jax.nn.relu(jnp.einsum('bcrhw,cd->bdrhw', qk, params['mlp1_w'])
                     + params['mlp1_b'][None, :, None, None, None])
    z = (jnp.einsum('bcrhw,cd->bdrhw', h1, params['mlp2_w'])
         + params['mlp2_b'][None, :, None, None, None])
    zg = z.reshape(B, O, G, k2, H, W)
    mean = zg.mean(axis=(2, 3, 4, 5), keepdims=True)
    var = ((zg - mean) ** 2).mean(axis=(2, 3, 4, 5), keepdims=True)
    zhat = (zg - mean) / jnp.sqrt(var + 1e-5)
    attn = (zhat * params['gn_gamma'].reshape(1, O, G, 1, 1, 1)
            + params['gn_beta'].reshape(1, O, G, 1, 1, 1))
    V = unfold(yv).reshape(B, O, G, k2, H, W)
    return (attn * V).sum(axis=3).sum(axis=2)


# ----------------------------------------------------------------------------
if __name__ == "__main__":
    B, C, H, W = 2, 16, 16, 16          # NCHW input
    out_channels, kernel_size = 16, 3
    group_channels, reduction_ratio = 4, 4

    key = jax.random.PRNGKey(0)
    kx, kp = jax.random.split(key)
    x = jax.random.normal(kx, (B, C, H, W), dtype=jnp.float32)
    params = init_params(kp, C, out_channels, kernel_size,
                         group_channels, reduction_ratio)

    ref = reference_forward(x, params, kernel_size=kernel_size,
                            out_channels=out_channels,
                            group_channels=group_channels)

    # f32 path: strict parity with the PyTorch-mirroring reference.
    fwd_f32 = jax.jit(functools.partial(at_kernel_forward,
                                        kernel_size=kernel_size,
                                        out_channels=out_channels,
                                        group_channels=group_channels,
                                        stride=1, matmul_dtype=jnp.float32))
    out = jax.block_until_ready(fwd_f32(x, params))
    assert out.shape == (B, out_channels, H, W)
    max_err = float(jnp.max(jnp.abs(out - ref)))
    assert jnp.allclose(out, ref, atol=1e-3, rtol=1e-3), max_err

    # bf16 MXU-operand path (v6e/v7x review item): f32 accumulation, loose check.
    fwd_bf16 = jax.jit(functools.partial(at_kernel_forward,
                                         kernel_size=kernel_size,
                                         out_channels=out_channels,
                                         group_channels=group_channels,
                                         stride=1, matmul_dtype=jnp.bfloat16))
    out_b = jax.block_until_ready(fwd_bf16(x, params))
    assert out_b.shape == (B, out_channels, H, W)
    assert bool(jnp.all(jnp.isfinite(out_b)))
    assert float(jnp.mean(jnp.abs(out_b - ref))) < 0.1

    print("KERNEL_OK")
</pallas_src>

<mosaic_0001>
module attributes {stable_mosaic.version = 11 : i64} {
  func.func @_proj_unfold_mlp1_kernel(%arg0: i32, %arg1: memref<1x16x256xf32, #tpu.memory_space<vmem>>, %arg2: memref<16x16xf32, #tpu.memory_space<vmem>>, %arg3: memref<16x1xf32, #tpu.memory_space<vmem>>, %arg4: memref<64x16xf32, #tpu.memory_space<vmem>>, %arg5: memref<64x1xf32, #tpu.memory_space<vmem>>, %arg6: memref<4x16xf32, #tpu.memory_space<vmem>>, %arg7: memref<4x1xf32, #tpu.memory_space<vmem>>, %arg8: memref<4x16xf32, #tpu.memory_space<vmem>>, %arg9: memref<9x256xf32, #tpu.memory_space<vmem>>, %arg10: memref<1x64x256xf32, #tpu.memory_space<vmem>>, %arg11: memref<1x4x2304xf32, #tpu.memory_space<vmem>>) attributes {dimension_semantics = [#tpu.dimension_semantics<parallel>], iteration_bounds = array<i64: 2>, scalar_prefetch = 0 : i64, scratch_operands = 0 : i64, tpu.core_type = #tpu.core_type<tc>, window_params = [{transform_indices = @transform_0, window_bounds = array<i64: 1, 16, 256>}, {pipeline_mode = #tpu.pipeline_mode<synchronous>, transform_indices = @transform_1, window_bounds = array<i64: 16, 16>}, {pipeline_mode = #tpu.pipeline_mode<synchronous>, transform_indices = @transform_2, window_bounds = array<i64: 16, 1>}, {pipeline_mode = #tpu.pipeline_mode<synchronous>, transform_indices = @transform_3, window_bounds = array<i64: 64, 16>}, {pipeline_mode = #tpu.pipeline_mode<synchronous>, transform_indices = @transform_4, window_bounds = array<i64: 64, 1>}, {pipeline_mode = #tpu.pipeline_mode<synchronous>, transform_indices = @transform_5, window_bounds = array<i64: 4, 16>}, {pipeline_mode = #tpu.pipeline_mode<synchronous>, transform_indices = @transform_6, window_bounds = array<i64: 4, 1>}, {pipeline_mode = #tpu.pipeline_mode<synchronous>, transform_indices = @transform_7, window_bounds = array<i64: 4, 16>}, {pipeline_mode = #tpu.pipeline_mode<synchronous>, transform_indices = @transform_8, window_bounds = array<i64: 9, 256>}, {transform_indices = @transform_9, window_bounds = array<i64: 1, 64, 256>}, {transform_indices = @transform_10, window_bounds = array<i64: 1, 4, 2304>}]} {
    %c0 = arith.constant 0 : index
    %c0_0 = arith.constant 0 : index
    %c0_1 = arith.constant 0 : index
    %0 = vector.load %arg1[%c0, %c0_0, %c0_1] : memref<1x16x256xf32, #tpu.memory_space<vmem>>, vector<1x16x256xf32>
    %1 = vector.shape_cast %0 : vector<1x16x256xf32> to vector<16x256xf32>
    %c0_2 = arith.constant 0 : index
    %c0_3 = arith.constant 0 : index
    %2 = vector.load %arg2[%c0_2, %c0_3] : memref<16x16xf32, #tpu.memory_space<vmem>>, vector<16x16xf32>
    %cst = arith.constant dense<0.000000e+00> : vector<16x256xf32>
    %3 = tpu.matmul %2, %1, %cst {dimension_numbers = #tpu.dot_dimension_numbers<[1], [0], [0], [1], [0, 0, 1, 1], [], []>} : vector<16x16xf32>, vector<16x256xf32>, vector<16x256xf32> -> vector<16x256xf32>
    %c0_4 = arith.constant 0 : index
    %c0_5 = arith.constant 0 : index
    %4 = vector.load %arg3[%c0_4, %c0_5] : memref<16x1xf32, #tpu.memory_space<vmem>>, vector<16x1xf32>
    %5 = vector.broadcast %4 : vector<16x1xf32> to vector<16x256xf32>
    %6 = arith.addf %3, %5 : vector<16x256xf32>
    %cst_6 = arith.constant 0.000000e+00 : f32
    %7 = vector.broadcast %cst_6 : f32 to vector<16x256xf32>
    %8 = arith.maximumf %6, %7 : vector<16x256xf32>
    %c0_7 = arith.constant 0 : index
    %c0_8 = arith.constant 0 : index
    %9 = vector.load %arg4[%c0_7, %c0_8] : memref<64x16xf32, #tpu.memory_space<vmem>>, vector<64x16xf32>
    %cst_9 = arith.constant dense<0.000000e+00> : vector<64x256xf32>
    %10 = tpu.matmul %9, %1, %cst_9 {dimension_numbers = #tpu.dot_dimension_numbers<[1], [0], [0], [1], [0, 0, 1, 1], [], []>} : vector<64x16xf32>, vector<16x256xf32>, vector<64x256xf32> -> vector<64x256xf32>
    %c0_10 = arith.constant 0 : index
    %c0_11 = arith.constant 0 : index
    %11 = vector.load %arg5[%c0_10, %c0_11] : memref<64x1xf32, #tpu.memory_space<vmem>>, vector<64x1xf32>
    %12 = vector.broadcast %11 : vector<64x1xf32> to vector<64x256xf32>
    %13 = arith.addf %10, %12 : vector<64x256xf32>
    %14 = vector.shape_cast %13 : vector<64x256xf32> to vector<1x64x256xf32>
    %c0_12 = arith.constant 0 : index
    %c0_13 = arith.constant 0 : index
    %c0_14 = arith.constant 0 : index
    %15 = vector.load %arg10[%c0_12, %c0_13, %c0_14] : memref<1x64x256xf32, #tpu.memory_space<vmem>>, vector<1x64x256xf32>
    tpu.vector_store %arg10[%c0_12, %c0_13, %c0_14], %14 {strides = array<i32>} : memref<1x64x256xf32, #tpu.memory_space<vmem>>, vector<1x64x256xf32>,
    %c0_15 = arith.constant 0 : index
    %c0_16 = arith.constant 0 : index
    %16 = vector.load %arg6[%c0_15, %c0_16] : memref<4x16xf32, #tpu.memory_space<vmem>>, vector<4x16xf32>
    %cst_17 = arith.constant dense<0.000000e+00> : vector<4x256xf32>
    %17 = tpu.matmul %16, %1, %cst_17 {dimension_numbers = #tpu.dot_dimension_numbers<[1], [0], [0], [1], [0, 0, 1, 1], [], []>} : vector<4x16xf32>, vector<16x256xf32>, vector<4x256xf32> -> vector<4x256xf32>
    %c0_18 = arith.constant 0 : index
    %c0_19 = arith.constant 0 : index
    %18 = vector.load %arg7[%c0_18, %c0_19] : memref<4x1xf32, #tpu.memory_space<vmem>>, vector<4x1xf32>
    %19 = vector.broadcast %18 : vector<4x1xf32> to vector<4x256xf32>
    %20 = arith.addf %17, %19 : vector<4x256xf32>
    %c17_i32 = arith.constant 17 : i32
    %21 = tpu.dynamic_rotate %8 by %c17_i32 dim 1 : vector<16x256xf32>, i32 -> vector<16x256xf32>
    %c0_20 = arith.constant 0 : index
    %c0_21 = arith.constant 0 : index
    %22 = vector.load %arg9[%c0_20, %c0_21] : memref<9x256xf32, #tpu.memory_space<vmem>>, vector<1x256xf32>
    %23 = vector.broadcast %22 : vector<1x256xf32> to vector<16x256xf32>
    %24 = arith.mulf %21, %23 : vector<16x256xf32>
    %c16_i32 = arith.constant 16 : i32
    %25 = tpu.dynamic_rotate %8 by %c16_i32 dim 1 : vector<16x256xf32>, i32 -> vector<16x256xf32>
    %c1 = arith.constant 1 : index
    %c0_22 = arith.constant 0 : index
    %26 = vector.load %arg9[%c1, %c0_22] : memref<9x256xf32, #tpu.memory_space<vmem>>, vector<1x256xf32>
    %27 = vector.broadcast %26 : vector<1x256xf32> to vector<16x256xf32>
    %28 = arith.mulf %25, %27 : vector<16x256xf32>
    %c15_i32 = arith.constant 15 : i32
    %29 = tpu.dynamic_rotate %8 by %c15_i32 dim 1 : vector<16x256xf32>, i32 -> vector<16x256xf32>
    %c2 = arith.constant 2 : index
    %c0_23 = arith.constant 0 : index
    %30 = vector.load %arg9[%c2, %c0_23] : memref<9x256xf32, #tpu.memory_space<vmem>>, vector<1x256xf32>
    %31 = vector.broadcast %30 : vector<1x256xf32> to vector<16x256xf32>
    %32 = arith.mulf %29, %31 : vector<16x256xf32>
    %c1_i32 = arith.constant 1 : i32
    %33 = tpu.dynamic_rotate %8 by %c1_i32 dim 1 : vector<16x256xf32>, i32 -> vector<16x256xf32>
    %c3 = arith.constant 3 : index
    %c0_24 = arith.constant 0 : index
    %34 = vector.load %arg9[%c3, %c0_24] : memref<9x256xf32, #tpu.memory_space<vmem>>, vector<1x256xf32>
    %35 = vector.broadcast %34 : vector<1x256xf32> to vector<16x256xf32>
    %36 = arith.mulf %33, %35 : vector<16x256xf32>
    %c4 = arith.constant 4 : index
    %c0_25 = arith.constant 0 : index
    %37 = vector.load %arg9[%c4, %c0_25] : memref<9x256xf32, #tpu.memory_space<vmem>>, vector<1x256xf32>
    %38 = vector.broadcast %37 : vector<1x256xf32> to vector<16x256xf32>
    %39 = arith.mulf %8, %38 : vector<16x256xf32>
    %c255_i32 = arith.constant 255 : i32
    %40 = tpu.dynamic_rotate %8 by %c255_i32 dim 1 : vector<16x256xf32>, i32 -> vector<16x256xf32>
    %c5 = arith.constant 5 : index
    %c0_26 = arith.constant 0 : index
    %41 = vector.load %arg9[%c5, %c0_26] : memref<9x256xf32, #tpu.memory_space<vmem>>, vector<1x256xf32>
    %42 = vector.broadcast %41 : vector<1x256xf32> to vector<16x256xf32>
    %43 = arith.mulf %40, %42 : vector<16x256xf32>
    %c241_i32 = arith.constant 241 : i32
    %44 = tpu.dynamic_rotate %8 by %c241_i32 dim 1 : vector<16x256xf32>, i32 -> vector<16x256xf32>
    %c6 = arith.constant 6 : index
    %c0_27 = arith.constant 0 : index
    %45 = vector.load %arg9[%c6, %c0_27] : memref<9x256xf32, #tpu.memory_space<vmem>>, vector<1x256xf32>
    %46 = vector.broadcast %45 : vector<1x256xf32> to vector<16x256xf32>
    %47 = arith.mulf %44, %46 : vector<16x256xf32>
    %c240_i32 = arith.constant 240 : i32
    %48 = tpu.dynamic_rotate %8 by %c240_i32 dim 1 : vector<16x256xf32>, i32 -> vector<16x256xf32>
    %c7 = arith.constant 7 : index
    %c0_28 = arith.constant 0 : index
    %49 = vector.load %arg9[%c7, %c0_28] : memref<9x256xf32, #tpu.memory_space<vmem>>, vector<1x256xf32>
    %50 = vector.broadcast %49 : vector<1x256xf32> to vector<16x256xf32>
    %51 = arith.mulf %48, %50 : vector<16x256xf32>
    %c239_i32 = arith.constant 239 : i32
    %52 = tpu.dynamic_rotate %8 by %c239_i32 dim 1 : vector<16x256xf32>, i32 -> vector<16x256xf32>
    %c8 = arith.constant 8 : index
    %c0_29 = arith.constant 0 : index
    %53 = vector.load %arg9[%c8, %c0_29] : memref<9x256xf32, #tpu.memory_space<vmem>>, vector<1x256xf32>
    %54 = vector.broadcast %53 : vector<1x256xf32> to vector<16x256xf32>
    %55 = arith.mulf %52, %54 : vector<16x256xf32>
    %56 = tpu.concatenate %24, %28, %32, %36, %39, %43, %47, %51, %55 in 1 : vector<16x256xf32>, vector<16x256xf32>, vector<16x256xf32>, vector<16x256xf32>, vector<16x256xf32>, vector<16x256xf32>, vector<16x256xf32>, vector<16x256xf32>, vector<16x256xf32> -> vector<16x2304xf32>
    %c0_30 = arith.constant 0 : index
    %c0_31 = arith.constant 0 : index
    %57 = vector.load %arg8[%c0_30, %c0_31] : memref<4x16xf32, #tpu.memory_space<vmem>>, vector<4x16xf32>
    %cst_32 = arith.constant dense<0.000000e+00> : vector<4x2304xf32>
    %58 = tpu.matmul %57, %56, %cst_32 {dimension_numbers = #tpu.dot_dimension_numbers<[1], [0], [0], [1], [0, 0, 1, 1], [], []>} : vector<4x16xf32>, vector<16x2304xf32>, vector<4x2304xf32> -> vector<4x2304xf32>
    %59 = tpu.concatenate %20, %20, %20, %20, %20, %20, %20, %20, %20 in 1 : vector<4x256xf32>, vector<4x256xf32>, vector<4x256xf32>, vector<4x256xf32>, vector<4x256xf32>, vector<4x256xf32>, vector<4x256xf32>, vector<4x256xf32>, vector<4x256xf32> -> vector<4x2304xf32>
    %60 = arith.addf %58, %59 : vector<4x2304xf32>
    %cst_33 = arith.constant 0.000000e+00 : f32
    %61 = vector.broadcast %cst_33 : f32 to vector<4x2304xf32>
    %62 = arith.maximumf %60, %61 : vector<4x2304xf32>
    %63 = vector.shape_cast %62 : vector<4x2304xf32> to vector<1x4x2304xf32>
    %c0_34 = arith.constant 0 : index
    %c0_35 = arith.constant 0 : index
    %c0_36 = arith.constant 0 : index
    %64 = vector.load %arg11[%c0_34, %c0_35, %c0_36] : memref<1x4x2304xf32, #tpu.memory_space<vmem>>, vector<1x4x2304xf32>
    tpu.vector_store %arg11[%c0_34, %c0_35, %c0_36], %63 {strides = array<i32>} : memref<1x4x2304xf32, #tpu.memory_space<vmem>>, vector<1x4x2304xf32>,
    return
  }
  func.func @transform_0(%arg0: i32) -> (i32, i32, i32) {
    %c0_i32 = arith.constant 0 : i32
    %c0_i32_0 = arith.constant 0 : i32
    %c0_i32_1 = arith.constant 0 : i32
    return %arg0, %c0_i32, %c0_i32_0 : i32, i32, i32
  }
  func.func @transform_1(%arg0: i32) -> (i32, i32) {
    %c0_i32 = arith.constant 0 : i32
    %c0_i32_0 = arith.constant 0 : i32
    %c0_i32_1 = arith.constant 0 : i32
    return %c0_i32, %c0_i32_0 : i32, i32
  }
  func.func @transform_2(%arg0: i32) -> (i32, i32) {
    %c0_i32 = arith.constant 0 : i32
    %c0_i32_0 = arith.constant 0 : i32
    %c0_i32_1 = arith.constant 0 : i32
    return %c0_i32, %c0_i32_0 : i32, i32
  }
  func.func @transform_3(%arg0: i32) -> (i32, i32) {
    %c0_i32 = arith.constant 0 : i32
    %c0_i32_0 = arith.constant 0 : i32
    %c0_i32_1 = arith.constant 0 : i32
    return %c0_i32, %c0_i32_0 : i32, i32
  }
  func.func @transform_4(%arg0: i32) -> (i32, i32) {
    %c0_i32 = arith.constant 0 : i32
    %c0_i32_0 = arith.constant 0 : i32
    %c0_i32_1 = arith.constant 0 : i32
    return %c0_i32, %c0_i32_0 : i32, i32
  }
  func.func @transform_5(%arg0: i32) -> (i32, i32) {
    %c0_i32 = arith.constant 0 : i32
    %c0_i32_0 = arith.constant 0 : i32
    %c0_i32_1 = arith.constant 0 : i32
    return %c0_i32, %c0_i32_0 : i32, i32
  }
  func.func @transform_6(%arg0: i32) -> (i32, i32) {
    %c0_i32 = arith.constant 0 : i32
    %c0_i32_0 = arith.constant 0 : i32
    %c0_i32_1 = arith.constant 0 : i32
    return %c0_i32, %c0_i32_0 : i32, i32
  }
  func.func @transform_7(%arg0: i32) -> (i32, i32) {
    %c0_i32 = arith.constant 0 : i32
    %c0_i32_0 = arith.constant 0 : i32
    %c0_i32_1 = arith.constant 0 : i32
    return %c0_i32, %c0_i32_0 : i32, i32
  }
  func.func @transform_8(%arg0: i32) -> (i32, i32) {
    %c0_i32 = arith.constant 0 : i32
    %c0_i32_0 = arith.constant 0 : i32
    %c0_i32_1 = arith.constant 0 : i32
    return %c0_i32, %c0_i32_0 : i32, i32
  }
  func.func @transform_9(%arg0: i32) -> (i32, i32, i32) {
    %c0_i32 = arith.constant 0 : i32
    %c0_i32_0 = arith.constant 0 : i32
    %c0_i32_1 = arith.constant 0 : i32
    return %arg0, %c0_i32, %c0_i32_0 : i32, i32, i32
  }
  func.func @transform_10(%arg0: i32) -> (i32, i32, i32) {
    %c0_i32 = arith.constant 0 : i32
    %c0_i32_0 = arith.constant 0 : i32
    %c0_i32_1 = arith.constant 0 : i32
    return %arg0, %c0_i32, %c0_i32_0 : i32, i32, i32
  }
}

module attributes {stable_mosaic.version = 11 : i64} {
  func.func @_mlp2_gn_attnv_kernel(%arg0: i32, %arg1: i32, %arg2: memref<1x4x2304xf32, #tpu.memory_space<vmem>>, %arg3: memref<1x64x256xf32, #tpu.memory_space<vmem>>, %arg4: memref<64x4xf32, #tpu.memory_space<vmem>>, %arg5: memref<64x1xf32, #tpu.memory_space<vmem>>, %arg6: memref<64x1xf32, #tpu.memory_space<vmem>>, %arg7: memref<64x1xf32, #tpu.memory_space<vmem>>, %arg8: memref<64x64xf32, #tpu.memory_space<vmem>>, %arg9: memref<16x64xf32, #tpu.memory_space<vmem>>, %arg10: memref<9x256xf32, #tpu.memory_space<vmem>>, %arg11: memref<1x2304xf32, #tpu.memory_space<vmem>>, %arg12: memref<1x16x256xf32, #tpu.memory_space<vmem>>) attributes {dimension_semantics = [#tpu.dimension_semantics<parallel>, #tpu.dimension_semantics<parallel>], iteration_bounds = array<i64: 2, 1>, scalar_prefetch = 0 : i64, scratch_operands = 0 : i64, tpu.core_type = #tpu.core_type<tc>, window_params = [{transform_indices = @transform_0, window_bounds = array<i64: 1, 4, 2304>}, {transform_indices = @transform_1, window_bounds = array<i64: 1, 64, 256>}, {transform_indices = @transform_2, window_bounds = array<i64: 64, 4>}, {transform_indices = @transform_3, window_bounds = array<i64: 64, 1>}, {transform_indices = @transform_4, window_bounds = array<i64: 64, 1>}, {transform_indices = @transform_5, window_bounds = array<i64: 64, 1>}, {pipeline_mode = #tpu.pipeline_mode<synchronous>, transform_indices = @transform_6, window_bounds = array<i64: 64, 64>}, {pipeline_mode = #tpu.pipeline_mode<synchronous>, transform_indices = @transform_7, window_bounds = array<i64: 16, 64>}, {pipeline_mode = #tpu.pipeline_mode<synchronous>, transform_indices = @transform_8, window_bounds = array<i64: 9, 256>}, {pipeline_mode = #tpu.pipeline_mode<synchronous>, transform_indices = @transform_9, window_bounds = array<i64: 1, 2304>}, {transform_indices = @transform_10, window_bounds = array<i64: 1, 16, 256>}]} {
    %c0 = arith.constant 0 : index
    %c0_0 = arith.constant 0 : index
    %c0_1 = arith.constant 0 : index
    %0 = vector.load %arg2[%c0, %c0_0, %c0_1] : memref<1x4x2304xf32, #tpu.memory_space<vmem>>, vector<1x4x2304xf32>
    %1 = vector.shape_cast %0 : vector<1x4x2304xf32> to vector<4x2304xf32>
    %c0_2 = arith.constant 0 : index
    %c0_3 = arith.constant 0 : index
    %2 = vector.load %arg4[%c0_2, %c0_3] : memref<64x4xf32, #tpu.memory_space<vmem>>, vector<64x4xf32>
    %cst = arith.constant dense<0.000000e+00> : vector<64x2304xf32>
    %3 = tpu.matmul %2, %1, %cst {dimension_numbers = #tpu.dot_dimension_numbers<[1], [0], [0], [1], [0, 0, 1, 1], [], []>} : vector<64x4xf32>, vector<4x2304xf32>, vector<64x2304xf32> -> vector<64x2304xf32>
    %c0_4 = arith.constant 0 : index
    %c0_5 = arith.constant 0 : index
    %4 = vector.load %arg5[%c0_4, %c0_5] : memref<64x1xf32, #tpu.memory_space<vmem>>, vector<64x1xf32>
    %5 = vector.broadcast %4 : vector<64x1xf32> to vector<64x2304xf32>
    %6 = arith.addf %3, %5 : vector<64x2304xf32>
    %c0_6 = arith.constant 0 : index
    %c0_7 = arith.constant 0 : index
    %7 = vector.load %arg11[%c0_6, %c0_7] : memref<1x2304xf32, #tpu.memory_space<vmem>>, vector<1x2304xf32>
    %8 = vector.broadcast %7 : vector<1x2304xf32> to vector<64x2304xf32>
    %9 = arith.mulf %6, %8 : vector<64x2304xf32>
    %cst_8 = arith.constant dense<0.000000e+00> : vector<64xf32>
    %10 = vector.multi_reduction <add>, %9, %cst_8 [1] : vector<64x2304xf32> to vector<64xf32>
    %11 = vector.shape_cast %10 : vector<64xf32> to vector<64x1xf32>
    %12 = arith.mulf %9, %9 : vector<64x2304xf32>
    %cst_9 = arith.constant dense<0.000000e+00> : vector<64xf32>
    %13 = vector.multi_reduction <add>, %12, %cst_9 [1] : vector<64x2304xf32> to vector<64xf32>
    %14 = vector.shape_cast %13 : vector<64xf32> to vector<64x1xf32>
    %c0_10 = arith.constant 0 : index
    %c0_11 = arith.constant 0 : index
    %15 = vector.load %arg8[%c0_10, %c0_11] : memref<64x64xf32, #tpu.memory_space<vmem>>, vector<64x64xf32>
    %16 = tpu.concatenate %11, %14 in 1 : vector<64x1xf32>, vector<64x1xf32> -> vector<64x2xf32>
    %cst_12 = arith.constant dense<0.000000e+00> : vector<64x2xf32>
    %17 = tpu.matmul %15, %16, %cst_12 {dimension_numbers = #tpu.dot_dimension_numbers<[1], [0], [0], [1], [0, 0, 1, 1], [], []>} : vector<64x64xf32>, vector<64x2xf32>, vector<64x2xf32> -> vector<64x2xf32>
    %18 = vector.extract_strided_slice %17 {offsets = [0, 0], sizes = [64, 1], strides = [1, 1]} : vector<64x2xf32> to vector<64x1xf32>
    %19 = vector.extract_strided_slice %17 {offsets = [0, 1], sizes = [64, 1], strides = [1, 1]} : vector<64x2xf32> to vector<64x1xf32>
    %20 = arith.mulf %18, %18 : vector<64x1xf32>
    %21 = arith.subf %19, %20 : vector<64x1xf32>
    %cst_13 = arith.constant 0.000000e+00 : f32
    %22 = vector.broadcast %cst_13 : f32 to vector<64x1xf32>
    %23 = arith.maximumf %21, %22 : vector<64x1xf32>
    %cst_14 = arith.constant 9.99999974E-6 : f32
    %24 = vector.broadcast %cst_14 : f32 to vector<64x1xf32>
    %25 = arith.addf %23, %24 : vector<64x1xf32>
    %26 = math.rsqrt %25 : vector<64x1xf32>
    %c0_15 = arith.constant 0 : index
    %c0_16 = arith.constant 0 : index
    %27 = vector.load %arg6[%c0_15, %c0_16] : memref<64x1xf32, #tpu.memory_space<vmem>>, vector<64x1xf32>
    %28 = arith.mulf %27, %26 : vector<64x1xf32>
    %c0_17 = arith.constant 0 : index
    %c0_18 = arith.constant 0 : index
    %29 = vector.load %arg7[%c0_17, %c0_18] : memref<64x1xf32, #tpu.memory_space<vmem>>, vector<64x1xf32>
    %30 = arith.mulf %18, %28 : vector<64x1xf32>
    %31 = arith.subf %29, %30 : vector<64x1xf32>
    %32 = vector.broadcast %28 : vector<64x1xf32> to vector<64x2304xf32>
    %33 = arith.mulf %9, %32 : vector<64x2304xf32>
    %34 = vector.broadcast %31 : vector<64x1xf32> to vector<64x2304xf32>
    %35 = arith.addf %33, %34 : vector<64x2304xf32>
    %c0_19 = arith.constant 0 : index
    %c0_20 = arith.constant 0 : index
    %c0_21 = arith.constant 0 : index
    %36 = vector.load %arg3[%c0_19, %c0_20, %c0_21] : memref<1x64x256xf32, #tpu.memory_space<vmem>>, vector<1x64x256xf32>
    %37 = vector.shape_cast %36 : vector<1x64x256xf32> to vector<64x256xf32>
    %cst_22 = arith.constant 0.000000e+00 : f32
    %38 = vector.broadcast %cst_22 : f32 to vector<64x256xf32>
    %c17_i32 = arith.constant 17 : i32
    %39 = tpu.dynamic_rotate %37 by %c17_i32 dim 1 : vector<64x256xf32>, i32 -> vector<64x256xf32>
    %c0_23 = arith.constant 0 : index
    %c0_24 = arith.constant 0 : index
    %40 = vector.load %arg10[%c0_23, %c0_24] : memref<9x256xf32, #tpu.memory_space<vmem>>, vector<1x256xf32>
    %41 = vector.broadcast %40 : vector<1x256xf32> to vector<64x256xf32>
    %42 = arith.mulf %39, %41 : vector<64x256xf32>
    %43 = vector.extract_strided_slice %35 {offsets = [0, 0], sizes = [64, 256], strides = [1, 1]} : vector<64x2304xf32> to vector<64x256xf32>
    %44 = arith.mulf %43, %42 : vector<64x256xf32>
    %45 = arith.addf %38, %44 : vector<64x256xf32>
    %c16_i32 = arith.constant 16 : i32
    %46 = tpu.dynamic_rotate %37 by %c16_i32 dim 1 : vector<64x256xf32>, i32 -> vector<64x256xf32>
    %c1 = arith.constant 1 : index
    %c0_25 = arith.constant 0 : index
    %47 = vector.load %arg10[%c1, %c0_25] : memref<9x256xf32, #tpu.memory_space<vmem>>, vector<1x256xf32>
    %48 = vector.broadcast %47 : vector<1x256xf32> to vector<64x256xf32>
    %49 = arith.mulf %46, %48 : vector<64x256xf32>
    %50 = vector.extract_strided_slice %35 {offsets = [0, 256], sizes = [64, 256], strides = [1, 1]} : vector<64x2304xf32> to vector<64x256xf32>
    %51 = arith.mulf %50, %49 : vector<64x256xf32>
    %52 = arith.addf %45, %51 : vector<64x256xf32>
    %c15_i32 = arith.constant 15 : i32
    %53 = tpu.dynamic_rotate %37 by %c15_i32 dim 1 : vector<64x256xf32>, i32 -> vector<64x256xf32>
    %c2 = arith.constant 2 : index
    %c0_26 = arith.constant 0 : index
    %54 = vector.load %arg10[%c2, %c0_26] : memref<9x256xf32, #tpu.memory_space<vmem>>, vector<1x256xf32>
    %55 = vector.broadcast %54 : vector<1x256xf32> to vector<64x256xf32>
    %56 = arith.mulf %53, %55 : vector<64x256xf32>
    %57 = vector.extract_strided_slice %35 {offsets = [0, 512], sizes = [64, 256], strides = [1, 1]} : vector<64x2304xf32> to vector<64x256xf32>
    %58 = arith.mulf %57, %56 : vector<64x256xf32>
    %59 = arith.addf %52, %58 : vector<64x256xf32>
    %c1_i32 = arith.constant 1 : i32
    %60 = tpu.dynamic_rotate %37 by %c1_i32 dim 1 : vector<64x256xf32>, i32 -> vector<64x256xf32>
    %c3 = arith.constant 3 : index
    %c0_27 = arith.constant 0 : index
    %61 = vector.load %arg10[%c3, %c0_27] : memref<9x256xf32, #tpu.memory_space<vmem>>, vector<1x256xf32>
    %62 = vector.broadcast %61 : vector<1x256xf32> to vector<64x256xf32>
    %63 = arith.mulf %60, %62 : vector<64x256xf32>
    %64 = vector.extract_strided_slice %35 {offsets = [0, 768], sizes = [64, 256], strides = [1, 1]} : vector<64x2304xf32> to vector<64x256xf32>
    %65 = arith.mulf %64, %63 : vector<64x256xf32>
    %66 = arith.addf %59, %65 : vector<64x256xf32>
    %c4 = arith.constant 4 : index
    %c0_28 = arith.constant 0 : index
    %67 = vector.load %arg10[%c4, %c0_28] : memref<9x256xf32, #tpu.memory_space<vmem>>, vector<1x256xf32>
    %68 = vector.broadcast %67 : vector<1x256xf32> to vector<64x256xf32>
    %69 = arith.mulf %37, %68 : vector<64x256xf32>
    %70 = vector.extract_strided_slice %35 {offsets = [0, 1024], sizes = [64, 256], strides = [1, 1]} : vector<64x2304xf32> to vector<64x256xf32>
    %71 = arith.mulf %70, %69 : vector<64x256xf32>
    %72 = arith.addf %66, %71 : vector<64x256xf32>
    %c255_i32 = arith.constant 255 : i32
    %73 = tpu.dynamic_rotate %37 by %c255_i32 dim 1 : vector<64x256xf32>, i32 -> vector<64x256xf32>
    %c5 = arith.constant 5 : index
    %c0_29 = arith.constant 0 : index
    %74 = vector.load %arg10[%c5, %c0_29] : memref<9x256xf32, #tpu.memory_space<vmem>>, vector<1x256xf32>
    %75 = vector.broadcast %74 : vector<1x256xf32> to vector<64x256xf32>
    %76 = arith.mulf %73, %75 : vector<64x256xf32>
    %77 = vector.extract_strided_slice %35 {offsets = [0, 1280], sizes = [64, 256], strides = [1, 1]} : vector<64x2304xf32> to vector<64x256xf32>
    %78 = arith.mulf %77, %76 : vector<64x256xf32>
    %79 = arith.addf %72, %78 : vector<64x256xf32>
    %c241_i32 = arith.constant 241 : i32
    %80 = tpu.dynamic_rotate %37 by %c241_i32 dim 1 : vector<64x256xf32>, i32 -> vector<64x256xf32>
    %c6 = arith.constant 6 : index
    %c0_30 = arith.constant 0 : index
    %81 = vector.load %arg10[%c6, %c0_30] : memref<9x256xf32, #tpu.memory_space<vmem>>, vector<1x256xf32>
    %82 = vector.broadcast %81 : vector<1x256xf32> to vector<64x256xf32>
    %83 = arith.mulf %80, %82 : vector<64x256xf32>
    %84 = vector.extract_strided_slice %35 {offsets = [0, 1536], sizes = [64, 256], strides = [1, 1]} : vector<64x2304xf32> to vector<64x256xf32>
    %85 = arith.mulf %84, %83 : vector<64x256xf32>
    %86 = arith.addf %79, %85 : vector<64x256xf32>
    %c240_i32 = arith.constant 240 : i32
    %87 = tpu.dynamic_rotate %37 by %c240_i32 dim 1 : vector<64x256xf32>, i32 -> vector<64x256xf32>
    %c7 = arith.constant 7 : index
    %c0_31 = arith.constant 0 : index
    %88 = vector.load %arg10[%c7, %c0_31] : memref<9x256xf32, #tpu.memory_space<vmem>>, vector<1x256xf32>
    %89 = vector.broadcast %88 : vector<1x256xf32> to vector<64x256xf32>
    %90 = arith.mulf %87, %89 : vector<64x256xf32>
    %91 = vector.extract_strided_slice %35 {offsets = [0, 1792], sizes = [64, 256], strides = [1, 1]} : vector<64x2304xf32> to vector<64x256xf32>
    %92 = arith.mulf %91, %90 : vector<64x256xf32>
    %93 = arith.addf %86, %92 : vector<64x256xf32>
    %c239_i32 = arith.constant 239 : i32
    %94 = tpu.dynamic_rotate %37 by %c239_i32 dim 1 : vector<64x256xf32>, i32 -> vector<64x256xf32>
    %c8 = arith.constant 8 : index
    %c0_32 = arith.constant 0 : index
    %95 = vector.load %arg10[%c8, %c0_32] : memref<9x256xf32, #tpu.memory_space<vmem>>, vector<1x256xf32>
    %96 = vector.broadcast %95 : vector<1x256xf32> to vector<64x256xf32>
    %97 = arith.mulf %94, %96 : vector<64x256xf32>
    %98 = vector.extract_strided_slice %35 {offsets = [0, 2048], sizes = [64, 256], strides = [1, 1]} : vector<64x2304xf32> to vector<64x256xf32>
    %99 = arith.mulf %98, %97 : vector<64x256xf32>
    %100 = arith.addf %93, %99 : vector<64x256xf32>
    %c0_33 = arith.constant 0 : index
    %c0_34 = arith.constant 0 : index
    %101 = vector.load %arg9[%c0_33, %c0_34] : memref<16x64xf32, #tpu.memory_space<vmem>>, vector<16x64xf32>
    %cst_35 = arith.constant dense<0.000000e+00> : vector<16x256xf32>
    %102 = tpu.matmul %101, %100, %cst_35 {dimension_numbers = #tpu.dot_dimension_numbers<[1], [0], [0], [1], [0, 0, 1, 1], [], []>} : vector<16x64xf32>, vector<64x256xf32>, vector<16x256xf32> -> vector<16x256xf32>
    %103 = vector.shape_cast %102 : vector<16x256xf32> to vector<1x16x256xf32>
    %c0_36 = arith.constant 0 : index
    %c0_37 = arith.constant 0 : index
    %c0_38 = arith.constant 0 : index
    %104 = vector.load %arg12[%c0_36, %c0_37, %c0_38] : memref<1x16x256xf32, #tpu.memory_space<vmem>>, vector<1x16x256xf32>
    tpu.vector_store %arg12[%c0_36, %c0_37, %c0_38], %103 {strides = array<i32>} : memref<1x16x256xf32, #tpu.memory_space<vmem>>, vector<1x16x256xf32>,
    return
  }
  func.func @transform_0(%arg0: i32, %arg1: i32) -> (i32, i32, i32) {
    %c0_i32 = arith.constant 0 : i32
    %c0_i32_0 = arith.constant 0 : i32
    %c0_i32_1 = arith.constant 0 : i32
    return %arg0, %c0_i32, %c0_i32_0 : i32, i32, i32
  }
  func.func @transform_1(%arg0: i32, %arg1: i32) -> (i32, i32, i32) {
    %c0_i32 = arith.constant 0 : i32
    %c0_i32_0 = arith.constant 0 : i32
    return %arg0, %arg1, %c0_i32 : i32, i32, i32
  }
  func.func @transform_2(%arg0: i32, %arg1: i32) -> (i32, i32) {
    %c0_i32 = arith.constant 0 : i32
    %c0_i32_0 = arith.constant 0 : i32
    return %arg1, %c0_i32 : i32, i32
  }
  func.func @transform_3(%arg0: i32, %arg1: i32) -> (i32, i32) {
    %c0_i32 = arith.constant 0 : i32
    %c0_i32_0 = arith.constant 0 : i32
    return %arg1, %c0_i32 : i32, i32
  }
  func.func @transform_4(%arg0: i32, %arg1: i32) -> (i32, i32) {
    %c0_i32 = arith.constant 0 : i32
    %c0_i32_0 = arith.constant 0 : i32
    return %arg1, %c0_i32 : i32, i32
  }
  func.func @transform_5(%arg0: i32, %arg1: i32) -> (i32, i32) {
    %c0_i32 = arith.constant 0 : i32
    %c0_i32_0 = arith.constant 0 : i32
    return %arg1, %c0_i32 : i32, i32
  }
  func.func @transform_6(%arg0: i32, %arg1: i32) -> (i32, i32) {
    %c0_i32 = arith.constant 0 : i32
    %c0_i32_0 = arith.constant 0 : i32
    %c0_i32_1 = arith.constant 0 : i32
    return %c0_i32, %c0_i32_0 : i32, i32
  }
  func.func @transform_7(%arg0: i32, %arg1: i32) -> (i32, i32) {
    %c0_i32 = arith.constant 0 : i32
    %c0_i32_0 = arith.constant 0 : i32
    %c0_i32_1 = arith.constant 0 : i32
    return %c0_i32, %c0_i32_0 : i32, i32
  }
  func.func @transform_8(%arg0: i32, %arg1: i32) -> (i32, i32) {
    %c0_i32 = arith.constant 0 : i32
    %c0_i32_0 = arith.constant 0 : i32
    %c0_i32_1 = arith.constant 0 : i32
    return %c0_i32, %c0_i32_0 : i32, i32
  }
  func.func @transform_9(%arg0: i32, %arg1: i32) -> (i32, i32) {
    %c0_i32 = arith.constant 0 : i32
    %c0_i32_0 = arith.constant 0 : i32
    %c0_i32_1 = arith.constant 0 : i32
    return %c0_i32, %c0_i32_0 : i32, i32
  }
  func.func @transform_10(%arg0: i32, %arg1: i32) -> (i32, i32, i32) {
    %c0_i32 = arith.constant 0 : i32
    %c0_i32_0 = arith.constant 0 : i32
    return %arg0, %arg1, %c0_i32 : i32, i32, i32
  }
}

</mosaic_0001>

<bundles_post_ra>
// kernel: at_kernel_forward.2
= control target key start
LH: loop header
LB: loop body
LE: loop exit
PB: predicated region body
PF: predicated region fallthrough
CT: control target
= control target key end

     0   :  { %s1957_s13 = smov 0   ;;  %s2382_s0 = inlined_call_operand.vmem [shape: f32[2,16,256], index: 0, kind: input, shape index: {}]   ;;  %s2383_s1 = inlined_call_operand.vmem [shape: f32[16,16], index: 1, kind: input, shape index: {}]   ;;  %s2384_s2 = inlined_call_operand.vmem [shape: f32[16,1], index: 2, kind: input, shape index: {}]   ;;  %s2385_s3 = inlined_call_operand.vmem [shape: f32[64,16], index: 3, kind: input, shape index: {}]   ;;  %s2386_s4 = inlined_call_operand.vmem [shape: f32[64,1], index: 4, kind: input, shape index: {}]   ;;  %s2387_s5 = inlined_call_operand.vmem [shape: f32[4,16], index: 5, kind: input, shape index: {}]   ;;  %s2388_s6 = inlined_call_operand.vmem [shape: f32[4,1], index: 6, kind: input, shape index: {}]   ;;  %s2389_s7 = inlined_call_operand.vmem [shape: f32[4,16], index: 7, kind: input, shape index: {}]   ;;  %s2390_s8 = inlined_call_operand.vmem [shape: f32[9,256], index: 8, kind: input, shape index: {}]   ;;  %s2391_s9 = inlined_call_operand.vmem [shape: f32[2,64,256], index: 9, kind: output, shape index: {0}]   ;;  %s2392_s10 = inlined_call_operand.vmem [shape: f32[2,4,2304], index: 10, kind: output, shape index: {1}]  }
   0x1 LB: > { %s1821_s14 = sadd.s32 4294967295, %s1890_s13   ;;  %p1825_p0 = scmp.ge.s32.totalorder %s1890_s13, 1  ;;  %s1890_s13 = sphi %s1957_s13, %s21_s13  }
   0x2   : > { %p315_p1 = scmp.lt.s32.totalorder %s1890_s13, 3 }
   0x4   : > { %p316_p2 = pnand %p1825_p0, %p315_p1 }
   0x5   : > { %p358_p3 = scmp.lt.s32.totalorder (!%p316_p2), %s1821_s14, 1  ;;  %s1894_s27 = smov (!%p316_p2), 17  }
   0x6   : > { %319 = sbr.rel (%p316_p2) target bundleno = 604 (0x25c), region = 56  ;;  %s1895_s28 = smov (!%p316_p2), 16  }
   0x7   : > { %s1896_s29 = smov (!%p316_p2), 15   ;;  %s1897_s30 = smov (!%p316_p2), 1  }
   0x8   : > { %s1898_s11 = smov (!%p316_p2), 127   ;;  %s1899_s12 = smov (!%p316_p2), 113  }
   0x9   : > { %s1900_s15 = smov (!%p316_p2), 112   ;;  %s1901_s16 = smov (!%p316_p2), 111  }
   0xb   : > { %v1892_v0 = vmov 0.0   ;;  %v1893_v1 = vmov 0   ;;  %v380_v2 = vld [vmem:[%s2384_s2 + $0x8] sm:$0xff]  ;;  %s2394_s14 = smov (!%p358_p3, %s1821_s14), 1  ;;  %v379_v3 = vld [vmem:[%s2384_s2] sm:$0xff]  ;;  %vm391_vm0 = vcmask 130048   ;;  %v777_v55 = vlaneseq }
   0xc   : > { %462 = vmatprep.mubr.f32.mxu0 %v1892_v0  ;;  %1882 = vset.pattern.permute.xlu0 %v1893_v1  ;;  %s1861_s19 = sshll.u32 %s2394_s14, 5  ;;  %v377_v8 = vld [vmem:[%s2383_s1] sm:$0xff]  ;;  %v378_v10 = vld [vmem:[%s2383_s1 + $0x8] sm:$0xff]  ;;  %v481_v12 = vld [vmem:[%s2385_s3 + $0x10] sm:$0xff]  ;;  %s1863_s23 = smul.u32 72, %s2394_s14 }
   0xd   : > { %388 = vperm.xlu0 %1882, %v380_v2   ;;  %623 = vmatprep.mubr.f32.mxu1 %v1892_v0  ;;  %s362_s22 = scalar_lea.vmem %s2382_s0, %s1861_s19  ;;  %v479_v9 = vld [vmem:[%s2385_s3] sm:$0xff]  ;;  %v480_v11 = vld [vmem:[%s2385_s3 + $0x8] sm:$0xff]  ;;  %v482_v14 = vld [vmem:[%s2385_s3 + $0x18] sm:$0xff]  ;;  %v2129_v59 = vand.u32 127, %v777_v55  ;;  %v787_v60 = vshrl.u32 %v777_v55, 7  ;;  %s1862_s19 = sshll.u32 %s2394_s14, 7 }
   0xe   : > { %1883 = vset.pattern.permute.xlu1 %v1893_v1  ;;  %v376_v4 = vld [vmem:[%s362_s22 + $0x18] sm:$0xff]  ;;  %v375_v5 = vld [vmem:[%s362_s22 + $0x10] sm:$0xff]  ;;  %v374_v6 = vld [vmem:[%s362_s22 + $0x8] sm:$0xff]  ;;  %s2353_s26 = scalar_lea.vmem %s2392_s10, %s1863_s23 }
   0xf   : > { %426 = vmatprep.subr.mxu0 %v376_v4  ;;  %v373_v7 = vld [vmem:[%s362_s22] sm:$0xff]  ;;  %587 = vmatprep.subr.mxu1 %v376_v4  ;;  %v484_v16 = vld [vmem:[%s2385_s3 + $0x28] sm:$0xff]  ;;  %v485_v17 = vld [vmem:[%s2385_s3 + $0x30] sm:$0xff]  ;;  %vm779_vm1 = vcmp.lt.s32.totalorder %v2129_v59, 17  ;;  %v2137_v2 = vsub.s32 0, %v787_v60  ;;  %vm808_vm2 = vcmp.lt.s32.totalorder %v2129_v59, 16  ;;  %s2314_s22 = scalar_lea.vmem %s2391_s9, %s1862_s19 }
  0x10   : > { %427 = vmatpush1.msra.mxu0 %v375_v5  ;;  %588 = vmatpush1.msra.mxu1 %v375_v5  ;;  %v688_v13 = vld [vmem:[%s2387_s5] sm:$0xf]  ;;  %v486_v18 = vld [vmem:[%s2385_s3 + $0x38] sm:$0xff]  ;;  %v488_v34 = vld [vmem:[%s2386_s4 + $0x8] sm:$0xff]  ;;  %vm838_vm3 = vcmp.lt.s32.totalorder %v2129_v59, 15  ;;  %vm868_vm4 = vcmp.lt.s32.totalorder %v2129_v59, 1 }
  0x11   : > { %383 = vperm.xlu0 %1882, %v379_v3   ;;  %428 = vmatprep.subr.mxu0 %v374_v6  ;;  %v483_v15 = vld [vmem:[%s2385_s3 + $0x20] sm:$0xff]  ;;  %v490_v35 = vld [vmem:[%s2386_s4 + $0x18] sm:$0xff]  ;;  %v492_v36 = vld [vmem:[%s2386_s4 + $0x28] sm:$0xff]  ;;  %v2139_v3 = vsub.s32 1, %v787_v60  ;;  %vm915_vm5 = vcmp.lt.s32.totalorder %v2129_v59, 127  ;;  %vm945_vm6 = vcmp.lt.s32.totalorder %v2129_v59, 113 }
  0x12   : > { %589 = vmatprep.subr.mxu1 %v374_v6  ;;  %429 = vmatpush1.msra.mxu0 %v373_v7  ;;  %v689_v33 = vld [vmem:[%s2388_s6] sm:$0xf]  ;;  %v494_v37 = vld [vmem:[%s2386_s4 + $0x38] sm:$0xff]  ;;  %v489_v39 = vld [vmem:[%s2386_s4 + $0x10] sm:$0xff]  ;;  %vm975_vm7 = vcmp.lt.s32.totalorder %v2129_v59, 112  ;;  %vm1005_vm8 = vcmp.lt.s32.totalorder %v2129_v59, 111 }
  0x13   : > { %590 = vmatpush1.msra.mxu1 %v373_v7  ;;  %1831 = vmatmul.mubr.msk.f32.vlgmr.msra.gmra.mxu0 %vm391_vm0, %v377_v8  ;;  %v487_v38 = vld [vmem:[%s2386_s4] sm:$0xff]  ;;  %v493_v41 = vld [vmem:[%s2386_s4 + $0x30] sm:$0xff] }
  0x14   : > { %1833 = vmatmul.mubr.msk.f32.vlgmr.msra.gmra.mxu1 %vm391_vm0, %v479_v9  ;;  %468 = vmatprep.mubr.f32.mxu0 %v1892_v0  ;;  %v491_v40 = vld [vmem:[%s2386_s4 + $0x20] sm:$0xff] }
  0x15   : > { %629 = vmatprep.mubr.f32.mxu1 %v1892_v0  ;;  %726 = vmatprep.subr.mxu0 %v376_v4  ;;  %v784_v63 = vld [vmem:[%s2390_s8] ss:$8 sm:$0x3] }
  0x16   : > { %727 = vmatpush1.msra.mxu0 %v375_v5  ;;  %v789_v5 = vrot.slane %v784_v63, %v2137_v2 }
  0x17   : > { %1832 = vmatmul.mubr.msk.f32.gmra.mxu0 %vm391_vm0, %v378_v10  ;;  %728 = vmatprep.subr.mxu0 %v374_v6  ;;  %v793_v6 = vrot.slane %v784_v63, %v2139_v3 }
  0x18   : > { %1834 = vmatmul.mubr.msk.f32.gmra.mxu1 %vm391_vm0, %v480_v11  ;;  %729 = vmatpush1.msra.mxu0 %v373_v7  ;;  %v1842_v7 = vld [vmem:[%s2390_s8 + $0x1] ss:$8 sm:$0x3] }
  0x19   : > { %635 = vmatprep.mubr.f32.mxu1 %v1892_v0  ;;  %762 = vmatprep.mubr.f32.mxu0 %v1892_v0 }
  0x1b   : > { %1841 = vmatmul.mubr.msk.f32.vlgmr.msra.gmra.mxu0 %vm391_vm0, %v688_v13 }
  0x1c   : > { %1835 = vmatmul.mubr.msk.f32.gmra.mxu1 %vm391_vm0, %v481_v12  ;;  %1095 = vmatprep.mubr.f32.mxu0 %v1892_v0 }
  0x1d   : > { %641 = vmatprep.mubr.f32.mxu1 %v1892_v0 }
  0x20   : > { %1836 = vmatmul.mubr.msk.f32.gmra.mxu1 %vm391_vm0, %v482_v14 }
  0x21   : > { %647 = vmatprep.mubr.f32.mxu1 %v1892_v0 }
  0x24   : > { %1837 = vmatmul.mubr.msk.f32.gmra.mxu1 %vm391_vm0, %v483_v15 }
  0x25   : > { %653 = vmatprep.mubr.f32.mxu1 %v1892_v0 }
  0x28   : > { %1838 = vmatmul.mubr.msk.f32.gmra.mxu1 %vm391_vm0, %v484_v16 }
  0x29   : > { %659 = vmatprep.mubr.f32.mxu1 %v1892_v0 }
  0x2c   : > { %1839 = vmatmul.mubr.msk.f32.gmra.mxu1 %vm391_vm0, %v485_v17  ;;  %v819_v17 = vrot.slane %v1842_v7, %v2137_v2 }
  0x2d   : > { %665 = vmatprep.mubr.f32.mxu1 %v1892_v0 }
  0x30   : > { %1840 = vmatmul.mubr.msk.f32.gmra.mxu1 %vm391_vm0, %v486_v18 }
  0x31   : > { %1521 = vmatprep.mubr.f32.mxu1 %v1892_v0 }
  0x88   : > { %v389_v19 = vpop.permute.xlu0 %388 }
  0x8c   : > { %v384_v20 = vpop.permute.xlu0 %383 }
  0xd3   : > { %v464_v21 = vpop.f32.mrf.mxu0 }
  0xd4   : > { %v465_v22 = vadd.f32 %v464_v21, %v384_v20  ;;  %v2121_v54 = vpop.f32.mrf.mxu1  ;;  %v1843_v21 = vld [vmem:[%s2390_s8 + $0x2] ss:$8 sm:$0x3] }
  0xd5   : > { %v466_v23 = vpop.f32.mrf.mxu0 }
  0xd6   : > { %v2034_v24 = vmax.f32 %v465_v22, 0.0  ;;  %v467_v25 = vadd.f32 %v466_v23, %v384_v20  ;;  %v2127_v58 = vpop.f32.mrf.mxu1  ;;  %v823_v20 = vrot.slane %v1842_v7, %v2139_v3 }
  0xd7   : > { %v470_v27 = vpop.f32.mrf.mxu0 }
  0xd8   : > { %v2036_v26 = vmax.f32 %v467_v25, 0.0  ;;  %769 = vrot.lane.b32.xlu0 %v2034_v24, %s1894_s27  ;;  %v471_v28 = vadd.f32 %v470_v27, %v389_v19  ;;  %v2134_v1 = vpop.f32.mrf.mxu1 }
  0xd9   : > { %v472_v29 = vpop.f32.mrf.mxu0 }
  0xda   : > { %773 = vrot.lane.b32.xlu1 %v2036_v26, %s1894_s27  ;;  %v2053_v30 = vmax.f32 %v471_v28, 0.0  ;;  %v473_v31 = vadd.f32 %v472_v29, %v389_v19  ;;  %v2146_v13 = vpop.f32.mrf.mxu1  ;;  %v2158_v29 = vld [vmem:[%s2389_s7] sm:$0xf] }
  0xdc   : > { %800 = vrot.lane.b32.xlu0 %v2034_v24, %s1895_s28  ;;  %v2059_v32 = vmax.f32 %v473_v31, 0.0  ;;  %v2160_v31 = vpop.f32.mrf.mxu1 }
  0xde   : > { %804 = vrot.lane.b32.xlu1 %v2036_v26, %s1895_s28  ;;  %v2187_v60 = vpop.f32.mrf.mxu1 }
  0xe0   : > { %830 = vrot.lane.b32.xlu0 %v2034_v24, %s1896_s29 }
  0xe2   : > { %834 = vrot.lane.b32.xlu1 %v2036_v26, %s1896_s29 }
  0xe4   : > { %860 = vrot.lane.b32.xlu0 %v2034_v24, %s1897_s30 }
  0xe6   : > { %864 = vrot.lane.b32.xlu1 %v2036_v26, %s1897_s30 }
  0xe8   : > { %907 = vrot.lane.b32.xlu0 %v2034_v24, %s1898_s11 }
  0xea   : > { %911 = vrot.lane.b32.xlu1 %v2036_v26, %s1898_s11 }
  0xec   : > { %937 = vrot.lane.b32.xlu0 %v2034_v24, %s1899_s12 }
  0xee   : > { %941 = vrot.lane.b32.xlu1 %v2036_v26, %s1899_s12 }
  0xf0   : > { %967 = vrot.lane.b32.xlu0 %v2034_v24, %s1900_s15 }
  0xf2   : > { %971 = vrot.lane.b32.xlu1 %v2036_v26, %s1900_s15 }
  0xf4   : > { %802 = vrot.lane.b32.xlu0 %v2053_v30, %s1895_s28 }
  0xf6   : > { %771 = vrot.lane.b32.xlu1 %v2053_v30, %s1894_s27 }
  0xf8   : > { %832 = vrot.lane.b32.xlu0 %v2053_v30, %s1896_s29 }
  0xfa   : > { %775 = vrot.lane.b32.xlu1 %v2059_v32, %s1894_s27 }
  0xfc   : > { %862 = vrot.lane.b32.xlu0 %v2053_v30, %s1897_s30 }
  0xfe   : > { %806 = vrot.lane.b32.xlu1 %v2059_v32, %s1895_s28 }
 0x100   : > { %909 = vrot.lane.b32.xlu0 %v2053_v30, %s1898_s11 }
 0x102   : > { %836 = vrot.lane.b32.xlu1 %v2059_v32, %s1896_s29 }
 0x104   : > { %939 = vrot.lane.b32.xlu0 %v2053_v30, %s1899_s12 }
 0x106   : > { %866 = vrot.lane.b32.xlu1 %v2059_v32, %s1897_s30 }
 0x108   : > { %969 = vrot.lane.b32.xlu0 %v2053_v30, %s1900_s15 }
 0x10a   : > { %913 = vrot.lane.b32.xlu1 %v2059_v32, %s1898_s11 }
 0x10c   : > { %999 = vrot.lane.b32.xlu0 %v2053_v30, %s1901_s16 }
 0x10e   : > { %943 = vrot.lane.b32.xlu1 %v2059_v32, %s1899_s12 }
 0x110   : > { %997 = vrot.lane.b32.xlu0 %v2034_v24, %s1901_s16 }
 0x112   : > { %973 = vrot.lane.b32.xlu1 %v2059_v32, %s1900_s15 }
 0x114   : > { %692 = vperm.xlu0 %1882, %v689_v33  }
 0x116   : > { %1003 = vrot.lane.b32.xlu1 %v2059_v32, %s1901_s16 }
 0x118   : > { %502 = vperm.xlu0 %1882, %v488_v34  }
 0x11a   : > { %1001 = vrot.lane.b32.xlu1 %v2036_v26, %s1901_s16 }
 0x11c   : > { %512 = vperm.xlu0 %1882, %v490_v35   ;;  %v849_v35 = vrot.slane %v1843_v21, %v2137_v2 }
 0x11e   : > { %497 = vperm.xlu1 %1883, %v487_v38  }
 0x120   : > { %522 = vperm.xlu0 %1882, %v492_v36   ;;  %v853_v36 = vrot.slane %v1843_v21, %v2139_v3 }
 0x122   : > { %507 = vperm.xlu1 %1883, %v489_v39  }
 0x124   : > { %532 = vperm.xlu0 %1882, %v494_v37  }
 0x126   : > { %517 = vperm.xlu1 %1883, %v491_v40  }
 0x12a   : > { %527 = vperm.xlu1 %1883, %v493_v41   ;;  %v1844_v41 = vld [vmem:[%s2390_s8 + $0x3] ss:$8 sm:$0x3] }
 0x12b   : > { %v879_v63 = vrot.slane %v1844_v41, %v2137_v2 }
 0x14a   : > { %v770_v42 = vpop.permute.xlu0 %769 }
 0x14c   : > { %v774_v43 = vpop.permute.xlu1 %773 }
 0x14d   : > { %v780_v9 = vsel %vm779_vm1, %v770_v42, %v774_v43  ;;  %v782_v10 = vsel %vm779_vm1, %v774_v43, %v770_v42  ;;  %v1845_v43 = vld [vmem:[%s2390_s8 + $0x4] ss:$8 sm:$0x3] }
 0x14e   : > { %v801_v44 = vpop.permute.xlu0 %800  ;;  %v796_v18 = vmul.f32 %v789_v5, %v782_v10  ;;  %v797_v19 = vmul.f32 %v793_v6, %v780_v9 }
 0x150   : > { %v805_v45 = vpop.permute.xlu1 %804 }
 0x151   : > { %v809_v23 = vsel %vm808_vm2, %v801_v44, %v805_v45  ;;  %v811_v25 = vsel %vm808_vm2, %v805_v45, %v801_v44 }
 0x152   : > { %v2105_v46 = vpop.permute.xlu0 %830  ;;  %v826_v38 = vmul.f32 %v819_v17, %v811_v25  ;;  %v827_v39 = vmul.f32 %v823_v20, %v809_v23 }
 0x154   : > { %v2107_v47 = vpop.permute.xlu1 %834 }
 0x155   : > { %v839_v40 = vsel %vm838_vm3, %v2105_v46, %v2107_v47  ;;  %v841_v44 = vsel %vm838_vm3, %v2107_v47, %v2105_v46  ;;  %v896_v46 = vrot.slane %v1845_v43, %v2137_v2 }
 0x156   : > { %v2109_v48 = vpop.permute.xlu0 %860  ;;  %v856_v47 = vmul.f32 %v849_v35, %v841_v44 }
 0x158   : > { %v2111_v49 = vpop.permute.xlu1 %864 }
 0x159   : > { %v869_v7 = vsel %vm868_vm4, %v2109_v48, %v2111_v49 }
 0x15a   : > { %v2113_v50 = vpop.permute.xlu0 %907 }
 0x15c   : > { %v2115_v51 = vpop.permute.xlu1 %911 }
 0x15e   : > { %v2117_v52 = vpop.permute.xlu0 %937 }
 0x160   : > { %v2119_v53 = vpop.permute.xlu1 %941 }
 0x161   : > { %v946_v44 = vsel %vm945_vm6, %v2117_v52, %v2119_v53 }
 0x162   : > { %v2123_v56 = vpop.permute.xlu0 %967 }
 0x164   : > { %v2125_v57 = vpop.permute.xlu1 %971 }
 0x166   : > { %v803_v61 = vpop.permute.xlu0 %802 }
 0x168   : > { %v772_v62 = vpop.permute.xlu1 %771 }
 0x16a   : > { %v833_v4 = vpop.permute.xlu0 %832 }
 0x16c   : > { %v776_v8 = vpop.permute.xlu1 %775 }
 0x16d   : > { %v781_v11 = vsel %vm779_vm1, %v772_v62, %v776_v8  ;;  %v783_v12 = vsel %vm779_vm1, %v776_v8, %v772_v62 }
 0x16e   : > { %v798_v14 = vmul.f32 %v789_v5, %v783_v12  ;;  %v799_v15 = vmul.f32 %v793_v6, %v781_v11  ;;  %v863_v16 = vpop.permute.xlu0 %862  ;;  %v857_v5 = vmul.f32 %v853_v36, %v839_v40  ;;  %v883_v6 = vrot.slane %v1844_v41, %v2139_v3  ;;  %v2204_v11 = vpop.f32.mrf.mxu1 }
 0x16f   : > { %v871_v12 = vsel %vm868_vm4, %v2111_v49, %v2109_v48  ;;  %v903_v49 = vmul.f32 %v896_v46, %v2034_v24 }
 0x170   : > { %1059 = vmatprep.subr.mxu0 %v799_v15  ;;  %v807_v22 = vpop.permute.xlu1 %806  ;;  %v886_v48 = vmul.f32 %v879_v63, %v871_v12  ;;  %v2222_v21 = vpop.f32.mrf.mxu1  ;;  %v976_v12 = vsel %vm975_vm7, %v2123_v56, %v2125_v57 }
 0x171   : > { %v810_v27 = vsel %vm808_vm2, %v803_v61, %v807_v22  ;;  %v812_v28 = vsel %vm808_vm2, %v807_v22, %v803_v61  ;;  %1060 = vmatpush1.msra.mxu0 %v798_v14 }
 0x172   : > { %v828_v33 = vmul.f32 %v819_v17, %v812_v28  ;;  %v829_v34 = vmul.f32 %v823_v20, %v810_v27  ;;  %1061 = vmatprep.subr.mxu0 %v797_v19  ;;  %v2164_v37 = vpop.permute.xlu0 %909  ;;  %v900_v17 = vrot.slane %v1845_v43, %v2139_v3  ;;  %v1847_v19 = vld [vmem:[%s2390_s8 + $0x6] ss:$8 sm:$0x3]  ;;  %v2259_v41 = vpop.f32.mrf.mxu1 }
 0x173   : > { %1062 = vmatpush1.msra.mxu0 %v796_v18  ;;  %v1846_v18 = vld [vmem:[%s2390_s8 + $0x5] ss:$8 sm:$0x3]  ;;  %v956_v28 = vrot.slane %v1847_v19, %v2137_v2 }
 0x174   : > { %v837_v42 = vpop.permute.xlu1 %836  ;;  %1850 = vmatmul.mubr.msk.f32.vlgmr.msra.gmra.mxu0 %vm391_vm0, %v2158_v29  ;;  %1130 = vmatprep.subr.mxu0 %v829_v34  ;;  %v926_v22 = vrot.slane %v1846_v18, %v2137_v2  ;;  %v930_v23 = vrot.slane %v1846_v18, %v2139_v3  ;;  %v906_v25 = vmul.f32 %v900_v17, %v2059_v32 }
 0x175   : > { %v840_v45 = vsel %vm838_vm3, %v833_v4, %v837_v42  ;;  %v842_v55 = vsel %vm838_vm3, %v837_v42, %v833_v4  ;;  %1131 = vmatpush1.msra.mxu0 %v828_v33  ;;  %1166 = vmatprep.mubr.f32.mxu0 %v1892_v0  ;;  %v904_v27 = vmul.f32 %v900_v17, %v2036_v26  ;;  %v1848_v26 = vld [vmem:[%s2390_s8 + $0x7] ss:$8 sm:$0x3] }
 0x176   : > { %v858_v61 = vmul.f32 %v849_v35, %v842_v55  ;;  %v859_v62 = vmul.f32 %v853_v36, %v840_v45  ;;  %1132 = vmatprep.subr.mxu0 %v827_v39  ;;  %v940_v8 = vpop.permute.xlu0 %939  ;;  %v905_v34 = vmul.f32 %v896_v46, %v2053_v30  ;;  %v916_v35 = vsel %vm915_vm5, %v2113_v50, %v2115_v51 }
 0x177   : > { %1133 = vmatpush1.msra.mxu0 %v826_v38  ;;  %v960_v32 = vrot.slane %v1847_v19, %v2139_v3  ;;  %v918_v30 = vsel %vm915_vm5, %v2115_v51, %v2113_v50  ;;  %v948_v50 = vsel %vm945_vm6, %v2119_v53, %v2117_v52  ;;  %v986_v45 = vrot.slane %v1848_v26, %v2137_v2 }
 0x178   : > { %v867_v4 = vpop.permute.xlu1 %866  ;;  %1851 = vmatmul.mubr.msk.f32.vlgmr.msra.gmra.mxu0 %vm391_vm0, %v2158_v29  ;;  %1201 = vmatprep.subr.mxu0 %v859_v62  ;;  %v990_v55 = vrot.slane %v1848_v26, %v2139_v3  ;;  %v933_v62 = vmul.f32 %v926_v22, %v916_v35 }
 0x179   : > { %v870_v9 = vsel %vm868_vm4, %v863_v16, %v867_v4  ;;  %v872_v10 = vsel %vm868_vm4, %v867_v4, %v863_v16  ;;  %1202 = vmatpush1.msra.mxu0 %v858_v61  ;;  %1237 = vmatprep.mubr.f32.mxu0 %v1892_v0  ;;  %v887_v16 = vmul.f32 %v883_v6, %v869_v7  ;;  %v2279_v4 = vpop.f32.mrf.mxu1 }
 0x17a   : > { %v888_v14 = vmul.f32 %v879_v63, %v872_v10  ;;  %v889_v15 = vmul.f32 %v883_v6, %v870_v9  ;;  %1203 = vmatprep.subr.mxu0 %v857_v5  ;;  %v970_v33 = vpop.permute.xlu0 %969  ;;  %v934_v63 = vmul.f32 %v930_v23, %v918_v30  ;;  %v964_v5 = vmul.f32 %v960_v32, %v948_v50 }
 0x17b   : > { %1204 = vmatpush1.msra.mxu0 %v856_v47  ;;  %v963_v7 = vmul.f32 %v956_v28, %v946_v44  ;;  %v978_v9 = vsel %vm975_vm7, %v2125_v57, %v2123_v56  ;;  %v655_v17 = vpop.f32.mrf.mxu1  ;;  %v993_v57 = vmul.f32 %v986_v45, %v976_v12 }
 0x17c   : > { %v914_v20 = vpop.permute.xlu1 %913  ;;  %1852 = vmatmul.mubr.msk.f32.vlgmr.msra.gmra.mxu0 %vm391_vm0, %v2158_v29  ;;  %1272 = vmatprep.subr.mxu0 %v889_v15  ;;  %v994_v18 = vmul.f32 %v990_v55, %v978_v9 }
 0x17d   : > { %1273 = vmatpush1.msra.mxu0 %v888_v14  ;;  %1308 = vmatprep.mubr.f32.mxu0 %v1892_v0  ;;  %v919_v24 = vsel %vm915_vm5, %v914_v20, %v2164_v37  ;;  %v917_v36 = vsel %vm915_vm5, %v2164_v37, %v914_v20  ;;  %v1849_v37 = vld [vmem:[%s2390_s8 + $0x10] ss:$8 sm:$0x3] }
 0x17e   : > { %1274 = vmatprep.subr.mxu0 %v887_v16  ;;  %v936_v51 = vmul.f32 %v930_v23, %v919_v24  ;;  %v935_v61 = vmul.f32 %v926_v22, %v917_v36  ;;  %v1016_v47 = vrot.slane %v1849_v37, %v2137_v2  ;;  %v1000_v6 = vpop.permute.xlu0 %999  ;;  %v1020_v2 = vrot.slane %v1849_v37, %v2139_v3  ;;  %v657_v22 = vpop.f32.mrf.mxu1 }
 0x17f   : > { %1275 = vmatpush1.msra.mxu0 %v886_v48 }
 0x180   : > { %v944_v38 = vpop.permute.xlu1 %943  ;;  %1853 = vmatmul.mubr.msk.f32.vlgmr.msra.gmra.mxu0 %vm391_vm0, %v2158_v29  ;;  %1343 = vmatprep.subr.mxu0 %v906_v25 }
 0x181   : > { %v947_v39 = vsel %vm945_vm6, %v940_v8, %v944_v38  ;;  %v949_v40 = vsel %vm945_vm6, %v944_v38, %v940_v8  ;;  %1344 = vmatpush1.msra.mxu0 %v905_v34  ;;  %1379 = vmatprep.mubr.f32.mxu0 %v1892_v0 }
 0x182   : > { %v965_v42 = vmul.f32 %v956_v28, %v947_v39  ;;  %v966_v43 = vmul.f32 %v960_v32, %v949_v40  ;;  %1345 = vmatprep.subr.mxu0 %v904_v27  ;;  %v998_v19 = vpop.permute.xlu0 %997 }
 0x183   : > { %1346 = vmatpush1.msra.mxu0 %v903_v49 }
 0x184   : > { %v974_v46 = vpop.permute.xlu1 %973  ;;  %1854 = vmatmul.mubr.msk.f32.vlgmr.msra.gmra.mxu0 %vm391_vm0, %v2158_v29  ;;  %1414 = vmatprep.subr.mxu0 %v936_v51 }
 0x185   : > { %v977_v52 = vsel %vm975_vm7, %v970_v33, %v974_v46  ;;  %v979_v53 = vsel %vm975_vm7, %v974_v46, %v970_v33  ;;  %1485 = vmatprep.subr.mxu1 %v966_v43  ;;  %1415 = vmatpush1.msra.mxu0 %v935_v61 }
 0x186   : > { %v996_v8 = vmul.f32 %v990_v55, %v979_v53  ;;  %1486 = vmatpush1.msra.mxu1 %v965_v42  ;;  %1416 = vmatprep.subr.mxu0 %v934_v63  ;;  %v995_v10 = vmul.f32 %v986_v45, %v977_v52  ;;  %v764_v55 = vpop.f32.mrf.mxu0 }
 0x187   : > { %1487 = vmatprep.subr.mxu1 %v964_v5  ;;  %1417 = vmatpush1.msra.mxu0 %v933_v62 }
 0x188   : > { %1450 = vmatprep.mubr.f32.mxu0 %v1892_v0  ;;  %1488 = vmatpush1.msra.mxu1 %v963_v7  ;;  %v1004_v14 = vpop.permute.xlu1 %1003  ;;  %v766_v61 = vpop.f32.mrf.mxu0 }
 0x189   : > { %v1007_v3 = vsel %vm1005_vm8, %v1000_v6, %v1004_v14  ;;  %v1009_v15 = vsel %vm1005_vm8, %v1004_v14, %v1000_v6  ;;  %1855 = vmatmul.mubr.msk.f32.vlgmr.msra.gmra.mxu0 %vm391_vm0, %v2158_v29  ;;  %1856 = vmatmul.mubr.msk.f32.vlgmr.msra.gmra.mxu1 %vm391_vm0, %v2158_v29 }
 0x18a   : > { %v1025_v16 = vmul.f32 %v1016_v47, %v1007_v3  ;;  %v1026_v56 = vmul.f32 %v1020_v2, %v1009_v15  ;;  %1556 = vmatprep.subr.mxu0 %v996_v8  ;;  %1592 = vmatprep.mubr.f32.mxu0 %v1892_v0 }
 0x18b   : > { %1557 = vmatpush1.msra.mxu0 %v995_v10  ;;  %1663 = vmatprep.mubr.f32.mxu1 %v1892_v0  ;;  %v661_v0 = vpop.f32.mrf.mxu1 }
 0x18c   : > { %1558 = vmatprep.subr.mxu0 %v994_v18  ;;  %v1002_v20 = vpop.permute.xlu1 %1001  ;;  %1627 = vmatprep.subr.mxu1 %v1026_v56 }
 0x18d   : > { %1559 = vmatpush1.msra.mxu0 %v993_v57  ;;  %v1006_v48 = vsel %vm1005_vm8, %v998_v19, %v1002_v20  ;;  %v1008_v49 = vsel %vm1005_vm8, %v1002_v20, %v998_v19  ;;  %1628 = vmatpush1.msra.mxu1 %v1025_v16  ;;  %v663_v24 = vpop.f32.mrf.mxu1 }
 0x18e   : > { %v1023_v23 = vmul.f32 %v1016_v47, %v1006_v48  ;;  %v1024_v25 = vmul.f32 %v1020_v2, %v1008_v49  ;;  %1857 = vmatmul.mubr.msk.f32.vlgmr.msra.gmra.mxu0 %vm391_vm0, %v2158_v29 }
 0x18f   : > { %v693_v27 = vpop.permute.xlu0 %692  ;;  %v667_v32 = vpop.f32.mrf.mxu1 }
 0x190   : > { %1629 = vmatprep.subr.mxu1 %v1024_v25  ;;  %v2344_v62 = vadd.f32 %v766_v61, %v693_v27 }
 0x191   : > { %1630 = vmatpush1.msra.mxu1 %v1023_v23  ;;  %v669_v38 = vpop.f32.mrf.mxu1 }
 0x192   : > { %1858 = vmatmul.mubr.msk.f32.vlgmr.msra.gmra.mxu1 %vm391_vm0, %v2158_v29 }
 0x193   : > { %v503_v59 = vpop.permute.xlu0 %502 }
 0x194   : > { %v632_v28 = vadd.f32 %v2134_v1, %v503_v59  ;;  %v634_v33 = vadd.f32 %v2146_v13, %v503_v59 }
 0x196   : > { %674 = vst [vmem:[%s2314_s22 + $0x10] sm:$0xff] %v632_v28  ;;  %675 = vst [vmem:[%s2314_s22 + $0x18] sm:$0xff] %v634_v33 }
 0x197   : > { %v513_v29 = vpop.permute.xlu0 %512 }
 0x198   : > { %v644_v34 = vadd.f32 %v2204_v11, %v513_v29  ;;  %v646_v35 = vadd.f32 %v2222_v21, %v513_v29 }
 0x199   : > { %v498_v11 = vpop.permute.xlu1 %497 }
 0x19a   : > { %678 = vst [vmem:[%s2314_s22 + $0x30] sm:$0xff] %v644_v34  ;;  %679 = vst [vmem:[%s2314_s22 + $0x38] sm:$0xff] %v646_v35  ;;  %v626_v21 = vadd.f32 %v2121_v54, %v498_v11  ;;  %v628_v40 = vadd.f32 %v2127_v58, %v498_v11 }
 0x19b   : > { %v523_v26 = vpop.permute.xlu0 %522 }
 0x19c   : > { %v656_v1 = vadd.f32 %v655_v17, %v523_v26  ;;  %v658_v36 = vadd.f32 %v657_v22, %v523_v26  ;;  %672 = vst [vmem:[%s2314_s22] sm:$0xff] %v626_v21  ;;  %673 = vst [vmem:[%s2314_s22 + $0x8] sm:$0xff] %v628_v40 }
 0x19d   : > { %v508_v37 = vpop.permute.xlu1 %507 }
 0x19e   : > { %682 = vst [vmem:[%s2314_s22 + $0x50] sm:$0xff] %v656_v1  ;;  %683 = vst [vmem:[%s2314_s22 + $0x58] sm:$0xff] %v658_v36  ;;  %v638_v50 = vadd.f32 %v2160_v31, %v508_v37  ;;  %v640_v51 = vadd.f32 %v2187_v60, %v508_v37  ;;  %v2342_v31 = vadd.f32 %v764_v55, %v693_v27 }
 0x19f   : > { %v533_v13 = vpop.permute.xlu0 %532 }
 0x1a0   : > { %v668_v30 = vadd.f32 %v667_v32, %v533_v13  ;;  %v670_v39 = vadd.f32 %v669_v38, %v533_v13  ;;  %676 = vst [vmem:[%s2314_s22 + $0x20] sm:$0xff] %v638_v50  ;;  %677 = vst [vmem:[%s2314_s22 + $0x28] sm:$0xff] %v640_v51 }
 0x1a1   : > { %v518_v42 = vpop.permute.xlu1 %517 }
 0x1a2   : > { %686 = vst [vmem:[%s2314_s22 + $0x70] sm:$0xff] %v668_v30  ;;  %687 = vst [vmem:[%s2314_s22 + $0x78] sm:$0xff] %v670_v39  ;;  %v650_v43 = vadd.f32 %v2259_v41, %v518_v42  ;;  %v652_v44 = vadd.f32 %v2279_v4, %v518_v42 }
 0x1a4   : > { %680 = vst [vmem:[%s2314_s22 + $0x40] sm:$0xff] %v650_v43  ;;  %681 = vst [vmem:[%s2314_s22 + $0x48] sm:$0xff] %v652_v44 }
 0x1a5   : > { %v528_v54 = vpop.permute.xlu1 %527 }
 0x1a6   : > { %v662_v58 = vadd.f32 %v661_v0, %v528_v54  ;;  %v664_v45 = vadd.f32 %v663_v24, %v528_v54 }
 0x1a8   : > { %684 = vst [vmem:[%s2314_s22 + $0x60] sm:$0xff] %v662_v58  ;;  %685 = vst [vmem:[%s2314_s22 + $0x68] sm:$0xff] %v664_v45 }
 0x234   : > { %v1097_v60 = vpop.f32.mrf.mxu0 }
 0x235   : > { %v1098_v63 = vadd.f32 %v1097_v60, %v2342_v31 }
 0x236   : > { %v1099_v41 = vpop.f32.mrf.mxu0 }
 0x237   : > { %v1100_v46 = vadd.f32 %v1099_v41, %v2344_v62  ;;  %v1670_v5 = vmax.f32 %v1098_v63, 0.0 }
 0x238   : > { %v1168_v47 = vpop.f32.mrf.mxu0 }
 0x239   : > { %v1671_v6 = vmax.f32 %v1100_v46, 0.0  ;;  %v1169_v52 = vadd.f32 %v1168_v47, %v2342_v31 }
 0x23a   : > { %v1170_v53 = vpop.f32.mrf.mxu0 }
 0x23b   : > { %v1706_v4 = vcombine.low %v1670_v5, %v1671_v6  ;;  %v1171_v7 = vadd.f32 %v1170_v53, %v2344_v62  ;;  %v1672_v2 = vmax.f32 %v1169_v52, 0.0 }
 0x23c   : > { %v1239_v8 = vpop.f32.mrf.mxu0 }
 0x23d   : > { %1724 = vst [vmem:[%s2353_s26] sm:$0xff] %v1706_v4  ;;  %v1673_v9 = vmax.f32 %v1171_v7, 0.0  ;;  %v1240_v10 = vadd.f32 %v1239_v8, %v2342_v31 }
 0x23e   : > { %v1241_v12 = vpop.f32.mrf.mxu0 }
 0x23f   : > { %v1707_v14 = vcombine.low %v1672_v2, %v1673_v9  ;;  %v1242_v3 = vadd.f32 %v1241_v12, %v2344_v62  ;;  %v1674_v17 = vmax.f32 %v1240_v10, 0.0 }
 0x240   : > { %v1310_v15 = vpop.f32.mrf.mxu0 }
 0x241   : > { %1725 = vst [vmem:[%s2353_s26 + $0x8] sm:$0xff] %v1707_v14  ;;  %v1675_v18 = vmax.f32 %v1242_v3, 0.0  ;;  %v1311_v16 = vadd.f32 %v1310_v15, %v2342_v31 }
 0x242   : > { %v1312_v56 = vpop.f32.mrf.mxu0 }
 0x243   : > { %v1708_v57 = vcombine.low %v1674_v17, %v1675_v18  ;;  %v1313_v19 = vadd.f32 %v1312_v56, %v2344_v62  ;;  %v1676_v48 = vmax.f32 %v1311_v16, 0.0 }
 0x244   : > { %v1381_v20 = vpop.f32.mrf.mxu0 }
 0x245   : > { %1726 = vst [vmem:[%s2353_s26 + $0x10] sm:$0xff] %v1708_v57  ;;  %v1677_v49 = vmax.f32 %v1313_v19, 0.0  ;;  %v1382_v22 = vadd.f32 %v1381_v20, %v2342_v31 }
 0x246   : > { %v1383_v23 = vpop.f32.mrf.mxu0 }
 0x247   : > { %v1709_v25 = vcombine.low %v1676_v48, %v1677_v49  ;;  %v1384_v27 = vadd.f32 %v1383_v23, %v2344_v62  ;;  %v1678_v0 = vmax.f32 %v1382_v22, 0.0 }
 0x249   : > { %1727 = vst [vmem:[%s2353_s26 + $0x18] sm:$0xff] %v1709_v25  ;;  %v1679_v59 = vmax.f32 %v1384_v27, 0.0  ;;  %v1452_v28 = vpop.f32.mrf.mxu0  ;;  %v1523_v33 = vpop.f32.mrf.mxu1 }
 0x24a   : > { %v1453_v24 = vadd.f32 %v1452_v28, %v2342_v31  ;;  %v1524_v29 = vadd.f32 %v1523_v33, %v2342_v31 }
 0x24b   : > { %v1710_v34 = vcombine.low %v1678_v0, %v1679_v59  ;;  %v1454_v35 = vpop.f32.mrf.mxu0  ;;  %v1525_v32 = vpop.f32.mrf.mxu1 }
 0x24c   : > { %v1455_v26 = vadd.f32 %v1454_v35, %v2344_v62  ;;  %v1526_v1 = vadd.f32 %v1525_v32, %v2344_v62  ;;  %v1680_v36 = vmax.f32 %v1453_v24, 0.0  ;;  %v1682_v38 = vmax.f32 %v1524_v29, 0.0 }
 0x24d   : > { %1728 = vst [vmem:[%s2353_s26 + $0x20] sm:$0xff] %v1710_v34 }
 0x24e   : > { %v1681_v13 = vmax.f32 %v1455_v26, 0.0  ;;  %v1683_v30 = vmax.f32 %v1526_v1, 0.0  ;;  %v1594_v39 = vpop.f32.mrf.mxu0 }
 0x24f   : > { %v1595_v11 = vadd.f32 %v1594_v39, %v2342_v31 }
 0x250   : > { %v1711_v21 = vcombine.low %v1680_v36, %v1681_v13  ;;  %v1712_v40 = vcombine.low %v1682_v38, %v1683_v30  ;;  %v1596_v37 = vpop.f32.mrf.mxu0 }
 0x251   : > { %v1597_v50 = vadd.f32 %v1596_v37, %v2344_v62  ;;  %v1684_v42 = vmax.f32 %v1595_v11, 0.0 }
 0x252   : > { %1729 = vst [vmem:[%s2353_s26 + $0x28] sm:$0xff] %v1711_v21  ;;  %1730 = vst [vmem:[%s2353_s26 + $0x30] sm:$0xff] %v1712_v40  ;;  %v1665_v51 = vpop.f32.mrf.mxu1 }
 0x253   : > { %v1685_v43 = vmax.f32 %v1597_v50, 0.0  ;;  %v1666_v44 = vadd.f32 %v1665_v51, %v2342_v31 }
 0x254   : > { %v1667_v54 = vpop.f32.mrf.mxu1 }
 0x255   : > { %v1713_v58 = vcombine.low %v1684_v42, %v1685_v43  ;;  %v1668_v45 = vadd.f32 %v1667_v54, %v2344_v62  ;;  %v1686_v55 = vmax.f32 %v1666_v44, 0.0 }
 0x257   : > { %1731 = vst [vmem:[%s2353_s26 + $0x38] sm:$0xff] %v1713_v58  ;;  %v1687_v61 = vmax.f32 %v1668_v45, 0.0 }
 0x259   : > { %v1714_v60 = vcombine.low %v1686_v55, %v1687_v61 }
 0x25b   : > { %1732 = vst [vmem:[%s2353_s26 + $0x40] sm:$0xff] %v1714_v60 }
 0x25c PF: > { %s21_s13 = sadd.s32 1, %s1890_s13  }
 0x25d   : > { %p18_p4 = scmp.ge.s32.totalorder %s21_s13, 4  }
 0x25f   :  { %20 = sbr.rel (!%p18_p4) target bundleno = 1 (0x1), region = 106 }

// kernel: at_kernel_forward.3
= control target key start
LH: loop header
LB: loop body
LE: loop exit
PB: predicated region body
PF: predicated region fallthrough
CT: control target
= control target key end

     0   :  { %s4575_s13 = smov 0   ;;  %s4577_s14 = smov 0   ;;  %s8827_s0 = inlined_call_operand.vmem [shape: f32[2,4,2304], index: 0, kind: input, shape index: {}]   ;;  %s8828_s1 = inlined_call_operand.vmem [shape: f32[2,64,256], index: 1, kind: input, shape index: {}]   ;;  %s8829_s2 = inlined_call_operand.vmem [shape: f32[64,4], index: 2, kind: input, shape index: {}]   ;;  %s8830_s3 = inlined_call_operand.vmem [shape: f32[64,1], index: 3, kind: input, shape index: {}]   ;;  %s8831_s4 = inlined_call_operand.vmem [shape: f32[64,1], index: 4, kind: input, shape index: {}]   ;;  %s8832_s5 = inlined_call_operand.vmem [shape: f32[64,1], index: 5, kind: input, shape index: {}]   ;;  %s8833_s6 = inlined_call_operand.vmem [shape: f32[64,64], index: 6, kind: input, shape index: {}]   ;;  %s8834_s7 = inlined_call_operand.vmem [shape: f32[16,64], index: 7, kind: input, shape index: {}]   ;;  %s8835_s8 = inlined_call_operand.vmem [shape: f32[9,256], index: 8, kind: input, shape index: {}]   ;;  %s8836_s9 = inlined_call_operand.vmem [shape: f32[1,2304], index: 9, kind: input, shape index: {}]   ;;  %s8837_s10 = inlined_call_operand.vmem [shape: f32[2,16,256], index: 10, kind: output, shape index: {}]  }
   0x1   :  { %s4579_s15 = smov 0  }
   0x2 LB: > { %s32_s16 = sadd.s32 1, %s4504_s14  ;;  %p4244_p0 = scmp.ge.s32.totalorder %s4508_s15, 1  ;;  %s4508_s15 = sphi %s4579_s15, %s20_s15   ;;  %s4504_s14 = sphi %s4577_s14, %s9841_s14   ;;  %s4500_s13 = sphi %s4575_s13, %s9840_s13  }
   0x3   : > { %p34_p1 = scmp.ge.s32.totalorder %s32_s16, 2  ;;  %p388_p2 = scmp.lt.s32.totalorder %s4508_s15, 3 }
   0x5   : > { %s9843_s16 = smov (%p34_p1, %s32_s16), 0  ;;  %p389_p3 = pnand %p4244_p0, %p388_p2 }
   0x7   : > { %392 = sbr.rel (%p389_p3) target bundleno = 1497 (0x5d9), region = 60 }
   0xc   : > { %p461_p4 = scmp.lt.s32.totalorder %s4500_s13, 1  ;;  %v8839_v0 = vmov 0.0   ;;  %v4511_v1 = vmov 0   ;;  %v534_v2 = vld [vmem:[%s8830_s3 + $0x28] sm:$0xff]  ;;  %v536_v3 = vld [vmem:[%s8830_s3 + $0x38] sm:$0xff]  ;;  %v533_v4 = vld [vmem:[%s8830_s3 + $0x20] sm:$0xff]  ;;  %v8838_v39 = vlaneseq }
   0xd   : > { %721 = vmatprep.mubr.f32.mxu0 %v8839_v0  ;;  %763 = vmatprep.mubr.f32.mxu1 %v8839_v0  ;;  %v535_v5 = vld [vmem:[%s8830_s3 + $0x30] sm:$0xff]  ;;  %vm620_vm0 = vcmask 1043456   ;;  %v4622_v11 = vld [vmem:[%s8829_s2] sm:$0xff]  ;;  %vm595_vm1 = vcmask 31744   ;;  %v4627_v12 = vld [vmem:[%s8829_s2 + $0x38] sm:$0xff]  ;;  %vm2379_vm2 = vcmask 523264  }
   0xe   : > { %s9845_s13 = smov (!%p461_p4, %s4500_s13), 1  ;;  %4444 = vset.pattern.permute.xlu1 %v4511_v1  ;;  %4443 = vset.pattern.permute.xlu0 %v4511_v1  ;;  %v4643_v17 = vld [vmem:[%s8829_s2 + $0x8] sm:$0xff]  ;;  %v531_v20 = vld [vmem:[%s8830_s3 + $0x10] sm:$0xff]  ;;  %v532_v23 = vld [vmem:[%s8830_s3 + $0x18] sm:$0xff]  ;;  %v4921_v44 = vshrl.u32 %v8838_v39, 7  ;;  %s4512_s18 = smov 17  }
   0xf   : > { %s4408_s21 = smul.u32 72, %s9845_s13  ;;  %564 = vperm.xlu1 %4444, %v534_v2   ;;  %574 = vperm.xlu0 %4443, %v536_v3   ;;  %v4662_v21 = vld [vmem:[%s8829_s2 + $0x10] sm:$0xff]  ;;  %v529_v24 = vld [vmem:[%s8830_s3] sm:$0xff]  ;;  %v4682_v25 = vld [vmem:[%s8829_s2 + $0x18] sm:$0xff]  ;;  %s4360_s30 = sshll.u32 %s9845_s13, 7  ;;  %vm2370_vm3 = vcmask 7168  }
  0x10   : > { %v530_v26 = vld [vmem:[%s8830_s3 + $0x8] sm:$0xff]  ;;  %v4697_v27 = vld [vmem:[%s8829_s2 + $0x20] sm:$0xff]  ;;  %v4719_v29 = vld [vmem:[%s8829_s2 + $0x30] sm:$0xff]  ;;  %v4924_v47 = vsub.s32 1, %v4921_v44  ;;  %v4931_v52 = vsub.s32 0, %v4921_v44  ;;  %v1690_v58 = vsub.s32 2, %v4921_v44  ;;  %s6506_s17 = scalar_lea.vmem %s8828_s1, %s4360_s30 }
  0x11   : > { %s4613_s28 = scalar_lea.vmem %s8827_s0, %s4408_s21  ;;  %v4708_v28 = vld [vmem:[%s8829_s2 + $0x28] sm:$0xff]  ;;  %v1674_v53 = vld [vmem:[%s8836_s9] sm:$0xff]  ;;  %v1694_v59 = vsub.s32 3, %v4921_v44  ;;  %v1698_v62 = vsub.s32 4, %v4921_v44  ;;  %v1702_v63 = vsub.s32 5, %v4921_v44  ;;  %v1706_v3 = vsub.s32 6, %v4921_v44 }
  0x12   : > { %v512_v6 = vld [vmem:[%s4613_s28] sm:$0xff]  ;;  %v513_v7 = vld [vmem:[%s4613_s28 + $0x8] sm:$0xff]  ;;  %v514_v9 = vld [vmem:[%s4613_s28 + $0x10] sm:$0xff]  ;;  %9078 = vst [vmem:[#allocation3_spill] sm:$0xff] %v4924_v47  ;;  %v4938_v57 = vrot.slane %v1674_v53, %v4924_v47  ;;  %v4946_v2 = vrot.slane %v1674_v53, %v4931_v52  ;;  %s4513_s19 = smov 16   ;;  %s4514_s20 = smov 15  }
  0x13   : > { %v586_v8 = vcombine.high %v512_v6, %v512_v6  ;;  %v515_v10 = vld [vmem:[%s4613_s28 + $0x18] sm:$0xff]  ;;  %559 = vperm.xlu1 %4444, %v533_v4   ;;  %569 = vperm.xlu0 %4443, %v535_v5   ;;  %v587_v13 = vcombine.high %v513_v7, %v513_v7  ;;  %v588_v14 = vcombine.high %v514_v9, %v514_v9  ;;  %v516_v16 = vld [vmem:[%s4613_s28 + $0x20] sm:$0xff]  ;;  %v517_v19 = vld [vmem:[%s4613_s28 + $0x28] sm:$0xff]  ;;  %v1710_v4 = vsub.s32 7, %v4921_v44  ;;  %s4515_s21 = smov 1   ;;  %s4517_s22 = smov 113  }
  0x14   : > { %v589_v15 = vcombine.high %v515_v10, %v515_v10  ;;  %v590_v18 = vcombine.high %v516_v16, %v516_v16  ;;  %v591_v22 = vcombine.high %v517_v19, %v517_v19  ;;  %v518_v30 = vld [vmem:[%s4613_s28 + $0x30] sm:$0xff]  ;;  %v519_v32 = vld [vmem:[%s4613_s28 + $0x38] sm:$0xff]  ;;  %v520_v34 = vld [vmem:[%s4613_s28 + $0x40] sm:$0xff]  ;;  %9079 = vst [vmem:[#allocation4_spill] sm:$0xff] %v4931_v52  ;;  %s4516_s28 = smov 127   ;;  %s4518_s24 = smov 112  }
  0x15   : > { %4250 = vmatprep.subr.msk.mxu0 %vm620_vm0, %v586_v8  ;;  %4406 = vmatprep.subr.msk.mxu1 %vm620_vm0, %v586_v8  ;;  %v592_v31 = vcombine.high %v518_v30, %v518_v30  ;;  %v593_v33 = vcombine.high %v519_v32, %v519_v32  ;;  %v594_v35 = vcombine.high %v520_v34, %v520_v34  ;;  %s4361_s29 = sshll.u32 %s9845_s13, 5 }
  0x16   : > { %4251 = vmatpush1.msk.msra.mxu0 %vm620_vm0, %v512_v6  ;;  %4407 = vmatpush1.msk.msra.mxu1 %vm620_vm0, %v512_v6 }
  0x17   : > { %4252 = vmatmul.mubr.msk.f32.vlgmr.msra.gmra.mxu0 %vm595_vm1, %v4622_v11  ;;  %4259 = vmatmul.mubr.msk.f32.vlgmr.msra.gmra.mxu1 %vm595_vm1, %v4627_v12 }
  0x18   : > { %4260 = vmatprep.subr.msk.mxu1 %vm620_vm0, %v587_v13  ;;  %727 = vmatprep.mubr.f32.mxu0 %v8839_v0  ;;  %v1675_v13 = vld [vmem:[%s8836_s9 + $0x8] sm:$0xff] }
  0x19   : > { %4261 = vmatpush1.msk.msra.mxu1 %vm620_vm0, %v513_v7  ;;  %834 = vmatprep.mubr.f32.mxu1 %v8839_v0  ;;  %v5001_v44 = vrot.slane %v1675_v13, %v1698_v62 }
  0x1a   : > { %4270 = vmatprep.subr.msk.mxu0 %vm620_vm0, %v588_v14  ;;  %4280 = vmatprep.subr.msk.mxu1 %vm620_vm0, %v589_v15  ;;  %v4963_v14 = vrot.slane %v1674_v53, %v1694_v59 }
  0x1b   : > { %4253 = vmatmul.mubr.msk.f32.gmra.mxu0 %vm595_vm1, %v4643_v17  ;;  %4262 = vmatmul.mubr.msk.f32.vlgmr.msra.gmra.mxu1 %vm595_vm1, %v4622_v11  ;;  %9090 = vst [vmem:[#allocation15_spill] sm:$0xff] %v5001_v44 }
  0x1c   : > { %733 = vmatprep.mubr.f32.mxu0 %v8839_v0  ;;  %840 = vmatprep.mubr.f32.mxu1 %v8839_v0 }
  0x1d   : > { %4271 = vmatpush1.msk.msra.mxu0 %vm620_vm0, %v514_v9  ;;  %4281 = vmatpush1.msk.msra.mxu1 %vm620_vm0, %v515_v10 }
  0x1e   : > { %4290 = vmatprep.subr.msk.mxu0 %vm620_vm0, %v590_v18  ;;  %549 = vperm.xlu1 %4444, %v531_v20   ;;  %v4967_v18 = vrot.slane %v1674_v53, %v1702_v63 }
  0x1f   : > { %4254 = vmatmul.mubr.msk.f32.gmra.mxu0 %vm595_vm1, %v4662_v21  ;;  %4263 = vmatmul.mubr.msk.f32.gmra.mxu1 %vm595_vm1, %v4643_v17 }
  0x20   : > { %739 = vmatprep.mubr.f32.mxu0 %v8839_v0  ;;  %846 = vmatprep.mubr.f32.mxu1 %v8839_v0 }
  0x21   : > { %4300 = vmatprep.subr.msk.mxu1 %vm620_vm0, %v591_v22  ;;  %554 = vperm.xlu0 %4443, %v532_v23   ;;  %v4975_v22 = vrot.slane %v1674_v53, %v1710_v4 }
  0x22   : > { %539 = vperm.xlu1 %4444, %v529_v24  }
  0x23   : > { %4255 = vmatmul.mubr.msk.f32.gmra.mxu0 %vm595_vm1, %v4682_v25  ;;  %4264 = vmatmul.mubr.msk.f32.gmra.mxu1 %vm595_vm1, %v4662_v21 }
  0x24   : > { %745 = vmatprep.mubr.f32.mxu0 %v8839_v0  ;;  %852 = vmatprep.mubr.f32.mxu1 %v8839_v0 }
  0x25   : > { %544 = vperm.xlu0 %4443, %v530_v26  }
  0x27   : > { %4256 = vmatmul.mubr.msk.f32.gmra.mxu0 %vm595_vm1, %v4697_v27  ;;  %4265 = vmatmul.mubr.msk.f32.gmra.mxu1 %vm595_vm1, %v4682_v25 }
  0x28   : > { %751 = vmatprep.mubr.f32.mxu0 %v8839_v0  ;;  %858 = vmatprep.mubr.f32.mxu1 %v8839_v0 }
  0x2b   : > { %4257 = vmatmul.mubr.msk.f32.gmra.mxu0 %vm595_vm1, %v4708_v28  ;;  %4266 = vmatmul.mubr.msk.f32.gmra.mxu1 %vm595_vm1, %v4697_v27 }
  0x2c   : > { %757 = vmatprep.mubr.f32.mxu0 %v8839_v0  ;;  %864 = vmatprep.mubr.f32.mxu1 %v8839_v0 }
  0x2f   : > { %4258 = vmatmul.mubr.msk.f32.gmra.mxu0 %vm595_vm1, %v4719_v29  ;;  %4267 = vmatmul.mubr.msk.f32.gmra.mxu1 %vm595_vm1, %v4708_v28 }
  0x30   : > { %870 = vmatprep.mubr.f32.mxu1 %v8839_v0  ;;  %947 = vmatprep.mubr.f32.mxu0 %v8839_v0 }
  0x33   : > { %4268 = vmatmul.mubr.msk.f32.gmra.mxu1 %vm595_vm1, %v4719_v29  ;;  %4272 = vmatmul.mubr.msk.f32.vlgmr.msra.gmra.mxu0 %vm595_vm1, %v4622_v11 }
  0x34   : > { %876 = vmatprep.mubr.f32.mxu1 %v8839_v0  ;;  %953 = vmatprep.mubr.f32.mxu0 %v8839_v0 }
  0x35   : > { %4291 = vmatpush1.msk.msra.mxu0 %vm620_vm0, %v516_v16 }
  0x36   : > { %4310 = vmatprep.subr.msk.mxu0 %vm620_vm0, %v592_v31 }
  0x37   : > { %4269 = vmatmul.mubr.msk.f32.gmra.mxu1 %vm595_vm1, %v4627_v12  ;;  %4273 = vmatmul.mubr.msk.f32.gmra.mxu0 %vm595_vm1, %v4643_v17 }
  0x38   : > { %959 = vmatprep.mubr.f32.mxu0 %v8839_v0  ;;  %1060 = vmatprep.mubr.f32.mxu1 %v8839_v0 }
  0x3b   : > { %4274 = vmatmul.mubr.msk.f32.gmra.mxu0 %vm595_vm1, %v4662_v21  ;;  %4282 = vmatmul.mubr.msk.f32.vlgmr.msra.gmra.mxu1 %vm595_vm1, %v4622_v11 }
  0x3c   : > { %965 = vmatprep.mubr.f32.mxu0 %v8839_v0  ;;  %1066 = vmatprep.mubr.f32.mxu1 %v8839_v0 }
  0x3d   : > { %4301 = vmatpush1.msk.msra.mxu1 %vm620_vm0, %v517_v19 }
  0x3e   : > { %4320 = vmatprep.subr.msk.mxu1 %vm620_vm0, %v593_v33 }
  0x3f   : > { %4275 = vmatmul.mubr.msk.f32.gmra.mxu0 %vm595_vm1, %v4682_v25  ;;  %4283 = vmatmul.mubr.msk.f32.gmra.mxu1 %vm595_vm1, %v4643_v17 }
  0x40   : > { %971 = vmatprep.mubr.f32.mxu0 %v8839_v0  ;;  %1072 = vmatprep.mubr.f32.mxu1 %v8839_v0 }
  0x43   : > { %4276 = vmatmul.mubr.msk.f32.gmra.mxu0 %vm595_vm1, %v4697_v27  ;;  %4284 = vmatmul.mubr.msk.f32.gmra.mxu1 %vm595_vm1, %v4662_v21 }
  0x44   : > { %977 = vmatprep.mubr.f32.mxu0 %v8839_v0  ;;  %1078 = vmatprep.mubr.f32.mxu1 %v8839_v0 }
  0x47   : > { %4277 = vmatmul.mubr.msk.f32.gmra.mxu0 %vm595_vm1, %v4708_v28  ;;  %4285 = vmatmul.mubr.msk.f32.gmra.mxu1 %vm595_vm1, %v4682_v25 }
  0x48   : > { %983 = vmatprep.mubr.f32.mxu0 %v8839_v0  ;;  %1084 = vmatprep.mubr.f32.mxu1 %v8839_v0 }
  0x4b   : > { %4278 = vmatmul.mubr.msk.f32.gmra.mxu0 %vm595_vm1, %v4719_v29  ;;  %4286 = vmatmul.mubr.msk.f32.gmra.mxu1 %vm595_vm1, %v4697_v27 }
  0x4c   : > { %989 = vmatprep.mubr.f32.mxu0 %v8839_v0  ;;  %1090 = vmatprep.mubr.f32.mxu1 %v8839_v0 }
  0x4f   : > { %4279 = vmatmul.mubr.msk.f32.gmra.mxu0 %vm595_vm1, %v4627_v12  ;;  %4287 = vmatmul.mubr.msk.f32.gmra.mxu1 %vm595_vm1, %v4708_v28 }
  0x50   : > { %1096 = vmatprep.mubr.f32.mxu1 %v8839_v0  ;;  %1173 = vmatprep.mubr.f32.mxu0 %v8839_v0 }
  0x53   : > { %4288 = vmatmul.mubr.msk.f32.gmra.mxu1 %vm595_vm1, %v4719_v29  ;;  %4292 = vmatmul.mubr.msk.f32.vlgmr.msra.gmra.mxu0 %vm595_vm1, %v4622_v11 }
  0x54   : > { %1102 = vmatprep.mubr.f32.mxu1 %v8839_v0  ;;  %1179 = vmatprep.mubr.f32.mxu0 %v8839_v0 }
  0x55   : > { %4311 = vmatpush1.msk.msra.mxu0 %vm620_vm0, %v518_v30 }
  0x56   : > { %4330 = vmatprep.subr.msk.mxu0 %vm620_vm0, %v594_v35 }
  0x57   : > { %4289 = vmatmul.mubr.msk.f32.gmra.mxu1 %vm595_vm1, %v4627_v12  ;;  %4293 = vmatmul.mubr.msk.f32.gmra.mxu0 %vm595_vm1, %v4643_v17 }
  0x58   : > { %1185 = vmatprep.mubr.f32.mxu0 %v8839_v0  ;;  %1286 = vmatprep.mubr.f32.mxu1 %v8839_v0 }
  0x5b   : > { %4294 = vmatmul.mubr.msk.f32.gmra.mxu0 %vm595_vm1, %v4662_v21  ;;  %4302 = vmatmul.mubr.msk.f32.vlgmr.msra.gmra.mxu1 %vm595_vm1, %v4622_v11 }
  0x5c   : > { %1191 = vmatprep.mubr.f32.mxu0 %v8839_v0  ;;  %1292 = vmatprep.mubr.f32.mxu1 %v8839_v0 }
  0x5d   : > { %4321 = vmatpush1.msk.msra.mxu1 %vm620_vm0, %v519_v32  ;;  %v4995_v32 = vrot.slane %v1675_v13, %v1690_v58 }
  0x5f   : > { %4295 = vmatmul.mubr.msk.f32.gmra.mxu0 %vm595_vm1, %v4682_v25  ;;  %4303 = vmatmul.mubr.msk.f32.gmra.mxu1 %vm595_vm1, %v4643_v17  ;;  %9088 = vst [vmem:[#allocation13_spill] sm:$0xff] %v4995_v32 }
  0x60   : > { %1197 = vmatprep.mubr.f32.mxu0 %v8839_v0  ;;  %1298 = vmatprep.mubr.f32.mxu1 %v8839_v0 }
  0x63   : > { %4296 = vmatmul.mubr.msk.f32.gmra.mxu0 %vm595_vm1, %v4697_v27  ;;  %4304 = vmatmul.mubr.msk.f32.gmra.mxu1 %vm595_vm1, %v4662_v21 }
  0x64   : > { %1203 = vmatprep.mubr.f32.mxu0 %v8839_v0  ;;  %1304 = vmatprep.mubr.f32.mxu1 %v8839_v0 }
  0x67   : > { %4297 = vmatmul.mubr.msk.f32.gmra.mxu0 %vm595_vm1, %v4708_v28  ;;  %4305 = vmatmul.mubr.msk.f32.gmra.mxu1 %vm595_vm1, %v4682_v25 }
  0x68   : > { %1209 = vmatprep.mubr.f32.mxu0 %v8839_v0  ;;  %1310 = vmatprep.mubr.f32.mxu1 %v8839_v0 }
  0x6b   : > { %4298 = vmatmul.mubr.msk.f32.gmra.mxu0 %vm595_vm1, %v4719_v29  ;;  %4306 = vmatmul.mubr.msk.f32.gmra.mxu1 %vm595_vm1, %v4697_v27 }
  0x6c   : > { %1215 = vmatprep.mubr.f32.mxu0 %v8839_v0  ;;  %1316 = vmatprep.mubr.f32.mxu1 %v8839_v0 }
  0x6f   : > { %4299 = vmatmul.mubr.msk.f32.gmra.mxu0 %vm595_vm1, %v4627_v12  ;;  %4307 = vmatmul.mubr.msk.f32.gmra.mxu1 %vm595_vm1, %v4708_v28 }
  0x70   : > { %1322 = vmatprep.mubr.f32.mxu1 %v8839_v0  ;;  %1399 = vmatprep.mubr.f32.mxu0 %v8839_v0 }
  0x73   : > { %4308 = vmatmul.mubr.msk.f32.gmra.mxu1 %vm595_vm1, %v4719_v29  ;;  %4312 = vmatmul.mubr.msk.f32.vlgmr.msra.gmra.mxu0 %vm595_vm1, %v4622_v11 }
  0x74   : > { %1328 = vmatprep.mubr.f32.mxu1 %v8839_v0  ;;  %1405 = vmatprep.mubr.f32.mxu0 %v8839_v0 }
  0x75   : > { %4331 = vmatpush1.msk.msra.mxu0 %vm620_vm0, %v520_v34 }
  0x77   : > { %4309 = vmatmul.mubr.msk.f32.gmra.mxu1 %vm595_vm1, %v4627_v12  ;;  %4313 = vmatmul.mubr.msk.f32.gmra.mxu0 %vm595_vm1, %v4643_v17 }
  0x78   : > { %1411 = vmatprep.mubr.f32.mxu0 %v8839_v0  ;;  %1512 = vmatprep.mubr.f32.mxu1 %v8839_v0 }
  0x7b   : > { %4314 = vmatmul.mubr.msk.f32.gmra.mxu0 %vm595_vm1, %v4662_v21  ;;  %4322 = vmatmul.mubr.msk.f32.vlgmr.msra.gmra.mxu1 %vm595_vm1, %v4622_v11 }
  0x7c   : > { %1417 = vmatprep.mubr.f32.mxu0 %v8839_v0  ;;  %1518 = vmatprep.mubr.f32.mxu1 %v8839_v0 }
  0x7f   : > { %4315 = vmatmul.mubr.msk.f32.gmra.mxu0 %vm595_vm1, %v4682_v25  ;;  %4323 = vmatmul.mubr.msk.f32.gmra.mxu1 %vm595_vm1, %v4643_v17 }
  0x80   : > { %1423 = vmatprep.mubr.f32.mxu0 %v8839_v0  ;;  %1524 = vmatprep.mubr.f32.mxu1 %v8839_v0 }
  0x83   : > { %4316 = vmatmul.mubr.msk.f32.gmra.mxu0 %vm595_vm1, %v4697_v27  ;;  %4324 = vmatmul.mubr.msk.f32.gmra.mxu1 %vm595_vm1, %v4662_v21 }
  0x84   : > { %1429 = vmatprep.mubr.f32.mxu0 %v8839_v0  ;;  %1530 = vmatprep.mubr.f32.mxu1 %v8839_v0 }
  0x87   : > { %4317 = vmatmul.mubr.msk.f32.gmra.mxu0 %vm595_vm1, %v4708_v28  ;;  %4325 = vmatmul.mubr.msk.f32.gmra.mxu1 %vm595_vm1, %v4682_v25 }
  0x88   : > { %1435 = vmatprep.mubr.f32.mxu0 %v8839_v0  ;;  %1536 = vmatprep.mubr.f32.mxu1 %v8839_v0 }
  0x8a   : > { %v4910_v36 = vpop.permute.xlu1 %564  ;;  %v4912_v37 = vpop.permute.xlu0 %574 }
  0x8b   : > { %4318 = vmatmul.mubr.msk.f32.gmra.mxu0 %vm595_vm1, %v4719_v29  ;;  %4326 = vmatmul.mubr.msk.f32.gmra.mxu1 %vm595_vm1, %v4697_v27 }
  0x8c   : > { %1441 = vmatprep.mubr.f32.mxu0 %v8839_v0  ;;  %1542 = vmatprep.mubr.f32.mxu1 %v8839_v0 }
  0x8e   : > { %v4914_v38 = vpop.permute.xlu1 %559  ;;  %v4916_v40 = vpop.permute.xlu0 %569 }
  0x8f   : > { %4319 = vmatmul.mubr.msk.f32.gmra.mxu0 %vm595_vm1, %v4627_v12  ;;  %4327 = vmatmul.mubr.msk.f32.gmra.mxu1 %vm595_vm1, %v4708_v28  ;;  %9077 = vst [vmem:[#allocation2_spill] sm:$0xff] %v4916_v40 }
  0x90   : > { %1548 = vmatprep.mubr.f32.mxu1 %v8839_v0  ;;  %1625 = vmatprep.mubr.f32.mxu0 %v8839_v0 }
  0x93   : > { %4328 = vmatmul.mubr.msk.f32.gmra.mxu1 %vm595_vm1, %v4719_v29  ;;  %4332 = vmatmul.mubr.msk.f32.vlgmr.msra.gmra.mxu0 %vm595_vm1, %v4622_v11 }
  0x94   : > { %1554 = vmatprep.mubr.f32.mxu1 %v8839_v0  ;;  %1631 = vmatprep.mubr.f32.mxu0 %v8839_v0 }
  0x97   : > { %4329 = vmatmul.mubr.msk.f32.gmra.mxu1 %vm595_vm1, %v4627_v12  ;;  %4333 = vmatmul.mubr.msk.f32.gmra.mxu0 %vm595_vm1, %v4643_v17  ;;  %v4965_v17 = vrot.slane %v1674_v53, %v1698_v62 }
  0x98   : > { %1637 = vmatprep.mubr.f32.mxu0 %v8839_v0 }
  0x99   : > { %v4918_v41 = vpop.permute.xlu1 %549 }
  0x9b   : > { %4334 = vmatmul.mubr.msk.f32.gmra.mxu0 %vm595_vm1, %v4662_v21  ;;  %v4973_v21 = vrot.slane %v1674_v53, %v1706_v3 }
  0x9c   : > { %1643 = vmatprep.mubr.f32.mxu0 %v8839_v0  ;;  %v4926_v50 = vpop.permute.xlu0 %554 }
  0x9d   : > { %v4928_v51 = vpop.permute.xlu1 %539 }
  0x9f   : > { %4335 = vmatmul.mubr.msk.f32.gmra.mxu0 %vm595_vm1, %v4682_v25 }
  0xa0   : > { %1649 = vmatprep.mubr.f32.mxu0 %v8839_v0  ;;  %v4955_v10 = vpop.permute.xlu0 %544 }
  0xa1   : > { %9081 = vst [vmem:[#allocation6_spill] sm:$0xff] %v4955_v10 }
  0xa3   : > { %4336 = vmatmul.mubr.msk.f32.gmra.mxu0 %vm595_vm1, %v4697_v27  ;;  %v4984_v27 = vrot.slane %v1675_v13, %v4931_v52 }
  0xa4   : > { %1655 = vmatprep.mubr.f32.mxu0 %v8839_v0 }
  0xa5   : > { %9085 = vst [vmem:[#allocation10_spill] sm:$0xff] %v4984_v27 }
  0xa7   : > { %4337 = vmatmul.mubr.msk.f32.gmra.mxu0 %vm595_vm1, %v4708_v28  ;;  %v4987_v28 = vrot.slane %v1675_v13, %v4924_v47 }
  0xa8   : > { %1661 = vmatprep.mubr.f32.mxu0 %v8839_v0 }
  0xa9   : > { %9086 = vst [vmem:[#allocation11_spill] sm:$0xff] %v4987_v28 }
  0xab   : > { %4338 = vmatmul.mubr.msk.f32.gmra.mxu0 %vm595_vm1, %v4719_v29 }
  0xac   : > { %1667 = vmatprep.mubr.f32.mxu0 %v8839_v0 }
  0xaf   : > { %4339 = vmatmul.mubr.msk.f32.gmra.mxu0 %vm595_vm1, %v4627_v12  ;;  %v4958_v12 = vrot.slane %v1674_v53, %v1690_v58 }
  0xd7   : > { %v723_v42 = vpop.f32.mrf.mxu0  ;;  %v765_v43 = vpop.f32.mrf.mxu1 }
  0xd8   : > { %v724_v1 = vadd.f32 %v723_v42, %v4928_v51  ;;  %v766_v5 = vadd.f32 %v765_v43, %v4912_v37  ;;  %v4999_v43 = vrot.slane %v1675_v13, %v1694_v59  ;;  %v5016_v59 = vrot.slane %v1675_v13, %v1706_v3 }
  0xd9   : > { %v725_v45 = vpop.f32.mrf.mxu0  ;;  %v767_v46 = vpop.f32.mrf.mxu1 }
  0xda   : > { %v726_v56 = vadd.f32 %v725_v45, %v4928_v51  ;;  %v768_v6 = vadd.f32 %v767_v46, %v4912_v37  ;;  %v4970_v19 = vmul.f32 %v4946_v2, %v724_v1  ;;  %v4978_v23 = vmul.f32 %v4946_v2, %v766_v5  ;;  %9089 = vst [vmem:[#allocation14_spill] sm:$0xff] %v4999_v43 }
  0xdb   : > { %v729_v48 = vpop.f32.mrf.mxu0  ;;  %v836_v49 = vpop.f32.mrf.mxu1  ;;  %9093 = vst [vmem:[#allocation18_spill] sm:$0xff] %v5016_v59 }
  0xdc   : > { %v4953_v9 = vmul.f32 %v4938_v57, %v726_v56  ;;  %v837_v11 = vadd.f32 %v836_v49, %v4928_v51  ;;  %9082 = vst [vmem:[#allocation7_spill] sm:$0xff] %v4970_v19  ;;  %9083 = vst [vmem:[#allocation8_spill] sm:$0xff] %v4978_v23  ;;  %v4981_v24 = vmul.f32 %v4938_v57, %v768_v6 }
  0xdd   : > { %v731_v54 = vpop.f32.mrf.mxu0  ;;  %v838_v55 = vpop.f32.mrf.mxu1  ;;  %v730_v30 = vadd.f32 %v729_v48, %v4955_v10  ;;  %v2066_v45 = vmul.f32 %v4970_v19, %v4970_v19  ;;  %v5009_v49 = vrot.slane %v1675_v13, %v1702_v63  ;;  %v2192_v53 = vmul.f32 %v4978_v23, %v4978_v23 }
  0xde   : > { %9080 = vst [vmem:[#allocation5_spill] sm:$0xff] %v4953_v9  ;;  %v732_v20 = vadd.f32 %v731_v54, %v4955_v10  ;;  %9084 = vst [vmem:[#allocation9_spill] sm:$0xff] %v4981_v24  ;;  %v2067_v29 = vmul.f32 %v4953_v9, %v4953_v9  ;;  %v4993_v31 = vmul.f32 %v4958_v12, %v837_v11 }
  0xdf   : > { %v735_v60 = vpop.f32.mrf.mxu0  ;;  %v842_v61 = vpop.f32.mrf.mxu1  ;;  %v839_v33 = vadd.f32 %v838_v55, %v4928_v51  ;;  %9092 = vst [vmem:[#allocation17_spill] sm:$0xff] %v5009_v49  ;;  %v2193_v54 = vmul.f32 %v4981_v24, %v4981_v24  ;;  %v1914_v62 = vadd.f32 %v4953_v9, %v4970_v19  ;;  %v5032_v11 = vrot.slane %v1675_v13, %v1710_v4 }
  0xe0   : > { %9087 = vst [vmem:[#allocation12_spill] sm:$0xff] %v4993_v31  ;;  %v5006_v46 = vmul.f32 %v4938_v57, %v732_v20  ;;  %v843_v48 = vadd.f32 %v842_v61, %v4955_v10  ;;  %v736_v55 = vadd.f32 %v735_v60, %v4918_v41  ;;  %v2210_v1 = vadd.f32 %v2067_v29, %v2066_v45 }
  0xe1   : > { %v737_v7 = vpop.f32.mrf.mxu0  ;;  %v844_v8 = vpop.f32.mrf.mxu1  ;;  %v5021_v61 = vmul.f32 %v4946_v2, %v730_v30  ;;  %v2068_v63 = vmul.f32 %v4993_v31, %v4993_v31  ;;  %v5026_v5 = vmul.f32 %v4963_v14, %v839_v33  ;;  %9097 = vst [vmem:[#allocation22_spill] sm:$0xff] %v5032_v11  ;;  %v5036_v20 = vadd.f32 %v4981_v24, %v4978_v23 }
  0xe2   : > { %v738_v34 = vadd.f32 %v737_v7, %v4918_v41  ;;  %9091 = vst [vmem:[#allocation16_spill] sm:$0xff] %v5006_v46  ;;  %v2085_v29 = vmul.f32 %v5006_v46, %v5006_v46  ;;  %v5041_v30 = vmul.f32 %v4958_v12, %v843_v48  ;;  %v845_v4 = vadd.f32 %v844_v8, %v4955_v10 }
  0xe3   : > { %v741_v15 = vpop.f32.mrf.mxu0  ;;  %v848_v16 = vpop.f32.mrf.mxu1  ;;  %9094 = vst [vmem:[#allocation19_spill] sm:$0xff] %v5021_v61  ;;  %9095 = vst [vmem:[#allocation20_spill] sm:$0xff] %v5026_v5  ;;  %v2084_v0 = vmul.f32 %v5021_v61, %v5021_v61  ;;  %v1915_v48 = vadd.f32 %v1914_v62, %v4993_v31  ;;  %v2211_v23 = vadd.f32 %v2210_v1, %v2068_v63 }
  0xe4   : > { %v5029_v6 = vmul.f32 %v4938_v57, %v738_v34  ;;  %v849_v60 = vadd.f32 %v848_v16, %v4918_v41  ;;  %9098 = vst [vmem:[#allocation23_spill] sm:$0xff] %v5041_v30  ;;  %v5044_v34 = vadd.f32 %v2193_v54, %v2192_v53  ;;  %v5047_v16 = vmul.f32 %v4946_v2, %v736_v55 }
  0xe5   : > { %v743_v25 = vpop.f32.mrf.mxu0  ;;  %v850_v26 = vpop.f32.mrf.mxu1  ;;  %v742_v13 = vadd.f32 %v741_v15, %v4926_v50  ;;  %v2069_v53 = vmul.f32 %v5026_v5, %v5026_v5  ;;  %v2229_v9 = vadd.f32 %v2085_v29, %v2084_v0  ;;  %v2086_v62 = vmul.f32 %v5041_v30, %v5041_v30 }
  0xe6   : > { %9096 = vst [vmem:[#allocation21_spill] sm:$0xff] %v5029_v6  ;;  %v744_v33 = vadd.f32 %v743_v25, %v4926_v50  ;;  %9099 = vst [vmem:[#allocation24_spill] sm:$0xff] %v5047_v16  ;;  %v1933_v25 = vadd.f32 %v5006_v46, %v5021_v61  ;;  %v2103_v8 = vmul.f32 %v5029_v6, %v5029_v6 }
  0xe7   : > { %v747_v35 = vpop.f32.mrf.mxu0  ;;  %v854_v42 = vpop.f32.mrf.mxu1  ;;  %v5063_v15 = vmul.f32 %v4958_v12, %v849_v60  ;;  %v851_v54 = vadd.f32 %v850_v26, %v4918_v41  ;;  %v2102_v46 = vmul.f32 %v5047_v16, %v5047_v16  ;;  %v1952_v60 = vadd.f32 %v5029_v6, %v5047_v16 }
  0xe8   : > { %v5069_v1 = vmul.f32 %v4938_v57, %v744_v33  ;;  %v855_v63 = vadd.f32 %v854_v42, %v4926_v50  ;;  %v5077_v31 = vmul.f32 %v4963_v14, %v845_v4  ;;  %v5080_v26 = vmul.f32 %v4946_v2, %v742_v13 }
  0xe9   : > { %v749_v56 = vpop.f32.mrf.mxu0  ;;  %v856_v58 = vpop.f32.mrf.mxu1  ;;  %9100 = vst [vmem:[#allocation25_spill] sm:$0xff] %v5063_v15  ;;  %v5083_v19 = vadd.f32 %v1915_v48, %v5026_v5  ;;  %v1934_v33 = vadd.f32 %v1933_v25, %v5041_v30  ;;  %v748_v42 = vadd.f32 %v747_v35, %v4914_v38  ;;  %v5088_v47 = vadd.f32 %v2211_v23, %v2069_v53 }
  0xea   : > { %9101 = vst [vmem:[#allocation26_spill] sm:$0xff] %v5069_v1  ;;  %9102 = vst [vmem:[#allocation27_spill] sm:$0xff] %v5077_v31  ;;  %v750_v61 = vadd.f32 %v749_v56, %v4914_v38  ;;  %v2248_v6 = vadd.f32 %v2103_v8, %v2102_v46  ;;  %v2104_v4 = vmul.f32 %v5063_v15, %v5063_v15 }
  0xeb   : > { %v753_v3 = vpop.f32.mrf.mxu0  ;;  %v860_v7 = vpop.f32.mrf.mxu1  ;;  %9103 = vst [vmem:[#allocation28_spill] sm:$0xff] %v5080_v26  ;;  %v5093_v13 = vmul.f32 %v4963_v14, %v851_v54  ;;  %v2230_v11 = vadd.f32 %v2229_v9, %v2086_v62  ;;  %v2121_v48 = vmul.f32 %v5069_v1, %v5069_v1  ;;  %v5098_v25 = vmul.f32 %v4958_v12, %v855_v63 }
  0xec   : > { %v2087_v23 = vmul.f32 %v5077_v31, %v5077_v31  ;;  %v2120_v46 = vmul.f32 %v5080_v26, %v5080_v26  ;;  %v1953_v56 = vadd.f32 %v1952_v60, %v5063_v15  ;;  %v857_v53 = vadd.f32 %v856_v58, %v4926_v50 }
  0xed   : > { %v755_v45 = vpop.f32.mrf.mxu0  ;;  %v5051_v39 = vpop.f32.mrf.mxu1  ;;  %9104 = vst [vmem:[#allocation29_spill] sm:$0xff] %v5093_v13  ;;  %9105 = vst [vmem:[#allocation30_spill] sm:$0xff] %v5098_v25  ;;  %v1971_v54 = vadd.f32 %v5069_v1, %v5080_v26  ;;  %v5112_v62 = vmul.f32 %v4946_v2, %v748_v42  ;;  %v754_v63 = vadd.f32 %v753_v3, %v4910_v36 }
  0xee   : > { %v756_v35 = vadd.f32 %v755_v45, %v4910_v36  ;;  %v5115_v45 = vmul.f32 %v4938_v57, %v750_v61  ;;  %v5119_v5 = vadd.f32 %v1934_v33, %v5077_v31  ;;  %v2249_v60 = vadd.f32 %v2248_v6, %v2104_v4 }
  0xef   : > { %v759_v55 = vpop.f32.mrf.mxu0  ;;  %v866_v24 = vpop.f32.mrf.mxu1  ;;  %9106 = vst [vmem:[#allocation31_spill] sm:$0xff] %v5112_v62  ;;  %v2105_v58 = vmul.f32 %v5093_v13, %v5093_v13  ;;  %v861_v15 = vadd.f32 %v860_v7, %v4914_v38  ;;  %v2267_v1 = vadd.f32 %v2121_v48, %v2120_v46  ;;  %v2122_v42 = vmul.f32 %v5098_v25, %v5098_v25 }
  0xf0   : > { %9107 = vst [vmem:[#allocation32_spill] sm:$0xff] %v5115_v45  ;;  %v5127_v61 = vmul.f32 %v4938_v57, %v756_v35  ;;  %v867_v3 = vadd.f32 %v866_v24, %v4910_v36  ;;  %v5130_v26 = vadd.f32 %v2230_v11, %v2087_v23  ;;  %v5133_v6 = vadd.f32 %v1953_v56, %v5093_v13 }
  0xf1   : > { %v761_v0 = vpop.f32.mrf.mxu0  ;;  %v868_v29 = vpop.f32.mrf.mxu1  ;;  %v5136_v33 = vmul.f32 %v4963_v14, %v857_v53  ;;  %v2138_v46 = vmul.f32 %v5112_v62, %v5112_v62  ;;  %v1972_v35 = vadd.f32 %v1971_v54, %v5098_v25  ;;  %v2139_v24 = vmul.f32 %v5115_v45, %v5115_v45 }
  0xf2   : > { %9108 = vst [vmem:[#allocation33_spill] sm:$0xff] %v5127_v61  ;;  %v762_v7 = vadd.f32 %v761_v0, %v4916_v40  ;;  %v5147_v11 = vmul.f32 %v4946_v2, %v754_v63  ;;  %v5149_v23 = vadd.f32 %v2249_v60, %v2105_v58  ;;  %v5152_v56 = vmul.f32 %v4958_v12, %v861_v15 }
  0xf3   : > { %v872_v16 = vpop.f32.mrf.mxu1  ;;  %v949_v52 = vpop.f32.mrf.mxu0  ;;  %9109 = vst [vmem:[#allocation34_spill] sm:$0xff] %v5136_v33  ;;  %v863_v0 = vadd.f32 %v5051_v39, %v4914_v38  ;;  %v760_v53 = vadd.f32 %v759_v55, %v4916_v40  ;;  %v2268_v54 = vadd.f32 %v2267_v1, %v2122_v42  ;;  %v2157_v25 = vmul.f32 %v5127_v61, %v5127_v61 }
  0xf4   : > { %9110 = vst [vmem:[#allocation35_spill] sm:$0xff] %v5147_v11  ;;  %9111 = vst [vmem:[#allocation36_spill] sm:$0xff] %v5152_v56  ;;  %v5162_v63 = vmul.f32 %v4958_v12, %v867_v3  ;;  %v869_v60 = vadd.f32 %v868_v29, %v4910_v36  ;;  %v1990_v15 = vadd.f32 %v5115_v45, %v5112_v62 }
  0xf5   : > { %v874_v8 = vpop.f32.mrf.mxu1  ;;  %v5107_v9 = vpop.f32.mrf.mxu0  ;;  %v2123_v39 = vmul.f32 %v5136_v33, %v5136_v33  ;;  %v5170_v55 = vmul.f32 %v4938_v57, %v762_v7  ;;  %v873_v58 = vadd.f32 %v872_v16, %v4916_v40  ;;  %v2286_v49 = vadd.f32 %v2139_v24, %v2138_v46 }
  0xf6   : > { %9112 = vst [vmem:[#allocation37_spill] sm:$0xff] %v5162_v63  ;;  %v5178_v3 = vadd.f32 %v1972_v35, %v5136_v33  ;;  %v2156_v29 = vmul.f32 %v5147_v11, %v5147_v11  ;;  %v950_v62 = vadd.f32 %v949_v52, %v4928_v51  ;;  %v2140_v45 = vmul.f32 %v5152_v56, %v5152_v56 }
  0xf7   : > { %v878_v30 = vpop.f32.mrf.mxu1  ;;  %v955_v59 = vpop.f32.mrf.mxu0  ;;  %9113 = vst [vmem:[#allocation38_spill] sm:$0xff] %v5170_v55  ;;  %v2009_v57 = vadd.f32 %v5127_v61, %v5147_v11  ;;  %v5188_v16 = vmul.f32 %v4963_v14, %v863_v0  ;;  %v5191_v7 = vmul.f32 %v4946_v2, %v760_v53  ;;  %v2158_v33 = vmul.f32 %v5162_v63, %v5162_v63 }
  0xf8   : > { %v2305_v24 = vadd.f32 %v2157_v25, %v2156_v29  ;;  %v5198_v52 = vmul.f32 %v4963_v14, %v869_v60  ;;  %v875_v44 = vadd.f32 %v874_v8, %v4916_v40  ;;  %v5201_v43 = vadd.f32 %v2268_v54, %v2123_v39 }
  0xf9   : > { %v880_v4 = vpop.f32.mrf.mxu1  ;;  %v5139_v48 = vpop.f32.mrf.mxu0  ;;  %9114 = vst [vmem:[#allocation39_spill] sm:$0xff] %v5188_v16  ;;  %9115 = vst [vmem:[#allocation40_spill] sm:$0xff] %v5191_v7  ;;  %v2175_v0 = vmul.f32 %v5170_v55, %v5170_v55  ;;  %v5206_v2 = vmul.f32 %v4958_v12, %v873_v58  ;;  %v879_v53 = vadd.f32 %v878_v30, %v4912_v37 }
  0xfa   : > { %9116 = vst [vmem:[#allocation41_spill] sm:$0xff] %v5198_v52  ;;  %v1991_v29 = vadd.f32 %v1990_v15, %v5152_v56  ;;  %v5215_v60 = vmul.f32 %v4965_v17, %v950_v62  ;;  %v952_v8 = vadd.f32 %v5107_v9, %v4928_v51  ;;  %v956_v54 = vadd.f32 %v955_v59, %v4955_v10 }
  0xfb   : > { %v961_v31 = vpop.f32.mrf.mxu0  ;;  %v5157_v13 = vpop.f32.mrf.mxu1  ;;  %9117 = vst [vmem:[#allocation42_spill] sm:$0xff] %v5206_v2  ;;  %v2287_v39 = vadd.f32 %v2286_v49, %v2140_v45  ;;  %v2141_v58 = vmul.f32 %v5188_v16, %v5188_v16  ;;  %v2174_v30 = vmul.f32 %v5191_v7, %v5191_v7  ;;  %v2028_v61 = vadd.f32 %v5170_v55, %v5191_v7 }
  0xfc   : > { %9118 = vst [vmem:[#allocation43_spill] sm:$0xff] %v5215_v60  ;;  %v2010_v62 = vadd.f32 %v2009_v57, %v5162_v63  ;;  %v2306_v56 = vadd.f32 %v2305_v24, %v2158_v33  ;;  %v2159_v59 = vmul.f32 %v5198_v52, %v5198_v52  ;;  %v5234_v49 = vmul.f32 %v4963_v14, %v875_v44 }
  0xfd   : > { %v5173_v1 = vpop.f32.mrf.mxu0  ;;  %v5175_v42 = vpop.f32.mrf.mxu1  ;;  %v2324_v9 = vadd.f32 %v2175_v0, %v2174_v30  ;;  %v2176_v45 = vmul.f32 %v5206_v2, %v5206_v2  ;;  %v5239_v28 = vmul.f32 %v4958_v12, %v879_v53  ;;  %v881_v7 = vadd.f32 %v880_v4, %v4912_v37 }
  0xfe   : > { %9119 = vst [vmem:[#allocation44_spill] sm:$0xff] %v5234_v49  ;;  %v5247_v33 = vadd.f32 %v1991_v29, %v5188_v16  ;;  %v2070_v44 = vmul.f32 %v5215_v60, %v5215_v60  ;;  %v5252_v57 = vmul.f32 %v4967_v18, %v952_v8  ;;  %v5255_v24 = vmul.f32 %v4965_v17, %v956_v54 }
  0xff   : > { %v967_v46 = vpop.f32.mrf.mxu0  ;;  %v5193_v35 = vpop.f32.mrf.mxu1  ;;  %9120 = vst [vmem:[#allocation45_spill] sm:$0xff] %v5239_v28  ;;  %v5257_v12 = vadd.f32 %v2287_v39, %v2141_v58  ;;  %v2029_v4 = vadd.f32 %v2028_v61, %v5206_v2  ;;  %v958_v0 = vadd.f32 %v5139_v48, %v4955_v10  ;;  %v962_v53 = vadd.f32 %v961_v31, %v4918_v41 }
 0x100   : > { %9121 = vst [vmem:[#allocation46_spill] sm:$0xff] %v5252_v57  ;;  %9122 = vst [vmem:[#allocation47_spill] sm:$0xff] %v5255_v24  ;;  %v5268_v16 = vadd.f32 %v2010_v62, %v5198_v52  ;;  %v5270_v8 = vadd.f32 %v2306_v56, %v2159_v59  ;;  %v1917_v54 = vadd.f32 %v5083_v19, %v5215_v60 }
 0x101   : > { %v5209_v11 = vpop.f32.mrf.mxu0  ;;  %v5211_v25 = vpop.f32.mrf.mxu1  ;;  %v1063_v61 = vadd.f32 %v5157_v13, %v4928_v51  ;;  %v2325_v39 = vadd.f32 %v2324_v9, %v2176_v45  ;;  %v2177_v48 = vmul.f32 %v5234_v49, %v5234_v49  ;;  %v2194_v31 = vmul.f32 %v5239_v28, %v5239_v28 }
 0x102   : > { %v5281_v58 = vmul.f32 %v4963_v14, %v881_v7  ;;  %v2213_v59 = vadd.f32 %v5088_v47, %v2070_v44  ;;  %v2071_v19 = vmul.f32 %v5252_v57, %v5252_v57  ;;  %v2088_v13 = vmul.f32 %v5255_v24, %v5255_v24 }
 0x103   : > { %v5226_v32 = vpop.f32.mrf.mxu0  ;;  %v5228_v15 = vpop.f32.mrf.mxu1  ;;  %v964_v9 = vadd.f32 %v5173_v1, %v4918_v41  ;;  %v5295_v45 = vadd.f32 %v2029_v4, %v5234_v49  ;;  %v5298_v14 = vmul.f32 %v4967_v18, %v958_v0  ;;  %v5301_v7 = vmul.f32 %v4965_v17, %v962_v53 }
 0x104   : > { %9123 = vst [vmem:[#allocation48_spill] sm:$0xff] %v5281_v58  ;;  %v968_v47 = vadd.f32 %v967_v46, %v4926_v50  ;;  %v1918_v52 = vadd.f32 %v1917_v54, %v5252_v57  ;;  %v5310_v2 = vmul.f32 %v4973_v21, %v1063_v61  ;;  %v1065_v1 = vadd.f32 %v5175_v42, %v4928_v51 }
 0x105   : > { %v5242_v55 = vpop.f32.mrf.mxu0  ;;  %v5244_v27 = vpop.f32.mrf.mxu1  ;;  %9124 = vst [vmem:[#allocation49_spill] sm:$0xff] %v5298_v14  ;;  %9125 = vst [vmem:[#allocation50_spill] sm:$0xff] %v5301_v7  ;;  %v1069_v4 = vadd.f32 %v5193_v35, %v4955_v10  ;;  %v5316_v0 = vadd.f32 %v2325_v39, %v2177_v48  ;;  %v2048_v46 = vadd.f32 %v5036_v20, %v5239_v28 }
 0x106   : > { %9126 = vst [vmem:[#allocation51_spill] sm:$0xff] %v5310_v2  ;;  %v2344_v53 = vadd.f32 %v5044_v34, %v2194_v31  ;;  %v2195_v49 = vmul.f32 %v5281_v58, %v5281_v58  ;;  %v2214_v57 = vadd.f32 %v2213_v59, %v2071_v19  ;;  %v1936_v42 = vadd.f32 %v5119_v5, %v5255_v24 }
 0x107   : > { %v5263_v29 = vpop.f32.mrf.mxu0  ;;  %v5265_v30 = vpop.f32.mrf.mxu1  ;;  %v2232_v35 = vadd.f32 %v5130_v26, %v2088_v13  ;;  %v5331_v39 = vmul.f32 %v4967_v18, %v964_v9  ;;  %v2089_v20 = vmul.f32 %v5298_v14, %v5298_v14  ;;  %v2106_v34 = vmul.f32 %v5301_v7, %v5301_v7 }
 0x108   : > { %v5338_v48 = vmul.f32 %v4965_v17, %v968_v47  ;;  %v970_v31 = vadd.f32 %v5209_v11, %v4926_v50  ;;  %v2072_v26 = vmul.f32 %v5310_v2, %v5310_v2  ;;  %v5349_v19 = vmul.f32 %v4975_v22, %v1065_v1 }
 0x109   : > { %v5283_v62 = vpop.f32.mrf.mxu0  ;;  %v5285_v56 = vpop.f32.mrf.mxu1  ;;  %9127 = vst [vmem:[#allocation52_spill] sm:$0xff] %v5331_v39  ;;  %v5352_v13 = vmul.f32 %v4973_v21, %v1069_v4  ;;  %v1071_v9 = vadd.f32 %v5211_v25, %v4955_v10  ;;  %v5357_v47 = vadd.f32 %v2048_v46, %v5281_v58  ;;  %v5359_v11 = vadd.f32 %v2344_v53, %v2195_v49 }
 0x10a   : > { %9128 = vst [vmem:[#allocation53_spill] sm:$0xff] %v5338_v48  ;;  %9129 = vst [vmem:[#allocation54_spill] sm:$0xff] %v5349_v19  ;;  %v974_v28 = vadd.f32 %v5226_v32, %v4914_v38  ;;  %v1075_v60 = vadd.f32 %v5228_v15, %v4918_v41  ;;  %v1937_v4 = vadd.f32 %v1936_v42, %v5298_v14 }
 0x10b   : > { %v5304_v44 = vpop.f32.mrf.mxu0  ;;  %v5306_v63 = vpop.f32.mrf.mxu1  ;;  %9130 = vst [vmem:[#allocation55_spill] sm:$0xff] %v5352_v13  ;;  %9131 = vst [vmem:[#allocation56_spill] sm:$0xff] %v5357_v47  ;;  %v1955_v25 = vadd.f32 %v5133_v6, %v5301_v7  ;;  %v1919_v46 = vadd.f32 %v1918_v52, %v5310_v2  ;;  %v2107_v49 = vmul.f32 %v5331_v39, %v5331_v39 }
 0x10c   : > { %9132 = vst [vmem:[#allocation57_spill] sm:$0xff] %v5359_v11  ;;  %v2233_v53 = vadd.f32 %v2232_v35, %v2089_v20  ;;  %v2251_v32 = vadd.f32 %v5149_v23, %v2106_v34  ;;  %v2124_v15 = vmul.f32 %v5338_v48, %v5338_v48  ;;  %v5379_v58 = vmul.f32 %v4967_v18, %v970_v31 }
 0x10d   : > { %v5323_v54 = vpop.f32.mrf.mxu0  ;;  %v5325_v61 = vpop.f32.mrf.mxu1  ;;  %v2215_v14 = vadd.f32 %v2214_v57, %v2072_v26  ;;  %v2073_v6 = vmul.f32 %v5349_v19, %v5349_v19  ;;  %v2090_v52 = vmul.f32 %v5352_v13, %v5352_v13  ;;  %v5390_v35 = vmul.f32 %v4975_v22, %v1071_v9 }
 0x10e   : > { %9133 = vst [vmem:[#allocation58_spill] sm:$0xff] %v5379_v58  ;;  %v5393_v23 = vmul.f32 %v4965_v17, %v974_v28  ;;  %v5396_v20 = vmul.f32 %v4973_v21, %v1075_v60  ;;  %v976_v34 = vadd.f32 %v5242_v55, %v4914_v38  ;;  %v980_v57 = vadd.f32 %v5263_v29, %v4910_v36 }
 0x10f   : > { %v5342_v59 = vpop.f32.mrf.mxu0  ;;  %v5344_v5 = vpop.f32.mrf.mxu1  ;;  %9134 = vst [vmem:[#allocation59_spill] sm:$0xff] %v5390_v35  ;;  %v1956_v7 = vadd.f32 %v1955_v25, %v5331_v39  ;;  %v5408_v9 = vadd.f32 %v1919_v46, %v5349_v19  ;;  %v1974_v28 = vadd.f32 %v5178_v3, %v5338_v48  ;;  %v1081_v60 = vadd.f32 %v5265_v30, %v4926_v50 }
 0x110   : > { %9135 = vst [vmem:[#allocation60_spill] sm:$0xff] %v5393_v23  ;;  %9136 = vst [vmem:[#allocation61_spill] sm:$0xff] %v5396_v20  ;;  %v2252_v2 = vadd.f32 %v2251_v32, %v2107_v49  ;;  %v2270_v55 = vadd.f32 %v5201_v43, %v2124_v15  ;;  %v2125_v29 = vmul.f32 %v5379_v58, %v5379_v58 }
 0x111   : > { %v5365_v24 = vpop.f32.mrf.mxu0  ;;  %v5367_v1 = vpop.f32.mrf.mxu1  ;;  %v1077_v10 = vadd.f32 %v5244_v27, %v4918_v41  ;;  %v5423_v46 = vadd.f32 %v2215_v14, %v2073_v6  ;;  %v1938_v3 = vadd.f32 %v1937_v4, %v5352_v13  ;;  %v2234_v39 = vadd.f32 %v2233_v53, %v2090_v52 }
 0x112   : > { %v2091_v30 = vmul.f32 %v5390_v35, %v5390_v35  ;;  %v2142_v43 = vmul.f32 %v5393_v23, %v5393_v23  ;;  %v2108_v49 = vmul.f32 %v5396_v20, %v5396_v20  ;;  %v5433_v27 = vmul.f32 %v4967_v18, %v976_v34 }
 0x113   : > { %v5381_v11 = vpop.f32.mrf.mxu1  ;;  %v5383_v42 = vpop.f32.mrf.mxu0  ;;  %v5436_v32 = vmul.f32 %v4965_v17, %v980_v57  ;;  %v5443_v4 = vmul.f32 %v4973_v21, %v1081_v60  ;;  %v982_v53 = vadd.f32 %v5283_v62, %v4910_v36  ;;  %v1083_v6 = vadd.f32 %v5285_v56, %v4926_v50 }
 0x114   : > { %9137 = vst [vmem:[#allocation62_spill] sm:$0xff] %v5433_v27  ;;  %v986_v52 = vadd.f32 %v5304_v44, %v4916_v40  ;;  %v1975_v34 = vadd.f32 %v1974_v28, %v5379_v58  ;;  %v2271_v57 = vadd.f32 %v2270_v55, %v2125_v29  ;;  %v1993_v48 = vadd.f32 %v5247_v33, %v5393_v23 }
 0x115   : > { %v5402_v31 = vpop.f32.mrf.mxu1  ;;  %v5404_v26 = vpop.f32.mrf.mxu0  ;;  %9138 = vst [vmem:[#allocation63_spill] sm:$0xff] %v5436_v32  ;;  %9139 = vst [vmem:[#allocation64_spill] sm:$0xff] %v5443_v4  ;;  %v5455_v19 = vmul.f32 %v4975_v22, %v1077_v10  ;;  %v5462_v62 = vadd.f32 %v1938_v3, %v5390_v35  ;;  %v5464_v56 = vadd.f32 %v2234_v39, %v2091_v30 }
 0x116   : > { %v1957_v44 = vadd.f32 %v1956_v7, %v5396_v20  ;;  %v1087_v28 = vadd.f32 %v5306_v63, %v4914_v38  ;;  %v2289_v55 = vadd.f32 %v5257_v12, %v2142_v43  ;;  %v2253_v33 = vadd.f32 %v2252_v2, %v2108_v49 }
 0x117   : > { %v5419_v47 = vpop.f32.mrf.mxu1  ;;  %v5421_v25 = vpop.f32.mrf.mxu0  ;;  %9140 = vst [vmem:[#allocation65_spill] sm:$0xff] %v5455_v19  ;;  %9141 = vst [vmem:[#allocation66_spill] sm:$0xff] %v5464_v56  ;;  %v2143_v10 = vmul.f32 %v5433_v27, %v5433_v27  ;;  %v2160_v29 = vmul.f32 %v5436_v32, %v5436_v32  ;;  %v2126_v39 = vmul.f32 %v5443_v4, %v5443_v4 }
 0x118   : > { %v5481_v7 = vmul.f32 %v4967_v18, %v982_v53  ;;  %v5484_v63 = vmul.f32 %v4975_v22, %v1083_v6  ;;  %v5487_v2 = vmul.f32 %v4965_v17, %v986_v52  ;;  %v1994_v12 = vadd.f32 %v1993_v48, %v5433_v27 }
 0x119   : > { %v5438_v14 = vpop.f32.mrf.mxu1  ;;  %v5440_v15 = vpop.f32.mrf.mxu0  ;;  %v2109_v30 = vmul.f32 %v5455_v19, %v5455_v19  ;;  %v988_v43 = vadd.f32 %v5323_v54, %v4916_v40  ;;  %v992_v49 = vadd.f32 %v5342_v59, %v4912_v37  ;;  %v5501_v6 = vadd.f32 %v1957_v44, %v5455_v19 }
 0x11a   : > { %9142 = vst [vmem:[#allocation67_spill] sm:$0xff] %v5481_v7  ;;  %9143 = vst [vmem:[#allocation68_spill] sm:$0xff] %v5484_v63  ;;  %v2012_v52 = vadd.f32 %v5268_v16, %v5436_v32  ;;  %v5506_v48 = vmul.f32 %v4973_v21, %v1087_v28  ;;  %v1089_v23 = vadd.f32 %v5325_v61, %v4914_v38 }
 0x11b   : > { %v5457_v60 = vpop.f32.mrf.mxu0  ;;  %v5459_v13 = vpop.f32.mrf.mxu1  ;;  %9144 = vst [vmem:[#allocation69_spill] sm:$0xff] %v5487_v2  ;;  %v2290_v54 = vadd.f32 %v2289_v55, %v2143_v10  ;;  %v2308_v27 = vadd.f32 %v5270_v8, %v2160_v29  ;;  %v1976_v59 = vadd.f32 %v1975_v34, %v5443_v4  ;;  %v1093_v20 = vadd.f32 %v5344_v5, %v4910_v36 }
 0x11c   : > { %9145 = vst [vmem:[#allocation70_spill] sm:$0xff] %v5506_v48  ;;  %v2272_v19 = vadd.f32 %v2271_v57, %v2126_v39  ;;  %v2161_v16 = vmul.f32 %v5481_v7, %v5481_v7  ;;  %v2127_v28 = vmul.f32 %v5484_v63, %v5484_v63  ;;  %v2178_v61 = vmul.f32 %v5487_v2, %v5487_v2 }
 0x11d   : > { %v5474_v58 = vpop.f32.mrf.mxu0  ;;  %v5476_v3 = vpop.f32.mrf.mxu1  ;;  %v5524_v8 = vadd.f32 %v2253_v33, %v2109_v30  ;;  %v5527_v34 = vmul.f32 %v4967_v18, %v988_v43  ;;  %v5530_v5 = vmul.f32 %v4965_v17, %v992_v49  ;;  %v994_v57 = vadd.f32 %v5365_v24, %v4912_v37 }
 0x11e   : > { %v2144_v29 = vmul.f32 %v5506_v48, %v5506_v48  ;;  %v5541_v39 = vmul.f32 %v4975_v22, %v1089_v23  ;;  %v1095_v33 = vadd.f32 %v5367_v1, %v4910_v36  ;;  %v1099_v17 = vadd.f32 %v5381_v11, %v4916_v40 }
 0x11f   : > { %v5496_v35 = vpop.f32.mrf.mxu0  ;;  %v5498_v53 = vpop.f32.mrf.mxu1  ;;  %9146 = vst [vmem:[#allocation71_spill] sm:$0xff] %v5527_v34  ;;  %9147 = vst [vmem:[#allocation72_spill] sm:$0xff] %v5530_v5  ;;  %v2013_v30 = vadd.f32 %v2012_v52, %v5481_v7  ;;  %v5549_v24 = vadd.f32 %v1976_v59, %v5484_v63  ;;  %v5552_v43 = vmul.f32 %v4973_v21, %v1093_v20 }
 0x120   : > { %9148 = vst [vmem:[#allocation73_spill] sm:$0xff] %v5541_v39  ;;  %v1176_v49 = vadd.f32 %v5383_v42, %v4928_v51  ;;  %v2309_v4 = vadd.f32 %v2308_v27, %v2161_v16  ;;  %v5560_v1 = vadd.f32 %v2272_v19, %v2127_v28  ;;  %v2031_v11 = vadd.f32 %v5295_v45, %v5487_v2  ;;  %v9155_v28 = vld [vmem:[#allocation10_spill] sm:$0xff] }
 0x121   : > { %v5514_v56 = vpop.f32.mrf.mxu0  ;;  %v5516_v44 = vpop.f32.mrf.mxu1  ;;  %9149 = vst [vmem:[#allocation74_spill] sm:$0xff] %v5552_v43  ;;  %v2327_v52 = vadd.f32 %v5316_v0, %v2178_v61  ;;  %v1995_v59 = vadd.f32 %v1994_v12, %v5506_v48  ;;  %v2179_v20 = vmul.f32 %v5527_v34, %v5527_v34  ;;  %v2196_v42 = vmul.f32 %v5530_v5, %v5530_v5 }
 0x122   : > { %9150 = vst [vmem:[#allocation75_spill] sm:$0xff] %v5560_v1  ;;  %v5571_v63 = vmul.f32 %v4967_v18, %v994_v57  ;;  %v2291_v27 = vadd.f32 %v2290_v54, %v2144_v29  ;;  %v2145_v45 = vmul.f32 %v5541_v39, %v5541_v39  ;;  %v5580_v0 = vmul.f32 %v4975_v22, %v1095_v33 }
 0x123   : > { %v5534_v55 = vpop.f32.mrf.mxu0  ;;  %v5536_v10 = vpop.f32.mrf.mxu1  ;;  %v5583_v12 = vmul.f32 %v4973_v21, %v1099_v17  ;;  %v2162_v16 = vmul.f32 %v5552_v43, %v5552_v43  ;;  %v5588_v18 = vmul.f32 %v9155_v28, %v1176_v49  ;;  %v1101_v61 = vadd.f32 %v5402_v31, %v4916_v40  ;;  %v9159_v17 = vld [vmem:[#allocation56_spill] sm:$0xff]  ;;  %v9160_v49 = vld [vmem:[#allocation6_spill] sm:$0xff] }
 0x124   : > { %9151 = vst [vmem:[#allocation76_spill] sm:$0xff] %v5571_v63  ;;  %9153 = vst [vmem:[#allocation78_spill] sm:$0xff] %v5580_v0  ;;  %v1178_v54 = vadd.f32 %v5404_v26, %v4928_v51  ;;  %v2032_v33 = vadd.f32 %v2031_v11, %v5527_v34  ;;  %v2050_v48 = vadd.f32 %v9159_v17, %v5530_v5  ;;  %v9161_v26 = vld [vmem:[#allocation57_spill] sm:$0xff] }
 0x125   : > { %v5556_v32 = vpop.f32.mrf.mxu0  ;;  %v5558_v23 = vpop.f32.mrf.mxu1  ;;  %9154 = vst [vmem:[#allocation79_spill] sm:$0xff] %v5583_v12  ;;  %9156 = vst [vmem:[#allocation10_spill] sm:$0xff] %v5588_v18  ;;  %v1105_v2 = vadd.f32 %v5419_v47, %v4912_v37  ;;  %v2328_v1 = vadd.f32 %v2327_v52, %v2179_v20  ;;  %v5606_v31 = vadd.f32 %v1995_v59, %v5541_v39 }
 0x126   : > { %v2346_v40 = vadd.f32 %v9161_v26, %v2196_v42  ;;  %v5615_v17 = vadd.f32 %v2291_v27, %v2145_v45  ;;  %v2014_v47 = vadd.f32 %v2013_v30, %v5552_v43  ;;  %v2180_v52 = vmul.f32 %v5583_v12, %v5583_v12  ;;  %v9163_v26 = vld [vmem:[#allocation11_spill] sm:$0xff] }
 0x127   : > { %v5573_v7 = vpop.f32.mrf.mxu0  ;;  %v5575_v19 = vpop.f32.mrf.mxu1  ;;  %v2310_v59 = vadd.f32 %v2309_v4, %v2162_v16  ;;  %v2074_v20 = vmul.f32 %v5588_v18, %v5588_v18  ;;  %v5625_v42 = vmul.f32 %v4975_v22, %v1101_v61  ;;  %v5628_v39 = vmul.f32 %v9163_v26, %v1178_v54 }
 0x128   : > { %9152 = vst [vmem:[#allocation77_spill] sm:$0xff] %v5575_v19  ;;  %v1182_v19 = vadd.f32 %v5421_v25, %v9160_v49  ;;  %v2163_v25 = vmul.f32 %v5580_v0, %v5580_v0  ;;  %v5635_v30 = vmul.f32 %v4973_v21, %v1105_v2  ;;  %v1107_v4 = vadd.f32 %v5438_v14, %v4912_v37 }
 0x129   : > { %v5594_v57 = vpop.f32.mrf.mxu0  ;;  %v5596_v29 = vpop.f32.mrf.mxu1  ;;  %9162 = vst [vmem:[#allocation56_spill] sm:$0xff] %v5625_v42  ;;  %9164 = vst [vmem:[#allocation6_spill] sm:$0xff] %v5628_v39  ;;  %v1184_v16 = vadd.f32 %v5440_v15, %v9160_v49  ;;  %v2051_v61 = vadd.f32 %v2050_v48, %v5571_v63  ;;  %v2033_v34 = vadd.f32 %v2032_v33, %v5583_v12 }
 0x12a   : > { %9157 = vst [vmem:[#allocation80_spill] sm:$0xff] %v5594_v57  ;;  %9158 = vst [vmem:[#allocation81_spill] sm:$0xff] %v5596_v29  ;;  %v2197_v29 = vmul.f32 %v5571_v63, %v5571_v63  ;;  %v5638_v43 = vmul.f32 %v9155_v28, %v1182_v19  ;;  %v1188_v5 = vadd.f32 %v5457_v60, %v4918_v41 }
 0x12b   : > { %v5611_v57 = vpop.f32.mrf.mxu0  ;;  %v5613_v11 = vpop.f32.mrf.mxu1  ;;  %9166 = vst [vmem:[#allocation11_spill] sm:$0xff] %v5635_v30  ;;  %v5653_v2 = vadd.f32 %v2014_v47, %v5580_v0  ;;  %v2329_v19 = vadd.f32 %v2328_v1, %v2180_v52  ;;  %v1921_v14 = vadd.f32 %v5408_v9, %v5588_v18  ;;  %v1289_v15 = vadd.f32 %v5459_v13, %v4928_v51 }
 0x12c   : > { %9167 = vst [vmem:[#allocation82_spill] sm:$0xff] %v5638_v43  ;;  %v2347_v54 = vadd.f32 %v2346_v40, %v2197_v29  ;;  %v5659_v40 = vadd.f32 %v2310_v59, %v2163_v25  ;;  %v2217_v48 = vadd.f32 %v5423_v46, %v2074_v20  ;;  %v2181_v60 = vmul.f32 %v5625_v42, %v5625_v42 }
 0x12d   : > { %v5630_v27 = vpop.f32.mrf.mxu0  ;;  %v5632_v45 = vpop.f32.mrf.mxu1  ;;  %v2075_v29 = vmul.f32 %v5628_v39, %v5628_v39  ;;  %v2198_v9 = vmul.f32 %v5635_v30, %v5635_v30  ;;  %v2092_v13 = vmul.f32 %v5638_v43, %v5638_v43  ;;  %v5675_v1 = vmul.f32 %v4975_v22, %v1107_v4  ;;  %v9172_v4 = vld [vmem:[#allocation13_spill] sm:$0xff] }
 0x12e   : > { %9165 = vst [vmem:[#allocation57_spill] sm:$0xff] %v5632_v45  ;;  %v5678_v46 = vmul.f32 %v9163_v26, %v1184_v16  ;;  %v5681_v25 = vadd.f32 %v2033_v34, %v5625_v42  ;;  %v5684_v52 = vmul.f32 %v9155_v28, %v1188_v5  ;;  %v1190_v59 = vadd.f32 %v5474_v58, %v4918_v41 }
 0x12f   : > { %v5648_v45 = vpop.f32.mrf.mxu0  ;;  %v5650_v21 = vpop.f32.mrf.mxu1  ;;  %9168 = vst [vmem:[#allocation83_spill] sm:$0xff] %v5675_v1  ;;  %v1194_v20 = vadd.f32 %v5496_v35, %v4926_v50  ;;  %v1922_v22 = vadd.f32 %v1921_v14, %v5628_v39  ;;  %v5696_v16 = vmul.f32 %v9172_v4, %v1289_v15  ;;  %v1291_v34 = vadd.f32 %v5476_v3, %v4928_v51  ;;  %v9175_v39 = vld [vmem:[#allocation66_spill] sm:$0xff] }
 0x130   : > { %9169 = vst [vmem:[#allocation84_spill] sm:$0xff] %v5678_v46  ;;  %9170 = vst [vmem:[#allocation85_spill] sm:$0xff] %v5684_v52  ;;  %v1295_v5 = vadd.f32 %v5498_v53, %v9160_v49  ;;  %v5702_v42 = vadd.f32 %v2329_v19, %v2181_v60  ;;  %v2218_v58 = vadd.f32 %v2217_v48, %v2075_v29  ;;  %v9179_v29 = vld [vmem:[#allocation14_spill] sm:$0xff] }
 0x131   : > { %v5666_v33 = vpop.f32.mrf.mxu0  ;;  %v5668_v47 = vpop.f32.mrf.mxu1  ;;  %9173 = vst [vmem:[#allocation13_spill] sm:$0xff] %v5696_v16  ;;  %v2052_v35 = vadd.f32 %v2051_v61, %v5635_v30  ;;  %v1940_v63 = vadd.f32 %v5462_v62, %v5638_v43  ;;  %v2348_v15 = vadd.f32 %v2347_v54, %v2198_v9  ;;  %v2199_v3 = vmul.f32 %v5675_v1, %v5675_v1 }
 0x132   : > { %v2093_v53 = vmul.f32 %v5678_v46, %v5678_v46  ;;  %v2110_v19 = vmul.f32 %v5684_v52, %v5684_v52  ;;  %v5719_v61 = vmul.f32 %v9163_v26, %v1190_v59  ;;  %v5722_v62 = vmul.f32 %v9155_v28, %v1194_v20 }
 0x133   : > { %v5690_v0 = vpop.f32.mrf.mxu1  ;;  %v5692_v12 = vpop.f32.mrf.mxu0  ;;  %v1196_v54 = vadd.f32 %v5514_v56, %v4926_v50  ;;  %v2076_v60 = vmul.f32 %v5696_v16, %v5696_v16  ;;  %v5733_v9 = vmul.f32 %v9179_v29, %v1291_v34  ;;  %v1297_v59 = vadd.f32 %v5516_v44, %v9160_v49 }
 0x134   : > { %9171 = vst [vmem:[#allocation86_spill] sm:$0xff] %v5692_v12  ;;  %v2236_v12 = vadd.f32 %v9175_v39, %v2092_v13  ;;  %9176 = vst [vmem:[#allocation66_spill] sm:$0xff] %v5719_v61  ;;  %v5736_v13 = vmul.f32 %v9172_v4, %v1295_v5  ;;  %v5741_v20 = vadd.f32 %v2052_v35, %v5675_v1 }
 0x135   : > { %v5707_v18 = vpop.f32.mrf.mxu1  ;;  %v5709_v14 = vpop.f32.mrf.mxu0  ;;  %9177 = vst [vmem:[#allocation88_spill] sm:$0xff] %v5722_v62  ;;  %9180 = vst [vmem:[#allocation14_spill] sm:$0xff] %v5733_v9  ;;  %v1941_v56 = vadd.f32 %v1940_v63, %v5678_v46  ;;  %v1200_v30 = vadd.f32 %v5534_v55, %v4914_v38  ;;  %v1301_v43 = vadd.f32 %v5536_v10, %v4918_v41 }
 0x136   : > { %9174 = vst [vmem:[#allocation87_spill] sm:$0xff] %v5709_v14  ;;  %9181 = vst [vmem:[#allocation90_spill] sm:$0xff] %v5736_v13  ;;  %v5752_v5 = vadd.f32 %v2348_v15, %v2199_v3  ;;  %v2237_v14 = vadd.f32 %v2236_v12, %v2093_v53  ;;  %v1959_v44 = vadd.f32 %v5501_v6, %v5684_v52 }
 0x137   : > { %v5726_v48 = vpop.f32.mrf.mxu1  ;;  %v5728_v39 = vpop.f32.mrf.mxu0  ;;  %v1923_v35 = vadd.f32 %v1922_v22, %v5696_v16  ;;  %v2255_v63 = vadd.f32 %v5524_v8, %v2110_v19  ;;  %v2111_v55 = vmul.f32 %v5719_v61, %v5719_v61  ;;  %v2128_v10 = vmul.f32 %v5722_v62, %v5722_v62 }
 0x138   : > { %9178 = vst [vmem:[#allocation89_spill] sm:$0xff] %v5728_v39  ;;  %v5763_v46 = vmul.f32 %v9163_v26, %v1196_v54  ;;  %v2219_v12 = vadd.f32 %v2218_v58, %v2076_v60  ;;  %v2077_v6 = vmul.f32 %v5733_v9, %v5733_v9  ;;  %v2094_v8 = vmul.f32 %v5736_v13, %v5736_v13 }
 0x139   : > { %v5748_v39 = vpop.f32.mrf.mxu1  ;;  %v5750_v34 = vpop.f32.mrf.mxu0  ;;  %v5774_v22 = vmul.f32 %v9179_v29, %v1297_v59  ;;  %v5777_v3 = vmul.f32 %v9155_v28, %v1200_v30  ;;  %v5780_v53 = vmul.f32 %v9172_v4, %v1301_v43  ;;  %v1202_v19 = vadd.f32 %v5556_v32, %v4914_v38  ;;  %v9190_v32 = vld [vmem:[#allocation75_spill] sm:$0xff] }
 0x13a   : > { %9182 = vst [vmem:[#allocation91_spill] sm:$0xff] %v5750_v34  ;;  %9183 = vst [vmem:[#allocation92_spill] sm:$0xff] %v5763_v46  ;;  %v1303_v58 = vadd.f32 %v5558_v23, %v4918_v41  ;;  %v1960_v16 = vadd.f32 %v1959_v44, %v5719_v61  ;;  %v5792_v59 = vadd.f32 %v1923_v35, %v5733_v9 }
 0x13b   : > { %v5765_v1 = vpop.f32.mrf.mxu0  ;;  %v5767_v15 = vpop.f32.mrf.mxu1  ;;  %9185 = vst [vmem:[#allocation94_spill] sm:$0xff] %v5774_v22  ;;  %9186 = vst [vmem:[#allocation95_spill] sm:$0xff] %v5777_v3  ;;  %v1978_v30 = vadd.f32 %v5549_v24, %v5722_v62  ;;  %v1206_v43 = vadd.f32 %v5573_v7, %v4910_v36  ;;  %v2256_v52 = vadd.f32 %v2255_v63, %v2111_v55 }
 0x13c   : > { %9184 = vst [vmem:[#allocation93_spill] sm:$0xff] %v5767_v15  ;;  %9187 = vst [vmem:[#allocation96_spill] sm:$0xff] %v5780_v53  ;;  %v2274_v15 = vadd.f32 %v9190_v32, %v2128_v10  ;;  %v2129_v23 = vmul.f32 %v5763_v46, %v5763_v46  ;;  %v5807_v35 = vadd.f32 %v2219_v12, %v2077_v6  ;;  %v9197_v32 = vld [vmem:[#allocation80_spill] sm:$0xff] }
 0x13d   : > { %v5786_v54 = vpop.f32.mrf.mxu0  ;;  %v5788_v60 = vpop.f32.mrf.mxu1  ;;  %v1942_v24 = vadd.f32 %v1941_v56, %v5736_v13  ;;  %v2238_v61 = vadd.f32 %v2237_v14, %v2094_v8  ;;  %v2095_v7 = vmul.f32 %v5774_v22, %v5774_v22  ;;  %v2146_v63 = vmul.f32 %v5777_v3, %v5777_v3 }
 0x13e   : > { %9188 = vst [vmem:[#allocation97_spill] sm:$0xff] %v5786_v54  ;;  %9189 = vst [vmem:[#allocation98_spill] sm:$0xff] %v5788_v60  ;;  %v9191_v54 = vld [vmem:[#allocation77_spill] sm:$0xff]  ;;  %v2112_v55 = vmul.f32 %v5780_v53, %v5780_v53  ;;  %v5817_v10 = vmul.f32 %v9163_v26, %v1202_v19  ;;  %v1979_v14 = vadd.f32 %v1978_v30, %v5763_v46 }
 0x13f   : > { %v1307_v60 = vadd.f32 %v9191_v54, %v4926_v50  ;;  %v5803_v34 = vpop.f32.mrf.mxu0  ;;  %v5805_v44 = vpop.f32.mrf.mxu1  ;;  %v5820_v54 = vmul.f32 %v9179_v29, %v1303_v58  ;;  %v1997_v56 = vadd.f32 %v5606_v31, %v5777_v3  ;;  %v5830_v8 = vmul.f32 %v9155_v28, %v1206_v43  ;;  %v9199_v58 = vld [vmem:[#allocation81_spill] sm:$0xff] }
 0x140   : > { %9192 = vst [vmem:[#allocation75_spill] sm:$0xff] %v5817_v10  ;;  %v1208_v9 = vadd.f32 %v9197_v32, %v4910_v36  ;;  %v2275_v19 = vadd.f32 %v2274_v15, %v2129_v23  ;;  %v1309_v13 = vadd.f32 %v9199_v58, %v4926_v50  ;;  %v5844_v31 = vadd.f32 %v1942_v24, %v5774_v22 }
 0x141   : > { %9193 = vst [vmem:[#allocation77_spill] sm:$0xff] %v5820_v54  ;;  %v5822_v12 = vpop.f32.mrf.mxu0  ;;  %v5824_v6 = vpop.f32.mrf.mxu1  ;;  %9196 = vst [vmem:[#allocation101_spill] sm:$0xff] %v5830_v8  ;;  %v5835_v62 = vmul.f32 %v9172_v4, %v1307_v60  ;;  %v5846_v43 = vadd.f32 %v2238_v61, %v2095_v7  ;;  %v1961_v46 = vadd.f32 %v1960_v16, %v5780_v53 }
 0x142   : > { %9194 = vst [vmem:[#allocation99_spill] sm:$0xff] %v5822_v12  ;;  %9195 = vst [vmem:[#allocation100_spill] sm:$0xff] %v5824_v6  ;;  %v9200_v12 = vld [vmem:[#allocation2_spill] sm:$0xff]  ;;  %v1313_v15 = vadd.f32 %v5613_v11, %v4914_v38  ;;  %v2293_v60 = vadd.f32 %v5615_v17, %v2146_v63  ;;  %v2257_v23 = vadd.f32 %v2256_v52, %v2112_v55 }
 0x143   : > { %9198 = vst [vmem:[#allocation80_spill] sm:$0xff] %v5835_v62  ;;  %v1212_v6 = vadd.f32 %v5611_v57, %v9200_v12  ;;  %v5841_v30 = vpop.f32.mrf.mxu0  ;;  %v2147_v32 = vmul.f32 %v5817_v10, %v5817_v10  ;;  %v2113_v57 = vmul.f32 %v5820_v54, %v5820_v54  ;;  %v5856_v58 = vpop.f32.mrf.mxu1  ;;  %v1998_v61 = vadd.f32 %v1997_v56, %v5817_v10 }
 0x144   : > { %v2164_v16 = vmul.f32 %v5830_v8, %v5830_v8  ;;  %v5864_v11 = vmul.f32 %v9163_v26, %v1208_v9  ;;  %v1218_v17 = vadd.f32 %v5648_v45, %v4912_v37  ;;  %v2130_v52 = vmul.f32 %v5835_v62, %v5835_v62 }
 0x145   : > { %v5858_v24 = vpop.f32.mrf.mxu0  ;;  %v5871_v7 = vmul.f32 %v9179_v29, %v1309_v13  ;;  %v5874_v63 = vmul.f32 %v9155_v28, %v1212_v6  ;;  %v1214_v55 = vadd.f32 %v5630_v27, %v9200_v12  ;;  %v5881_v9 = vadd.f32 %v1961_v46, %v5820_v54  ;;  %v9206_v6 = vld [vmem:[#allocation57_spill] sm:$0xff] }
 0x146   : > { %9201 = vst [vmem:[#allocation81_spill] sm:$0xff] %v5858_v24  ;;  %9202 = vst [vmem:[#allocation2_spill] sm:$0xff] %v5864_v11  ;;  %v2016_v45 = vadd.f32 %v5653_v2, %v5830_v8  ;;  %v1980_v22 = vadd.f32 %v1979_v14, %v5835_v62  ;;  %v5887_v3 = vmul.f32 %v9172_v4, %v1313_v15  ;;  %v5895_v24 = vpop.f32.mrf.mxu1  ;;  %v9220_v62 = vld [vmem:[#allocation89_spill] sm:$0xff] }
 0x147   : > { %9203 = vst [vmem:[#allocation102_spill] sm:$0xff] %v5871_v7  ;;  %9204 = vst [vmem:[#allocation103_spill] sm:$0xff] %v5874_v63  ;;  %v5878_v56 = vpop.f32.mrf.mxu0  ;;  %v2294_v13 = vadd.f32 %v2293_v60, %v2147_v32  ;;  %v5889_v10 = vadd.f32 %v2257_v23, %v2113_v57  ;;  %v1315_v53 = vadd.f32 %v9206_v6, %v4914_v38 }
 0x148   : > { %9205 = vst [vmem:[#allocation104_spill] sm:$0xff] %v5887_v3  ;;  %v1319_v27 = vadd.f32 %v5650_v21, %v4910_v36  ;;  %v2312_v2 = vadd.f32 %v5659_v40, %v2164_v16  ;;  %v2165_v14 = vmul.f32 %v5864_v11, %v5864_v11  ;;  %v5903_v15 = vmul.f32 %v9155_v28, %v1218_v17 }
 0x149   : > { %v5897_v46 = vpop.f32.mrf.mxu0  ;;  %v1220_v60 = vadd.f32 %v5666_v33, %v4912_v37  ;;  %v2276_v23 = vadd.f32 %v2275_v19, %v2130_v52  ;;  %v2131_v32 = vmul.f32 %v5871_v7, %v5871_v7  ;;  %v2182_v21 = vmul.f32 %v5874_v63, %v5874_v63 }
 0x14a   : > { %9207 = vst [vmem:[#allocation57_spill] sm:$0xff] %v5903_v15  ;;  %v5912_v57 = vmul.f32 %v9163_v26, %v1214_v55  ;;  %v2017_v16 = vadd.f32 %v2016_v45, %v5864_v11  ;;  %v5918_v28 = vadd.f32 %v1980_v22, %v5871_v7  ;;  %v2035_v33 = vadd.f32 %v5681_v25, %v5874_v63  ;;  %v5934_v22 = vpop.f32.mrf.mxu1 }
 0x14b   : > { %v5914_v40 = vpop.f32.mrf.mxu0  ;;  %v2148_v19 = vmul.f32 %v5887_v3, %v5887_v3  ;;  %v5925_v17 = vmul.f32 %v9179_v29, %v1315_v53  ;;  %v5928_v52 = vmul.f32 %v9172_v4, %v1319_v27  ;;  %v1321_v55 = vadd.f32 %v5668_v47, %v4910_v36  ;;  %v9212_v27 = vld [vmem:[#allocation86_spill] sm:$0xff] }
 0x14c   : > { %9208 = vst [vmem:[#allocation105_spill] sm:$0xff] %v5912_v57  ;;  %v1325_v45 = vadd.f32 %v5690_v0, %v9200_v12  ;;  %v2313_v25 = vadd.f32 %v2312_v2, %v2165_v14  ;;  %v2200_v54 = vmul.f32 %v5903_v15, %v5903_v15  ;;  %v5941_v53 = vmul.f32 %v9163_v26, %v1220_v60 }
 0x14d   : > { %9209 = vst [vmem:[#allocation106_spill] sm:$0xff] %v5925_v17  ;;  %9210 = vst [vmem:[#allocation107_spill] sm:$0xff] %v5928_v52  ;;  %v5936_v6 = vpop.f32.mrf.mxu0  ;;  %v1402_v7 = vadd.f32 %v9212_v27, %v4928_v51  ;;  %v5945_v8 = vadd.f32 %v2276_v23, %v2131_v32  ;;  %v2331_v47 = vadd.f32 %v5702_v42, %v2182_v21 }
 0x14e   : > { %9211 = vst [vmem:[#allocation108_spill] sm:$0xff] %v5941_v53  ;;  %v1999_v0 = vadd.f32 %v1998_v61, %v5887_v3  ;;  %v2183_v11 = vmul.f32 %v5912_v57, %v5912_v57  ;;  %v2295_v2 = vadd.f32 %v2294_v13, %v2148_v19  ;;  %v2036_v14 = vadd.f32 %v2035_v33, %v5912_v57  ;;  %v5968_v13 = vpop.f32.mrf.mxu1  ;;  %v9217_v19 = vld [vmem:[#allocation15_spill] sm:$0xff] }
 0x14f   : > { %v5951_v63 = vpop.f32.mrf.mxu0  ;;  %v1327_v26 = vadd.f32 %v5707_v18, %v9200_v12  ;;  %v1331_v60 = vadd.f32 %v5726_v48, %v4912_v37  ;;  %v2149_v23 = vmul.f32 %v5925_v17, %v5925_v17  ;;  %v2166_v42 = vmul.f32 %v5928_v52, %v5928_v52  ;;  %9215 = vst [vmem:[#allocation110_spill] sm:$0xff] %v5968_v13 }
 0x150   : > { %v5963_v61 = vmul.f32 %v9179_v29, %v1321_v55  ;;  %v5966_v32 = vmul.f32 %v9172_v4, %v1325_v45  ;;  %v2054_v18 = vadd.f32 %v5741_v20, %v5903_v15  ;;  %v2350_v48 = vadd.f32 %v5752_v5, %v2200_v54  ;;  %v9219_v45 = vld [vmem:[#allocation87_spill] sm:$0xff] }
 0x151   : > { %v5970_v21 = vpop.f32.mrf.mxu0  ;;  %v2201_v33 = vmul.f32 %v5941_v53, %v5941_v53  ;;  %v5978_v27 = vmul.f32 %v9217_v19, %v1402_v7  ;;  %v2332_v55 = vadd.f32 %v2331_v47, %v2183_v11  ;;  %v5981_v3 = vadd.f32 %v1999_v0, %v5925_v17 }
 0x152   : > { %9213 = vst [vmem:[#allocation86_spill] sm:$0xff] %v5963_v61  ;;  %9214 = vst [vmem:[#allocation109_spill] sm:$0xff] %v5966_v32  ;;  %v1404_v57 = vadd.f32 %v9219_v45, %v4928_v51  ;;  %v2018_v20 = vadd.f32 %v2017_v16, %v5928_v52  ;;  %v5991_v5 = vmul.f32 %v9179_v29, %v1327_v26  ;;  %v6003_v45 = vpop.f32.mrf.mxu1 }
 0x153   : > { %9216 = vst [vmem:[#allocation111_spill] sm:$0xff] %v5970_v21  ;;  %9218 = vst [vmem:[#allocation15_spill] sm:$0xff] %v5978_v27  ;;  %v1408_v21 = vadd.f32 %v9220_v62, %v9160_v49  ;;  %v5987_v13 = vpop.f32.mrf.mxu0  ;;  %v5994_v54 = vmul.f32 %v9172_v4, %v1331_v60  ;;  %v1333_v11 = vadd.f32 %v5748_v39, %v4912_v37 }
 0x154   : > { %9221 = vst [vmem:[#allocation87_spill] sm:$0xff] %v5991_v5  ;;  %v5998_v7 = vadd.f32 %v2295_v2, %v2149_v23  ;;  %v2314_v47 = vadd.f32 %v2313_v25, %v2166_v42  ;;  %v2167_v0 = vmul.f32 %v5963_v61, %v5963_v61  ;;  %v2037_v62 = vadd.f32 %v2036_v14, %v5966_v32  ;;  %v9224_v2 = vld [vmem:[#allocation17_spill] sm:$0xff] }
 0x155   : > { %9222 = vst [vmem:[#allocation89_spill] sm:$0xff] %v5994_v54  ;;  %v6005_v16 = vpop.f32.mrf.mxu0  ;;  %v2055_v26 = vadd.f32 %v2054_v18, %v5941_v53  ;;  %v2351_v17 = vadd.f32 %v2350_v48, %v2201_v33  ;;  %v2184_v4 = vmul.f32 %v5966_v32, %v5966_v32  ;;  %v2078_v39 = vmul.f32 %v5978_v27, %v5978_v27 }
 0x156   : > { %9223 = vst [vmem:[#allocation112_spill] sm:$0xff] %v6005_v16  ;;  %v1925_v25 = vadd.f32 %v5792_v59, %v5978_v27  ;;  %v6015_v60 = vmul.f32 %v9224_v2, %v1404_v57  ;;  %v6018_v14 = vmul.f32 %v9217_v19, %v1408_v21  ;;  %v1414_v23 = vadd.f32 %v5765_v1, %v4918_v41  ;;  %v9228_v1 = vld [vmem:[#allocation91_spill] sm:$0xff] }
 0x157   : > { %v6022_v42 = vpop.f32.mrf.mxu0  ;;  %v6025_v18 = vadd.f32 %v2018_v20, %v5963_v61  ;;  %v2185_v48 = vmul.f32 %v5991_v5, %v5991_v5  ;;  %v2202_v59 = vmul.f32 %v5994_v54, %v5994_v54  ;;  %v6032_v57 = vmul.f32 %v9179_v29, %v1333_v11  ;;  %v6043_v61 = vpop.f32.mrf.mxu1  ;;  %v9230_v11 = vld [vmem:[#allocation93_spill] sm:$0xff] }
 0x158   : > { %9225 = vst [vmem:[#allocation17_spill] sm:$0xff] %v6015_v60  ;;  %9226 = vst [vmem:[#allocation113_spill] sm:$0xff] %v6018_v14  ;;  %v6034_v33 = vadd.f32 %v2314_v47, %v2167_v0  ;;  %v6037_v21 = vadd.f32 %v2037_v62, %v5991_v5  ;;  %v1410_v52 = vadd.f32 %v9228_v1, %v9160_v49  ;;  %v9232_v1 = vld [vmem:[#allocation97_spill] sm:$0xff] }
 0x159   : > { %9227 = vst [vmem:[#allocation114_spill] sm:$0xff] %v6032_v57  ;;  %v1420_v20 = vadd.f32 %v5803_v34, %v4926_v50  ;;  %v6045_v32 = vpop.f32.mrf.mxu0  ;;  %v2333_v15 = vadd.f32 %v2332_v55, %v2184_v4  ;;  %v6048_v53 = vadd.f32 %v5807_v35, %v2078_v39  ;;  %v2056_v29 = vadd.f32 %v2055_v26, %v5994_v54  ;;  %v6081_v54 = vpop.f32.mrf.mxu1 }
 0x15a   : > { %v1515_v47 = vadd.f32 %v9230_v11, %v4928_v51  ;;  %v1926_v0 = vadd.f32 %v1925_v25, %v6015_v60  ;;  %v2096_v62 = vmul.f32 %v6018_v14, %v6018_v14  ;;  %v6057_v34 = vmul.f32 %v9217_v19, %v1414_v23 }
 0x15b   : > { %9229 = vst [vmem:[#allocation91_spill] sm:$0xff] %v6048_v53  ;;  %v1416_v5 = vadd.f32 %v9232_v1, %v4918_v41  ;;  %v6061_v55 = vpop.f32.mrf.mxu0  ;;  %v6065_v35 = vmul.f32 %v6015_v60, %v6015_v60  ;;  %v2352_v26 = vadd.f32 %v2351_v17, %v2202_v59  ;;  %v1944_v4 = vadd.f32 %v5844_v31, %v6018_v14 }
 0x15c   : > { %9231 = vst [vmem:[#allocation93_spill] sm:$0xff] %v6057_v34  ;;  %v2203_v39 = vmul.f32 %v6032_v57, %v6032_v57  ;;  %v6072_v25 = vmul.f32 %v9224_v2, %v1410_v52  ;;  %v6075_v23 = vmul.f32 %v9217_v19, %v1420_v20  ;;  %v1521_v11 = vadd.f32 %v5805_v44, %v9160_v49  ;;  %v9236_v52 = vld [vmem:[#allocation18_spill] sm:$0xff]  ;;  %v9238_v20 = vld [vmem:[#allocation99_spill] sm:$0xff] }
 0x15d   : > { %9233 = vst [vmem:[#allocation97_spill] sm:$0xff] %v6065_v35  ;;  %v1426_v1 = vadd.f32 %v5841_v30, %v4914_v38  ;;  %v6083_v17 = vpop.f32.mrf.mxu0  ;;  %v6085_v31 = vadd.f32 %v2333_v15, %v2185_v48  ;;  %v6088_v59 = vadd.f32 %v2056_v29, %v6032_v57  ;;  %v6091_v60 = vmul.f32 %v9236_v52, %v1515_v47  ;;  %v9241_v47 = vld [vmem:[#allocation98_spill] sm:$0xff] }
 0x15e   : > { %9234 = vst [vmem:[#allocation115_spill] sm:$0xff] %v6072_v25  ;;  %9235 = vst [vmem:[#allocation116_spill] sm:$0xff] %v6075_v23  ;;  %v1422_v27 = vadd.f32 %v9238_v20, %v4926_v50  ;;  %v6096_v44 = vadd.f32 %v5846_v43, %v2096_v62  ;;  %v1963_v30 = vadd.f32 %v5881_v9, %v6057_v34 }
 0x15f   : > { %9237 = vst [vmem:[#allocation18_spill] sm:$0xff] %v6091_v60  ;;  %v2114_v14 = vmul.f32 %v6057_v34, %v6057_v34  ;;  %v6103_v15 = vmul.f32 %v9224_v2, %v1416_v5  ;;  %v6105_v48 = vpop.f32.mrf.mxu0  ;;  %v6107_v29 = vadd.f32 %v2352_v26, %v2203_v39  ;;  %v6111_v57 = vadd.f32 %v9241_v47, %v4928_v51  ;;  %v1546_v39 = vpop.f32.mrf.mxu1  ;;  %v9247_v34 = vld [vmem:[#allocation81_spill] sm:$0xff] }
 0x160   : > { %9239 = vst [vmem:[#allocation99_spill] sm:$0xff] %v6096_v44  ;;  %v1527_v43 = vadd.f32 %v5856_v58, %v4918_v41  ;;  %v1432_v9 = vadd.f32 %v5878_v56, %v4910_v36  ;;  %v1945_v62 = vadd.f32 %v1944_v4, %v6072_v25  ;;  %v2132_v5 = vmul.f32 %v6075_v23, %v6075_v23 }
 0x161   : > { %9240 = vst [vmem:[#allocation117_spill] sm:$0xff] %v6103_v15  ;;  %9242 = vst [vmem:[#allocation98_spill] sm:$0xff] %v6111_v57  ;;  %v6121_v20 = vmul.f32 %v9236_v52, %v1521_v11  ;;  %v6124_v26 = vmul.f32 %v9217_v19, %v1426_v1  ;;  %v6126_v47 = vpop.f32.mrf.mxu0  ;;  %v6130_v58 = vmul.f32 %v6072_v25, %v6072_v25 }
 0x162   : > { %v1982_v56 = vadd.f32 %v5918_v28, %v6075_v23  ;;  %v6135_v4 = vmul.f32 %v9224_v2, %v1422_v27  ;;  %v1428_v11 = vadd.f32 %v9247_v34, %v4914_v38  ;;  %v6140_v53 = vadd.f32 %v5889_v10, %v2114_v14  ;;  %v9254_v34 = vld [vmem:[#allocation100_spill] sm:$0xff] }
 0x163   : > { %9243 = vst [vmem:[#allocation118_spill] sm:$0xff] %v6121_v20  ;;  %9244 = vst [vmem:[#allocation119_spill] sm:$0xff] %v6124_v26  ;;  %v6143_v1 = vadd.f32 %v1926_v0, %v6091_v60  ;;  %v1964_v35 = vadd.f32 %v1963_v30, %v6103_v15  ;;  %v1438_v25 = vadd.f32 %v5914_v40, %v9200_v12  ;;  %v6148_v16 = vpop.f32.mrf.mxu0 }
 0x164   : > { %9245 = vst [vmem:[#allocation120_spill] sm:$0xff] %v6130_v58  ;;  %9246 = vst [vmem:[#allocation121_spill] sm:$0xff] %v6135_v4  ;;  %v6152_v28 = vmul.f32 %v6103_v15, %v6103_v15  ;;  %v6155_v27 = vmul.f32 %v9236_v52, %v1527_v43  ;;  %v6158_v10 = vmul.f32 %v9217_v19, %v1432_v9  ;;  %v1550_v15 = vpop.f32.mrf.mxu1 }
 0x165   : > { %9248 = vst [vmem:[#allocation81_spill] sm:$0xff] %v6140_v53  ;;  %9249 = vst [vmem:[#allocation122_spill] sm:$0xff] %v6143_v1  ;;  %v1434_v14 = vadd.f32 %v5897_v46, %v4910_v36  ;;  %v6163_v0 = vadd.f32 %v5945_v8, %v2132_v5  ;;  %v6166_v40 = vadd.f32 %v1945_v62, %v6121_v20  ;;  %v6174_v23 = vpop.f32.mrf.mxu0 }
 0x166   : > { %9250 = vst [vmem:[#allocation123_spill] sm:$0xff] %v6152_v28  ;;  %9251 = vst [vmem:[#allocation124_spill] sm:$0xff] %v6155_v27  ;;  %v6170_v30 = vadd.f32 %v9254_v34, %v9160_v49  ;;  %v2150_v43 = vmul.f32 %v6124_v26, %v6124_v26  ;;  %v1983_v9 = vadd.f32 %v1982_v56, %v6135_v4 }
 0x167   : > { %9252 = vst [vmem:[#allocation125_spill] sm:$0xff] %v6158_v10  ;;  %9253 = vst [vmem:[#allocation126_spill] sm:$0xff] %v6166_v40  ;;  %v2001_v46 = vadd.f32 %v5981_v3, %v6124_v26  ;;  %v6180_v8 = vmul.f32 %v9224_v2, %v1428_v11  ;;  %v1444_v62 = vadd.f32 %v5951_v63, %v4912_v37  ;;  %v6195_v3 = vpop.f32.mrf.mxu0  ;;  %v9258_v26 = vld [vmem:[#allocation110_spill] sm:$0xff]  ;;  %v1552_v40 = vpop.f32.mrf.mxu1 }
 0x168   : > { %v6186_v5 = vmul.f32 %v6135_v4, %v6135_v4  ;;  %v1533_v34 = vadd.f32 %v5934_v22, %v4926_v50  ;;  %v6191_v60 = vmul.f32 %v9217_v19, %v1438_v25  ;;  %v1440_v56 = vadd.f32 %v5936_v6, %v9200_v12 }
 0x169   : > { %9255 = vst [vmem:[#allocation100_spill] sm:$0xff] %v6180_v8  ;;  %v6198_v11 = vadd.f32 %v1964_v35, %v6155_v27  ;;  %v6202_v63 = vadd.f32 %v5895_v24, %v4918_v41  ;;  %v2168_v4 = vmul.f32 %v6158_v10, %v6158_v10  ;;  %v6207_v22 = vmul.f32 %v9224_v2, %v1434_v14  ;;  %v1659_v24 = vpop.f32.mrf.mxu0 }
 0x16a   : > { %9256 = vst [vmem:[#allocation127_spill] sm:$0xff] %v6191_v60  ;;  %v2297_v25 = vadd.f32 %v5998_v7, %v2150_v43  ;;  %v1535_v6 = vadd.f32 %v9258_v26, %v4926_v50  ;;  %v1539_v1 = vadd.f32 %v6003_v45, %v4914_v38  ;;  %v1541_v35 = vadd.f32 %v6043_v61, %v4914_v38  ;;  %v9260_v7 = vld [vmem:[#allocation111_spill] sm:$0xff] }
 0x16b   : > { %9257 = vst [vmem:[#allocation128_spill] sm:$0xff] %v6207_v22  ;;  %v2002_v20 = vadd.f32 %v2001_v46, %v6180_v8  ;;  %v2151_v57 = vmul.f32 %v6180_v8, %v6180_v8  ;;  %v6220_v14 = vmul.f32 %v9217_v19, %v1444_v62  ;;  %v1446_v43 = vadd.f32 %v9260_v7, %v4912_v37  ;;  %v1663_v44 = vpop.f32.mrf.mxu0  ;;  %v9263_v8 = vld [vmem:[#allocation22_spill] sm:$0xff] }
 0x16c   : > { %v6225_v26 = vmul.f32 %v9236_v52, %v1533_v34  ;;  %v2186_v45 = vmul.f32 %v6191_v60, %v6191_v60  ;;  %v6230_v61 = vmul.f32 %v9224_v2, %v1440_v56  ;;  %v1545_v46 = vadd.f32 %v6081_v54, %v4910_v36 }
 0x16d   : > { %9259 = vst [vmem:[#allocation110_spill] sm:$0xff] %v6220_v14  ;;  %v2020_v19 = vadd.f32 %v6025_v18, %v6158_v10  ;;  %v2316_v62 = vadd.f32 %v6034_v33, %v2168_v4  ;;  %v2169_v7 = vmul.f32 %v6207_v22, %v6207_v22  ;;  %v1547_v34 = vadd.f32 %v1546_v39, %v4910_v36  ;;  %v1556_v18 = vpop.f32.mrf.mxu1 }
 0x16e   : > { %9261 = vst [vmem:[#allocation111_spill] sm:$0xff] %v6225_v26  ;;  %9262 = vst [vmem:[#allocation129_spill] sm:$0xff] %v6230_v61  ;;  %v6241_v58 = vmul.f32 %v9263_v8, %v1535_v6  ;;  %v2039_v56 = vadd.f32 %v6037_v21, %v6191_v60  ;;  %v6246_v53 = vmul.f32 %v9236_v52, %v1539_v1 }
 0x16f   : > { %v6249_v54 = vmul.f32 %v9263_v8, %v1541_v35  ;;  %v2298_v10 = vadd.f32 %v2297_v25, %v2151_v57  ;;  %v2204_v33 = vmul.f32 %v6220_v14, %v6220_v14  ;;  %v6254_v4 = vmul.f32 %v9224_v2, %v1446_v43  ;;  %v6266_v57 = vpop.f32.mrf.mxu0 }
 0x170   : > { %9264 = vst [vmem:[#allocation22_spill] sm:$0xff] %v6241_v58  ;;  %9265 = vst [vmem:[#allocation130_spill] sm:$0xff] %v6246_v53  ;;  %v1551_v39 = vadd.f32 %v1550_v15, %v9200_v12  ;;  %v6258_v6 = vadd.f32 %v1983_v9, %v6225_v26  ;;  %v2335_v21 = vadd.f32 %v6085_v31, %v2186_v45 }
 0x171   : > { %9266 = vst [vmem:[#allocation131_spill] sm:$0xff] %v6249_v54  ;;  %9267 = vst [vmem:[#allocation132_spill] sm:$0xff] %v6254_v4  ;;  %v2187_v1 = vmul.f32 %v6230_v61, %v6230_v61  ;;  %v6264_v35 = vmul.f32 %v9236_v52, %v1545_v46  ;;  %v2021_v25 = vadd.f32 %v2020_v19, %v6207_v22  ;;  %v1676_v46 = vld [vmem:[%s8836_s9 + $0x10] sm:$0x3]  ;;  %v1558_v19 = vpop.f32.mrf.mxu1 }
 0x172   : > { %v2317_v60 = vadd.f32 %v2316_v62, %v2169_v7  ;;  %v6270_v2 = vmul.f32 %v9263_v8, %v1547_v34  ;;  %v1557_v15 = vadd.f32 %v1556_v18, %v4912_v37  ;;  %v2003_v9 = vadd.f32 %v2002_v20, %v6246_v53 }
 0x173   : > { %9268 = vst [vmem:[#allocation133_spill] sm:$0xff] %v6264_v35  ;;  %v2152_v31 = vmul.f32 %v6246_v53, %v6246_v53  ;;  %v2040_v43 = vadd.f32 %v2039_v56, %v6230_v61  ;;  %v2153_v45 = vmul.f32 %v6249_v54, %v6249_v54  ;;  %v2354_v62 = vadd.f32 %v6107_v29, %v2204_v33  ;;  %v1669_v61 = vpop.f32.mrf.mxu0  ;;  %v9271_v33 = vld [vmem:[#allocation4_spill] sm:$0xff] }
 0x174   : > { %9269 = vst [vmem:[#allocation134_spill] sm:$0xff] %v6270_v2  ;;  %v2205_v7 = vmul.f32 %v6254_v4, %v6254_v4  ;;  %v6286_v20 = vmul.f32 %v9236_v52, %v1551_v39  ;;  %v1553_v34 = vadd.f32 %v1552_v40, %v9200_v12  ;;  %v2336_v18 = vadd.f32 %v2335_v21, %v2187_v1  ;;  %v9273_v21 = vld [vmem:[#allocation3_spill] sm:$0xff] }
 0x175   : > { %v6291_v56 = vadd.f32 %v6088_v59, %v6220_v14  ;;  %v2022_v53 = vadd.f32 %v2021_v25, %v6264_v35  ;;  %v2170_v22 = vmul.f32 %v6264_v35, %v6264_v35  ;;  %v2171_v29 = vmul.f32 %v6270_v2, %v6270_v2 }
 0x176   : > { %9270 = vst [vmem:[#allocation135_spill] sm:$0xff] %v6286_v20  ;;  %v6299_v28 = vrot.slane %v1676_v46, %v9271_v33  ;;  %v6302_v39 = vmul.f32 %v9236_v52, %v1557_v15  ;;  %v1559_v40 = vadd.f32 %v1558_v19, %v4912_v37  ;;  %v6306_v59 = vrot.slane %v1676_v46, %v9273_v21 }
 0x177   : > { %v1652_v1 = vadd.f32 %v6148_v16, %v4914_v38  ;;  %v1654_v25 = vadd.f32 %v6174_v23, %v4914_v38  ;;  %v1658_v35 = vadd.f32 %v6195_v3, %v4910_v36  ;;  %v2355_v14 = vadd.f32 %v2354_v62, %v2205_v7  ;;  %v1671_v23 = vpop.f32.mrf.mxu0 }
 0x178   : > { %9272 = vst [vmem:[#allocation136_spill] sm:$0xff] %v6302_v39  ;;  %v2041_v33 = vadd.f32 %v2040_v43, %v6286_v20  ;;  %v6316_v52 = vmul.f32 %v9263_v8, %v1553_v34  ;;  %v1660_v15 = vadd.f32 %v1659_v24, %v4910_v36  ;;  %v2004_v38 = vadd.f32 %v2003_v9, %v6249_v54 }
 0x179   : > { %v6320_v46 = vmul.f32 %v6299_v28, %v1652_v1  ;;  %v6323_v19 = vmul.f32 %v6306_v59, %v1654_v25  ;;  %v6326_v16 = vmul.f32 %v6299_v28, %v1658_v35  ;;  %v2206_v3 = vmul.f32 %v6302_v39, %v6302_v39 }
 0x17a   : > { %9274 = vst [vmem:[#allocation3_spill] sm:$0xff] %v6316_v52  ;;  %v6332_v43 = vmul.f32 %v9263_v8, %v1559_v40  ;;  %v2299_v62 = vadd.f32 %v2298_v10, %v2152_v31  ;;  %v1670_v36 = vadd.f32 %v1669_v61, %v4912_v37  ;;  %v6336_v24 = vmul.f32 %v6306_v59, %v1660_v15 }
 0x17b   : > { %9275 = vst [vmem:[#allocation137_spill] sm:$0xff] %v6320_v46  ;;  %9276 = vst [vmem:[#allocation138_spill] sm:$0xff] %v6323_v19  ;;  %v1664_v7 = vadd.f32 %v1663_v44, %v9200_v12  ;;  %v2005_v35 = vadd.f32 %v2004_v38, %v6320_v46  ;;  %v2154_v9 = vmul.f32 %v6320_v46, %v6320_v46 }
 0x17c   : > { %9277 = vst [vmem:[#allocation139_spill] sm:$0xff] %v6326_v16  ;;  %9278 = vst [vmem:[#allocation140_spill] sm:$0xff] %v6332_v43  ;;  %v2155_v34 = vmul.f32 %v6323_v19, %v6323_v19  ;;  %v2300_v1 = vadd.f32 %v2299_v62, %v2153_v45  ;;  %v2023_v40 = vadd.f32 %v2022_v53, %v6270_v2 }
 0x17d   : > { %9279 = vst [vmem:[#allocation141_spill] sm:$0xff] %v6336_v24  ;;  %v1672_v10 = vadd.f32 %v1671_v23, %v4912_v37  ;;  %v2006_v61 = vadd.f32 %v2005_v35, %v6323_v19  ;;  %v6348_v31 = vmul.f32 %v6299_v28, %v1670_v36  ;;  %v2172_v44 = vmul.f32 %v6326_v16, %v6326_v16 }
 0x17e   : > { %v2318_v25 = vadd.f32 %v2317_v60, %v2170_v22  ;;  %v2188_v15 = vmul.f32 %v6286_v20, %v6286_v20  ;;  %v1646_v38 = vadd.f32 %v6105_v48, %v4926_v50  ;;  %v2301_v45 = vadd.f32 %v2300_v1, %v2154_v9 }
 0x17f   : > { %9280 = vst [vmem:[#allocation142_spill] sm:$0xff] %v6348_v31  ;;  %v2024_v53 = vadd.f32 %v2023_v40, %v6326_v16  ;;  %v2207_v37 = vmul.f32 %v6332_v43, %v6332_v43  ;;  %2007 = vadd.xlane.f32.xlu1 %v2006_v61  ;;  %v6360_v23 = vmul.f32 %v6306_v59, %v1672_v10 }
 0x180   : > { %v2173_v62 = vmul.f32 %v6336_v24, %v6336_v24  ;;  %v2319_v60 = vadd.f32 %v2318_v25, %v2171_v29  ;;  %v6365_v22 = vmul.f32 %v6299_v28, %v1664_v7  ;;  %v1666_v48 = vadd.f32 %v6266_v57, %v9200_v12 }
 0x181   : > { %9281 = vst [vmem:[#allocation143_spill] sm:$0xff] %v6360_v23  ;;  %v2302_v36 = vadd.f32 %v2301_v45, %v2155_v34  ;;  %v2025_v35 = vadd.f32 %v2024_v53, %v6336_v24  ;;  %v2189_v9 = vmul.f32 %v6316_v52, %v6316_v52  ;;  %v2208_v40 = vmul.f32 %v6348_v31, %v6348_v31 }
 0x182   : > { %9282 = vst [vmem:[#allocation144_spill] sm:$0xff] %v6365_v22  ;;  %v2320_v1 = vadd.f32 %v2319_v60, %v2172_v44  ;;  %v2356_v10 = vadd.f32 %v2355_v14, %v2206_v3  ;;  %v1640_v29 = vadd.f32 %v6061_v55, %v4918_v41  ;;  %v6377_v7 = vmul.f32 %v6299_v28, %v1646_v38 }
 0x183   : > { %2303 = vadd.xlane.f32.xlu0 %v2302_v36  ;;  %v2042_v12 = vadd.f32 %v2041_v33, %v6316_v52  ;;  %v2337_v57 = vadd.f32 %v2336_v18, %v2188_v15  ;;  %v1648_v34 = vadd.f32 %v6126_v47, %v4926_v50  ;;  %2026 = vadd.xlane.f32.xlu1 %v2025_v35 }
 0x184   : > { %9283 = vst [vmem:[#allocation145_spill] sm:$0xff] %v6377_v7  ;;  %v2321_v61 = vadd.f32 %v2320_v1, %v2173_v62  ;;  %v2209_v44 = vmul.f32 %v6360_v23, %v6360_v23  ;;  %v2357_v25 = vadd.f32 %v2356_v10, %v2207_v37  ;;  %v2059_v14 = vadd.f32 %v6291_v56, %v6254_v4 }
 0x185   : > { %v6387_v55 = vmul.f32 %v6306_v59, %v1666_v48  ;;  %v2043_v3 = vadd.f32 %v2042_v12, %v6365_v22  ;;  %v2190_v18 = vmul.f32 %v6365_v22, %v6365_v22  ;;  %v6394_v50 = vmul.f32 %v9263_v8, %v6202_v63  ;;  %v9291_v12 = vld [vmem:[#allocation123_spill] sm:$0xff] }
 0x186   : > { %v2134_v47 = vmul.f32 %v6225_v26, %v6225_v26  ;;  %v2358_v33 = vadd.f32 %v2357_v25, %v2208_v40  ;;  %v1985_v15 = vadd.f32 %v6258_v6, %v6241_v58  ;;  %v2060_v56 = vadd.f32 %v2059_v14, %v6302_v39  ;;  %v9295_v14 = vld [vmem:[#allocation98_spill] sm:$0xff] }
 0x187   : > { %9284 = vst [vmem:[#allocation146_spill] sm:$0xff] %v6387_v55  ;;  %9285 = vst [vmem:[#allocation147_spill] sm:$0xff] %v6394_v50  ;;  %v1634_v38 = vadd.f32 %v6022_v42, %v9160_v49  ;;  %v1642_v45 = vadd.f32 %v6083_v17, %v4918_v41  ;;  %2322 = vadd.xlane.f32.xlu0 %v2321_v61  ;;  %v2338_v53 = vadd.f32 %v2337_v57, %v2189_v9  ;;  %v9292_v57 = vld [vmem:[#allocation81_spill] sm:$0xff]  ;;  %v9293_v61 = vld [vmem:[#allocation120_spill] sm:$0xff] }
 0x188   : > { %v6406_v63 = vmul.f32 %v6299_v28, %v1640_v29  ;;  %v6409_v37 = vmul.f32 %v6306_v59, %v1648_v34  ;;  %v2359_v62 = vadd.f32 %v2358_v33, %v2209_v44  ;;  %v1986_v60 = vadd.f32 %v1985_v15, %v6377_v7  ;;  %v9294_v44 = vld [vmem:[#allocation99_spill] sm:$0xff]  ;;  %v9298_v33 = vld [vmem:[#allocation126_spill] sm:$0xff] }
 0x189   : > { %v2279_v6 = vadd.f32 %v6163_v0, %v6186_v5  ;;  %v2044_v48 = vadd.f32 %v2043_v3, %v6387_v55  ;;  %v2191_v42 = vmul.f32 %v6387_v55, %v6387_v55  ;;  %v2339_v41 = vadd.f32 %v2338_v53, %v2190_v18  ;;  %v9297_v18 = vld [vmem:[#allocation118_spill] sm:$0xff] }
 0x18a   : > { %9286 = vst [vmem:[#allocation148_spill] sm:$0xff] %v6406_v63  ;;  %9287 = vst [vmem:[#allocation149_spill] sm:$0xff] %v6409_v37  ;;  %v6419_v17 = vmul.f32 %v9263_v8, %v6170_v30  ;;  %v2116_v36 = vmul.f32 %v6155_v27, %v6155_v27  ;;  %v2135_v35 = vmul.f32 %v6241_v58, %v6241_v58  ;;  %2360 = vadd.xlane.f32.xlu1 %v2359_v62 }
 0x18b   : > { %v1966_v0 = vadd.f32 %v6198_v11, %v6394_v50  ;;  %v1628_v5 = vadd.f32 %v5987_v13, %v4928_v51  ;;  %v1636_v9 = vadd.f32 %v6045_v32, %v9160_v49  ;;  %2045 = vadd.xlane.f32.xlu0 %v2044_v48  ;;  %v2061_v30 = vadd.f32 %v2060_v56, %v6332_v43 }
 0x18c   : > { %9288 = vst [vmem:[#allocation150_spill] sm:$0xff] %v6419_v17  ;;  %v2280_v1 = vadd.f32 %v2279_v6, %v2134_v47  ;;  %v6433_v40 = vmul.f32 %v6299_v28, %v1634_v38  ;;  %v6436_v10 = vmul.f32 %v6306_v59, %v1642_v45  ;;  %v1987_v29 = vadd.f32 %v1986_v60, %v6409_v37  ;;  %v9299_v38 = vld [vmem:[#allocation112_spill] sm:$0xff] }
 0x18d   : > { %v1967_v11 = vadd.f32 %v1966_v0, %v6406_v63  ;;  %v2260_v13 = vadd.f32 %v9292_v57, %v9291_v12  ;;  %v2340_v34 = vadd.f32 %v2339_v41, %v2191_v42  ;;  %v2062_v49 = vadd.f32 %v2061_v30, %v6348_v31 }
 0x18e   : > { %9289 = vst [vmem:[#allocation151_spill] sm:$0xff] %v6433_v40  ;;  %9290 = vst [vmem:[#allocation152_spill] sm:$0xff] %v6436_v10  ;;  %v2136_v32 = vmul.f32 %v6377_v7, %v6377_v7  ;;  %v2241_v25 = vadd.f32 %v9294_v44, %v9293_v61  ;;  %v6449_v3 = vmul.f32 %v9263_v8, %v9295_v14  ;;  %1988 = vadd.xlane.f32.xlu1 %v1987_v29  ;;  %v9304_v29 = vld [vmem:[#allocation97_spill] sm:$0xff] }
 0x18f   : > { %v2098_v47 = vmul.f32 %v9297_v18, %v9297_v18  ;;  %v1947_v15 = vadd.f32 %v9298_v33, %v6419_v17  ;;  %v2117_v56 = vmul.f32 %v6394_v50, %v6394_v50  ;;  %v1630_v45 = vadd.f32 %v9299_v38, %v4928_v51  ;;  %2341 = vadd.xlane.f32.xlu0 %v2340_v34 }
 0x190   : > { %9296 = vst [vmem:[#allocation123_spill] sm:$0xff] %v6449_v3  ;;  %v2281_v53 = vadd.f32 %v2280_v1, %v2135_v35  ;;  %v2261_v62 = vadd.f32 %v2260_v13, %v2116_v36  ;;  %v6460_v60 = vmul.f32 %v6299_v28, %v1628_v5  ;;  %v6463_v8 = vmul.f32 %v6306_v59, %v1636_v9  ;;  %v9302_v28 = vld [vmem:[#allocation122_spill] sm:$0xff] }
 0x191   : > { %v1968_v6 = vadd.f32 %v1967_v11, %v6436_v10  ;;  %v1948_v48 = vadd.f32 %v1947_v15, %v6433_v40  ;;  %v2063_v42 = vadd.f32 %v2062_v49, %v6360_v23  ;;  %v2137_v41 = vmul.f32 %v6409_v37, %v6409_v37  ;;  %v9303_v35 = vld [vmem:[#allocation18_spill] sm:$0xff]  ;;  %v9305_v11 = vld [vmem:[#allocation91_spill] sm:$0xff] }
 0x192   : > { %9300 = vst [vmem:[#allocation81_spill] sm:$0xff] %v6460_v60  ;;  %9301 = vst [vmem:[#allocation120_spill] sm:$0xff] %v6463_v8  ;;  %v2282_v0 = vadd.f32 %v2281_v53, %v2136_v32  ;;  %v2118_v51 = vmul.f32 %v6406_v63, %v6406_v63  ;;  %v1928_v36 = vadd.f32 %v9302_v28, %v6449_v3  ;;  %v6526_v28 = vld [vmem:[%s6506_s17 + $0x68] sm:$0xff] }
 0x193   : > { %1969 = vadd.xlane.f32.xlu1 %v1968_v6  ;;  %v2080_v5 = vmul.f32 %v9303_v35, %v9303_v35  ;;  %v2099_v9 = vmul.f32 %v6419_v17, %v6419_v17  ;;  %2064 = vadd.xlane.f32.xlu0 %v2063_v42  ;;  %v2262_v30 = vadd.f32 %v2261_v62, %v2117_v56  ;;  %v2362_v42 = vld [vmem:[%s8833_s6] sm:$0xff] }
 0x194   : > { %v2242_v1 = vadd.f32 %v2241_v25, %v2098_v47  ;;  %v2222_v12 = vadd.f32 %v9305_v11, %v9304_v29  ;;  %v6481_v57 = vmul.f32 %v6306_v59, %v1630_v45  ;;  %v1949_v13 = vadd.f32 %v1948_v48, %v6463_v8  ;;  %4394 = vmatprep.mubr.msk.f32.mxu1 %vm2379_vm2, %v2362_v42  ;;  %v6588_v29 = vld [vmem:[%s6506_s17 + $0x30] sm:$0xff]  ;;  %v6611_v11 = vld [vmem:[%s6506_s17 + $0x20] sm:$0xff] }
 0x195   : > { %v1929_v34 = vadd.f32 %v1928_v36, %v6460_v60  ;;  %v2283_v49 = vadd.f32 %v2282_v0, %v2137_v41  ;;  %v2119_v32 = vmul.f32 %v6436_v10, %v6436_v10  ;;  %v2263_v61 = vadd.f32 %v2262_v30, %v2118_v51  ;;  %v6509_v41 = vld [vmem:[%s6506_s17 + $0x78] sm:$0xff]  ;;  %v6512_v0 = vld [vmem:[%s6506_s17 + $0x70] sm:$0xff]  ;;  %v6523_v51 = vld [vmem:[%s6506_s17 + $0x60] sm:$0xff] }
 0x196   : > { %9306 = vst [vmem:[#allocation99_spill] sm:$0xff] %v6481_v57  ;;  %v2100_v44 = vmul.f32 %v6433_v40, %v6433_v40  ;;  %v2081_v25 = vmul.f32 %v6449_v3, %v6449_v3  ;;  %v2243_v14 = vadd.f32 %v2242_v1, %v2099_v9  ;;  %v2223_v59 = vadd.f32 %v2222_v12, %v2080_v5  ;;  %v6541_v36 = vld [vmem:[%s6506_s17 + $0x58] sm:$0xff]  ;;  %v6544_v5 = vld [vmem:[%s6506_s17 + $0x50] sm:$0xff]  ;;  %v6563_v9 = vld [vmem:[%s6506_s17 + $0x40] sm:$0xff] }
 0x197   : > { %1950 = vadd.xlane.f32.xlu1 %v1949_v13  ;;  %2284 = vadd.xlane.f32.xlu0 %v2283_v49  ;;  %v1930_v47 = vadd.f32 %v1929_v34, %v6481_v57  ;;  %v2264_v33 = vadd.f32 %v2263_v61, %v2119_v32  ;;  %v2101_v15 = vmul.f32 %v6463_v8, %v6463_v8  ;;  %v6566_v30 = vld [vmem:[%s6506_s17 + $0x48] sm:$0xff]  ;;  %v6585_v1 = vld [vmem:[%s6506_s17 + $0x38] sm:$0xff] }
 0x198   : > { %v2244_v56 = vadd.f32 %v2243_v14, %v2100_v44  ;;  %v2082_v38 = vmul.f32 %v6460_v60, %v6460_v60  ;;  %v2224_v45 = vadd.f32 %v2223_v59, %v2081_v25  ;;  %v2083_v62 = vmul.f32 %v6481_v57, %v6481_v57  ;;  %v6614_v12 = vld [vmem:[%s6506_s17 + $0x28] sm:$0xff]  ;;  %v6641_v59 = vld [vmem:[%s6506_s17 + $0x10] sm:$0xff] }
 0x19a   : > { %v2245_v53 = vadd.f32 %v2244_v56, %v2101_v15  ;;  %v2225_v6 = vadd.f32 %v2224_v45, %v2082_v38 }
 0x19b   : > { %1931 = vadd.xlane.f32.xlu1 %v1930_v47  ;;  %2265 = vadd.xlane.f32.xlu0 %v2264_v33  ;;  %v6644_v47 = vld [vmem:[%s6506_s17 + $0x18] sm:$0xff] }
 0x19c   : > { %v2226_v48 = vadd.f32 %v2225_v6, %v2083_v62 }
 0x19f   : > { %2246 = vadd.xlane.f32.xlu0 %v2245_v53 }
 0x1a3   : > { %2227 = vadd.xlane.f32.xlu0 %v2226_v48 }
 0x1ac   : > { %3051 = vrot.lane.b32.xlu1 %v6512_v0, %s4512_s18 }
 0x1b0   : > { %3162 = vrot.lane.b32.xlu1 %v6512_v0, %s4513_s19 }
 0x1b4   : > { %3065 = vrot.lane.b32.xlu1 %v6526_v28, %s4512_s18 }
 0x1b8   : > { %3176 = vrot.lane.b32.xlu1 %v6526_v28, %s4513_s19 }
 0x1b9   : > { %3067 = vrot.lane.b32.xlu0 %v6509_v41, %s4512_s18 }
 0x1bc   : > { %3288 = vrot.lane.b32.xlu1 %v6509_v41, %s4514_s20 }
 0x1bd   : > { %3178 = vrot.lane.b32.xlu0 %v6509_v41, %s4513_s19 }
 0x1c0   : > { %3047 = vrot.lane.b32.xlu1 %v6544_v5, %s4512_s18 }
 0x1c1   : > { %3049 = vrot.lane.b32.xlu0 %v6523_v51, %s4512_s18 }
 0x1c4   : > { %3158 = vrot.lane.b32.xlu1 %v6544_v5, %s4513_s19 }
 0x1c5   : > { %3160 = vrot.lane.b32.xlu0 %v6523_v51, %s4513_s19 }
 0x1c8   : > { %3270 = vrot.lane.b32.xlu1 %v6523_v51, %s4514_s20 }
 0x1c9   : > { %3272 = vrot.lane.b32.xlu0 %v6512_v0, %s4514_s20 }
 0x1cc   : > { %3382 = vrot.lane.b32.xlu1 %v6512_v0, %s4515_s21 }
 0x1cd   : > { %3063 = vrot.lane.b32.xlu0 %v6541_v36, %s4512_s18 }
 0x1d0   : > { %3061 = vrot.lane.b32.xlu1 %v6566_v30, %s4512_s18 }
 0x1d1   : > { %3174 = vrot.lane.b32.xlu0 %v6541_v36, %s4513_s19 }
 0x1d4   : > { %3172 = vrot.lane.b32.xlu1 %v6566_v30, %s4513_s19 }
 0x1d5   : > { %3286 = vrot.lane.b32.xlu0 %v6526_v28, %s4514_s20 }
 0x1d8   : > { %3284 = vrot.lane.b32.xlu1 %v6541_v36, %s4514_s20 }
 0x1d9   : > { %3398 = vrot.lane.b32.xlu0 %v6509_v41, %s4515_s21 }
 0x1dc   : > { %3396 = vrot.lane.b32.xlu1 %v6526_v28, %s4515_s21 }
 0x1dd   : > { %3045 = vrot.lane.b32.xlu0 %v6563_v9, %s4512_s18 }
 0x1e0   : > { %3043 = vrot.lane.b32.xlu1 %v6588_v29, %s4512_s18 }
 0x1e1   : > { %3156 = vrot.lane.b32.xlu0 %v6563_v9, %s4513_s19 }
 0x1e4   : > { %3154 = vrot.lane.b32.xlu1 %v6588_v29, %s4513_s19 }
 0x1e5   : > { %3268 = vrot.lane.b32.xlu0 %v6544_v5, %s4514_s20 }
 0x1e8   : > { %3266 = vrot.lane.b32.xlu1 %v6563_v9, %s4514_s20 }
 0x1e9   : > { %3380 = vrot.lane.b32.xlu0 %v6523_v51, %s4515_s21 }
 0x1ec   : > { %3378 = vrot.lane.b32.xlu1 %v6544_v5, %s4515_s21 }
 0x1ed   : > { %3059 = vrot.lane.b32.xlu0 %v6585_v1, %s4512_s18 }
 0x1f0   : > { %3553 = vrot.lane.b32.xlu1 %v6512_v0, %s4516_s28 }
 0x1f1   : > { %3170 = vrot.lane.b32.xlu0 %v6585_v1, %s4513_s19 }
 0x1f4   : > { %3057 = vrot.lane.b32.xlu1 %v6614_v12, %s4512_s18 }
 0x1f5   : > { %3282 = vrot.lane.b32.xlu0 %v6566_v30, %s4514_s20 }
 0x1f8   : > { %3168 = vrot.lane.b32.xlu1 %v6614_v12, %s4513_s19 }
 0x1f9   : > { %3394 = vrot.lane.b32.xlu0 %v6541_v36, %s4515_s21 }
 0x1fc   : > { %3280 = vrot.lane.b32.xlu1 %v6585_v1, %s4514_s20 }
 0x1fd   : > { %3569 = vrot.lane.b32.xlu0 %v6509_v41, %s4516_s28 }
 0x200   : > { %3392 = vrot.lane.b32.xlu1 %v6566_v30, %s4515_s21 }
 0x201   : > { %3041 = vrot.lane.b32.xlu0 %v6611_v11, %s4512_s18 }
 0x204   : > { %3567 = vrot.lane.b32.xlu1 %v6526_v28, %s4516_s28 }
 0x205   : > { %3152 = vrot.lane.b32.xlu0 %v6611_v11, %s4513_s19 }
 0x208   : > { %v2008_v13 = vpop.xlane.xlu1 %2007  ;;  %3679 = vrot.lane.b32.xlu1 %v6509_v41, %s4517_s22 }
 0x209   : > { %3264 = vrot.lane.b32.xlu0 %v6588_v29, %s4514_s20 }
 0x20c   : > { %v2304_v34 = vpop.xlane.xlu0 %2303  ;;  %v2027_v49 = vpop.xlane.xlu1 %2026  ;;  %3055 = vrot.lane.b32.xlu1 %v6644_v47, %s4512_s18 }
 0x20d   : > { %3376 = vrot.lane.b32.xlu0 %v6563_v9, %s4515_s21  ;;  %v2375_v62 = vsel %vm2370_vm3, %v2008_v13, %v2304_v34 }
 0x210   : > { %v2323_v32 = vpop.xlane.xlu0 %2322  ;;  %3166 = vrot.lane.b32.xlu1 %v6644_v47, %s4513_s19 }
 0x211   : > { %3551 = vrot.lane.b32.xlu0 %v6523_v51, %s4516_s28  ;;  %v2376_v53 = vsel %vm2370_vm3, %v2027_v49, %v2323_v32 }
 0x213   : > { %v2361_v44 = vpop.xlane.xlu1 %2360 }
 0x214   : > { %v2046_v61 = vpop.xlane.xlu0 %2045  ;;  %3278 = vrot.lane.b32.xlu1 %v6614_v12, %s4514_s20 }
 0x215   : > { %3663 = vrot.lane.b32.xlu0 %v6512_v0, %s4517_s22 }
 0x217   : > { %v1989_v14 = vpop.xlane.xlu1 %1988 }
 0x218   : > { %v2342_v25 = vpop.xlane.xlu0 %2341  ;;  %3390 = vrot.lane.b32.xlu1 %v6585_v1, %s4515_s21 }
 0x219   : > { %3039 = vrot.lane.b32.xlu0 %v6641_v59, %s4512_s18  ;;  %v2377_v56 = vsel %vm2370_vm3, %v2046_v61, %v2342_v25  ;;  %v2363_v25 = vld [vmem:[%s8833_s6 + $0x8] sm:$0xff] }
 0x21c   : > { %v2065_v33 = vpop.xlane.xlu0 %2064  ;;  %v1970_v45 = vpop.xlane.xlu1 %1969  ;;  %3565 = vrot.lane.b32.xlu1 %v6541_v36, %s4516_s28 }
 0x21d   : > { %v2378_v15 = vsel %vm2370_vm3, %v2065_v33, %v2361_v44  ;;  %3150 = vrot.lane.b32.xlu0 %v6641_v59, %s4513_s19  ;;  %v2365_v33 = vld [vmem:[%s8833_s6 + $0x18] sm:$0xff] }
 0x21e   : > { %4378 = vmatprep.subr.mxu1 %v2378_v15 }
 0x21f   : > { %4379 = vmatpush3.msra.mxu1 %v2378_v15  ;;  %v2366_v15 = vld [vmem:[%s8833_s6 + $0x20] sm:$0xff] }
 0x220   : > { %4380 = vmatprep.subr.mxu1 %v2377_v56  ;;  %v2285_v38 = vpop.xlane.xlu0 %2284  ;;  %v1951_v42 = vpop.xlane.xlu1 %1950  ;;  %3677 = vrot.lane.b32.xlu1 %v6526_v28, %s4517_s22 }
 0x221   : > { %4381 = vmatpush3.msra.mxu1 %v2377_v56  ;;  %v2374_v48 = vsel %vm2370_vm3, %v1989_v14, %v2285_v38  ;;  %3262 = vrot.lane.b32.xlu0 %v6611_v11, %s4514_s20  ;;  %v2364_v14 = vld [vmem:[%s8833_s6 + $0x10] sm:$0xff]  ;;  %v2367_v56 = vld [vmem:[%s8833_s6 + $0x28] sm:$0xff] }
 0x222   : > { %4382 = vmatprep.subr.mxu1 %v2376_v53  ;;  %v2368_v38 = vld [vmem:[%s8833_s6 + $0x30] sm:$0xff] }
 0x223   : > { %4383 = vmatpush3.msra.mxu1 %v2376_v53  ;;  %v2369_v53 = vld [vmem:[%s8833_s6 + $0x38] sm:$0xff] }
 0x224   : > { %4384 = vmatprep.subr.mxu1 %v2375_v62  ;;  %v2266_v6 = vpop.xlane.xlu0 %2265  ;;  %v1932_v34 = vpop.xlane.xlu1 %1931  ;;  %3789 = vrot.lane.b32.xlu1 %v6509_v41, %s4518_s24 }
 0x225   : > { %4385 = vmatpush3.msra.mxu1 %v2375_v62  ;;  %v2373_v49 = vsel %vm2370_vm3, %v1970_v45, %v2266_v6  ;;  %3374 = vrot.lane.b32.xlu0 %v6588_v29, %s4515_s21  ;;  %v6703_v45 = vld [vmem:[%s6506_s17] sm:$0xff]  ;;  %v9307_v62 = vmov 0.0   ;;  %v6719_v6 = vld [vmem:[%s6506_s17 + $0x8] sm:$0xff] }
 0x226   : > { %4386 = vmatprep.subr.mxu1 %v2374_v48 }
 0x227   : > { %4387 = vmatpush3.msra.mxu1 %v2374_v48 }
 0x228   : > { %4388 = vmatprep.subr.mxu1 %v2373_v49  ;;  %v2247_v32 = vpop.xlane.xlu0 %2246  ;;  %3053 = vrot.lane.b32.xlu1 %v6719_v6, %s4512_s18 }
 0x229   : > { %4389 = vmatpush3.msra.mxu1 %v2373_v49  ;;  %v2372_v13 = vsel %vm2370_vm3, %v1951_v42, %v2247_v32  ;;  %3549 = vrot.lane.b32.xlu0 %v6544_v5, %s4516_s28  ;;  %v6727_v49 = vpop.permute.xlu1 %3051 }
 0x22a   : > { %4390 = vmatprep.subr.mxu1 %v2372_v13 }
 0x22b   : > { %4391 = vmatpush3.msra.mxu1 %v2372_v13 }
 0x22c   : > { %v2228_v61 = vpop.xlane.xlu0 %2227 }
 0x22d   : > { %v2371_v44 = vsel %vm2370_vm3, %v1932_v34, %v2228_v61  ;;  %3661 = vrot.lane.b32.xlu0 %v6523_v51, %s4517_s22  ;;  %v6731_v13 = vpop.permute.xlu1 %3162 }
 0x22e   : > { %4392 = vmatprep.subr.mxu1 %v2371_v44 }
 0x22f   : > { %4393 = vmatpush3.msra.mxu1 %v2371_v44 }
 0x230   : > { %4395 = vmatmul.mubr.msk.f32.vlgmr.msra.gmra.mxu1 %vm2379_vm2, %v2363_v25  ;;  %v6723_v48 = vpop.permute.xlu0 %3067 }
 0x231   : > { %4397 = vmatprep.mubr.msk.f32.mxu1 %vm2379_vm2, %v2364_v14  ;;  %3773 = vrot.lane.b32.xlu0 %v6512_v0, %s4518_s24  ;;  %v6735_v61 = vpop.permute.xlu1 %3065 }
 0x234   : > { %4398 = vmatmul.mubr.msk.f32.gmra.mxu1 %vm2379_vm2, %v2365_v33  ;;  %v6725_v42 = vpop.permute.xlu0 %3178 }
 0x235   : > { %4400 = vmatprep.mubr.msk.f32.mxu1 %vm2379_vm2, %v2366_v15  ;;  %3037 = vrot.lane.b32.xlu0 %v6703_v45, %s4512_s18  ;;  %v6739_v25 = vpop.permute.xlu1 %3176  ;;  %s4519_s18 = smov 111  }
 0x238   : > { %4401 = vmatmul.mubr.msk.f32.gmra.mxu1 %vm2379_vm2, %v2367_v56  ;;  %v6729_v32 = vpop.permute.xlu0 %3049 }
 0x239   : > { %4403 = vmatprep.mubr.msk.f32.mxu1 %vm2379_vm2, %v2368_v38  ;;  %3148 = vrot.lane.b32.xlu0 %v6703_v45, %s4513_s19  ;;  %v6743_v33 = vpop.permute.xlu1 %3288 }
 0x23c   : > { %4404 = vmatmul.mubr.msk.f32.gmra.mxu1 %vm2379_vm2, %v2369_v53  ;;  %v6733_v34 = vpop.permute.xlu0 %3160 }
 0x23d   : > { %4051 = vmatprep.mubr.f32.mxu1 %v9307_v62  ;;  %v6747_v56 = vpop.permute.xlu1 %3047 }
 0x240   : > { %v6737_v44 = vpop.permute.xlu0 %3272 }
 0x241   : > { %v6751_v53 = vpop.permute.xlu1 %3158 }
 0x244   : > { %v6741_v14 = vpop.permute.xlu0 %3063 }
 0x245   : > { %v6755_v60 = vpop.permute.xlu1 %3270 }
 0x248   : > { %v6745_v15 = vpop.permute.xlu0 %3174 }
 0x249   : > { %v6759_v8 = vpop.permute.xlu1 %3382 }
 0x24c   : > { %v6749_v38 = vpop.permute.xlu0 %3286 }
 0x24d   : > { %v6763_v3 = vpop.permute.xlu1 %3061 }
 0x250   : > { %v6753_v62 = vpop.permute.xlu0 %3398 }
 0x251   : > { %v6767_v58 = vpop.permute.xlu1 %3172 }
 0x254   : > { %v6757_v57 = vpop.permute.xlu0 %3045 }
 0x255   : > { %v6771_v63 = vpop.permute.xlu1 %3284 }
 0x258   : > { %v6761_v40 = vpop.permute.xlu0 %3156 }
 0x259   : > { %v6779_v16 = vpop.permute.xlu1 %3396 }
 0x25a   : > { %9310 = vst [vmem:[#allocation112_spill] sm:$0xff] %v6779_v16 }
 0x25c   : > { %v6765_v35 = vpop.permute.xlu0 %3268 }
 0x25d   : > { %v6798_v39 = vpop.permute.xlu1 %3043 }
 0x25e   : > { %9312 = vst [vmem:[#allocation97_spill] sm:$0xff] %v6798_v39 }
 0x260   : > { %v6769_v10 = vpop.permute.xlu0 %3380 }
 0x261   : > { %9308 = vst [vmem:[#allocation98_spill] sm:$0xff] %v6769_v10  ;;  %v9348_v10 = vlaneseq }
 0x264   : > { %v6773_v46 = vpop.permute.xlu0 %3059 }
 0x265   : > { %9309 = vst [vmem:[#allocation126_spill] sm:$0xff] %v6773_v46 }
 0x268   : > { %v6786_v22 = vpop.permute.xlu0 %3170 }
 0x269   : > { %9311 = vst [vmem:[#allocation122_spill] sm:$0xff] %v6786_v22 }
 0x26c   : > { %v6805_v43 = vpop.permute.xlu0 %3282 }
 0x26d   : > { %9313 = vst [vmem:[#allocation91_spill] sm:$0xff] %v6805_v43 }
 0x270   : > { %v6822_v7 = vpop.permute.xlu0 %3394 }
 0x271   : > { %9315 = vst [vmem:[#allocation154_spill] sm:$0xff] %v6822_v7 }
 0x274   : > { %v6831_v50 = vpop.permute.xlu0 %3569 }
 0x275   : > { %9317 = vst [vmem:[#allocation156_spill] sm:$0xff] %v6831_v50 }
 0x2f0   : > { %v6775_v19 = vpop.f32.mrf.mxu1 }
 0x2f1   : > { %v2510_v54 = vmul.f32 %v6775_v19, %v6775_v19 }
 0x2f2   : > { %v6781_v24 = vpop.f32.mrf.mxu1 }
 0x2f3   : > { %v2509_v2 = vmul.f32 %v6781_v24, %v6781_v24  ;;  %2527 = vrot.lane.b32.xlu0 %v2510_v54, %s4515_s21 }
 0x2f4   : > { %v6788_v20 = vpop.f32.mrf.mxu1 }
 0x2f5   : > { %v2512_v55 = vmul.f32 %v6788_v20, %v6788_v20  ;;  %2525 = vrot.lane.b32.xlu1 %v2509_v2, %s4515_s21 }
 0x2f6   : > { %v6793_v52 = vpop.f32.mrf.mxu1 }
 0x2f7   : > { %v2511_v31 = vmul.f32 %v6793_v52, %v6793_v52  ;;  %2531 = vrot.lane.b32.xlu0 %v2512_v55, %s4515_s21  ;;  %v6814_v55 = vpop.permute.xlu1 %3154 }
 0x2f8   : > { %v6800_v23 = vpop.f32.mrf.mxu1  ;;  %9314 = vst [vmem:[#allocation153_spill] sm:$0xff] %v6814_v55 }
 0x2f9   : > { %v2514_v54 = vmul.f32 %v6800_v23, %v6800_v23  ;;  %2529 = vrot.lane.b32.xlu1 %v2511_v31, %s4515_s21 }
 0x2fa   : > { %v6807_v4 = vpop.f32.mrf.mxu1 }
 0x2fb   : > { %3260 = vrot.lane.b32.xlu0 %v6641_v59, %s4514_s20  ;;  %v2513_v37 = vmul.f32 %v6807_v4, %v6807_v4 }
 0x2fc   : > { %v6811_v2 = vpop.f32.mrf.mxu1 }
 0x2fd   : > { %2535 = vrot.lane.b32.xlu1 %v2514_v54, %s4515_s21  ;;  %v2516_v18 = vmul.f32 %v6811_v2, %v6811_v2  ;;  %v6828_v54 = vpop.permute.xlu1 %3266 }
 0x2fe   : > { %v6816_v17 = vpop.f32.mrf.mxu1  ;;  %9316 = vst [vmem:[#allocation155_spill] sm:$0xff] %v6828_v54 }
 0x2ff   : > { %v2515_v31 = vmul.f32 %v6816_v17, %v6816_v17 }
 0x301   : > { %2533 = vrot.lane.b32.xlu1 %v2513_v37, %s4515_s21  ;;  %2537 = vrot.lane.b32.xlu0 %v2515_v31, %s4515_s21  ;;  %v6837_v27 = vpop.permute.xlu1 %3378  ;;  %v6841_v37 = vpop.permute.xlu0 %3041 }
 0x302   : > { %9318 = vst [vmem:[#allocation157_spill] sm:$0xff] %v6837_v27  ;;  %9319 = vst [vmem:[#allocation158_spill] sm:$0xff] %v6841_v37 }
 0x305   : > { %2539 = vrot.lane.b32.xlu1 %v2516_v18, %s4515_s21  ;;  %3372 = vrot.lane.b32.xlu0 %v6611_v11, %s4515_s21  ;;  %v6847_v18 = vpop.permute.xlu1 %3553  ;;  %v6849_v31 = vpop.permute.xlu0 %3152 }
 0x306   : > { %9320 = vst [vmem:[#allocation159_spill] sm:$0xff] %v6847_v18  ;;  %9321 = vst [vmem:[#allocation160_spill] sm:$0xff] %v6849_v31 }
 0x309   : > { %3164 = vrot.lane.b32.xlu1 %v6719_v6, %s4513_s19  ;;  %3547 = vrot.lane.b32.xlu0 %v6563_v9, %s4516_s28  ;;  %v6855_v26 = vpop.permute.xlu1 %3057  ;;  %v6861_v37 = vpop.permute.xlu0 %3264 }
 0x30a   : > { %9322 = vst [vmem:[#allocation161_spill] sm:$0xff] %v6855_v26  ;;  %9323 = vst [vmem:[#allocation162_spill] sm:$0xff] %v6861_v37 }
 0x30d   : > { %3276 = vrot.lane.b32.xlu1 %v6644_v47, %s4514_s20  ;;  %3659 = vrot.lane.b32.xlu0 %v6544_v5, %s4517_s22  ;;  %v6867_v31 = vpop.permute.xlu1 %3168  ;;  %v6869_v18 = vpop.permute.xlu0 %3376 }
 0x30e   : > { %9324 = vst [vmem:[#allocation163_spill] sm:$0xff] %v6867_v31  ;;  %9325 = vst [vmem:[#allocation164_spill] sm:$0xff] %v6869_v18 }
 0x311   : > { %3388 = vrot.lane.b32.xlu1 %v6614_v12, %s4515_s21  ;;  %3771 = vrot.lane.b32.xlu0 %v6523_v51, %s4518_s24  ;;  %v6875_v26 = vpop.permute.xlu1 %3280 }
 0x312   : > { %9326 = vst [vmem:[#allocation165_spill] sm:$0xff] %v6875_v26 }
 0x315   : > { %3563 = vrot.lane.b32.xlu1 %v6566_v30, %s4516_s28  ;;  %3883 = vrot.lane.b32.xlu0 %v6512_v0, %s4519_s18  ;;  %v6881_v0 = vpop.permute.xlu0 %3551  ;;  %v6887_v18 = vpop.permute.xlu1 %3392 }
 0x316   : > { %9327 = vst [vmem:[#allocation166_spill] sm:$0xff] %v6881_v0  ;;  %9328 = vst [vmem:[#allocation167_spill] sm:$0xff] %v6887_v18 }
 0x319   : > { %3675 = vrot.lane.b32.xlu1 %v6541_v36, %s4517_s22  ;;  %3258 = vrot.lane.b32.xlu0 %v6703_v45, %s4514_s20  ;;  %v6889_v37 = vpop.permute.xlu0 %3663 }
 0x31a   : > { %9329 = vst [vmem:[#allocation168_spill] sm:$0xff] %v6889_v37 }
 0x31d   : > { %3787 = vrot.lane.b32.xlu1 %v6526_v28, %s4518_s24  ;;  %3370 = vrot.lane.b32.xlu0 %v6641_v59, %s4515_s21  ;;  %v6901_v0 = vpop.permute.xlu0 %3039 }
 0x31e   : > { %9331 = vst [vmem:[#allocation170_spill] sm:$0xff] %v6901_v0 }
 0x321   : > { %3899 = vrot.lane.b32.xlu1 %v6509_v41, %s4519_s18  ;;  %3545 = vrot.lane.b32.xlu0 %v6588_v29, %s4516_s28  ;;  %v6895_v41 = vpop.permute.xlu1 %3567  ;;  %v6909_v18 = vpop.permute.xlu0 %3150 }
 0x322   : > { %9330 = vst [vmem:[#allocation169_spill] sm:$0xff] %v6895_v41  ;;  %9333 = vst [vmem:[#allocation172_spill] sm:$0xff] %v6909_v18 }
 0x325   : > { %3274 = vrot.lane.b32.xlu1 %v6719_v6, %s4514_s20  ;;  %3657 = vrot.lane.b32.xlu0 %v6563_v9, %s4517_s22  ;;  %v6907_v37 = vpop.permute.xlu1 %3679 }
 0x326   : > { %9332 = vst [vmem:[#allocation171_spill] sm:$0xff] %v6907_v37 }
 0x329   : > { %3386 = vrot.lane.b32.xlu1 %v6644_v47, %s4515_s21  ;;  %3769 = vrot.lane.b32.xlu0 %v6544_v5, %s4518_s24  ;;  %v6915_v41 = vpop.permute.xlu1 %3055 }
 0x32a   : > { %9334 = vst [vmem:[#allocation173_spill] sm:$0xff] %v6915_v41 }
 0x32d   : > { %3561 = vrot.lane.b32.xlu1 %v6585_v1, %s4516_s28  ;;  %3881 = vrot.lane.b32.xlu0 %v6523_v51, %s4519_s18  ;;  %v6921_v51 = vpop.permute.xlu0 %3262  ;;  %v6927_v18 = vpop.permute.xlu1 %3166 }
 0x32e   : > { %9335 = vst [vmem:[#allocation174_spill] sm:$0xff] %v6921_v51  ;;  %9336 = vst [vmem:[#allocation175_spill] sm:$0xff] %v6927_v18 }
 0x331   : > { %3673 = vrot.lane.b32.xlu1 %v6566_v30, %s4517_s22  ;;  %3368 = vrot.lane.b32.xlu0 %v6703_v45, %s4515_s21  ;;  %v6929_v0 = vpop.permute.xlu0 %3374  ;;  %v6933_v41 = vpop.permute.xlu1 %3278 }
 0x332   : > { %9337 = vst [vmem:[#allocation176_spill] sm:$0xff] %v6929_v0  ;;  %9338 = vst [vmem:[#allocation177_spill] sm:$0xff] %v6933_v41 }
 0x335   : > { %3785 = vrot.lane.b32.xlu1 %v6541_v36, %s4518_s24  ;;  %3543 = vrot.lane.b32.xlu0 %v6611_v11, %s4516_s28  ;;  %v6939_v51 = vpop.permute.xlu1 %3390 }
 0x336   : > { %9340 = vst [vmem:[#allocation179_spill] sm:$0xff] %v6939_v51 }
 0x339   : > { %3897 = vrot.lane.b32.xlu1 %v6526_v28, %s4519_s18  ;;  %3655 = vrot.lane.b32.xlu0 %v6588_v29, %s4517_s22  ;;  %v6937_v28 = vpop.permute.xlu0 %3549  ;;  %v6943_v26 = vpop.permute.xlu1 %3565 }
 0x33a   : > { %9339 = vst [vmem:[#allocation178_spill] sm:$0xff] %v6937_v28  ;;  %9342 = vst [vmem:[#allocation181_spill] sm:$0xff] %v6943_v26 }
 0x33d   : > { %3384 = vrot.lane.b32.xlu1 %v6719_v6, %s4515_s21  ;;  %3767 = vrot.lane.b32.xlu0 %v6563_v9, %s4518_s24  ;;  %v6941_v37 = vpop.permute.xlu0 %3661  ;;  %v6947_v18 = vpop.permute.xlu1 %3677  ;;  %s510_s21 = scalar_lea.vmem %s8837_s10, %s4361_s29 }
 0x33e   : > { %9341 = vst [vmem:[#allocation180_spill] sm:$0xff] %v6941_v37  ;;  %9344 = vst [vmem:[#allocation183_spill] sm:$0xff] %v6947_v18 }
 0x341   : > { %3559 = vrot.lane.b32.xlu1 %v6614_v12, %s4516_s28  ;;  %v6945_v31 = vpop.permute.xlu0 %3773  ;;  %v6951_v50 = vpop.permute.xlu1 %3789 }
 0x342   : > { %9343 = vst [vmem:[#allocation182_spill] sm:$0xff] %v6945_v31  ;;  %9346 = vst [vmem:[#allocation185_spill] sm:$0xff] %v6951_v50 }
 0x345   : > { %3671 = vrot.lane.b32.xlu1 %v6585_v1, %s4517_s22  ;;  %v6949_v0 = vpop.permute.xlu0 %3037  ;;  %v6953_v27 = vpop.permute.xlu1 %3053 }
 0x346   : > { %9345 = vst [vmem:[#allocation184_spill] sm:$0xff] %v6949_v0  ;;  %9347 = vst [vmem:[#allocation186_spill] sm:$0xff] %v6953_v27 }
 0x349   : > { %v3149_v41 = vpop.permute.xlu0 %3148 }
 0x365   : > { %v2528_v7 = vpop.permute.xlu0 %2527 }
 0x366   : > { %v2550_v28 = vsub.f32 %v6775_v19, %v2528_v7 }
 0x367   : > { %v2526_v54 = vpop.permute.xlu1 %2525 }
 0x368   : > { %v2558_v51 = vmax.f32 %v2550_v28, 0.0  ;;  %v2549_v37 = vsub.f32 %v6781_v24, %v2526_v54 }
 0x369   : > { %v2532_v43 = vpop.permute.xlu0 %2531 }
 0x36a   : > { %v2566_v26 = vadd.f32 1e-05, %v2558_v51  ;;  %v2557_v22 = vmax.f32 %v2549_v37, 0.0  ;;  %v2552_v31 = vsub.f32 %v6788_v20, %v2532_v43 }
 0x36b   : > { %v2530_v18 = vpop.permute.xlu1 %2529 }
 0x36c   : > { %4454 = vrsqrt.f32 %v2566_v26  ;;  %v2565_v0 = vadd.f32 1e-05, %v2557_v22  ;;  %v2560_v55 = vmax.f32 %v2552_v31, 0.0  ;;  %v2551_v50 = vsub.f32 %v6793_v52, %v2530_v18 }
 0x36d   : > { %v3261_v46 = vpop.permute.xlu0 %3260 }
 0x36e   : > { %4456 = vrsqrt.f32 %v2565_v0  ;;  %v2568_v27 = vadd.f32 1e-05, %v2560_v55  ;;  %v2559_v39 = vmax.f32 %v2551_v50, 0.0 }
 0x36f   : > { %v2536_v7 = vpop.permute.xlu1 %2535 }
 0x370   : > { %4458 = vrsqrt.f32 %v2568_v27  ;;  %v2567_v28 = vadd.f32 1e-05, %v2559_v39  ;;  %v2554_v54 = vsub.f32 %v6800_v23, %v2536_v7  ;;  %v6964_v7 = vand.u32 127, %v9348_v10 }
 0x372   : > { %4460 = vrsqrt.f32 %v2567_v28  ;;  %v2562_v51 = vmax.f32 %v2554_v54, 0.0  ;;  %9349 = vst [vmem:[#allocation187_spill] sm:$0xff] %v6964_v7  ;;  %vm3180_vm4 = vcmp.lt.s32.totalorder %v6964_v7, 16  ;;  %vm3290_vm5 = vcmp.lt.s32.totalorder %v6964_v7, 15 }
 0x373   : > { %v2538_v37 = vpop.permute.xlu0 %2537  ;;  %v2534_v16 = vpop.permute.xlu1 %2533  ;;  %vm3400_vm6 = vcmp.lt.s32.totalorder %v6964_v7, 1  ;;  %vm3571_vm7 = vcmp.lt.s32.totalorder %v6964_v7, 127  ;;  %vm3681_vm8 = vcmp.lt.s32.totalorder %v6964_v7, 113  ;;  %vm3791_vm9 = vcmp.lt.s32.totalorder %v6964_v7, 112 }
 0x374   : > { %v2570_v43 = vadd.f32 1e-05, %v2562_v51  ;;  %v2555_v26 = vsub.f32 %v6816_v17, %v2538_v37  ;;  %v2553_v22 = vsub.f32 %v6807_v4, %v2534_v16  ;;  %vm3901_vm10 = vcmp.lt.s32.totalorder %v6964_v7, 111 }
 0x375   : > { %vm3071_vm11 = vcmp.lt.s32.totalorder %v6964_v7, 17 }
 0x376   : > { %4462 = vrsqrt.f32 %v2570_v43  ;;  %v2561_v18 = vmax.f32 %v2553_v22, 0.0  ;;  %v2563_v31 = vmax.f32 %v2555_v26, 0.0 }
 0x377   : > { %v2540_v0 = vpop.permute.xlu1 %2539  ;;  %v3373_v55 = vpop.permute.xlu0 %3372 }
 0x378   : > { %v2569_v50 = vadd.f32 1e-05, %v2561_v18  ;;  %v2556_v27 = vsub.f32 %v6811_v2, %v2540_v0  ;;  %v2571_v51 = vadd.f32 1e-05, %v2563_v31 }
 0x379   : > { %v4455_v39 = vpop.eup %4454 }
 0x37a   : > { %v2564_v28 = vmax.f32 %v2556_v27, 0.0  ;;  %2599 = vrot.lane.b32.xlu0 %v4455_v39, %s4516_s28  ;;  %4464 = vrsqrt.f32 %v2569_v50 }
 0x37b   : > { %v4457_v54 = vpop.eup %4456  ;;  %v3165_v16 = vpop.permute.xlu1 %3164 }
 0x37c   : > { %v3548_v37 = vpop.permute.xlu0 %3547  ;;  %v2572_v43 = vadd.f32 1e-05, %v2564_v28  ;;  %v6970_v26 = vsel %vm3180_vm4, %v3149_v41, %v3165_v16  ;;  %v6974_v22 = vsel %vm3180_vm4, %v3165_v16, %v3149_v41  ;;  %2597 = vrot.lane.b32.xlu1 %v4457_v54, %s4516_s28 }
 0x37d   : > { %v4459_v10 = vpop.eup %4458 }
 0x37e   : > { %4466 = vrsqrt.f32 %v2572_v43  ;;  %2603 = vrot.lane.b32.xlu0 %v4459_v10, %s4516_s28 }
 0x37f   : > { %v4461_v18 = vpop.eup %4460  ;;  %4468 = vrsqrt.f32 %v2571_v51  ;;  %v3277_v31 = vpop.permute.xlu1 %3276 }
 0x380   : > { %v3660_v0 = vpop.permute.xlu0 %3659  ;;  %2601 = vrot.lane.b32.xlu1 %v4461_v18, %s4516_s28  ;;  %v6982_v50 = vsel %vm3290_vm5, %v3261_v46, %v3277_v31  ;;  %v6986_v41 = vsel %vm3290_vm5, %v3277_v31, %v3261_v46 }
 0x383   : > { %v4463_v27 = vpop.eup %4462  ;;  %v3389_v39 = vpop.permute.xlu1 %3388 }
 0x384   : > { %v3772_v28 = vpop.permute.xlu0 %3771  ;;  %2607 = vrot.lane.b32.xlu0 %v4463_v27, %s4516_s28  ;;  %v6992_v54 = vsel %vm3400_vm6, %v3373_v55, %v3389_v39  ;;  %v6996_v51 = vsel %vm3400_vm6, %v3389_v39, %v3373_v55 }
 0x385   : > { %9350 = vst [vmem:[#allocation188_spill] sm:$0xff] %v6992_v54 }
 0x387   : > { %v3564_v16 = vpop.permute.xlu1 %3563  ;;  %v4465_v43 = vpop.eup %4464 }
 0x388   : > { %v3884_v46 = vpop.permute.xlu0 %3883  ;;  %v7001_v10 = vsel %vm3571_vm7, %v3548_v37, %v3564_v16  ;;  %v7005_v18 = vsel %vm3571_vm7, %v3564_v16, %v3548_v37  ;;  %2605 = vrot.lane.b32.xlu1 %v4465_v43, %s4516_s28 }
 0x389   : > { %9351 = vst [vmem:[#allocation189_spill] sm:$0xff] %v7001_v10 }
 0x38b   : > { %v4467_v31 = vpop.eup %4466  ;;  %v3676_v55 = vpop.permute.xlu1 %3675 }
 0x38c   : > { %v3259_v27 = vpop.permute.xlu0 %3258  ;;  %v4469_v39 = vpop.eup %4468  ;;  %2611 = vrot.lane.b32.xlu0 %v4467_v31, %s4516_s28  ;;  %v7012_v54 = vsel %vm3681_vm8, %v3660_v0, %v3676_v55  ;;  %v7016_v10 = vsel %vm3681_vm8, %v3676_v55, %v3660_v0 }
 0x38d   : > { %9352 = vst [vmem:[#allocation190_spill] sm:$0xff] %v7016_v10  ;;  %2609 = vrot.lane.b32.xlu1 %v4469_v39, %s4516_s28  ;;  %v2631_v10 = vld [vmem:[%s8832_s5 + $0x10] sm:$0xff] }
 0x38f   : > { %v3788_v37 = vpop.permute.xlu1 %3787 }
 0x390   : > { %v3371_v16 = vpop.permute.xlu0 %3370  ;;  %v7022_v43 = vsel %vm3791_vm9, %v3772_v28, %v3788_v37  ;;  %v7026_v31 = vsel %vm3791_vm9, %v3788_v37, %v3772_v28  ;;  %3879 = vrot.lane.b32.xlu0 %v6544_v5, %s4519_s18 }
 0x391   : > { %9353 = vst [vmem:[#allocation191_spill] sm:$0xff] %v7022_v43  ;;  %9354 = vst [vmem:[#allocation192_spill] sm:$0xff] %v7026_v31  ;;  %3783 = vrot.lane.b32.xlu1 %v6566_v30, %s4518_s24 }
 0x393   : > { %v3900_v0 = vpop.permute.xlu1 %3899 }
 0x394   : > { %v3546_v55 = vpop.permute.xlu0 %3545  ;;  %v7035_v39 = vsel %vm3901_vm10, %v3884_v46, %v3900_v0  ;;  %v7039_v43 = vsel %vm3901_vm10, %v3900_v0, %v3884_v46  ;;  %3541 = vrot.lane.b32.xlu0 %v6641_v59, %s4516_s28 }
 0x395   : > { %9355 = vst [vmem:[#allocation193_spill] sm:$0xff] %v7035_v39  ;;  %9356 = vst [vmem:[#allocation194_spill] sm:$0xff] %v7039_v43  ;;  %3895 = vrot.lane.b32.xlu1 %v6541_v36, %s4519_s18  ;;  %v2629_v39 = vld [vmem:[%s8832_s5] sm:$0xff] }
 0x397   : > { %v3275_v5 = vpop.permute.xlu1 %3274 }
 0x398   : > { %v7047_v28 = vsel %vm3290_vm5, %v3259_v27, %v3275_v5  ;;  %v7051_v37 = vsel %vm3290_vm5, %v3275_v5, %v3259_v27  ;;  %3653 = vrot.lane.b32.xlu0 %v6611_v11, %s4517_s22  ;;  %v3658_v46 = vpop.permute.xlu0 %3657 }
 0x399   : > { %9357 = vst [vmem:[#allocation195_spill] sm:$0xff] %v7047_v28  ;;  %9358 = vst [vmem:[#allocation196_spill] sm:$0xff] %v7051_v37  ;;  %3557 = vrot.lane.b32.xlu1 %v6644_v47, %s4516_s28 }
 0x39b   : > { %v3387_v0 = vpop.permute.xlu1 %3386 }
 0x39c   : > { %v7059_v36 = vsel %vm3400_vm6, %v3371_v16, %v3387_v0  ;;  %v7063_v43 = vsel %vm3400_vm6, %v3387_v0, %v3371_v16  ;;  %3765 = vrot.lane.b32.xlu0 %v6588_v29, %s4518_s24  ;;  %v3770_v5 = vpop.permute.xlu0 %3769 }
 0x39d   : > { %9359 = vst [vmem:[#allocation197_spill] sm:$0xff] %v7059_v36  ;;  %9360 = vst [vmem:[#allocation198_spill] sm:$0xff] %v7063_v43  ;;  %3669 = vrot.lane.b32.xlu1 %v6614_v12, %s4517_s22  ;;  %v2583_v43 = vld [vmem:[%s8831_s4 + $0x10] sm:$0xff] }
 0x39f   : > { %v3562_v27 = vpop.permute.xlu1 %3561 }
 0x3a0   : > { %v7071_v28 = vsel %vm3571_vm7, %v3546_v55, %v3562_v27  ;;  %v7075_v37 = vsel %vm3571_vm7, %v3562_v27, %v3546_v55  ;;  %3877 = vrot.lane.b32.xlu0 %v6563_v9, %s4519_s18  ;;  %v3882_v55 = vpop.permute.xlu0 %3881 }
 0x3a1   : > { %9361 = vst [vmem:[#allocation199_spill] sm:$0xff] %v7071_v28  ;;  %9362 = vst [vmem:[#allocation200_spill] sm:$0xff] %v7075_v37  ;;  %3781 = vrot.lane.b32.xlu1 %v6585_v1, %s4518_s24 }
 0x3a3   : > { %v3674_v16 = vpop.permute.xlu1 %3673 }
 0x3a4   : > { %v7083_v0 = vsel %vm3681_vm8, %v3658_v46, %v3674_v16  ;;  %v7087_v36 = vsel %vm3681_vm8, %v3674_v16, %v3658_v46  ;;  %3539 = vrot.lane.b32.xlu0 %v6703_v45, %s4516_s28  ;;  %v3369_v46 = vpop.permute.xlu0 %3368 }
 0x3a5   : > { %9363 = vst [vmem:[#allocation201_spill] sm:$0xff] %v7083_v0  ;;  %9364 = vst [vmem:[#allocation202_spill] sm:$0xff] %v7087_v36  ;;  %3893 = vrot.lane.b32.xlu1 %v6566_v30, %s4519_s18 }
 0x3a7   : > { %v3786_v9 = vpop.permute.xlu1 %3785 }
 0x3a8   : > { %v7095_v27 = vsel %vm3791_vm9, %v3770_v5, %v3786_v9  ;;  %v7099_v37 = vsel %vm3791_vm9, %v3786_v9, %v3770_v5  ;;  %3651 = vrot.lane.b32.xlu0 %v6641_v59, %s4517_s22 }
 0x3a9   : > { %9365 = vst [vmem:[#allocation203_spill] sm:$0xff] %v7095_v27  ;;  %9366 = vst [vmem:[#allocation204_spill] sm:$0xff] %v7099_v37  ;;  %3555 = vrot.lane.b32.xlu1 %v6719_v6, %s4516_s28 }
 0x3ab   : > { %v3898_v16 = vpop.permute.xlu1 %3897 }
 0x3ac   : > { %v7107_v30 = vsel %vm3901_vm10, %v3882_v55, %v3898_v16  ;;  %v7111_v36 = vsel %vm3901_vm10, %v3898_v16, %v3882_v55  ;;  %3763 = vrot.lane.b32.xlu0 %v6611_v11, %s4518_s24 }
 0x3ad   : > { %9367 = vst [vmem:[#allocation205_spill] sm:$0xff] %v7107_v30  ;;  %9368 = vst [vmem:[#allocation206_spill] sm:$0xff] %v7111_v36  ;;  %3667 = vrot.lane.b32.xlu1 %v6644_v47, %s4517_s22  ;;  %v3544_v30 = vpop.permute.xlu0 %3543 }
 0x3af   : > { %v3385_v5 = vpop.permute.xlu1 %3384 }
 0x3b0   : > { %v7119_v9 = vsel %vm3400_vm6, %v3369_v46, %v3385_v5  ;;  %v7123_v37 = vsel %vm3400_vm6, %v3385_v5, %v3369_v46 }
 0x3b1   : > { %9369 = vst [vmem:[#allocation207_spill] sm:$0xff] %v7119_v9  ;;  %9370 = vst [vmem:[#allocation208_spill] sm:$0xff] %v7123_v37  ;;  %v3656_v36 = vpop.permute.xlu0 %3655  ;;  %v2582_v9 = vld [vmem:[%s8831_s4 + $0x8] sm:$0xff] }
 0x3b3   : > { %v3560_v27 = vpop.permute.xlu1 %3559 }
 0x3b4   : > { %v7127_v55 = vsel %vm3571_vm7, %v3544_v30, %v3560_v27  ;;  %v7131_v16 = vsel %vm3571_vm7, %v3560_v27, %v3544_v30  ;;  %v2581_v27 = vld [vmem:[%s8831_s4] sm:$0xff] }
 0x3b5   : > { %9371 = vst [vmem:[#allocation209_spill] sm:$0xff] %v7127_v55  ;;  %9372 = vst [vmem:[#allocation210_spill] sm:$0xff] %v7131_v16  ;;  %v3768_v5 = vpop.permute.xlu0 %3767 }
 0x3b7   : > { %v3672_v0 = vpop.permute.xlu1 %3671 }
 0x3b8   : > { %v7135_v28 = vsel %vm3681_vm8, %v3656_v36, %v3672_v0  ;;  %v7139_v46 = vsel %vm3681_vm8, %v3672_v0, %v3656_v36  ;;  %v2630_v0 = vld [vmem:[%s8832_s5 + $0x8] sm:$0xff] }
 0x3b9   : > { %9373 = vst [vmem:[#allocation211_spill] sm:$0xff] %v7135_v28  ;;  %9374 = vst [vmem:[#allocation212_spill] sm:$0xff] %v7139_v46  ;;  %v2584_v28 = vld [vmem:[%s8831_s4 + $0x18] sm:$0xff] }
 0x3ec   : > { %v2600_v55 = vpop.permute.xlu0 %2599 }
 0x3ed   : > { %v2622_v30 = vmul.f32 %v2600_v55, %v2582_v9 }
 0x3ee   : > { %v2598_v16 = vpop.permute.xlu1 %2597 }
 0x3ef   : > { %v2638_v37 = vmul.f32 %v6775_v19, %v2622_v30  ;;  %v2621_v36 = vmul.f32 %v2598_v16, %v2581_v27  ;;  %2660 = vperm.xlu1 %4444, %v2622_v30  }
 0x3f0   : > { %v2604_v46 = vpop.permute.xlu0 %2603 }
 0x3f1   : > { %v2637_v9 = vmul.f32 %v2621_v36, %v6781_v24  ;;  %v2624_v55 = vmul.f32 %v2604_v46, %v2584_v28  ;;  %2655 = vperm.xlu0 %4443, %v2621_v36   ;;  %v2646_v16 = vsub.f32 %v2630_v0, %v2638_v37  ;;  %v2586_v24 = vld [vmem:[%s8831_s4 + $0x28] sm:$0xff]  ;;  %v2632_v36 = vld [vmem:[%s8832_s5 + $0x18] sm:$0xff] }
 0x3f2   : > { %v2602_v19 = vpop.permute.xlu1 %2601 }
 0x3f3   : > { %v2623_v27 = vmul.f32 %v2602_v19, %v2583_v43  ;;  %2670 = vperm.xlu1 %4444, %v2624_v55   ;;  %v2645_v30 = vsub.f32 %v2629_v39, %v2637_v9  ;;  %v2585_v43 = vld [vmem:[%s8831_s4 + $0x20] sm:$0xff]  ;;  %v2640_v39 = vmul.f32 %v6788_v20, %v2624_v55  ;;  %v2588_v9 = vld [vmem:[%s8831_s4 + $0x38] sm:$0xff]  ;;  %v2587_v55 = vld [vmem:[%s8831_s4 + $0x30] sm:$0xff] }
 0x3f4   : > { %v2633_v20 = vld [vmem:[%s8832_s5 + $0x20] sm:$0xff] }
 0x3f5   : > { %v2639_v31 = vmul.f32 %v2623_v27, %v6793_v52  ;;  %2844 = vperm.xlu0 %4443, %v2646_v16  }
 0x3f6   : > { %v2608_v28 = vpop.permute.xlu0 %2607 }
 0x3f7   : > { %2839 = vperm.xlu1 %4444, %v2645_v30   ;;  %v2647_v46 = vsub.f32 %v2631_v10, %v2639_v31  ;;  %v2626_v52 = vmul.f32 %v2608_v28, %v2586_v24  ;;  %v2648_v31 = vsub.f32 %v2632_v36, %v2640_v39  ;;  %v2634_v39 = vld [vmem:[%s8832_s5 + $0x28] sm:$0xff] }
 0x3f9   : > { %2665 = vperm.xlu0 %4443, %v2623_v27   ;;  %v2642_v24 = vmul.f32 %v6800_v23, %v2626_v52 }
 0x3fa   : > { %v2606_v37 = vpop.permute.xlu1 %2605 }
 0x3fb   : > { %2849 = vperm.xlu1 %4444, %v2647_v46   ;;  %v2625_v0 = vmul.f32 %v2606_v37, %v2585_v43  ;;  %v2636_v37 = vld [vmem:[%s8832_s5 + $0x38] sm:$0xff] }
 0x3fd   : > { %2680 = vperm.xlu0 %4443, %v2626_v52   ;;  %v2641_v19 = vmul.f32 %v2625_v0, %v6807_v4  ;;  %v2650_v52 = vsub.f32 %v2634_v39, %v2642_v24 }
 0x3fe   : > { %v2612_v10 = vpop.permute.xlu0 %2611 }
 0x3ff   : > { %v2628_v16 = vmul.f32 %v2612_v10, %v2588_v9  ;;  %v2610_v27 = vpop.permute.xlu1 %2609  ;;  %v2649_v28 = vsub.f32 %v2633_v20, %v2641_v19  ;;  %v2635_v19 = vld [vmem:[%s8832_s5 + $0x30] sm:$0xff] }
 0x400   : > { %v2627_v43 = vmul.f32 %v2610_v27, %v2587_v55 }
 0x401   : > { %2854 = vperm.xlu0 %4443, %v2648_v31   ;;  %2690 = vperm.xlu1 %4444, %v2628_v16   ;;  %v2644_v46 = vmul.f32 %v6811_v2, %v2628_v16 }
 0x402   : > { %v3880_v30 = vpop.permute.xlu0 %3879  ;;  %v2643_v10 = vmul.f32 %v2627_v43, %v6816_v17 }
 0x403   : > { %v3784_v4 = vpop.permute.xlu1 %3783  ;;  %v2652_v9 = vsub.f32 %v2636_v37, %v2644_v46 }
 0x404   : > { %v7195_v36 = vsel %vm3791_vm9, %v3768_v5, %v3784_v4  ;;  %v7199_v23 = vsel %vm3791_vm9, %v3784_v4, %v3768_v5  ;;  %v2651_v27 = vsub.f32 %v2635_v19, %v2643_v10 }
 0x405   : > { %2675 = vperm.xlu0 %4443, %v2625_v0   ;;  %2859 = vperm.xlu1 %4444, %v2649_v28  }
 0x406   : > { %v3542_v2 = vpop.permute.xlu0 %3541 }
 0x407   : > { %v3896_v31 = vpop.permute.xlu1 %3895 }
 0x408   : > { %v7207_v16 = vsel %vm3901_vm10, %v3880_v30, %v3896_v31  ;;  %v7211_v5 = vsel %vm3901_vm10, %v3896_v31, %v3880_v30 }
 0x409   : > { %2864 = vperm.xlu0 %4443, %v2650_v52   ;;  %2874 = vperm.xlu1 %4444, %v2652_v9  }
 0x40a   : > { %v3654_v0 = vpop.permute.xlu0 %3653 }
 0x40b   : > { %v3558_v20 = vpop.permute.xlu1 %3557 }
 0x40c   : > { %v7215_v17 = vsel %vm3571_vm7, %v3542_v2, %v3558_v20  ;;  %v7219_v55 = vsel %vm3571_vm7, %v3558_v20, %v3542_v2  ;;  %v3196_v20 = vsel %vm3180_vm4, %v6725_v42, %v6731_v13 }
 0x40d   : > { %9375 = vst [vmem:[#allocation213_spill] sm:$0xff] %v7219_v55  ;;  %2685 = vperm.xlu0 %4443, %v2627_v43   ;;  %2869 = vperm.xlu1 %4444, %v2651_v27   ;;  %v9577_v55 = vld [vmem:[#allocation25_spill] sm:$0xff] }
 0x40e   : > { %v3766_v24 = vpop.permute.xlu0 %3765 }
 0x40f   : > { %v3670_v28 = vpop.permute.xlu1 %3669 }
 0x410   : > { %v7223_v30 = vsel %vm3681_vm8, %v3654_v0, %v3670_v28  ;;  %v7227_v46 = vsel %vm3681_vm8, %v3670_v28, %v3654_v0  ;;  %v3087_v0 = vsel %vm3071_vm11, %v6723_v48, %v6727_v49  ;;  %v3078_v28 = vsel %vm3071_vm11, %v6729_v32, %v6735_v61 }
 0x411   : > { %9376 = vst [vmem:[#allocation214_spill] sm:$0xff] %v7227_v46  ;;  %3779 = vrot.lane.b32.xlu1 %v6614_v12, %s4518_s24  ;;  %3875 = vrot.lane.b32.xlu0 %v6588_v29, %s4519_s18 }
 0x412   : > { %v3878_v39 = vpop.permute.xlu0 %3877 }
 0x413   : > { %v3782_v4 = vpop.permute.xlu1 %3781 }
 0x414   : > { %v7235_v43 = vsel %vm3791_vm9, %v3766_v24, %v3782_v4  ;;  %v7239_v37 = vsel %vm3791_vm9, %v3782_v4, %v3766_v24  ;;  %v3188_v24 = vsel %vm3180_vm4, %v6731_v13, %v6725_v42  ;;  %v3187_v42 = vsel %vm3180_vm4, %v6733_v34, %v6739_v25  ;;  %v4349_v13 = vld [vmem:[%s8835_s8 + $0x2] ss:$8 sm:$0x3] }
 0x415   : > { %9377 = vst [vmem:[#allocation215_spill] sm:$0xff] %v7239_v37  ;;  %3891 = vrot.lane.b32.xlu1 %v6585_v1, %s4519_s18  ;;  %3649 = vrot.lane.b32.xlu0 %v6703_v45, %s4517_s22  ;;  %v9569_v37 = vld [vmem:[#allocation46_spill] sm:$0xff] }
 0x416   : > { %v3540_v9 = vpop.permute.xlu0 %3539 }
 0x417   : > { %v3894_v2 = vpop.permute.xlu1 %3893 }
 0x418   : > { %v7247_v29 = vsel %vm3901_vm10, %v3878_v39, %v3894_v2  ;;  %v7251_v52 = vsel %vm3901_vm10, %v3894_v2, %v3878_v39 }
 0x419   : > { %9378 = vst [vmem:[#allocation216_spill] sm:$0xff] %v7247_v29  ;;  %9379 = vst [vmem:[#allocation217_spill] sm:$0xff] %v7251_v52  ;;  %3665 = vrot.lane.b32.xlu1 %v6719_v6, %s4517_s22  ;;  %3761 = vrot.lane.b32.xlu0 %v6641_v59, %s4518_s24  ;;  %v9566_v52 = vld [vmem:[#allocation20_spill] sm:$0xff] }
 0x41b   : > { %v3556_v1 = vpop.permute.xlu1 %3555 }
 0x41c   : > { %v7259_v10 = vsel %vm3571_vm7, %v3540_v9, %v3556_v1  ;;  %v7263_v31 = vsel %vm3571_vm7, %v3556_v1, %v3540_v9  ;;  %v4350_v9 = vld [vmem:[%s8835_s8 + $0x3] ss:$8 sm:$0x3] }
 0x41d   : > { %3777 = vrot.lane.b32.xlu1 %v6644_v47, %s4518_s24  ;;  %3873 = vrot.lane.b32.xlu0 %v6611_v11, %s4519_s18  ;;  %v3088_v11 = vld [vmem:[%s8835_s8] ss:$8 sm:$0x3] }
 0x421   : > { %3889 = vrot.lane.b32.xlu1 %v6614_v12, %s4519_s18  ;;  %3759 = vrot.lane.b32.xlu0 %v6703_v45, %s4518_s24  ;;  %v4348_v12 = vld [vmem:[%s8835_s8 + $0x1] ss:$8 sm:$0x3] }
 0x422   : > { %v7308_v27 = vrot.slane %v4348_v12, %v9273_v21 }
 0x424   : > { %v7362_v1 = vmul.f32 %v7308_v27, %v3187_v42 }
 0x425   : > { %3775 = vrot.lane.b32.xlu1 %v6719_v6, %s4518_s24  ;;  %3871 = vrot.lane.b32.xlu0 %v6641_v59, %s4519_s18  ;;  %v9380_v59 = vld [vmem:[#allocation4_spill] sm:$0xff] }
 0x426   : > { %v7291_v19 = vrot.slane %v3088_v11, %v9380_v59  ;;  %9388 = vst [vmem:[#allocation224_spill] sm:$0xff] %v7362_v1  ;;  %v9429_v1 = vld [vmem:[#allocation163_spill] sm:$0xff] }
 0x428   : > { %v7338_v4 = vmul.f32 %v7291_v19, %v3087_v0  ;;  %v3306_v0 = vsel %vm3290_vm5, %v6743_v33, %v6737_v44 }
 0x429   : > { %3887 = vrot.lane.b32.xlu1 %v6644_v47, %s4519_s18  ;;  %3869 = vrot.lane.b32.xlu0 %v6703_v45, %s4519_s18  ;;  %v7294_v47 = vrot.slane %v3088_v11, %v9273_v21  ;;  %v7297_v45 = vrot.slane %v4348_v12, %v9380_v59  ;;  %v7365_v11 = vrot.slane %v4349_v13, %v9380_v59 }
 0x42a   : > { %9381 = vst [vmem:[#allocation4_spill] sm:$0xff] %v7338_v4  ;;  %v7368_v12 = vrot.slane %v4349_v13, %v9273_v21  ;;  %v3076_v13 = vsel %vm3071_vm11, %v6757_v57, %v6763_v3  ;;  %v9449_v4 = vld [vmem:[#allocation172_spill] sm:$0xff] }
 0x42b   : > { %v7421_v42 = vmul.f32 %v7365_v11, %v3306_v0 }
 0x42d   : > { %3885 = vrot.lane.b32.xlu1 %v6719_v6, %s4519_s18  ;;  %v3079_v6 = vsel %vm3071_vm11, %v6727_v49, %v6723_v48  ;;  %v3086_v48 = vsel %vm3071_vm11, %v6735_v61, %v6729_v32  ;;  %v3195_v49 = vsel %vm3180_vm4, %v6739_v25, %v6733_v34  ;;  %v7344_v32 = vmul.f32 %v7297_v45, %v3196_v20 }
 0x42e   : > { %v7341_v39 = vmul.f32 %v7294_v47, %v3079_v6  ;;  %v7347_v61 = vmul.f32 %v7308_v27, %v3188_v24  ;;  %v7350_v2 = vmul.f32 %v7291_v19, %v3086_v48  ;;  %v7353_v34 = vmul.f32 %v7294_v47, %v3078_v28  ;;  %9389 = vst [vmem:[#allocation225_spill] sm:$0xff] %v7421_v42 }
 0x42f   : > { %9383 = vst [vmem:[#allocation219_spill] sm:$0xff] %v7344_v32  ;;  %v7356_v25 = vmul.f32 %v7297_v45, %v3195_v49  ;;  %v3298_v6 = vsel %vm3290_vm5, %v6737_v44, %v6743_v33  ;;  %v3077_v20 = vsel %vm3071_vm11, %v6747_v56, %v6741_v14  ;;  %v3085_v24 = vsel %vm3071_vm11, %v6741_v14, %v6747_v56 }
 0x430   : > { %9382 = vst [vmem:[#allocation218_spill] sm:$0xff] %v7341_v39  ;;  %9384 = vst [vmem:[#allocation220_spill] sm:$0xff] %v7347_v61  ;;  %v3186_v28 = vsel %vm3180_vm4, %v6751_v53, %v6745_v15  ;;  %v3194_v44 = vsel %vm3180_vm4, %v6745_v15, %v6751_v53  ;;  %v3305_v33 = vsel %vm3290_vm5, %v6749_v38, %v6755_v60  ;;  %v9473_v61 = vld [vmem:[#allocation186_spill] sm:$0xff] }
 0x431   : > { %9385 = vst [vmem:[#allocation221_spill] sm:$0xff] %v7350_v2  ;;  %9386 = vst [vmem:[#allocation222_spill] sm:$0xff] %v7353_v34  ;;  %v7399_v48 = vrot.slane %v4350_v9, %v9380_v59  ;;  %v7402_v14 = vrot.slane %v4350_v9, %v9273_v21  ;;  %v3297_v56 = vsel %vm3290_vm5, %v6755_v60, %v6749_v38 }
 0x432   : > { %9387 = vst [vmem:[#allocation223_spill] sm:$0xff] %v7356_v25  ;;  %v3408_v15 = vsel %vm3400_vm6, %v6759_v8, %v6753_v62  ;;  %v3416_v53 = vsel %vm3400_vm6, %v6753_v62, %v6759_v8  ;;  %v3084_v49 = vsel %vm3071_vm11, %v6763_v3, %v6757_v57  ;;  %v7424_v60 = vmul.f32 %v7368_v12, %v3298_v6  ;;  %v4352_v8 = vld [vmem:[%s8835_s8 + $0x5] ss:$8 sm:$0x3] }
 0x433   : > { %v7427_v38 = vmul.f32 %v7291_v19, %v3085_v24  ;;  %v7437_v62 = vmul.f32 %v7294_v47, %v3077_v20  ;;  %v7440_v9 = vmul.f32 %v7297_v45, %v3194_v44  ;;  %v7443_v6 = vmul.f32 %v7308_v27, %v3186_v28  ;;  %v4353_v28 = vld [vmem:[%s8835_s8 + $0x6] ss:$8 sm:$0x3] }
 0x434   : > { %9390 = vst [vmem:[#allocation226_spill] sm:$0xff] %v7424_v60  ;;  %v7446_v0 = vmul.f32 %v7365_v11, %v3305_v33  ;;  %v7449_v24 = vmul.f32 %v7368_v12, %v3297_v56  ;;  %v7452_v3 = vmul.f32 %v7399_v48, %v3416_v53  ;;  %v7455_v57 = vmul.f32 %v7402_v14, %v3408_v15  ;;  %v9472_v60 = vld [vmem:[#allocation184_spill] sm:$0xff] }
 0x435   : > { %9391 = vst [vmem:[#allocation227_spill] sm:$0xff] %v7427_v38  ;;  %9392 = vst [vmem:[#allocation228_spill] sm:$0xff] %v7437_v62  ;;  %v7458_v20 = vmul.f32 %v7291_v19, %v3084_v49  ;;  %v7464_v44 = vmul.f32 %v7294_v47, %v3076_v13  ;;  %v3185_v33 = vsel %vm3180_vm4, %v6761_v40, %v6767_v58  ;;  %v9401_v13 = vld [vmem:[#allocation98_spill] sm:$0xff] }
 0x436   : > { %9393 = vst [vmem:[#allocation229_spill] sm:$0xff] %v7440_v9  ;;  %9394 = vst [vmem:[#allocation230_spill] sm:$0xff] %v7443_v6  ;;  %v3193_v56 = vsel %vm3180_vm4, %v6767_v58, %v6761_v40  ;;  %v7475_v15 = vrot.slane %v4352_v8, %v9380_v59  ;;  %v3296_v53 = vsel %vm3290_vm5, %v6765_v35, %v6771_v63  ;;  %v9404_v9 = vld [vmem:[#allocation97_spill] sm:$0xff]  ;;  %v9405_v38 = vld [vmem:[#allocation126_spill] sm:$0xff] }
 0x437   : > { %9395 = vst [vmem:[#allocation231_spill] sm:$0xff] %v7446_v0  ;;  %9396 = vst [vmem:[#allocation232_spill] sm:$0xff] %v7449_v24  ;;  %v3304_v49 = vsel %vm3290_vm5, %v6771_v63, %v6765_v35  ;;  %v7490_v58 = vrot.slane %v4352_v8, %v9273_v21  ;;  %v3083_v6 = vsel %vm3071_vm11, %v9405_v38, %v9404_v9  ;;  %v9411_v0 = vld [vmem:[#allocation122_spill] sm:$0xff]  ;;  %v9428_v24 = vld [vmem:[#allocation160_spill] sm:$0xff] }
 0x438   : > { %9397 = vst [vmem:[#allocation233_spill] sm:$0xff] %v7452_v3  ;;  %9398 = vst [vmem:[#allocation234_spill] sm:$0xff] %v7455_v57  ;;  %v7501_v63 = vrot.slane %v4353_v28, %v9380_v59  ;;  %v7504_v35 = vrot.slane %v4353_v28, %v9273_v21  ;;  %v7507_v62 = vmul.f32 %v7297_v45, %v3193_v56  ;;  %v9447_v3 = vld [vmem:[#allocation173_spill] sm:$0xff] }
 0x439   : > { %9399 = vst [vmem:[#allocation235_spill] sm:$0xff] %v7458_v20  ;;  %9400 = vst [vmem:[#allocation236_spill] sm:$0xff] %v7464_v44  ;;  %v9402_v20 = vld [vmem:[#allocation112_spill] sm:$0xff]  ;;  %v7510_v8 = vmul.f32 %v7308_v27, %v3185_v33  ;;  %v7521_v2 = vmul.f32 %v7365_v11, %v3304_v49  ;;  %v7524_v28 = vmul.f32 %v7368_v12, %v3296_v53  ;;  %v9417_v49 = vld [vmem:[#allocation155_spill] sm:$0xff] }
 0x43a   : > { %v3415_v44 = vsel %vm3400_vm6, %v9402_v20, %v9401_v13  ;;  %9403 = vst [vmem:[#allocation98_spill] sm:$0xff] %v7490_v58  ;;  %v3407_v40 = vsel %vm3400_vm6, %v9401_v13, %v9402_v20  ;;  %9406 = vst [vmem:[#allocation112_spill] sm:$0xff] %v7501_v63  ;;  %v3075_v20 = vsel %vm3071_vm11, %v9404_v9, %v9405_v38  ;;  %v9410_v13 = vld [vmem:[#allocation153_spill] sm:$0xff] }
 0x43b   : > { %9407 = vst [vmem:[#allocation97_spill] sm:$0xff] %v7504_v35  ;;  %9408 = vst [vmem:[#allocation126_spill] sm:$0xff] %v7507_v62  ;;  %v3192_v25 = vsel %vm3180_vm4, %v9411_v0, %v9410_v13  ;;  %v7527_v56 = vmul.f32 %v7399_v48, %v3415_v44  ;;  %v3184_v33 = vsel %vm3180_vm4, %v9410_v13, %v9411_v0  ;;  %v9416_v62 = vld [vmem:[#allocation91_spill] sm:$0xff]  ;;  %v9420_v13 = vld [vmem:[#allocation157_spill] sm:$0xff] }
 0x43c   : > { %9409 = vst [vmem:[#allocation237_spill] sm:$0xff] %v7510_v8  ;;  %9412 = vst [vmem:[#allocation153_spill] sm:$0xff] %v7521_v2  ;;  %v7534_v38 = vmul.f32 %v7402_v14, %v3407_v40  ;;  %v7537_v9 = vmul.f32 %v7291_v19, %v3083_v6  ;;  %v3295_v53 = vsel %vm3290_vm5, %v9417_v49, %v9416_v62  ;;  %v9419_v40 = vld [vmem:[#allocation154_spill] sm:$0xff] }
 0x43d   : > { %9413 = vst [vmem:[#allocation122_spill] sm:$0xff] %v7524_v28  ;;  %9414 = vst [vmem:[#allocation238_spill] sm:$0xff] %v7527_v56  ;;  %v3303_v44 = vsel %vm3290_vm5, %v9416_v62, %v9417_v49  ;;  %v7548_v8 = vmul.f32 %v7294_v47, %v3075_v20  ;;  %v7551_v0 = vmul.f32 %v7297_v45, %v3192_v25  ;;  %v4354_v62 = vld [vmem:[%s8835_s8 + $0x7] ss:$8 sm:$0x3]  ;;  %v9422_v49 = vld [vmem:[#allocation156_spill] sm:$0xff] }
 0x43e   : > { %9415 = vst [vmem:[#allocation239_spill] sm:$0xff] %v7534_v38  ;;  %v3406_v6 = vsel %vm3400_vm6, %v9420_v13, %v9419_v40  ;;  %v3414_v2 = vsel %vm3400_vm6, %v9419_v40, %v9420_v13  ;;  %v7565_v20 = vmul.f32 %v7308_v27, %v3184_v33  ;;  %v9423_v25 = vld [vmem:[#allocation159_spill] sm:$0xff]  ;;  %v9424_v56 = vld [vmem:[#allocation158_spill] sm:$0xff]  ;;  %v9425_v38 = vld [vmem:[#allocation161_spill] sm:$0xff]  ;;  %v7580_v13 = vmul.f32 %v7365_v11, %v3303_v44 }
 0x43f   : > { %9418 = vst [vmem:[#allocation91_spill] sm:$0xff] %v7548_v8  ;;  %v3579_v8 = vsel %vm3571_vm7, %v9423_v25, %v9422_v49  ;;  %v3587_v28 = vsel %vm3571_vm7, %v9422_v49, %v9423_v25  ;;  %v3082_v40 = vsel %vm3071_vm11, %v9425_v38, %v9424_v56  ;;  %v7583_v33 = vmul.f32 %v7368_v12, %v3295_v53 }
 0x440   : > { %9421 = vst [vmem:[#allocation155_spill] sm:$0xff] %v7565_v20  ;;  %9426 = vst [vmem:[#allocation154_spill] sm:$0xff] %v7580_v13  ;;  %v3074_v20 = vsel %vm3071_vm11, %v9424_v56, %v9425_v38  ;;  %v3191_v49 = vsel %vm3180_vm4, %v9429_v1, %v9428_v24  ;;  %v7594_v25 = vmul.f32 %v7399_v48, %v3414_v2 }
 0x441   : > { %9427 = vst [vmem:[#allocation157_spill] sm:$0xff] %v7583_v33  ;;  %v7597_v34 = vmul.f32 %v7402_v14, %v3406_v6  ;;  %v3183_v53 = vsel %vm3180_vm4, %v9428_v24, %v9429_v1  ;;  %v7604_v44 = vrot.slane %v4354_v62, %v9380_v59  ;;  %v7607_v56 = vmul.f32 %v7475_v15, %v3579_v8  ;;  %v9437_v24 = vld [vmem:[#allocation165_spill] sm:$0xff]  ;;  %v9438_v33 = vld [vmem:[#allocation162_spill] sm:$0xff] }
 0x442   : > { %9430 = vst [vmem:[#allocation156_spill] sm:$0xff] %v7594_v25  ;;  %v7610_v38 = vmul.f32 %v7490_v58, %v3587_v28  ;;  %v7613_v2 = vmul.f32 %v7291_v19, %v3082_v40  ;;  %v7616_v6 = vrot.slane %v4354_v62, %v9273_v21  ;;  %v7619_v13 = vmul.f32 %v7294_v47, %v3074_v20  ;;  %v9440_v62 = vld [vmem:[#allocation167_spill] sm:$0xff]  ;;  %v9441_v25 = vld [vmem:[#allocation164_spill] sm:$0xff] }
 0x443   : > { %9431 = vst [vmem:[#allocation159_spill] sm:$0xff] %v7597_v34  ;;  %9432 = vst [vmem:[#allocation158_spill] sm:$0xff] %v7604_v44  ;;  %v7622_v1 = vmul.f32 %v7297_v45, %v3191_v49  ;;  %v3294_v8 = vsel %vm3290_vm5, %v9438_v33, %v9437_v24  ;;  %v3302_v28 = vsel %vm3290_vm5, %v9437_v24, %v9438_v33  ;;  %v9443_v34 = vld [vmem:[#allocation166_spill] sm:$0xff]  ;;  %v9445_v24 = vld [vmem:[#allocation168_spill] sm:$0xff] }
 0x444   : > { %9433 = vst [vmem:[#allocation161_spill] sm:$0xff] %v7607_v56  ;;  %9434 = vst [vmem:[#allocation160_spill] sm:$0xff] %v7610_v38  ;;  %v7633_v40 = vmul.f32 %v7308_v27, %v3183_v53  ;;  %v3405_v20 = vsel %vm3400_vm6, %v9441_v25, %v9440_v62  ;;  %v3413_v49 = vsel %vm3400_vm6, %v9440_v62, %v9441_v25  ;;  %v9444_v53 = vld [vmem:[#allocation171_spill] sm:$0xff]  ;;  %v9446_v62 = vld [vmem:[#allocation170_spill] sm:$0xff] }
 0x445   : > { %9435 = vst [vmem:[#allocation163_spill] sm:$0xff] %v7616_v6  ;;  %9436 = vst [vmem:[#allocation240_spill] sm:$0xff] %v7619_v13  ;;  %v9442_v13 = vld [vmem:[#allocation169_spill] sm:$0xff]  ;;  %v3697_v25 = vsel %vm3681_vm8, %v9444_v53, %v9445_v24  ;;  %v3081_v42 = vsel %vm3071_vm11, %v9447_v3, %v9446_v62  ;;  %v7664_v32 = vmul.f32 %v7365_v11, %v3302_v28  ;;  %v9450_v38 = vld [vmem:[#allocation175_spill] sm:$0xff] }
 0x446   : > { %9439 = vst [vmem:[#allocation165_spill] sm:$0xff] %v7633_v40  ;;  %v3578_v56 = vsel %vm3571_vm7, %v9443_v34, %v9442_v13  ;;  %v3586_v33 = vsel %vm3571_vm7, %v9442_v13, %v9443_v34  ;;  %v3689_v40 = vsel %vm3681_vm8, %v9445_v24, %v9444_v53  ;;  %v7667_v34 = vmul.f32 %v7368_v12, %v3294_v8 }
 0x447   : > { %v3073_v13 = vsel %vm3071_vm11, %v9446_v62, %v9447_v3  ;;  %v3190_v53 = vsel %vm3180_vm4, %v9450_v38, %v9449_v4  ;;  %v7678_v24 = vmul.f32 %v7399_v48, %v3413_v49  ;;  %v7681_v57 = vmul.f32 %v7402_v14, %v3405_v20 }
 0x448   : > { %9448 = vst [vmem:[#allocation162_spill] sm:$0xff] %v7667_v34  ;;  %v7684_v28 = vmul.f32 %v7475_v15, %v3578_v56  ;;  %v3182_v8 = vsel %vm3180_vm4, %v9449_v4, %v9450_v38  ;;  %v7691_v3 = vmul.f32 %v7490_v58, %v3586_v33  ;;  %v7694_v62 = vmul.f32 %v7501_v63, %v3689_v40  ;;  %v9461_v4 = vld [vmem:[#allocation174_spill] sm:$0xff] }
 0x449   : > { %9451 = vst [vmem:[#allocation167_spill] sm:$0xff] %v7678_v24  ;;  %9452 = vst [vmem:[#allocation164_spill] sm:$0xff] %v7681_v57  ;;  %v7697_v49 = vmul.f32 %v7504_v35, %v3697_v25  ;;  %v7700_v20 = vmul.f32 %v7291_v19, %v3081_v42  ;;  %v7703_v56 = vmul.f32 %v7294_v47, %v3073_v13  ;;  %v9460_v24 = vld [vmem:[#allocation177_spill] sm:$0xff]  ;;  %v9463_v42 = vld [vmem:[#allocation179_spill] sm:$0xff] }
 0x44a   : > { %9453 = vst [vmem:[#allocation169_spill] sm:$0xff] %v7684_v28  ;;  %9454 = vst [vmem:[#allocation166_spill] sm:$0xff] %v7691_v3  ;;  %v7706_v34 = vmul.f32 %v7297_v45, %v3190_v53  ;;  %v3293_v38 = vsel %vm3290_vm5, %v9461_v4, %v9460_v24  ;;  %v3301_v40 = vsel %vm3290_vm5, %v9460_v24, %v9461_v4  ;;  %v9464_v25 = vld [vmem:[#allocation176_spill] sm:$0xff]  ;;  %v9466_v57 = vld [vmem:[#allocation178_spill] sm:$0xff] }
 0x44b   : > { %9455 = vst [vmem:[#allocation171_spill] sm:$0xff] %v7694_v62  ;;  %9456 = vst [vmem:[#allocation168_spill] sm:$0xff] %v7697_v49  ;;  %v7717_v33 = vmul.f32 %v7308_v27, %v3182_v8  ;;  %v3404_v13 = vsel %vm3400_vm6, %v9464_v25, %v9463_v42  ;;  %v3412_v53 = vsel %vm3400_vm6, %v9463_v42, %v9464_v25  ;;  %v9467_v8 = vld [vmem:[#allocation183_spill] sm:$0xff]  ;;  %v9468_v4 = vld [vmem:[#allocation180_spill] sm:$0xff] }
 0x44c   : > { %9457 = vst [vmem:[#allocation170_spill] sm:$0xff] %v7700_v20  ;;  %9458 = vst [vmem:[#allocation173_spill] sm:$0xff] %v7703_v56  ;;  %v9465_v56 = vld [vmem:[#allocation181_spill] sm:$0xff]  ;;  %v3696_v42 = vsel %vm3681_vm8, %v9467_v8, %v9468_v4  ;;  %v9470_v3 = vld [vmem:[#allocation182_spill] sm:$0xff]  ;;  %v7748_v49 = vmul.f32 %v7365_v11, %v3301_v40  ;;  %v7765_v40 = vmul.f32 %v7399_v48, %v3412_v53 }
 0x44d   : > { %9459 = vst [vmem:[#allocation172_spill] sm:$0xff] %v7706_v34  ;;  %9462 = vst [vmem:[#allocation175_spill] sm:$0xff] %v7717_v33  ;;  %v3577_v28 = vsel %vm3571_vm7, %v9466_v57, %v9465_v56  ;;  %v3585_v24 = vsel %vm3571_vm7, %v9465_v56, %v9466_v57  ;;  %v3688_v33 = vsel %vm3681_vm8, %v9468_v4, %v9467_v8  ;;  %v9469_v25 = vld [vmem:[#allocation185_spill] sm:$0xff] }
 0x44e   : > { %v3799_v62 = vsel %vm3791_vm9, %v9470_v3, %v9469_v25  ;;  %v7751_v57 = vmul.f32 %v7368_v12, %v3293_v38  ;;  %v3807_v56 = vsel %vm3791_vm9, %v9469_v25, %v9470_v3  ;;  %v3080_v8 = vsel %vm3071_vm11, %v9473_v61, %v9472_v60  ;;  %v4355_v4 = vld [vmem:[%s8835_s8 + $0x10] ss:$8 sm:$0x3] }
 0x44f   : > { %v7768_v38 = vmul.f32 %v7402_v14, %v3404_v13  ;;  %v3072_v3 = vsel %vm3071_vm11, %v9472_v60, %v9473_v61  ;;  %v7778_v25 = vmul.f32 %v7490_v58, %v3585_v24  ;;  %v7781_v39 = vmul.f32 %v7501_v63, %v3688_v33  ;;  %v9584_v34 = vld [vmem:[#allocation93_spill] sm:$0xff] }
 0x450   : > { %9471 = vst [vmem:[#allocation177_spill] sm:$0xff] %v7751_v57  ;;  %v7771_v57 = vmul.f32 %v7475_v15, %v3577_v28  ;;  %v7784_v53 = vmul.f32 %v7504_v35, %v3696_v42  ;;  %v7787_v13 = vmul.f32 %v7604_v44, %v3799_v62  ;;  %v7792_v28 = vmul.f32 %v7616_v6, %v3807_v56  ;;  %v9486_v56 = vld [vmem:[#allocation188_spill] sm:$0xff] }
 0x451   : > { %9474 = vst [vmem:[#allocation174_spill] sm:$0xff] %v7768_v38  ;;  %9476 = vst [vmem:[#allocation176_spill] sm:$0xff] %v7778_v25  ;;  %v7789_v38 = vpop.permute.xlu0 %3651  ;;  %v7798_v61 = vrot.slane %v4355_v4, %v9380_v59  ;;  %v7801_v60 = vrot.slane %v4355_v4, %v9273_v21  ;;  %v7804_v33 = vmul.f32 %v7294_v47, %v3072_v3  ;;  %v7850_v3 = vpop.permute.xlu1 %3667  ;;  %v9509_v25 = vld [vmem:[#allocation199_spill] sm:$0xff] }
 0x452   : > { %9475 = vst [vmem:[#allocation179_spill] sm:$0xff] %v7771_v57  ;;  %9477 = vst [vmem:[#allocation181_spill] sm:$0xff] %v7781_v39  ;;  %v7795_v57 = vmul.f32 %v7291_v19, %v3080_v8  ;;  %v7808_v62 = vmul.f32 %v7297_v45, %v6974_v22  ;;  %v7812_v24 = vmul.f32 %v7308_v27, %v6970_v26  ;;  %v9488_v45 = vld [vmem:[#allocation189_spill] sm:$0xff]  ;;  %v9492_v27 = vld [vmem:[#allocation190_spill] sm:$0xff] }
 0x453   : > { %9478 = vst [vmem:[#allocation178_spill] sm:$0xff] %v7784_v53  ;;  %9479 = vst [vmem:[#allocation183_spill] sm:$0xff] %v7787_v13  ;;  %v7816_v19 = vmul.f32 %v7365_v11, %v6986_v41  ;;  %v7820_v42 = vmul.f32 %v7368_v12, %v6982_v50  ;;  %v7824_v47 = vmul.f32 %v7399_v48, %v6996_v51  ;;  %v9494_v8 = vld [vmem:[#allocation191_spill] sm:$0xff] }
 0x454   : > { %9480 = vst [vmem:[#allocation180_spill] sm:$0xff] %v7789_v38  ;;  %9481 = vst [vmem:[#allocation185_spill] sm:$0xff] %v7792_v28  ;;  %v7828_v22 = vmul.f32 %v7402_v14, %v9486_v56  ;;  %v7832_v26 = vmul.f32 %v7475_v15, %v9488_v45  ;;  %v7836_v41 = vmul.f32 %v7490_v58, %v7005_v18  ;;  %v9497_v56 = vld [vmem:[#allocation192_spill] sm:$0xff]  ;;  %v9499_v18 = vld [vmem:[#allocation193_spill] sm:$0xff] }
 0x455   : > { %9482 = vst [vmem:[#allocation182_spill] sm:$0xff] %v7798_v61  ;;  %9483 = vst [vmem:[#allocation184_spill] sm:$0xff] %v7801_v60  ;;  %v7840_v50 = vmul.f32 %v7501_v63, %v7012_v54  ;;  %v7844_v51 = vmul.f32 %v7504_v35, %v9492_v27  ;;  %v7848_v4 = vmul.f32 %v7604_v44, %v9494_v8  ;;  %v9501_v54 = vld [vmem:[#allocation194_spill] sm:$0xff]  ;;  %v9503_v27 = vld [vmem:[#allocation196_spill] sm:$0xff] }
 0x456   : > { %9484 = vst [vmem:[#allocation186_spill] sm:$0xff] %v7816_v19  ;;  %9485 = vst [vmem:[#allocation241_spill] sm:$0xff] %v7820_v42  ;;  %v7854_v45 = vmul.f32 %v7616_v6, %v9497_v56  ;;  %v7858_v42 = vmul.f32 %v7798_v61, %v9499_v18  ;;  %v9504_v8 = vld [vmem:[#allocation195_spill] sm:$0xff]  ;;  %v9574_v38 = vld [vmem:[#allocation64_spill] sm:$0xff] }
 0x457   : > { %9487 = vst [vmem:[#allocation188_spill] sm:$0xff] %v7828_v22  ;;  %9489 = vst [vmem:[#allocation189_spill] sm:$0xff] %v7832_v26  ;;  %v7862_v22 = vmul.f32 %v7801_v60, %v9501_v54  ;;  %v7866_v26 = vmul.f32 %v7365_v11, %v9503_v27  ;;  %v7882_v54 = vmul.f32 %v7475_v15, %v9509_v25  ;;  %v4351_v11 = vld [vmem:[%s8835_s8 + $0x4] ss:$8 sm:$0x3] }
 0x458   : > { %9490 = vst [vmem:[#allocation242_spill] sm:$0xff] %v7836_v41  ;;  %9491 = vst [vmem:[#allocation243_spill] sm:$0xff] %v7840_v50  ;;  %v7870_v41 = vmul.f32 %v7368_v12, %v9504_v8  ;;  %v9505_v50 = vld [vmem:[#allocation198_spill] sm:$0xff]  ;;  %v9511_v12 = vld [vmem:[#allocation200_spill] sm:$0xff] }
 0x459   : > { %9493 = vst [vmem:[#allocation190_spill] sm:$0xff] %v7844_v51  ;;  %9495 = vst [vmem:[#allocation191_spill] sm:$0xff] %v7848_v4  ;;  %v7874_v56 = vmul.f32 %v7399_v48, %v9505_v50  ;;  %v9507_v51 = vld [vmem:[#allocation197_spill] sm:$0xff]  ;;  %v7884_v4 = vpop.permute.xlu0 %3763  ;;  %v7891_v27 = vmul.f32 %v7490_v58, %v9511_v12  ;;  %v9517_v25 = vld [vmem:[#allocation203_spill] sm:$0xff] }
 0x45a   : > { %9496 = vst [vmem:[#allocation244_spill] sm:$0xff] %v7850_v3  ;;  %9498 = vst [vmem:[#allocation192_spill] sm:$0xff] %v7854_v45  ;;  %v7878_v18 = vmul.f32 %v7402_v14, %v9507_v51  ;;  %v9513_v50 = vld [vmem:[#allocation201_spill] sm:$0xff]  ;;  %v9515_v51 = vld [vmem:[#allocation202_spill] sm:$0xff]  ;;  %v7903_v39 = vmul.f32 %v7604_v44, %v9517_v25 }
 0x45b   : > { %9500 = vst [vmem:[#allocation193_spill] sm:$0xff] %v7858_v42  ;;  %9502 = vst [vmem:[#allocation194_spill] sm:$0xff] %v7862_v22  ;;  %v7895_v8 = vmul.f32 %v7501_v63, %v9513_v50  ;;  %v9519_v45 = vld [vmem:[#allocation204_spill] sm:$0xff]  ;;  %v9521_v42 = vld [vmem:[#allocation205_spill] sm:$0xff] }
 0x45c   : > { %9506 = vst [vmem:[#allocation196_spill] sm:$0xff] %v7874_v56  ;;  %9508 = vst [vmem:[#allocation195_spill] sm:$0xff] %v7878_v18  ;;  %v7899_v18 = vmul.f32 %v7504_v35, %v9515_v51  ;;  %v7907_v53 = vmul.f32 %v7616_v6, %v9519_v45  ;;  %v7911_v12 = vmul.f32 %v7798_v61, %v9521_v42  ;;  %v9527_v25 = vld [vmem:[#allocation207_spill] sm:$0xff]  ;;  %v9528_v45 = vld [vmem:[#allocation209_spill] sm:$0xff] }
 0x45d   : > { %9510 = vst [vmem:[#allocation198_spill] sm:$0xff] %v7884_v4  ;;  %9512 = vst [vmem:[#allocation197_spill] sm:$0xff] %v7891_v27  ;;  %v9523_v27 = vld [vmem:[#allocation206_spill] sm:$0xff]  ;;  %v9575_v3 = vld [vmem:[#allocation88_spill] sm:$0xff] }
 0x45e   : > { %9514 = vst [vmem:[#allocation199_spill] sm:$0xff] %v7895_v8  ;;  %9516 = vst [vmem:[#allocation200_spill] sm:$0xff] %v7899_v18  ;;  %v7915_v50 = vmul.f32 %v7801_v60, %v9523_v27  ;;  %v9525_v8 = vld [vmem:[#allocation208_spill] sm:$0xff]  ;;  %v9529_v42 = vld [vmem:[#allocation210_spill] sm:$0xff]  ;;  %v7936_v27 = vrot.slane %v4351_v11, %v9380_v59 }
 0x45f   : > { %9518 = vst [vmem:[#allocation201_spill] sm:$0xff] %v7903_v39  ;;  %9520 = vst [vmem:[#allocation202_spill] sm:$0xff] %v7907_v53  ;;  %v7919_v51 = vmul.f32 %v7399_v48, %v9525_v8  ;;  %v7925_v39 = vmul.f32 %v7402_v14, %v9527_v25  ;;  %v7929_v53 = vmul.f32 %v7475_v15, %v9528_v45  ;;  %v9532_v48 = vld [vmem:[#allocation211_spill] sm:$0xff]  ;;  %v9571_v56 = vld [vmem:[#allocation54_spill] sm:$0xff] }
 0x460   : > { %9522 = vst [vmem:[#allocation203_spill] sm:$0xff] %v7911_v12  ;;  %9524 = vst [vmem:[#allocation204_spill] sm:$0xff] %v7915_v50  ;;  %v7933_v12 = vmul.f32 %v7490_v58, %v9529_v42  ;;  %v7940_v8 = vmul.f32 %v7501_v63, %v9532_v48  ;;  %v9534_v50 = vld [vmem:[#allocation212_spill] sm:$0xff]  ;;  %v7948_v25 = vmul.f32 %v7604_v44, %v7195_v36  ;;  %v4470_v48 = vld [vmem:[%s6506_s17 + $0x20] sm:$0xff] }
 0x461   : > { %9531 = vst [vmem:[#allocation208_spill] sm:$0xff] %v7936_v27  ;;  %v7944_v14 = vmul.f32 %v7504_v35, %v9534_v50  ;;  %v7952_v45 = vmul.f32 %v7616_v6, %v7199_v23  ;;  %v7958_v42 = vmul.f32 %v7798_v61, %v7207_v16  ;;  %v7962_v50 = vmul.f32 %v7801_v60, %v7211_v5  ;;  %v9565_v60 = vld [vmem:[#allocation12_spill] sm:$0xff]  ;;  %v9567_v61 = vld [vmem:[#allocation43_spill] sm:$0xff]  ;;  %v9578_v19 = vld [vmem:[#allocation50_spill] sm:$0xff] }
 0x462   : > { %9530 = vst [vmem:[#allocation206_spill] sm:$0xff] %v7933_v12  ;;  %9533 = vst [vmem:[#allocation207_spill] sm:$0xff] %v7940_v8  ;;  %v7966_v36 = vmul.f32 %v4470_v48, %v7936_v27  ;;  %v7969_v12 = vrot.slane %v4351_v11, %v9273_v21  ;;  %v7973_v23 = vmul.f32 %v7475_v15, %v7215_v17  ;;  %v4472_v17 = vld [vmem:[%s6506_s17] sm:$0xff]  ;;  %v9570_v35 = vld [vmem:[#allocation51_spill] sm:$0xff] }
 0x463   : > { %9535 = vst [vmem:[#allocation209_spill] sm:$0xff] %v7944_v14  ;;  %9536 = vst [vmem:[#allocation210_spill] sm:$0xff] %v7948_v25  ;;  %v7977_v16 = vmul.f32 %v7501_v63, %v7223_v30  ;;  %v7981_v14 = vmul.f32 %v7604_v44, %v7235_v43  ;;  %v4471_v25 = vld [vmem:[%s6506_s17 + $0x30] sm:$0xff]  ;;  %v7991_v21 = vmul.f32 %v7475_v15, %v7259_v10  ;;  %v4473_v30 = vld [vmem:[%s6506_s17 + $0x8] sm:$0xff] }
 0x464   : > { %9537 = vst [vmem:[#allocation211_spill] sm:$0xff] %v7952_v45  ;;  %9539 = vst [vmem:[#allocation245_spill] sm:$0xff] %v7958_v42  ;;  %v7987_v48 = vmul.f32 %v4471_v25, %v7936_v27  ;;  %v7995_v11 = vmul.f32 %v4472_v17, %v7936_v27  ;;  %v7999_v45 = vmul.f32 %v4473_v30, %v7969_v12  ;;  %v4474_v43 = vld [vmem:[%s6506_s17 + $0x10] sm:$0xff]  ;;  %v9551_v10 = vld [vmem:[#allocation19_spill] sm:$0xff] }
 0x465   : > { %9540 = vst [vmem:[#allocation246_spill] sm:$0xff] %v7962_v50  ;;  %9541 = vst [vmem:[#allocation247_spill] sm:$0xff] %v7969_v12  ;;  %v8003_v42 = vmul.f32 %v4474_v43, %v7936_v27  ;;  %v8007_v25 = vmul.f32 %v7490_v58, %v7263_v31  ;;  %v9552_v17 = vld [vmem:[#allocation23_spill] sm:$0xff]  ;;  %v9576_v58 = vld [vmem:[#allocation24_spill] sm:$0xff] }
 0x466   : > { %9542 = vst [vmem:[#allocation248_spill] sm:$0xff] %v7973_v23  ;;  %9543 = vst [vmem:[#allocation249_spill] sm:$0xff] %v7981_v14  ;;  %v9554_v30 = vld [vmem:[#allocation47_spill] sm:$0xff]  ;;  %v9559_v23 = vld [vmem:[#allocation82_spill] sm:$0xff] }
 0x467   : > { %9545 = vst [vmem:[#allocation251_spill] sm:$0xff] %v7991_v21  ;;  %9546 = vst [vmem:[#allocation252_spill] sm:$0xff] %v7995_v11  ;;  %v9556_v43 = vld [vmem:[#allocation7_spill] sm:$0xff]  ;;  %v9581_v4 = vld [vmem:[#allocation96_spill] sm:$0xff] }
 0x468   : > { %9547 = vst [vmem:[#allocation253_spill] sm:$0xff] %v7999_v45  ;;  %9548 = vst [vmem:[#allocation254_spill] sm:$0xff] %v8003_v42  ;;  %v9557_v27 = vld [vmem:[#allocation55_spill] sm:$0xff]  ;;  %v9564_v42 = vld [vmem:[#allocation5_spill] sm:$0xff] }
 0x469   : > { %9549 = vst [vmem:[#allocation255_spill] sm:$0xff] %v8007_v25  ;;  %v9583_v14 = vld [vmem:[#allocation116_spill] sm:$0xff]  ;;  %v9587_v21 = vld [vmem:[#allocation10_spill] sm:$0xff]  ;;  %v9589_v11 = vld [vmem:[#allocation13_spill] sm:$0xff] }
 0x46a   : > { %v7921_v18 = vpop.permute.xlu1 %2660  ;;  %v9588_v45 = vld [vmem:[#allocation6_spill] sm:$0xff] }
 0x46b   : > { %9526 = vst [vmem:[#allocation205_spill] sm:$0xff] %v7921_v18  ;;  %v8013_v15 = vmul.f32 %v7921_v18, %v9551_v10  ;;  %v8017_v13 = vmul.f32 %v7921_v18, %v9552_v17  ;;  %v8021_v22 = vmul.f32 %v7921_v18, %v9554_v30  ;;  %v8027_v31 = vmul.f32 %v7921_v18, %v9557_v27  ;;  %v9561_v10 = vld [vmem:[#allocation90_spill] sm:$0xff] }
 0x46c   : > { %v7954_v59 = vpop.permute.xlu0 %2655  ;;  %v8031_v12 = vmul.f32 %v7921_v18, %v9559_v23  ;;  %v8035_v63 = vmul.f32 %v7921_v18, %v9561_v10  ;;  %v9568_v23 = vld [vmem:[#allocation28_spill] sm:$0xff]  ;;  %v9573_v18 = vld [vmem:[#allocation53_spill] sm:$0xff] }
 0x46d   : > { %9538 = vst [vmem:[#allocation212_spill] sm:$0xff] %v7954_v59  ;;  %9553 = vst [vmem:[#allocation19_spill] sm:$0xff] %v8017_v13  ;;  %v2693_v28 = vmul.f32 %v7954_v59, %v9556_v43  ;;  %v2694_v30 = vmul.f32 %v7954_v59, %v9564_v42  ;;  %v2695_v43 = vmul.f32 %v7954_v59, %v9565_v60  ;;  %v9572_v60 = vld [vmem:[#allocation30_spill] sm:$0xff] }
 0x46e   : > { %v7983_v5 = vpop.permute.xlu1 %2670  ;;  %9555 = vst [vmem:[#allocation23_spill] sm:$0xff] %v8021_v22  ;;  %9558 = vst [vmem:[#allocation47_spill] sm:$0xff] %v8027_v31  ;;  %v2696_v27 = vmul.f32 %v7954_v59, %v9566_v52  ;;  %v2697_v29 = vmul.f32 %v7954_v59, %v9567_v61  ;;  %v2698_v10 = vmul.f32 %v7954_v59, %v9569_v37  ;;  %v9582_v31 = vld [vmem:[#allocation80_spill] sm:$0xff]  ;;  %v9590_v13 = vld [vmem:[#allocation14_spill] sm:$0xff] }
 0x46f   : > { %9544 = vst [vmem:[#allocation250_spill] sm:$0xff] %v7983_v5  ;;  %9560 = vst [vmem:[#allocation7_spill] sm:$0xff] %v8031_v12  ;;  %v2747_v6 = vmul.f32 %v7983_v5, %v9568_v23  ;;  %v2699_v46 = vmul.f32 %v7954_v59, %v9570_v35  ;;  %v2700_v42 = vmul.f32 %v7954_v59, %v9571_v56  ;;  %v9579_v12 = vld [vmem:[#allocation61_spill] sm:$0xff] }
 0x470   : > { %v8009_v50 = vpop.permute.xlu0 %2844  ;;  %9562 = vst [vmem:[#allocation55_spill] sm:$0xff] %v8035_v63  ;;  %v2749_v52 = vmul.f32 %v7983_v5, %v9572_v60  ;;  %v2751_v61 = vmul.f32 %v7983_v5, %v9573_v18  ;;  %v2753_v23 = vmul.f32 %v7983_v5, %v9574_v38  ;;  %v2755_v37 = vmul.f32 %v7983_v5, %v9575_v3  ;;  %v9580_v18 = vld [vmem:[#allocation85_spill] sm:$0xff] }
 0x471   : > { %9550 = vst [vmem:[#allocation256_spill] sm:$0xff] %v8009_v50 }
 0x472   : > { %v8037_v17 = vpop.permute.xlu1 %2839 }
 0x473   : > { %9563 = vst [vmem:[#allocation82_spill] sm:$0xff] %v8037_v17 }
 0x474   : > { %v8055_v63 = vpop.permute.xlu0 %2665 }
 0x475   : > { %v2729_v35 = vmul.f32 %v8055_v63, %v9576_v58  ;;  %v2731_v56 = vmul.f32 %v8055_v63, %v9577_v55  ;;  %v2733_v44 = vmul.f32 %v8055_v63, %v9578_v19  ;;  %v2735_v60 = vmul.f32 %v8055_v63, %v9579_v12 }
 0x476   : > { %v8073_v7 = vpop.permute.xlu1 %2849  ;;  %v2737_v38 = vmul.f32 %v8055_v63, %v9580_v18  ;;  %v2739_v3 = vmul.f32 %v8055_v63, %v9581_v4  ;;  %v2757_v58 = vmul.f32 %v7983_v5, %v9582_v31  ;;  %v2759_v55 = vmul.f32 %v7983_v5, %v9583_v14  ;;  %v9586_v18 = vld [vmem:[#allocation111_spill] sm:$0xff] }
 0x477   : > { %v2741_v19 = vmul.f32 %v8055_v63, %v9584_v34  ;;  %v2913_v20 = vadd.f32 %v8073_v7, %v2729_v35  ;;  %v2915_v12 = vadd.f32 %v8073_v7, %v2731_v56  ;;  %v2917_v22 = vadd.f32 %v8073_v7, %v2733_v44 }
 0x478   : > { %v8088_v25 = vpop.permute.xlu0 %2680  ;;  %v2761_v4 = vmul.f32 %v7983_v5, %v9586_v18  ;;  %v2701_v31 = vmul.f32 %v7954_v59, %v9587_v21  ;;  %v2702_v14 = vmul.f32 %v7954_v59, %v9588_v45  ;;  %v2703_v34 = vmul.f32 %v7954_v59, %v9589_v11 }
 0x479   : > { %9585 = vst [vmem:[#allocation90_spill] sm:$0xff] %v8088_v25  ;;  %v2919_v35 = vadd.f32 %v8073_v7, %v2735_v60  ;;  %v3120_v56 = vmul.f32 %v7613_v2, %v2913_v20  ;;  %v3230_v44 = vmul.f32 %v7622_v1, %v2915_v12  ;;  %v2704_v25 = vmul.f32 %v7954_v59, %v9590_v13 }
 0x47a   : > { %v2921_v18 = vadd.f32 %v8073_v7, %v2737_v38  ;;  %v2877_v5 = vadd.f32 %v8037_v17, %v2693_v28  ;;  %v2878_v21 = vadd.f32 %v8037_v17, %v2694_v30  ;;  %v2879_v45 = vadd.f32 %v8037_v17, %v2695_v43 }
 0x47b   : > { %v2923_v8 = vadd.f32 %v8073_v7, %v2739_v3  ;;  %v2925_v11 = vadd.f32 %v8073_v7, %v2741_v19  ;;  %v3246_v60 = vadd.f32 %v3230_v44, %v3120_v56  ;;  %v3340_v2 = vmul.f32 %v7748_v49, %v2917_v22  ;;  %v9591_v49 = vld [vmem:[#allocation124_spill] sm:$0xff] }
 0x47c   : > { %v8110_v20 = vpop.permute.xlu0 %2854  ;;  %v8112_v1 = vpop.permute.xlu1 %2690  ;;  %v2880_v13 = vadd.f32 %v8037_v17, %v2696_v27  ;;  %v2881_v38 = vadd.f32 %v8037_v17, %v2697_v29  ;;  %v2882_v28 = vadd.f32 %v8037_v17, %v2698_v10  ;;  %v2883_v30 = vadd.f32 %v8037_v17, %v2699_v46 }
 0x47d   : > { %v3356_v43 = vadd.f32 %v3340_v2, %v3246_v60  ;;  %v3450_v3 = vmul.f32 %v7824_v47, %v2919_v35  ;;  %v2931_v19 = vadd.f32 %v8110_v20, %v2747_v6  ;;  %v2933_v12 = vadd.f32 %v8110_v20, %v2749_v52 }
 0x47e   : > { %v2743_v22 = vmul.f32 %v8055_v63, %v9591_v49  ;;  %v3511_v56 = vmul.f32 %v7966_v36, %v2921_v18  ;;  %v2935_v27 = vadd.f32 %v8110_v20, %v2751_v61  ;;  %v2884_v29 = vadd.f32 %v8037_v17, %v2700_v42  ;;  %v9595_v49 = vld [vmem:[#allocation253_spill] sm:$0xff] }
 0x47f   : > { %v3466_v44 = vadd.f32 %v3450_v3, %v3356_v43  ;;  %v3621_v10 = vmul.f32 %v7929_v53, %v2923_v8  ;;  %v3731_v46 = vmul.f32 %v7977_v16, %v2925_v11  ;;  %v2885_v47 = vadd.f32 %v8037_v17, %v2701_v31 }
 0x480   : > { %v8129_v35 = vpop.permute.xlu1 %2859  ;;  %v2937_v6 = vadd.f32 %v8110_v20, %v2753_v23  ;;  %v3122_v52 = vmul.f32 %v7537_v9, %v2931_v19  ;;  %v3232_v60 = vmul.f32 %v7551_v0, %v2933_v12  ;;  %v2886_v36 = vadd.f32 %v8037_v17, %v2702_v14 }
 0x481   : > { %v3527_v61 = vadd.f32 %v3511_v56, %v3466_v44  ;;  %v2939_v42 = vadd.f32 %v8110_v20, %v2755_v37  ;;  %v2887_v18 = vadd.f32 %v8037_v17, %v2703_v34  ;;  %v2888_v53 = vadd.f32 %v8037_v17, %v2704_v25 }
 0x482   : > { %v3248_v8 = vadd.f32 %v3232_v60, %v3122_v52  ;;  %v3342_v16 = vmul.f32 %v7664_v32, %v2935_v27  ;;  %v3116_v31 = vmul.f32 %v7795_v57, %v2877_v5  ;;  %v3117_v23 = vmul.f32 %v7804_v33, %v2878_v21  ;;  %v9596_v27 = vld [vmem:[#allocation251_spill] sm:$0xff]  ;;  %v9599_v52 = vld [vmem:[#allocation170_spill] sm:$0xff] }
 0x483   : > { %v3637_v11 = vadd.f32 %v3621_v10, %v3527_v61  ;;  %v2941_v9 = vadd.f32 %v8110_v20, %v2757_v58  ;;  %v3226_v0 = vmul.f32 %v7808_v62, %v2879_v45  ;;  %v3227_v14 = vmul.f32 %v7812_v24, %v2880_v13  ;;  %v9598_v10 = vld [vmem:[#allocation23_spill] sm:$0xff]  ;;  %v9600_v61 = vld [vmem:[#allocation172_spill] sm:$0xff] }
 0x484   : > { %v8144_v2 = vpop.permute.xlu1 %2874  ;;  %v2943_v37 = vadd.f32 %v8110_v20, %v2759_v55  ;;  %v3358_v34 = vadd.f32 %v3342_v16, %v3248_v8  ;;  %v3452_v25 = vmul.f32 %v7765_v40, %v2937_v6  ;;  %v3336_v32 = vmul.f32 %v7866_v26, %v2881_v38 }
 0x485   : > { %v3747_v43 = vadd.f32 %v3731_v46, %v3637_v11  ;;  %v3242_v57 = vadd.f32 %v3226_v0, %v3116_v31  ;;  %v3243_v5 = vadd.f32 %v3227_v14, %v3117_v23  ;;  %v3337_v33 = vmul.f32 %v7870_v41, %v2882_v28  ;;  %v9592_v41 = vld [vmem:[#allocation207_spill] sm:$0xff] }
 0x486   : > { %v2945_v58 = vadd.f32 %v8110_v20, %v2761_v4  ;;  %v3468_v21 = vadd.f32 %v3452_v25, %v3358_v34  ;;  %v3513_v62 = vmul.f32 %v7987_v48, %v2939_v42  ;;  %v3446_v24 = vmul.f32 %v7919_v51, %v2883_v30  ;;  %v9593_v4 = vld [vmem:[#allocation19_spill] sm:$0xff]  ;;  %v9594_v51 = vld [vmem:[#allocation252_spill] sm:$0xff]  ;;  %v9608_v34 = vld [vmem:[#allocation158_spill] sm:$0xff] }
 0x487   : > { %v3352_v45 = vadd.f32 %v3336_v32, %v3242_v57  ;;  %v3353_v13 = vadd.f32 %v3337_v33, %v3243_v5  ;;  %v3447_v55 = vmul.f32 %v7925_v39, %v2884_v29  ;;  %v2895_v40 = vadd.f32 %v8009_v50, %v8013_v15  ;;  %v9597_v15 = vld [vmem:[#allocation255_spill] sm:$0xff]  ;;  %v9609_v5 = vld [vmem:[#allocation186_spill] sm:$0xff] }
 0x488   : > { %v8156_v26 = vpop.permute.xlu1 %2869  ;;  %v3529_v38 = vadd.f32 %v3513_v62, %v3468_v21  ;;  %v3623_v3 = vmul.f32 %v7882_v54, %v2941_v9  ;;  %v3733_v28 = vmul.f32 %v9592_v41, %v2943_v37  ;;  %v2897_v19 = vadd.f32 %v8009_v50, %v9593_v4  ;;  %v9602_v23 = vld [vmem:[#allocation47_spill] sm:$0xff]  ;;  %v9611_v21 = vld [vmem:[#allocation98_spill] sm:$0xff] }
 0x489   : > { %v3462_v48 = vadd.f32 %v3446_v24, %v3352_v45  ;;  %v3463_v12 = vadd.f32 %v3447_v55, %v3353_v13  ;;  %v3507_v30 = vmul.f32 %v9594_v51, %v2885_v47  ;;  %v3508_v56 = vmul.f32 %v9595_v49, %v2886_v36  ;;  %v9601_v36 = vld [vmem:[#allocation249_spill] sm:$0xff]  ;;  %v9607_v37 = vld [vmem:[#allocation7_spill] sm:$0xff]  ;;  %v9613_v24 = vld [vmem:[#allocation244_spill] sm:$0xff] }
 0x48a   : > { %v3639_v39 = vadd.f32 %v3623_v3, %v3529_v38  ;;  %v3617_v29 = vmul.f32 %v9596_v27, %v2887_v18  ;;  %v3618_v44 = vmul.f32 %v9597_v15, %v2888_v53  ;;  %v2899_v46 = vadd.f32 %v8009_v50, %v9598_v10  ;;  %v9603_v53 = vld [vmem:[#allocation198_spill] sm:$0xff]  ;;  %v9614_v45 = vld [vmem:[#allocation180_spill] sm:$0xff]  ;;  %v9616_v38 = vld [vmem:[#allocation205_spill] sm:$0xff] }
 0x48b   : > { %v3523_v54 = vadd.f32 %v3507_v30, %v3462_v48  ;;  %v3524_v6 = vadd.f32 %v3508_v56, %v3463_v12  ;;  %v3118_v60 = vmul.f32 %v9599_v52, %v2895_v40  ;;  %v3228_v42 = vmul.f32 %v9600_v61, %v2897_v19  ;;  %v9615_v40 = vld [vmem:[#allocation113_spill] sm:$0xff]  ;;  %v9618_v48 = vld [vmem:[#allocation196_spill] sm:$0xff]  ;;  %v9619_v51 = vld [vmem:[#allocation214_spill] sm:$0xff] }
 0x48c   : > { %v2927_v8 = vadd.f32 %v8073_v7, %v2743_v22  ;;  %v8171_v16 = vpop.permute.xlu1 %3779  ;;  %v3749_v47 = vadd.f32 %v3733_v28, %v3639_v39  ;;  %v3843_v31 = vmul.f32 %v9601_v36, %v2945_v58  ;;  %v2901_v18 = vadd.f32 %v8009_v50, %v9602_v23  ;;  %v9610_v58 = vld [vmem:[#allocation213_spill] sm:$0xff]  ;;  %v9617_v28 = vld [vmem:[#allocation55_spill] sm:$0xff]  ;;  %v9626_v15 = vld [vmem:[#allocation182_spill] sm:$0xff] }
 0x48d   : > { %v3794_v9 = vsel %vm3791_vm9, %v9603_v53, %v8171_v16  ;;  %v8180_v0 = vadd.f32 %v3617_v29, %v3523_v54  ;;  %v8182_v14 = vadd.f32 %v3618_v44, %v3524_v6  ;;  %v2903_v22 = vadd.f32 %v8009_v50, %v9607_v37  ;;  %v9620_v30 = vld [vmem:[#allocation97_spill] sm:$0xff]  ;;  %v9622_v56 = vld [vmem:[#allocation215_spill] sm:$0xff]  ;;  %v9625_v29 = vld [vmem:[#allocation216_spill] sm:$0xff] }
 0x48e   : > { %v3825_v25 = vmul.f32 %v9608_v34, %v3794_v9  ;;  %v8187_v32 = vadd.f32 %v3843_v31, %v3749_v47  ;;  %v3244_v57 = vadd.f32 %v3228_v42, %v3118_v60  ;;  %v3338_v33 = vmul.f32 %v9609_v5, %v2899_v46  ;;  %v9623_v39 = vld [vmem:[#allocation163_spill] sm:$0xff]  ;;  %v9627_v10 = vld [vmem:[#allocation217_spill] sm:$0xff]  ;;  %v9628_v46 = vld [vmem:[#allocation184_spill] sm:$0xff]  ;;  %v8231_v31 = vpop.permute.xlu0 %2675 }
 0x48f   : > { %9605 = vst [vmem:[#allocation5_spill] sm:$0xff] %v8180_v0  ;;  %9606 = vst [vmem:[#allocation12_spill] sm:$0xff] %v8182_v14  ;;  %v8192_v62 = vmul.f32 %v9611_v21, %v9610_v58  ;;  %v3683_v13 = vsel %vm3681_vm8, %v9614_v45, %v9613_v24  ;;  %v3691_v55 = vsel %vm3681_vm8, %v9613_v24, %v9614_v45  ;;  %v9630_v61 = vld [vmem:[#allocation254_spill] sm:$0xff]  ;;  %v9633_v23 = vld [vmem:[#allocation9_spill] sm:$0xff] }
 0x490   : > { %v2723_v3 = vmul.f32 %v9616_v38, %v9615_v40  ;;  %v3841_v41 = vmul.f32 %v3825_v25, %v2927_v8  ;;  %v2905_v4 = vadd.f32 %v8009_v50, %v9617_v28  ;;  %v3354_v19 = vadd.f32 %v3338_v33, %v3244_v57  ;;  %v9631_v8 = vld [vmem:[#allocation112_spill] sm:$0xff]  ;;  %v4475_v9 = vld [vmem:[%s6506_s17 + $0x78] sm:$0xff]  ;;  %v4477_v21 = vld [vmem:[%s6506_s17 + $0x68] sm:$0xff] }
 0x491   : > { %9612 = vst [vmem:[#allocation20_spill] sm:$0xff] %v8192_v62  ;;  %v3448_v12 = vmul.f32 %v9618_v48, %v2901_v18  ;;  %v8209_v49 = vmul.f32 %v9620_v30, %v9619_v51  ;;  %v8213_v27 = vmul.f32 %v9623_v39, %v9622_v56  ;;  %v8217_v44 = vmul.f32 %v9626_v15, %v9625_v29  ;;  %v9635_v57 = vld [vmem:[#allocation248_spill] sm:$0xff]  ;;  %v4478_v40 = vld [vmem:[%s6506_s17 + $0x60] sm:$0xff] }
 0x492   : > { %v8221_v54 = vmul.f32 %v9628_v46, %v9627_v10  ;;  %v8223_v6 = vadd.f32 %v3841_v41, %v3747_v43  ;;  %v2907_v52 = vadd.f32 %v8009_v50, %v2723_v3  ;;  %v3509_v42 = vmul.f32 %v9630_v61, %v2903_v22  ;;  %v9634_v43 = vld [vmem:[#allocation247_spill] sm:$0xff]  ;;  %v4476_v22 = vld [vmem:[%s6506_s17 + $0x70] sm:$0xff]  ;;  %v4479_v41 = vld [vmem:[%s6506_s17 + $0x58] sm:$0xff] }
 0x493   : > { %9621 = vst [vmem:[#allocation43_spill] sm:$0xff] %v8209_v49  ;;  %9624 = vst [vmem:[#allocation28_spill] sm:$0xff] %v8213_v27  ;;  %v3464_v60 = vadd.f32 %v3448_v12, %v3354_v19  ;;  %v3713_v47 = vmul.f32 %v9631_v8, %v3683_v13  ;;  %v8229_v36 = vmul.f32 %v9620_v30, %v3691_v55  ;;  %v9636_v33 = vld [vmem:[#allocation208_spill] sm:$0xff]  ;;  %v4481_v61 = vld [vmem:[%s6506_s17 + $0x48] sm:$0xff] }
 0x494   : > { %9629 = vst [vmem:[#allocation46_spill] sm:$0xff] %v8223_v6  ;;  %v2820_v18 = vmul.f32 %v8112_v1, %v9633_v23  ;;  %v8237_v37 = vmul.f32 %v4475_v9, %v9634_v43  ;;  %v3619_v5 = vmul.f32 %v9635_v57, %v2905_v4  ;;  %v8242_v58 = vmul.f32 %v4476_v22, %v9636_v33  ;;  %v9637_v45 = vld [vmem:[#allocation48_spill] sm:$0xff]  ;;  %v9638_v4 = vld [vmem:[#allocation147_spill] sm:$0xff]  ;;  %v4482_v23 = vld [vmem:[%s6506_s17 + $0x40] sm:$0xff]  ;;  %v3892_v6 = vpop.permute.xlu1 %3891 }
 0x495   : > { %9632 = vst [vmem:[#allocation51_spill] sm:$0xff] %v8229_v36  ;;  %v3525_v25 = vadd.f32 %v3509_v42, %v3464_v60  ;;  %v8246_v24 = vmul.f32 %v4477_v21, %v9634_v43  ;;  %v2822_v13 = vmul.f32 %v8112_v1, %v9637_v45  ;;  %v8253_v3 = vmul.f32 %v4478_v40, %v9636_v33  ;;  %v4480_v51 = vld [vmem:[%s6506_s17 + $0x50] sm:$0xff]  ;;  %v9640_v9 = vld [vmem:[#allocation15_spill] sm:$0xff]  ;;  %v9642_v57 = vld [vmem:[#allocation118_spill] sm:$0xff]  ;;  %v8284_v21 = vpop.permute.xlu0 %2864 }
 0x496   : > { %v3004_v55 = vadd.f32 %v8144_v2, %v2820_v18  ;;  %v8257_v28 = vmul.f32 %v4479_v41, %v9634_v43  ;;  %v2744_v19 = vmul.f32 %v8055_v63, %v9638_v4  ;;  %v3729_v12 = vmul.f32 %v3713_v47, %v2907_v52  ;;  %v9639_v29 = vld [vmem:[#allocation76_spill] sm:$0xff]  ;;  %v9641_v47 = vld [vmem:[#allocation17_spill] sm:$0xff]  ;;  %v9646_v41 = vld [vmem:[#allocation83_spill] sm:$0xff] }
 0x497   : > { %v3635_v48 = vadd.f32 %v3619_v5, %v3525_v25  ;;  %v8263_v56 = vmul.f32 %v4480_v51, %v9636_v33  ;;  %v2824_v10 = vmul.f32 %v8112_v1, %v9639_v29  ;;  %v3006_v60 = vadd.f32 %v8144_v2, %v2822_v13  ;;  %v9644_v45 = vld [vmem:[#allocation145_spill] sm:$0xff]  ;;  %v9645_v13 = vld [vmem:[#allocation250_spill] sm:$0xff] }
 0x498   : > { %v8270_v42 = vmul.f32 %v4481_v61, %v9634_v43  ;;  %v8274_v18 = vmul.f32 %v4482_v23, %v9636_v33  ;;  %v2705_v52 = vmul.f32 %v7954_v59, %v9640_v9  ;;  %v2706_v25 = vmul.f32 %v7954_v59, %v9641_v47  ;;  %v9647_v51 = vld [vmem:[#allocation218_spill] sm:$0xff]  ;;  %v9648_v23 = vld [vmem:[#allocation149_spill] sm:$0xff]  ;;  %v9662_v59 = vld [vmem:[#allocation11_spill] sm:$0xff] }
 0x499   : > { %v2725_v5 = vmul.f32 %v9616_v38, %v9642_v57  ;;  %v8282_v22 = vadd.f32 %v3729_v12, %v3635_v48  ;;  %v2763_v40 = vmul.f32 %v9645_v13, %v9644_v45  ;;  %v2826_v33 = vmul.f32 %v8112_v1, %v9646_v41  ;;  %v9649_v57 = vld [vmem:[#allocation108_spill] sm:$0xff]  ;;  %v9657_v36 = vld [vmem:[#allocation45_spill] sm:$0xff]  ;;  %v8333_v62 = vpop.permute.xlu0 %2685 }
 0x49a   : > { %v3008_v4 = vadd.f32 %v8144_v2, %v2824_v10  ;;  %v3131_v29 = vmul.f32 %v9647_v51, %v3004_v55  ;;  %v8293_v61 = vadd.f32 %v8073_v7, %v2744_v19  ;;  %v2764_v9 = vmul.f32 %v9645_v13, %v9648_v23  ;;  %v9650_v45 = vld [vmem:[#allocation220_spill] sm:$0xff]  ;;  %v9651_v51 = vld [vmem:[#allocation150_spill] sm:$0xff] }
 0x49b   : > { %9643 = vst [vmem:[#allocation54_spill] sm:$0xff] %v8282_v22  ;;  %v8298_v48 = vadd.f32 %v8037_v17, %v2705_v52  ;;  %v8301_v12 = vadd.f32 %v8037_v17, %v2706_v25  ;;  %v8304_v47 = vadd.f32 %v8110_v20, %v2763_v40  ;;  %v2828_v10 = vmul.f32 %v8112_v1, %v9649_v57  ;;  %v9653_v25 = vld [vmem:[#allocation114_spill] sm:$0xff]  ;;  %v9655_v22 = vld [vmem:[#allocation132_spill] sm:$0xff] }
 0x49c   : > { %v3010_v55 = vadd.f32 %v8144_v2, %v2826_v33  ;;  %v3241_v19 = vmul.f32 %v9650_v45, %v3006_v60  ;;  %v8311_v41 = vadd.f32 %v8110_v20, %v2764_v9  ;;  %v2726_v52 = vmul.f32 %v9616_v38, %v9651_v51  ;;  %v9654_v45 = vld [vmem:[#allocation226_spill] sm:$0xff]  ;;  %v9658_v17 = vld [vmem:[#allocation140_spill] sm:$0xff] }
 0x49d   : > { %v8316_v23 = vadd.f32 %v8009_v50, %v2725_v5  ;;  %v2830_v40 = vmul.f32 %v8112_v1, %v9653_v25  ;;  %v3802_v57 = vsel %vm3791_vm9, %v8171_v16, %v9603_v53  ;;  %v3012_v33 = vadd.f32 %v8144_v2, %v2828_v10  ;;  %v9656_v5 = vld [vmem:[#allocation8_spill] sm:$0xff] }
 0x49e   : > { %v3257_v60 = vadd.f32 %v3241_v19, %v3131_v29  ;;  %v3351_v9 = vmul.f32 %v9654_v45, %v3008_v4  ;;  %v2832_v0 = vmul.f32 %v8112_v1, %v9655_v22  ;;  %v2819_v14 = vmul.f32 %v8112_v1, %v9656_v5  ;;  %v9659_v29 = vld [vmem:[#allocation234_spill] sm:$0xff]  ;;  %v9660_v4 = vld [vmem:[#allocation72_spill] sm:$0xff]  ;;  %v9661_v22 = vld [vmem:[#allocation143_spill] sm:$0xff] }
 0x49f   : > { %9652 = vst [vmem:[#allocation30_spill] sm:$0xff] %v8316_v23  ;;  %v3014_v51 = vadd.f32 %v8144_v2, %v2830_v40  ;;  %v2821_v25 = vmul.f32 %v8112_v1, %v9657_v36  ;;  %v2834_v16 = vmul.f32 %v8112_v1, %v9658_v17  ;;  %v3461_v10 = vmul.f32 %v9659_v29, %v3010_v55  ;;  %v9663_v29 = vld [vmem:[#allocation160_spill] sm:$0xff] }
 0x4a0   : > { %v3367_v53 = vadd.f32 %v3351_v9, %v3257_v60  ;;  %v2823_v19 = vmul.f32 %v8112_v1, %v9660_v4  ;;  %v2836_v40 = vmul.f32 %v8112_v1, %v9661_v22  ;;  %v3016_v45 = vadd.f32 %v8144_v2, %v2832_v0  ;;  %v9664_v22 = vld [vmem:[#allocation57_spill] sm:$0xff] }
 0x4a1   : > { %v3003_v5 = vadd.f32 %v8144_v2, %v2819_v14  ;;  %v3005_v36 = vadd.f32 %v8144_v2, %v2821_v25  ;;  %v3522_v38 = vmul.f32 %v8237_v37, %v3012_v33  ;;  %v2825_v17 = vmul.f32 %v8112_v1, %v9662_v59  ;;  %v3876_v14 = vpop.permute.xlu0 %3875  ;;  %v9665_v37 = vld [vmem:[#allocation4_spill] sm:$0xff] }
 0x4a2   : > { %v3477_v49 = vadd.f32 %v3461_v10, %v3367_v53  ;;  %v3007_v55 = vadd.f32 %v8144_v2, %v2823_v19  ;;  %v3018_v60 = vadd.f32 %v8144_v2, %v2834_v16  ;;  %v3020_v9 = vadd.f32 %v8144_v2, %v2836_v40  ;;  %v9666_v10 = vld [vmem:[#allocation219_spill] sm:$0xff]  ;;  %v9667_v40 = vld [vmem:[#allocation168_spill] sm:$0xff] }
 0x4a3   : > { %v3632_v4 = vmul.f32 %v9663_v29, %v3014_v51  ;;  %v2827_v0 = vmul.f32 %v8112_v1, %v9664_v22  ;;  %v3009_v53 = vadd.f32 %v8144_v2, %v2825_v17  ;;  %v3130_v33 = vmul.f32 %v9665_v37, %v3003_v5  ;;  %v9668_v51 = vld [vmem:[#allocation89_spill] sm:$0xff] }
 0x4a4   : > { %v3538_v25 = vadd.f32 %v3522_v38, %v3477_v49  ;;  %v3240_v59 = vmul.f32 %v9666_v10, %v3005_v36  ;;  %v3826_v19 = vmul.f32 %v9623_v39, %v3802_v57  ;;  %v8359_v16 = vadd.f32 %v8009_v50, %v2726_v52  ;;  %v9669_v49 = vld [vmem:[#allocation225_spill] sm:$0xff]  ;;  %v9671_v57 = vld [vmem:[#allocation194_spill] sm:$0xff] }
 0x4a5   : > { %v3742_v27 = vmul.f32 %v9667_v40, %v3016_v45  ;;  %v2829_v29 = vmul.f32 %v8112_v1, %v9668_v51  ;;  %v3011_v23 = vadd.f32 %v8144_v2, %v2827_v0  ;;  %v3350_v17 = vmul.f32 %v9669_v49, %v3007_v55  ;;  %v9670_v36 = vld [vmem:[#allocation185_spill] sm:$0xff]  ;;  %v9672_v52 = vld [vmem:[#allocation110_spill] sm:$0xff]  ;;  %v9674_v0 = vld [vmem:[#allocation136_spill] sm:$0xff] }
 0x4a6   : > { %v3648_v22 = vadd.f32 %v3632_v4, %v3538_v25  ;;  %v3256_v38 = vadd.f32 %v3240_v59, %v3130_v33  ;;  %v3905_v5 = vsel %vm3901_vm10, %v3876_v14, %v3892_v6  ;;  %v3852_v37 = vmul.f32 %v9670_v36, %v3018_v60  ;;  %v9673_v4 = vld [vmem:[#allocation233_spill] sm:$0xff]  ;;  %v9675_v59 = vld [vmem:[#allocation38_spill] sm:$0xff]  ;;  %v9676_v60 = vld [vmem:[#allocation44_spill] sm:$0xff] }
 0x4a7   : > { %v3962_v10 = vmul.f32 %v9671_v57, %v3020_v9  ;;  %v2831_v50 = vmul.f32 %v8112_v1, %v9672_v52  ;;  %v3013_v40 = vadd.f32 %v8144_v2, %v2829_v29  ;;  %v3460_v25 = vmul.f32 %v9673_v4, %v3009_v53 }
 0x4a8   : > { %v3758_v45 = vadd.f32 %v3742_v27, %v3648_v22  ;;  %v3366_v51 = vadd.f32 %v3350_v17, %v3256_v38  ;;  %v2833_v33 = vmul.f32 %v8112_v1, %v9674_v0  ;;  %v2802_v49 = vmul.f32 %v8333_v62, %v9675_v59  ;;  %v9677_v22 = vld [vmem:[#allocation71_spill] sm:$0xff]  ;;  %v9678_v17 = vld [vmem:[#allocation142_spill] sm:$0xff]  ;;  %v9679_v59 = vld [vmem:[#allocation161_spill] sm:$0xff] }
 0x4a9   : > { %v3015_v55 = vadd.f32 %v8144_v2, %v2831_v50  ;;  %v2804_v9 = vmul.f32 %v8333_v62, %v9676_v60  ;;  %v3521_v27 = vmul.f32 %v8242_v58, %v3011_v23  ;;  %v2806_v29 = vmul.f32 %v8333_v62, %v9677_v22 }
 0x4aa   : > { %v3868_v36 = vadd.f32 %v3852_v37, %v3758_v45  ;;  %v3476_v57 = vadd.f32 %v3460_v25, %v3366_v51  ;;  %v3913_v53 = vsel %vm3901_vm10, %v3892_v6, %v3876_v14  ;;  %v3937_v38 = vmul.f32 %v9626_v15, %v3905_v5  ;;  %v9680_v45 = vld [vmem:[#allocation56_spill] sm:$0xff]  ;;  %v9681_v51 = vld [vmem:[#allocation105_spill] sm:$0xff]  ;;  %v3650_v5 = vpop.permute.xlu0 %3649 }
 0x4ab   : > { %v2835_v50 = vmul.f32 %v8112_v1, %v9678_v17  ;;  %v3017_v52 = vadd.f32 %v8144_v2, %v2833_v33  ;;  %v3631_v37 = vmul.f32 %v9679_v59, %v3013_v40  ;;  %v2808_v58 = vmul.f32 %v8333_v62, %v9680_v45  ;;  %v9682_v40 = vld [vmem:[#allocation171_spill] sm:$0xff] }
 0x4ac   : > { %v3978_v4 = vadd.f32 %v3962_v10, %v3868_v36  ;;  %v3537_v0 = vadd.f32 %v3521_v27, %v3476_v57  ;;  %v2810_v25 = vmul.f32 %v8333_v62, %v9681_v51  ;;  %v2986_v6 = vadd.f32 %v8156_v26, %v2802_v49  ;;  %v3666_v10 = vpop.permute.xlu1 %3665  ;;  %v9683_v27 = vld [vmem:[#allocation183_spill] sm:$0xff] }
 0x4ad   : > { %v3019_v23 = vadd.f32 %v8144_v2, %v2835_v50  ;;  %v2988_v14 = vadd.f32 %v8156_v26, %v2804_v9  ;;  %v8399_v1 = vmul.f32 %v3826_v19, %v8293_v61  ;;  %v3741_v60 = vmul.f32 %v9682_v40, %v3015_v55  ;;  %v9684_v49 = vld [vmem:[#allocation87_spill] sm:$0xff]  ;;  %v9685_v19 = vld [vmem:[#allocation222_spill] sm:$0xff] }
 0x4ae   : > { %4003 = vmatprep.subr.mxu1 %v3978_v4  ;;  %v3647_v33 = vadd.f32 %v3631_v37, %v3537_v0  ;;  %v2990_v36 = vadd.f32 %v8156_v26, %v2806_v29  ;;  %v3938_v2 = vmul.f32 %v9628_v46, %v3913_v53  ;;  %v3953_v57 = vmul.f32 %v3937_v38, %v8304_v47  ;;  %v9686_v4 = vld [vmem:[#allocation224_spill] sm:$0xff]  ;;  %v9687_v29 = vld [vmem:[#allocation193_spill] sm:$0xff]  ;;  %v9689_v37 = vld [vmem:[#allocation3_spill] sm:$0xff] }
 0x4af   : > { %v3851_v22 = vmul.f32 %v9683_v27, %v3017_v52  ;;  %v2812_v9 = vmul.f32 %v8333_v62, %v9684_v49  ;;  %v2992_v61 = vadd.f32 %v8156_v26, %v2808_v58  ;;  %v3129_v50 = vmul.f32 %v9685_v19, %v2986_v6  ;;  %v9688_v53 = vld [vmem:[#allocation129_spill] sm:$0xff]  ;;  %v9690_v58 = vld [vmem:[#allocation232_spill] sm:$0xff] }
 0x4b0   : > { %v3757_v17 = vadd.f32 %v3741_v60, %v3647_v33  ;;  %v3239_v0 = vmul.f32 %v9686_v4, %v2988_v14  ;;  %v3682_v55 = vsel %vm3681_vm8, %v3650_v5, %v3666_v10  ;;  %v3961_v59 = vmul.f32 %v9687_v29, %v3019_v23  ;;  %v9691_v14 = vld [vmem:[#allocation40_spill] sm:$0xff]  ;;  %v9692_v60 = vld [vmem:[#allocation42_spill] sm:$0xff]  ;;  %v9693_v27 = vld [vmem:[#allocation69_spill] sm:$0xff] }
 0x4b1   : > { %v2814_v47 = vmul.f32 %v8333_v62, %v9688_v53  ;;  %v2994_v38 = vadd.f32 %v8156_v26, %v2810_v25  ;;  %v2816_v45 = vmul.f32 %v8333_v62, %v9689_v37  ;;  %v3349_v33 = vmul.f32 %v9690_v58, %v2990_v36  ;;  %v9695_v4 = vld [vmem:[#allocation79_spill] sm:$0xff] }
 0x4b2   : > { %v3867_v52 = vadd.f32 %v3851_v22, %v3757_v17  ;;  %v3255_v51 = vadd.f32 %v3239_v0, %v3129_v50  ;;  %v2996_v6 = vadd.f32 %v8156_v26, %v2812_v9  ;;  %v2801_v40 = vmul.f32 %v8333_v62, %v9691_v14  ;;  %v9694_v22 = vld [vmem:[#allocation239_spill] sm:$0xff]  ;;  %v9696_v0 = vld [vmem:[#allocation146_spill] sm:$0xff] }
 0x4b3   : > { %v2803_v23 = vmul.f32 %v8333_v62, %v9692_v60  ;;  %v2805_v49 = vmul.f32 %v8333_v62, %v9693_v27  ;;  %v3459_v17 = vmul.f32 %v9694_v22, %v2992_v61  ;;  %v2807_v50 = vmul.f32 %v8333_v62, %v9695_v4  ;;  %v9697_v58 = vld [vmem:[#allocation103_spill] sm:$0xff]  ;;  %v9698_v14 = vld [vmem:[#allocation166_spill] sm:$0xff]  ;;  %v9699_v60 = vld [vmem:[#allocation109_spill] sm:$0xff] }
 0x4b4   : > { %v3977_v19 = vadd.f32 %v3961_v59, %v3867_v52  ;;  %v3365_v25 = vadd.f32 %v3349_v33, %v3255_v51  ;;  %v2818_v36 = vmul.f32 %v8333_v62, %v9696_v0  ;;  %v2998_v9 = vadd.f32 %v8156_v26, %v2814_v47  ;;  %v9700_v27 = vld [vmem:[#allocation221_spill] sm:$0xff] }
 0x4b5   : > { %v3520_v29 = vmul.f32 %v8246_v24, %v2994_v38  ;;  %v2985_v53 = vadd.f32 %v8156_v26, %v2801_v40  ;;  %v2809_v59 = vmul.f32 %v8333_v62, %v9697_v58  ;;  %v2987_v52 = vadd.f32 %v8156_v26, %v2803_v23 }
 0x4b6   : > { %4004 = vmatpush1.msra.mxu1 %v3977_v19  ;;  %v3475_v37 = vadd.f32 %v3459_v17, %v3365_v25  ;;  %v2989_v61 = vadd.f32 %v8156_v26, %v2805_v49  ;;  %v3690_v51 = vsel %vm3681_vm8, %v3666_v10, %v3650_v5  ;;  %v3000_v33 = vadd.f32 %v8156_v26, %v2816_v45  ;;  %v9701_v25 = vld [vmem:[#allocation223_spill] sm:$0xff]  ;;  %v9702_v17 = vld [vmem:[#allocation178_spill] sm:$0xff] }
 0x4b7   : > { %v3630_v47 = vmul.f32 %v9698_v14, %v2996_v6  ;;  %v2811_v24 = vmul.f32 %v8333_v62, %v9699_v60  ;;  %v2991_v40 = vadd.f32 %v8156_v26, %v2807_v50  ;;  %v3128_v19 = vmul.f32 %v9700_v27, %v2985_v53  ;;  %v9703_v10 = vld [vmem:[#allocation127_spill] sm:$0xff]  ;;  %v9708_v60 = vld [vmem:[#allocation238_spill] sm:$0xff] }
 0x4b8   : > { %v3536_v38 = vadd.f32 %v3520_v29, %v3475_v37  ;;  %v3238_v22 = vmul.f32 %v9701_v25, %v2987_v52  ;;  %v3711_v23 = vmul.f32 %v9631_v8, %v3682_v55  ;;  %v3002_v49 = vadd.f32 %v8156_v26, %v2818_v36  ;;  %v9704_v29 = vld [vmem:[#allocation231_spill] sm:$0xff]  ;;  %v9706_v8 = vld [vmem:[#allocation144_spill] sm:$0xff] }
 0x4b9   : > { %v3740_v5 = vmul.f32 %v9702_v17, %v2998_v9  ;;  %v2813_v45 = vmul.f32 %v8333_v62, %v9703_v10  ;;  %v2993_v4 = vadd.f32 %v8156_v26, %v2809_v59  ;;  %v3348_v37 = vmul.f32 %v9704_v29, %v2989_v61  ;;  %v9705_v53 = vld [vmem:[#allocation135_spill] sm:$0xff]  ;;  %v9707_v52 = vld [vmem:[#allocation192_spill] sm:$0xff] }
 0x4ba   : > { %v3646_v6 = vadd.f32 %v3630_v47, %v3536_v38  ;;  %v3254_v0 = vadd.f32 %v3238_v22, %v3128_v19  ;;  %v8456_v50 = vmul.f32 %v3938_v2, %v8311_v41  ;;  %v2815_v58 = vmul.f32 %v8333_v62, %v9705_v53  ;;  %v9709_v61 = vld [vmem:[#allocation204_spill] sm:$0xff]  ;;  %v3762_v19 = vpop.permute.xlu0 %3761  ;;  %v9716_v53 = vld [vmem:[#allocation181_spill] sm:$0xff] }
 0x4bb   : > { %v2817_v55 = vmul.f32 %v8333_v62, %v9706_v8  ;;  %v2995_v36 = vadd.f32 %v8156_v26, %v2811_v24  ;;  %v3850_v14 = vmul.f32 %v9707_v52, %v3000_v33  ;;  %v3458_v59 = vmul.f32 %v9708_v60, %v2991_v40  ;;  %v3778_v62 = vpop.permute.xlu1 %3777 }
 0x4bc   : > { %v3756_v9 = vadd.f32 %v3740_v5, %v3646_v6  ;;  %v3364_v47 = vadd.f32 %v3348_v37, %v3254_v0  ;;  %v8466_v38 = vadd.f32 %v3953_v57, %v8187_v32  ;;  %v3712_v41 = vmul.f32 %v9620_v30, %v3690_v51  ;;  %v9710_v57 = vld [vmem:[#allocation169_spill] sm:$0xff]  ;;  %v9712_v51 = vld [vmem:[#allocation90_spill] sm:$0xff]  ;;  %v9714_v6 = vld [vmem:[#allocation67_spill] sm:$0xff] }
 0x4bd   : > { %v8470_v2 = vmul.f32 %v3711_v23, %v8298_v48  ;;  %v3960_v27 = vmul.f32 %v9709_v61, %v3002_v49  ;;  %v2997_v24 = vadd.f32 %v8156_v26, %v2813_v45  ;;  %v3519_v33 = vmul.f32 %v8253_v3, %v2993_v4  ;;  %v9711_v30 = vld [vmem:[#allocation33_spill] sm:$0xff] }
 0x4be   : > { %v3866_v25 = vadd.f32 %v3850_v14, %v3756_v9  ;;  %v3474_v22 = vadd.f32 %v3458_v59, %v3364_v47  ;;  %v2999_v40 = vadd.f32 %v8156_v26, %v2815_v58  ;;  %v3001_v32 = vadd.f32 %v8156_v26, %v2817_v55  ;;  %v9713_v49 = vld [vmem:[#allocation41_spill] sm:$0xff]  ;;  %v9715_v26 = vld [vmem:[#allocation78_spill] sm:$0xff] }
 0x4bf   : > { %v3629_v17 = vmul.f32 %v9710_v57, %v2995_v36  ;;  %v2784_v48 = vmul.f32 %v9712_v51, %v9711_v30  ;;  %v2786_v10 = vmul.f32 %v9712_v51, %v9713_v49  ;;  %v2788_v45 = vmul.f32 %v9712_v51, %v9714_v6  ;;  %v9717_v36 = vld [vmem:[#allocation191_spill] sm:$0xff]  ;;  %v9719_v14 = vld [vmem:[#allocation2_spill] sm:$0xff] }
 0x4c0   : > { %v3976_v23 = vadd.f32 %v3960_v27, %v3866_v25  ;;  %v3535_v5 = vadd.f32 %v3519_v33, %v3474_v22  ;;  %v8485_v0 = vmul.f32 %v3712_v41, %v8301_v12  ;;  %v3793_v3 = vsel %vm3791_vm9, %v3762_v19, %v3778_v62  ;;  %v9718_v12 = vld [vmem:[#allocation203_spill] sm:$0xff]  ;;  %v9720_v41 = vld [vmem:[#allocation86_spill] sm:$0xff]  ;;  %v9721_v27 = vld [vmem:[#allocation228_spill] sm:$0xff] }
 0x4c1   : > { %v2790_v4 = vmul.f32 %v9712_v51, %v9715_v26  ;;  %v2968_v29 = vadd.f32 %v8284_v21, %v2784_v48  ;;  %v3739_v58 = vmul.f32 %v9716_v53, %v2997_v24  ;;  %v2970_v8 = vadd.f32 %v8284_v21, %v2786_v10  ;;  %v9722_v24 = vld [vmem:[#allocation230_spill] sm:$0xff]  ;;  %v9723_v33 = vld [vmem:[#allocation128_spill] sm:$0xff] }
 0x4c2   : > { %4005 = vmatprep.subr.mxu1 %v3976_v23  ;;  %v3645_v37 = vadd.f32 %v3629_v17, %v3535_v5  ;;  %v2972_v55 = vadd.f32 %v8284_v21, %v2788_v45  ;;  %v3849_v9 = vmul.f32 %v9717_v36, %v2999_v40  ;;  %v3959_v52 = vmul.f32 %v9718_v12, %v3001_v32  ;;  %v9724_v17 = vld [vmem:[#allocation134_spill] sm:$0xff]  ;;  %v9725_v32 = vld [vmem:[#allocation141_spill] sm:$0xff] }
 0x4c3   : > { %v2792_v47 = vmul.f32 %v9712_v51, %v9719_v14  ;;  %v2974_v60 = vadd.f32 %v8284_v21, %v2790_v4  ;;  %v2794_v61 = vmul.f32 %v9712_v51, %v9720_v41  ;;  %v3127_v25 = vmul.f32 %v9721_v27, %v2968_v29  ;;  %v9726_v10 = vld [vmem:[#allocation122_spill] sm:$0xff]  ;;  %v9727_v29 = vld [vmem:[#allocation159_spill] sm:$0xff]  ;;  %v9729_v12 = vld [vmem:[#allocation37_spill] sm:$0xff] }
 0x4c4   : > { %v3755_v59 = vadd.f32 %v3739_v58, %v3645_v37  ;;  %v3237_v22 = vmul.f32 %v9722_v24, %v2970_v8  ;;  %v2796_v57 = vmul.f32 %v9712_v51, %v9723_v33  ;;  %v2798_v40 = vmul.f32 %v9712_v51, %v9724_v17  ;;  %v9728_v8 = vld [vmem:[#allocation35_spill] sm:$0xff]  ;;  %v9732_v24 = vld [vmem:[#allocation190_spill] sm:$0xff] }
 0x4c5   : > { %v2800_v30 = vmul.f32 %v9712_v51, %v9725_v32  ;;  %v2976_v48 = vadd.f32 %v8284_v21, %v2792_v47  ;;  %v2978_v5 = vadd.f32 %v8284_v21, %v2794_v61  ;;  %v3347_v6 = vmul.f32 %v9726_v10, %v2972_v55  ;;  %v9733_v33 = vld [vmem:[#allocation202_spill] sm:$0xff]  ;;  %v9736_v32 = vld [vmem:[#allocation101_spill] sm:$0xff] }
 0x4c6   : > { %v3865_v23 = vadd.f32 %v3849_v9, %v3755_v59  ;;  %v3253_v49 = vadd.f32 %v3237_v22, %v3127_v25  ;;  %v2980_v45 = vadd.f32 %v8284_v21, %v2796_v57  ;;  %v2982_v26 = vadd.f32 %v8284_v21, %v2798_v40  ;;  %v9730_v59 = vld [vmem:[#allocation63_spill] sm:$0xff]  ;;  %v9735_v17 = vld [vmem:[#allocation246_spill] sm:$0xff]  ;;  %v9739_v10 = vld [vmem:[#allocation125_spill] sm:$0xff] }
 0x4c7   : > { %v2984_v4 = vadd.f32 %v8284_v21, %v2800_v30  ;;  %v3457_v37 = vmul.f32 %v9727_v29, %v2974_v60  ;;  %v2783_v36 = vmul.f32 %v9712_v51, %v9728_v8  ;;  %v2785_v9 = vmul.f32 %v9712_v51, %v9729_v12  ;;  %v9731_v60 = vld [vmem:[#allocation176_spill] sm:$0xff] }
 0x4c8   : > { %v3975_v53 = vadd.f32 %v3959_v52, %v3865_v23  ;;  %v3363_v58 = vadd.f32 %v3347_v6, %v3253_v49  ;;  %v3801_v14 = vsel %vm3791_vm9, %v3778_v62, %v3762_v19  ;;  %v8524_v55 = vmul.f32 %v9608_v34, %v3793_v3  ;;  %v9734_v62 = vld [vmem:[#allocation74_spill] sm:$0xff] }
 0x4c9   : > { %v3518_v47 = vmul.f32 %v8257_v28, %v2976_v48  ;;  %v2787_v41 = vmul.f32 %v9712_v51, %v9730_v59  ;;  %v3628_v61 = vmul.f32 %v9731_v60, %v2978_v5  ;;  %v2967_v27 = vadd.f32 %v8284_v21, %v2783_v36  ;;  %v9737_v48 = vld [vmem:[#allocation227_spill] sm:$0xff]  ;;  %v9744_v59 = vld [vmem:[#allocation32_spill] sm:$0xff] }
 0x4ca   : > { %4006 = vmatpush1.msra.mxu1 %v3975_v53  ;;  %v3473_v52 = vadd.f32 %v3457_v37, %v3363_v58  ;;  %v2969_v25 = vadd.f32 %v8284_v21, %v2785_v9  ;;  %v3738_v22 = vmul.f32 %v9732_v24, %v2980_v45  ;;  %v3848_v19 = vmul.f32 %v9733_v33, %v2982_v26  ;;  %v9738_v5 = vld [vmem:[#allocation107_spill] sm:$0xff]  ;;  %v9740_v26 = vld [vmem:[#allocation229_spill] sm:$0xff]  ;;  %v9746_v24 = vld [vmem:[#allocation62_spill] sm:$0xff] }
 0x4cb   : > { %v2789_v3 = vmul.f32 %v9712_v51, %v9734_v62  ;;  %v2971_v28 = vadd.f32 %v8284_v21, %v2787_v41  ;;  %v3958_v40 = vmul.f32 %v9735_v17, %v2984_v4  ;;  %v2791_v30 = vmul.f32 %v9712_v51, %v9736_v32  ;;  %v9741_v53 = vld [vmem:[#allocation133_spill] sm:$0xff]  ;;  %v9742_v4 = vld [vmem:[#allocation139_spill] sm:$0xff] }
 0x4cc   : > { %v3534_v57 = vadd.f32 %v3518_v47, %v3473_v52  ;;  %v3126_v23 = vmul.f32 %v9737_v48, %v2967_v27  ;;  %v2793_v49 = vmul.f32 %v9712_v51, %v9738_v5  ;;  %v2795_v6 = vmul.f32 %v9712_v51, %v9739_v10  ;;  %v9743_v9 = vld [vmem:[#allocation153_spill] sm:$0xff]  ;;  %v9745_v52 = vld [vmem:[#allocation39_spill] sm:$0xff] }
 0x4cd   : > { %v2973_v45 = vadd.f32 %v8284_v21, %v2789_v3  ;;  %v3236_v29 = vmul.f32 %v9740_v26, %v2969_v25  ;;  %v2797_v58 = vmul.f32 %v9712_v51, %v9741_v53  ;;  %v2799_v8 = vmul.f32 %v9712_v51, %v9742_v4  ;;  %v9747_v3 = vld [vmem:[#allocation156_spill] sm:$0xff] }
 0x4ce   : > { %v3644_v37 = vadd.f32 %v3628_v61, %v3534_v57  ;;  %v2975_v36 = vadd.f32 %v8284_v21, %v2791_v30  ;;  %v3346_v47 = vmul.f32 %v9743_v9, %v2971_v28  ;;  %v2766_v41 = vmul.f32 %v8231_v31, %v9744_v59  ;;  %v9748_v28 = vld [vmem:[#allocation73_spill] sm:$0xff]  ;;  %v9749_v30 = vld [vmem:[#allocation75_spill] sm:$0xff] }
 0x4cf   : > { %v3252_v12 = vadd.f32 %v3236_v29, %v3126_v23  ;;  %v2768_v60 = vmul.f32 %v8231_v31, %v9745_v52  ;;  %v2977_v61 = vadd.f32 %v8284_v21, %v2793_v49  ;;  %v2979_v25 = vadd.f32 %v8284_v21, %v2795_v6  ;;  %v9750_v29 = vld [vmem:[#allocation179_spill] sm:$0xff] }
 0x4d0   : > { %v3754_v27 = vadd.f32 %v3738_v22, %v3644_v37  ;;  %v2770_v33 = vmul.f32 %v8231_v31, %v9746_v24  ;;  %v2981_v51 = vadd.f32 %v8284_v21, %v2797_v58  ;;  %v3456_v57 = vmul.f32 %v9747_v3, %v2973_v45  ;;  %v9751_v37 = vld [vmem:[#allocation106_spill] sm:$0xff]  ;;  %v9754_v59 = vld [vmem:[#allocation243_spill] sm:$0xff]  ;;  %v9758_v24 = vld [vmem:[#allocation157_spill] sm:$0xff] }
 0x4d1   : > { %v3362_v62 = vadd.f32 %v3346_v47, %v3252_v12  ;;  %v2772_v17 = vmul.f32 %v8231_v31, %v9748_v28  ;;  %v2774_v48 = vmul.f32 %v8231_v31, %v9749_v30  ;;  %v2950_v22 = vadd.f32 %v8129_v35, %v2766_v41  ;;  %v9752_v12 = vld [vmem:[#allocation236_spill] sm:$0xff]  ;;  %v3874_v30 = vpop.permute.xlu0 %3873 }
 0x4d2   : > { %v3864_v32 = vadd.f32 %v3848_v19, %v3754_v27  ;;  %v2952_v23 = vadd.f32 %v8129_v35, %v2768_v60  ;;  %v8570_v5 = vmul.f32 %v9623_v39, %v3801_v14  ;;  %v3517_v10 = vmul.f32 %v8263_v56, %v2975_v36  ;;  %v9753_v14 = vld [vmem:[#allocation237_spill] sm:$0xff]  ;;  %v9757_v60 = vld [vmem:[#allocation131_spill] sm:$0xff]  ;;  %v9761_v28 = vld [vmem:[#allocation36_spill] sm:$0xff] }
 0x4d3   : > { %v3472_v49 = vadd.f32 %v3456_v57, %v3362_v62  ;;  %v2954_v6 = vadd.f32 %v8129_v35, %v2770_v33  ;;  %v2983_v26 = vadd.f32 %v8284_v21, %v2799_v8  ;;  %v3627_v19 = vmul.f32 %v9750_v29, %v2977_v61  ;;  %v9755_v36 = vld [vmem:[#allocation201_spill] sm:$0xff]  ;;  %v9759_v62 = vld [vmem:[#allocation138_spill] sm:$0xff]  ;;  %v9760_v57 = vld [vmem:[#allocation31_spill] sm:$0xff] }
 0x4d4   : > { %v3974_v45 = vadd.f32 %v3958_v40, %v3864_v32  ;;  %v2776_v53 = vmul.f32 %v8231_v31, %v9751_v37  ;;  %v2956_v4 = vadd.f32 %v8129_v35, %v2772_v17  ;;  %v3125_v9 = vmul.f32 %v9752_v12, %v2950_v22  ;;  %v9756_v40 = vld [vmem:[#allocation100_spill] sm:$0xff] }
 0x4d5   : > { %v3533_v58 = vadd.f32 %v3517_v10, %v3472_v49  ;;  %v3235_v47 = vmul.f32 %v9753_v14, %v2952_v23  ;;  %v3737_v56 = vmul.f32 %v9754_v59, %v2979_v25  ;;  %v3847_v41 = vmul.f32 %v9755_v36, %v2981_v51  ;;  %v9762_v17 = vld [vmem:[#allocation60_spill] sm:$0xff] }
 0x4d6   : > { %4007 = vmatprep.subr.mxu1 %v3974_v45  ;;  %v2778_v21 = vmul.f32 %v8231_v31, %v9756_v40  ;;  %v2958_v8 = vadd.f32 %v8129_v35, %v2774_v48  ;;  %v2780_v27 = vmul.f32 %v8231_v31, %v9757_v60  ;;  %v3345_v33 = vmul.f32 %v9758_v24, %v2954_v6  ;;  %v3890_v48 = vpop.permute.xlu1 %3889  ;;  %v9763_v10 = vld [vmem:[#allocation164_spill] sm:$0xff]  ;;  %v9764_v45 = vld [vmem:[#allocation245_spill] sm:$0xff]  ;;  %v9769_v24 = vld [vmem:[#allocation235_spill] sm:$0xff] }
 0x4d7   : > { %v3643_v52 = vadd.f32 %v3627_v19, %v3533_v58  ;;  %v3251_v61 = vadd.f32 %v3235_v47, %v3125_v9  ;;  %v2782_v3 = vmul.f32 %v8231_v31, %v9759_v62  ;;  %v2765_v25 = vmul.f32 %v8231_v31, %v9760_v57  ;;  %v9765_v58 = vld [vmem:[#allocation70_spill] sm:$0xff] }
 0x4d8   : > { %v2767_v51 = vmul.f32 %v8231_v31, %v9761_v28  ;;  %v2769_v32 = vmul.f32 %v8231_v31, %v9762_v17  ;;  %v2960_v23 = vadd.f32 %v8129_v35, %v2776_v53  ;;  %v3455_v6 = vmul.f32 %v9763_v10, %v2956_v4  ;;  %v9770_v62 = vld [vmem:[#allocation126_spill] sm:$0xff] }
 0x4d9   : > { %v3753_v22 = vadd.f32 %v3737_v56, %v3643_v52  ;;  %v3361_v49 = vadd.f32 %v3345_v33, %v3251_v61  ;;  %v3957_v29 = vmul.f32 %v9764_v45, %v2983_v26  ;;  %v2962_v19 = vadd.f32 %v8129_v35, %v2778_v21  ;;  %v9766_v56 = vld [vmem:[#allocation95_spill] sm:$0xff]  ;;  %v9768_v52 = vld [vmem:[#allocation104_spill] sm:$0xff] }
 0x4da   : > { %v3516_v37 = vmul.f32 %v8270_v42, %v2958_v8  ;;  %v2771_v12 = vmul.f32 %v8231_v31, %v9765_v58  ;;  %v2949_v47 = vadd.f32 %v8129_v35, %v2765_v25  ;;  %v2951_v59 = vadd.f32 %v8129_v35, %v2767_v51  ;;  %v9771_v25 = vld [vmem:[#allocation200_spill] sm:$0xff]  ;;  %v9772_v51 = vld [vmem:[#allocation119_spill] sm:$0xff] }
 0x4db   : > { %v3863_v9 = vadd.f32 %v3847_v41, %v3753_v22  ;;  %v3471_v14 = vadd.f32 %v3455_v6, %v3361_v49  ;;  %v3904_v53 = vsel %vm3901_vm10, %v3874_v30, %v3890_v48  ;;  %v2964_v4 = vadd.f32 %v8129_v35, %v2780_v27  ;;  %v9767_v41 = vld [vmem:[#allocation242_spill] sm:$0xff]  ;;  %v9774_v22 = vld [vmem:[#allocation137_spill] sm:$0xff]  ;;  %v9777_v58 = vld [vmem:[#allocation152_spill] sm:$0xff] }
 0x4dc   : > { %v2773_v26 = vmul.f32 %v8231_v31, %v9766_v56  ;;  %v2953_v36 = vadd.f32 %v8129_v35, %v2769_v32  ;;  %v2966_v40 = vadd.f32 %v8129_v35, %v2782_v3  ;;  %v3626_v8 = vmul.f32 %v9767_v41, %v2960_v23  ;;  %v9773_v3 = vld [vmem:[#allocation130_spill] sm:$0xff]  ;;  %v9779_v56 = vld [vmem:[#allocation167_spill] sm:$0xff] }
 0x4dd   : > { %v3973_v42 = vadd.f32 %v3957_v29, %v3863_v9  ;;  %v3532_v21 = vadd.f32 %v3516_v37, %v3471_v14  ;;  %v2775_v60 = vmul.f32 %v8231_v31, %v9768_v52  ;;  %v2955_v61 = vadd.f32 %v8129_v35, %v2771_v12  ;;  %v9775_v6 = vld [vmem:[#allocation154_spill] sm:$0xff]  ;;  %v9776_v29 = vld [vmem:[#allocation148_spill] sm:$0xff]  ;;  %v9778_v9 = vld [vmem:[#allocation211_spill] sm:$0xff] }
 0x4de   : > { %v3124_v33 = vmul.f32 %v9769_v24, %v2949_v47  ;;  %v3234_v27 = vmul.f32 %v9770_v62, %v2951_v59  ;;  %v3736_v28 = vmul.f32 %v9771_v25, %v2962_v19  ;;  %v2777_v17 = vmul.f32 %v8231_v31, %v9772_v51 }
 0x4df   : > { %4008 = vmatpush1.msra.mxu1 %v3973_v42  ;;  %v3642_v57 = vadd.f32 %v3626_v8, %v3532_v21  ;;  %v2779_v32 = vmul.f32 %v8231_v31, %v9773_v3  ;;  %v2781_v23 = vmul.f32 %v8231_v31, %v9774_v22  ;;  %v2957_v49 = vadd.f32 %v8129_v35, %v2773_v26 }
 0x4e0   : > { %v3250_v10 = vadd.f32 %v3234_v27, %v3124_v33  ;;  %v3344_v45 = vmul.f32 %v9775_v6, %v2953_v36  ;;  %v2745_v37 = vmul.f32 %v8055_v63, %v9776_v29  ;;  %v2746_v19 = vmul.f32 %v8055_v63, %v9777_v58  ;;  %v9782_v33 = vld [vmem:[#allocation58_spill] sm:$0xff]  ;;  %v9787_v6 = vld [vmem:[#allocation92_spill] sm:$0xff] }
 0x4e1   : > { %v3752_v12 = vadd.f32 %v3736_v28, %v3642_v57  ;;  %v3846_v14 = vmul.f32 %v9778_v9, %v2964_v4  ;;  %v3912_v47 = vsel %vm3901_vm10, %v3890_v48, %v3874_v30  ;;  %v2959_v59 = vadd.f32 %v8129_v35, %v2775_v60  ;;  %v9780_v60 = vld [vmem:[#allocation26_spill] sm:$0xff] }
 0x4e2   : > { %v3360_v31 = vadd.f32 %v3344_v45, %v3250_v10  ;;  %v3454_v26 = vmul.f32 %v9779_v56, %v2955_v61  ;;  %v8638_v42 = vmul.f32 %v9626_v15, %v3904_v53  ;;  %v3956_v21 = vmul.f32 %v8221_v54, %v2966_v40  ;;  %v9781_v61 = vld [vmem:[#allocation34_spill] sm:$0xff] }
 0x4e3   : > { %v3862_v36 = vadd.f32 %v3846_v14, %v3752_v12  ;;  %v2961_v41 = vadd.f32 %v8129_v35, %v2777_v17  ;;  %v2963_v8 = vadd.f32 %v8129_v35, %v2779_v32  ;;  %v2965_v4 = vadd.f32 %v8129_v35, %v2781_v23  ;;  %v9783_v35 = vld [vmem:[#allocation189_spill] sm:$0xff]  ;;  %v9785_v32 = vld [vmem:[#allocation199_spill] sm:$0xff]  ;;  %v9786_v23 = vld [vmem:[#allocation210_spill] sm:$0xff] }
 0x4e4   : > { %v3470_v52 = vadd.f32 %v3454_v26, %v3360_v31  ;;  %v3515_v30 = vmul.f32 %v8274_v18, %v2957_v49  ;;  %v2748_v24 = vmul.f32 %v9645_v13, %v9780_v60  ;;  %v2750_v53 = vmul.f32 %v9645_v13, %v9781_v61  ;;  %v9784_v18 = vld [vmem:[#allocation68_spill] sm:$0xff]  ;;  %v9789_v12 = vld [vmem:[#allocation155_spill] sm:$0xff]  ;;  %v9791_v31 = vld [vmem:[#allocation121_spill] sm:$0xff] }
 0x4e5   : > { %v3972_v48 = vadd.f32 %v3956_v21, %v3862_v36  ;;  %v2752_v62 = vmul.f32 %v9645_v13, %v9782_v33  ;;  %v2929_v54 = vadd.f32 %v8073_v7, %v2745_v37  ;;  %v8653_v40 = vmul.f32 %v9628_v46, %v3912_v47  ;;  %v9788_v37 = vld [vmem:[#allocation91_spill] sm:$0xff]  ;;  %v9790_v47 = vld [vmem:[#allocation102_spill] sm:$0xff]  ;;  %v9794_v60 = vld [vmem:[#allocation21_spill] sm:$0xff] }
 0x4e6   : > { %v3531_v27 = vadd.f32 %v3515_v30, %v3470_v52  ;;  %v3625_v57 = vmul.f32 %v9783_v35, %v2959_v59  ;;  %v2754_v25 = vmul.f32 %v9645_v13, %v9784_v18  ;;  %v2932_v28 = vadd.f32 %v8110_v20, %v2748_v24  ;;  %v9792_v26 = vld [vmem:[#allocation22_spill] sm:$0xff]  ;;  %v9795_v61 = vld [vmem:[#allocation29_spill] sm:$0xff] }
 0x4e7   : > { %4009 = vmatprep.subr.mxu1 %v3972_v48  ;;  %v2934_v51 = vadd.f32 %v8110_v20, %v2750_v53  ;;  %v2936_v17 = vadd.f32 %v8110_v20, %v2752_v62  ;;  %v3735_v22 = vmul.f32 %v9785_v32, %v2961_v41  ;;  %v3845_v49 = vmul.f32 %v9786_v23, %v2963_v8  ;;  %v9793_v41 = vld [vmem:[#allocation162_spill] sm:$0xff] }
 0x4e8   : > { %v3641_v3 = vadd.f32 %v3625_v57, %v3531_v27  ;;  %v3955_v10 = vmul.f32 %v8217_v44, %v2965_v4  ;;  %v2756_v45 = vmul.f32 %v9645_v13, %v9787_v6  ;;  %v2938_v29 = vadd.f32 %v8110_v20, %v2754_v25  ;;  %v4483_v4 = vld [vmem:[%s6506_s17 + $0x38] sm:$0xff]  ;;  %v9796_v62 = vld [vmem:[#allocation174_spill] sm:$0xff]  ;;  %v9797_v27 = vld [vmem:[#allocation52_spill] sm:$0xff] }
 0x4e9   : > { %v3123_v58 = vmul.f32 %v9788_v37, %v2932_v28  ;;  %v3233_v9 = vmul.f32 %v9789_v12, %v2934_v51  ;;  %v2758_v59 = vmul.f32 %v9645_v13, %v9790_v47  ;;  %v2760_v56 = vmul.f32 %v9645_v13, %v9791_v31  ;;  %v9798_v57 = vld [vmem:[#allocation65_spill] sm:$0xff]  ;;  %v9799_v51 = vld [vmem:[#allocation66_spill] sm:$0xff]  ;;  %v9801_v37 = vld [vmem:[#allocation240_spill] sm:$0xff]  ;;  %v3760_v12 = vpop.permute.xlu0 %3759 }
 0x4ea   : > { %v3751_v14 = vadd.f32 %v3735_v22, %v3641_v3  ;;  %v2762_v36 = vmul.f32 %v9645_v13, %v9792_v26  ;;  %v2940_v44 = vadd.f32 %v8110_v20, %v2756_v45  ;;  %v3343_v8 = vmul.f32 %v9793_v41, %v2936_v17  ;;  %v9802_v47 = vld [vmem:[#allocation197_spill] sm:$0xff] }
 0x4eb   : > { %v3249_v21 = vadd.f32 %v3233_v9, %v3123_v58  ;;  %v3498_v52 = vmul.f32 %v4483_v4, %v9634_v43  ;;  %v2942_v48 = vadd.f32 %v8110_v20, %v2758_v59  ;;  %v2730_v24 = vmul.f32 %v8055_v63, %v9794_v60  ;;  %v3776_v9 = vpop.permute.xlu1 %3775  ;;  %v9805_v4 = vld [vmem:[#allocation209_spill] sm:$0xff] }
 0x4ec   : > { %v3861_v30 = vadd.f32 %v3845_v49, %v3751_v14  ;;  %v2732_v53 = vmul.f32 %v8055_v63, %v9795_v61  ;;  %v3453_v13 = vmul.f32 %v9796_v62, %v2938_v29  ;;  %v2734_v35 = vmul.f32 %v8055_v63, %v9797_v27  ;;  %v9806_v60 = vld [vmem:[#allocation177_spill] sm:$0xff]  ;;  %v9809_v27 = vld [vmem:[#allocation188_spill] sm:$0xff] }
 0x4ed   : > { %v3359_v33 = vadd.f32 %v3343_v8, %v3249_v21  ;;  %v2736_v18 = vmul.f32 %v8055_v63, %v9798_v57  ;;  %v2944_v28 = vadd.f32 %v8110_v20, %v2760_v56  ;;  %v2738_v17 = vmul.f32 %v8055_v63, %v9799_v51  ;;  %v9803_v56 = vld [vmem:[#allocation165_spill] sm:$0xff]  ;;  %v9810_v57 = vld [vmem:[#allocation46_spill] sm:$0xff] }
 0x4ee   : > { %v3971_v25 = vadd.f32 %v3955_v10, %v3861_v30  ;;  %v2914_v3 = vadd.f32 %v8073_v7, %v2730_v24  ;;  %v3514_v22 = vmul.f32 %v3498_v52, %v2940_v44  ;;  %v2916_v23 = vadd.f32 %v8073_v7, %v2732_v53  ;;  %v9800_v10 = vld [vmem:[#allocation77_spill] sm:$0xff]  ;;  %v9807_v24 = vld [vmem:[#allocation30_spill] sm:$0xff] }
 0x4ef   : > { %v3469_v32 = vadd.f32 %v3453_v13, %v3359_v33  ;;  %v2918_v49 = vadd.f32 %v8073_v7, %v2734_v35  ;;  %v2930_v6 = vadd.f32 %v8073_v7, %v2746_v19  ;;  %v2946_v45 = vadd.f32 %v8110_v20, %v2762_v36  ;;  %v9804_v19 = vld [vmem:[#allocation117_spill] sm:$0xff]  ;;  %v4484_v36 = vld [vmem:[%s6506_s17 + $0x28] sm:$0xff]  ;;  %v9808_v33 = vld [vmem:[#allocation28_spill] sm:$0xff] }
 0x4f0   : > { %4010 = vmatpush1.msra.mxu1 %v3971_v25  ;;  %v2740_v29 = vmul.f32 %v8055_v63, %v9800_v10  ;;  %v3121_v58 = vmul.f32 %v9801_v37, %v2914_v3  ;;  %v3624_v59 = vmul.f32 %v9802_v47, %v2942_v48  ;;  %v2920_v31 = vadd.f32 %v8073_v7, %v2736_v18  ;;  %v9811_v25 = vld [vmem:[#allocation18_spill] sm:$0xff]  ;;  %v9817_v37 = vld [vmem:[#allocation49_spill] sm:$0xff] }
 0x4f1   : > { %v3530_v14 = vadd.f32 %v3514_v22, %v3469_v32  ;;  %v3231_v26 = vmul.f32 %v9803_v56, %v2916_v23  ;;  %v3951_v44 = vmul.f32 %v8638_v42, %v2929_v54  ;;  %v2742_v21 = vmul.f32 %v8055_v63, %v9804_v19  ;;  %v9813_v32 = vld [vmem:[#allocation16_spill] sm:$0xff]  ;;  %v9814_v22 = vld [vmem:[#allocation205_spill] sm:$0xff]  ;;  %v9816_v10 = vld [vmem:[#allocation206_spill] sm:$0xff] }
 0x4f2   : > { %v2922_v20 = vadd.f32 %v8073_v7, %v2738_v17  ;;  %v3496_v41 = vmul.f32 %v4484_v36, %v9634_v43  ;;  %v3734_v52 = vmul.f32 %v9805_v4, %v2944_v28  ;;  %v3341_v48 = vmul.f32 %v9806_v60, %v2918_v49  ;;  %v3888_v17 = vpop.permute.xlu1 %3887  ;;  %v9815_v49 = vld [vmem:[#allocation27_spill] sm:$0xff]  ;;  %v9822_v36 = vld [vmem:[#allocation84_spill] sm:$0xff] }
 0x4f3   : > { %v3640_v8 = vadd.f32 %v3624_v59, %v3530_v14  ;;  %v3247_v30 = vadd.f32 %v3231_v26, %v3121_v58  ;;  %v8713_v61 = vmul.f32 %v8524_v55, %v9807_v24  ;;  %v8717_v42 = vmul.f32 %v8570_v5, %v8359_v16  ;;  %v9812_v55 = vld [vmem:[#allocation212_spill] sm:$0xff]  ;;  %v3872_v5 = vpop.permute.xlu0 %3871  ;;  %v9824_v60 = vld [vmem:[#allocation175_spill] sm:$0xff] }
 0x4f4   : > { %v3952_v63 = vmul.f32 %v8653_v40, %v2930_v6  ;;  %v2924_v54 = vadd.f32 %v8073_v7, %v2740_v29  ;;  %v3844_v62 = vmul.f32 %v9808_v33, %v2946_v45  ;;  %v3451_v35 = vmul.f32 %v9809_v27, %v2920_v31  ;;  %v9819_v31 = vld [vmem:[#allocation256_spill] sm:$0xff] }
 0x4f5   : > { %v3750_v53 = vadd.f32 %v3734_v52, %v3640_v8  ;;  %v3357_v13 = vadd.f32 %v3341_v48, %v3247_v30  ;;  %v8724_v18 = vadd.f32 %v3951_v44, %v9810_v57  ;;  %v2707_v28 = vmul.f32 %v9812_v55, %v9811_v25  ;;  %v9820_v44 = vld [vmem:[#allocation123_spill] sm:$0xff]  ;;  %v9823_v52 = vld [vmem:[#allocation173_spill] sm:$0xff] }
 0x4f6   : > { %v2926_v51 = vadd.f32 %v8073_v7, %v2742_v21  ;;  %v3512_v16 = vmul.f32 %v3496_v41, %v2922_v20  ;;  %v2712_v23 = vmul.f32 %v9814_v22, %v9813_v32  ;;  %v2714_v6 = vmul.f32 %v9814_v22, %v9815_v49  ;;  %v9818_v7 = vld [vmem:[#allocation59_spill] sm:$0xff]  ;;  %v9826_v25 = vld [vmem:[#allocation241_spill] sm:$0xff] }
 0x4f7   : > { %v3860_v40 = vadd.f32 %v3844_v62, %v3750_v53  ;;  %v3467_v3 = vadd.f32 %v3451_v35, %v3357_v13  ;;  %v3792_v45 = vsel %vm3791_vm9, %v3760_v12, %v3776_v9  ;;  %v3622_v29 = vmul.f32 %v9816_v10, %v2924_v54  ;;  %v9821_v21 = vld [vmem:[#allocation43_spill] sm:$0xff]  ;;  %v9825_v53 = vld [vmem:[#allocation94_spill] sm:$0xff]  ;;  %v3870_v27 = vpop.permute.xlu0 %3869  ;;  %v3886_v35 = vpop.permute.xlu1 %3885 }
 0x4f8   : > { %v2716_v58 = vmul.f32 %v9814_v22, %v9817_v37  ;;  %v2718_v14 = vmul.f32 %v9814_v22, %v9818_v7  ;;  %v2896_v56 = vadd.f32 %v9819_v31, %v2712_v23  ;;  %v2898_v26 = vadd.f32 %v9819_v31, %v2714_v6  ;;  %v9830_v7 = vld [vmem:[#allocation151_spill] sm:$0xff] }
 0x4f9   : > { %v3970_v47 = vadd.f32 %v8456_v50, %v3860_v40  ;;  %v3528_v59 = vadd.f32 %v3512_v16, %v3467_v3  ;;  %v2708_v19 = vmul.f32 %v9812_v55, %v9820_v44  ;;  %v3732_v20 = vmul.f32 %v9821_v21, %v2926_v51  ;;  %v4485_v16 = vld [vmem:[%s6506_s17 + $0x18] sm:$0xff]  ;;  %v9827_v3 = vld [vmem:[#allocation82_spill] sm:$0xff] }
 0x4fa   : > { %v2720_v41 = vmul.f32 %v9814_v22, %v9822_v36  ;;  %v2900_v8 = vadd.f32 %v9819_v31, %v2716_v58  ;;  %v2902_v50 = vadd.f32 %v9819_v31, %v2718_v14  ;;  %v3119_v30 = vmul.f32 %v9823_v52, %v2896_v56 }
 0x4fb   : > { %4011 = vmatprep.subr.mxu1 %v3970_v47  ;;  %v3638_v4 = vadd.f32 %v3622_v29, %v3528_v59  ;;  %v3229_v48 = vmul.f32 %v9824_v60, %v2898_v26  ;;  %v3800_v24 = vsel %vm3791_vm9, %v3776_v9, %v3760_v12  ;;  %v3821_v54 = vmul.f32 %v9608_v34, %v3792_v45  ;;  %v9828_v9 = vld [vmem:[#allocation115_spill] sm:$0xff]  ;;  %v9831_v47 = vld [vmem:[#allocation120_spill] sm:$0xff] }
 0x4fc   : > { %4012 = vmatpush1.msra.mxu1 %v8466_v38  ;;  %v2722_v33 = vmul.f32 %v9814_v22, %v9825_v53  ;;  %v2904_v62 = vadd.f32 %v9819_v31, %v2720_v41  ;;  %v3339_v51 = vmul.f32 %v9826_v25, %v2900_v8  ;;  %v3494_v40 = vmul.f32 %v4485_v16, %v9634_v43  ;;  %v9829_v45 = vld [vmem:[#allocation195_spill] sm:$0xff]  ;;  %v9834_v41 = vld [vmem:[#allocation81_spill] sm:$0xff]  ;;  %v9836_v53 = vld [vmem:[#allocation12_spill] sm:$0xff] }
 0x4fd   : > { %v3748_v13 = vadd.f32 %v3732_v20, %v3638_v4  ;;  %v3245_v57 = vadd.f32 %v3229_v48, %v3119_v30  ;;  %v2891_v12 = vadd.f32 %v9827_v3, %v2707_v28  ;;  %v3903_v34 = vsel %vm3901_vm10, %v3872_v5, %v3888_v17  ;;  %v9832_v26 = vld [vmem:[#allocation99_spill] sm:$0xff] }
 0x4fe   : > { %v3911_v38 = vsel %vm3901_vm10, %v3888_v17, %v3872_v5  ;;  %v2724_v32 = vmul.f32 %v9814_v22, %v9828_v9  ;;  %v2906_v49 = vadd.f32 %v9819_v31, %v2722_v33  ;;  %v3449_v10 = vmul.f32 %v9829_v45, %v2902_v50  ;;  %v9835_v30 = vld [vmem:[#allocation51_spill] sm:$0xff] }
 0x4ff   : > { %v3858_v23 = vadd.f32 %v8399_v1, %v3748_v13  ;;  %v3355_v6 = vadd.f32 %v3339_v51, %v3245_v57  ;;  %v2892_v43 = vadd.f32 %v9827_v3, %v2708_v19  ;;  %v3822_v28 = vmul.f32 %v9623_v39, %v3800_v24  ;;  %v9833_v19 = vld [vmem:[#allocation20_spill] sm:$0xff] }
 0x500   : > { %v3902_v29 = vsel %vm3901_vm10, %v3870_v27, %v3886_v35  ;;  %v3910_v5 = vsel %vm3901_vm10, %v3886_v35, %v3870_v27  ;;  %v2908_v37 = vadd.f32 %v9819_v31, %v2724_v32  ;;  %v3510_v1 = vmul.f32 %v3494_v40, %v2904_v62  ;;  %v9838_v27 = vld [vmem:[#allocation54_spill] sm:$0xff] }
 0x501   : > { %v3968_v17 = vadd.f32 %v3952_v63, %v3858_v23  ;;  %v3465_v58 = vadd.f32 %v3449_v10, %v3355_v6  ;;  %v2727_v14 = vmul.f32 %v9814_v22, %v9830_v7  ;;  %v2728_v59 = vmul.f32 %v9814_v22, %v9831_v47 }
 0x502   : > { %v3933_v56 = vmul.f32 %v9626_v15, %v3903_v34  ;;  %v3934_v39 = vmul.f32 %v9628_v46, %v3911_v38  ;;  %v2710_v11 = vmul.f32 %v9812_v55, %v9832_v26  ;;  %v3932_v63 = vmul.f32 %v9628_v46, %v3910_v5 }
 0x503   : > { %4013 = vmatprep.subr.mxu1 %v3968_v17  ;;  %v3526_v44 = vadd.f32 %v3510_v1, %v3465_v58  ;;  %v3620_v21 = vmul.f32 %v9833_v19, %v2906_v49  ;;  %v3838_v20 = vmul.f32 %v3822_v28, %v2892_v43  ;;  %v2911_v36 = vadd.f32 %v9819_v31, %v2727_v14 }
 0x504   : > { %4014 = vmatpush1.msra.mxu1 %v8724_v18  ;;  %v2709_v22 = vmul.f32 %v9812_v55, %v9834_v41  ;;  %v3931_v8 = vmul.f32 %v9626_v15, %v3902_v29  ;;  %v2912_v4 = vadd.f32 %v9819_v31, %v2728_v59  ;;  %v2894_v50 = vadd.f32 %v9827_v3, %v2710_v11  ;;  %v9837_v55 = vld [vmem:[#allocation5_spill] sm:$0xff] }
 0x505   : > { %v3636_v52 = vadd.f32 %v3620_v21, %v3526_v44  ;;  %v3730_v46 = vmul.f32 %v9835_v30, %v2908_v37  ;;  %v3837_v60 = vmul.f32 %v3821_v54, %v2891_v12  ;;  %v3949_v48 = vmul.f32 %v3933_v56, %v2911_v36 }
 0x506   : > { %v2893_v24 = vadd.f32 %v9827_v3, %v2709_v22  ;;  %v3744_v33 = vadd.f32 %v8485_v0, %v9836_v53  ;;  %v3950_v18 = vmul.f32 %v3934_v39, %v2912_v4  ;;  %v3948_v62 = vmul.f32 %v3932_v63, %v2894_v50  ;;  %v3979_v0 = vld [vmem:[%s8834_s7] sm:$0xff] }
 0x507   : > { %v3746_v13 = vadd.f32 %v3730_v46, %v3636_v52  ;;  %v3743_v15 = vadd.f32 %v8470_v2, %v9837_v55  ;;  %v3855_v31 = vadd.f32 %v8713_v61, %v9838_v27  ;;  %v9839_v2 = vmov 0.0   ;;  %v3980_v61 = vld [vmem:[%s8834_s7 + $0x8] sm:$0xff] }
 0x508   : > { %v3947_v35 = vmul.f32 %v3931_v8, %v2893_v24  ;;  %v3854_v54 = vadd.f32 %v3838_v20, %v3744_v33 }
 0x509   : > { %v3856_v57 = vadd.f32 %v8717_v42, %v3746_v13  ;;  %v3853_v25 = vadd.f32 %v3837_v60, %v3743_v15  ;;  %v3965_v51 = vadd.f32 %v3949_v48, %v3855_v31 }
 0x50a   : > { %v3964_v40 = vadd.f32 %v3948_v62, %v3854_v54 }
 0x50b   : > { %v3966_v16 = vadd.f32 %v3950_v18, %v3856_v57  ;;  %v3963_v3 = vadd.f32 %v3947_v35, %v3853_v25 }
 0x50d   : > { %4015 = vmatprep.subr.mxu1 %v3966_v16 }
 0x50e   : > { %4016 = vmatpush1.msra.mxu1 %v3965_v51 }
 0x50f   : > { %4017 = vmatprep.subr.mxu1 %v3964_v40 }
 0x510   : > { %4018 = vmatpush1.msra.mxu1 %v3963_v3 }
 0x511   : > { %4356 = vmatmul.mubr.msk.f32.vlgmr.msra.gmra.mxu1 %vm2379_vm2, %v3979_v0 }
 0x512   : > { %4057 = vmatprep.mubr.f32.mxu1 %v9839_v2 }
 0x515   : > { %4357 = vmatmul.mubr.msk.f32.gmra.mxu1 %vm2379_vm2, %v3980_v61 }
 0x5d1   : > { %v4053_v42 = vpop.f32.mrf.mxu1 }
 0x5d2   : > { %4064 = vst [vmem:[%s510_s21] sm:$0xff] %v4053_v42 }
 0x5d3   : > { %v4055_v12 = vpop.f32.mrf.mxu1 }
 0x5d4   : > { %4065 = vst [vmem:[%s510_s21 + $0x8] sm:$0xff] %v4055_v12 }
 0x5d5   : > { %v4059_v34 = vpop.f32.mrf.mxu1 }
 0x5d6   : > { %4066 = vst [vmem:[%s510_s21 + $0x10] sm:$0xff] %v4059_v34 }
 0x5d7   : > { %v4061_v38 = vpop.f32.mrf.mxu1 }
 0x5d8   : > { %4067 = vst [vmem:[%s510_s21 + $0x18] sm:$0xff] %v4061_v38 }
 0x5d9 PF: > { %s20_s15 = sadd.s32 1, %s4508_s15   ;;  %s9840_s13 = smov %s4504_s14 }
 0x5da   : > { %p17_p5 = scmp.ge.s32.totalorder %s20_s15, 4   ;;  %s9841_s14 = smov %s9843_s16 }
 0x5dc   :  { %19 = sbr.rel (!%p17_p5) target bundleno = 2 (0x2), region = 113 }

</bundles_post_ra>
